<compile_context>
chip_gen: v5e
topology: v5e:2x2
jax: 0.10.0
libtpu: 0.0.40
codegen_flags: <defaults>
</compile_context>

<pallas_src>
import jax
import jax.numpy as jnp
from jax import lax
from jax.experimental import pallas as pl
from jax.experimental.pallas import tpu as pltpu

EPS = 1e-5  # nn.BatchNorm2d default eps


def _im2col_3x3(src, relu=False):
    """src: (N, H+2, W+2, Cp) ref or array -> (N*H*W, 9*Cp) patch matrix.

    All concat pieces have a 128-multiple minor dim, so the concat offsets are
    lane-tile aligned and the reshape only collapses major dims.
    """
    n, hp, wp, cp = src.shape
    h, w = hp - 2, wp - 2
    taps = []
    for kh in range(3):
        for kw in range(3):
            t = src[:, kh:kh + h, kw:kw + w, :]
            if relu:
                t = jnp.maximum(t, 0.0)          # relu(0-halo) == 0-halo
            taps.append(t)
    return jnp.concatenate(taps, axis=-1).reshape(n * h * w, 9 * cp)


def _bn_train(y, gamma, beta):
    """Training-mode BatchNorm over rows (biased variance), one fused pass."""
    n = y.shape[0]
    s = jnp.sum(y, axis=0, keepdims=True)
    ss = jnp.sum(y * y, axis=0, keepdims=True)
    mean = s * (1.0 / n)
    var = jnp.maximum(ss * (1.0 / n) - mean * mean, 0.0)
    inv = lax.rsqrt(var + EPS)
    return (y - mean) * (inv * gamma) + beta


def basic_block_kernel(xpad_ref, w1_ref, g1_ref, b1_ref, w2_ref, g2_ref, b2_ref,
                       out_ref, ypad_ref):
    N, Hp, Wp, Cp = xpad_ref.shape
    H, W = Hp - 2, Wp - 2
    P = N * H * W

    # ---- conv1 over relu(x): single MXU matmul, K = 9*Cp ----
    y = jnp.dot(_im2col_3x3(xpad_ref, relu=True), w1_ref[...],
                preferred_element_type=jnp.float32)                 # (P, Cp)

    # ---- bn1 (batch stats, fused single pass) + relu ----
    y = jnp.maximum(_bn_train(y, g1_ref[...], b1_ref[...]), 0.0)

    # ---- stage y into the padded scratch; zero only the halo ----
    ypad_ref[:, 0:1, :, :] = jnp.zeros((N, 1, Wp, Cp), jnp.float32)
    ypad_ref[:, H + 1:H + 2, :, :] = jnp.zeros((N, 1, Wp, Cp), jnp.float32)
    ypad_ref[:, 1:H + 1, 0:1, :] = jnp.zeros((N, H, 1, Cp), jnp.float32)
    ypad_ref[:, 1:H + 1, W + 1:W + 2, :] = jnp.zeros((N, H, 1, Cp), jnp.float32)
    ypad_ref[:, 1:H + 1, 1:W + 1, :] = y.reshape(N, H, W, Cp)

    # ---- conv2: single MXU matmul ----
    z = jnp.dot(_im2col_3x3(ypad_ref), w2_ref[...],
                preferred_element_type=jnp.float32)                 # (P, Cp)

    # ---- bn2 + residual (recompute relu(x) from the resident input ref) ----
    z = _bn_train(z, g2_ref[...], b2_ref[...])
    resid = jnp.maximum(xpad_ref[:, 1:H + 1, 1:W + 1, :], 0.0).reshape(P, Cp)

    out_ref[...] = (z + resid).reshape(N, H, W, Cp)                 # dense vst


def basic_block(x_nchw, w1_hwio, g1, b1, w2_hwio, g2, b2):
    """x_nchw: (N,C,H,W) f32; w*: (3,3,C,C) HWIO; g/b: (1,C). Returns (N,C,H,W)."""
    N, C, H, W = x_nchw.shape
    Cp = max(128, ((C + 127) // 128) * 128)          # lane-dense channel width

    # NHWC + spatial zero-pad (conv1 needs no in-kernel pad buffer) + channel
    # pad to the lane width.  All done once in the wrapper with cheap XLA ops.
    x = jnp.transpose(x_nchw, (0, 2, 3, 1)).astype(jnp.float32)
    xpad = jnp.pad(x, ((0, 0), (1, 1), (1, 1), (0, Cp - C)))

    def prep_w(w):  # HWIO -> channel-padded -> (9*Cp, Cp) im2col weight matrix
        wp = jnp.pad(w.astype(jnp.float32),
                     ((0, 0), (0, 0), (0, Cp - C), (0, Cp - C)))
        return wp.reshape(9 * Cp, Cp)

    def prep_p(p):  # gamma/beta -> (1, Cp)
        return jnp.pad(p.astype(jnp.float32).reshape(1, C), ((0, 0), (0, Cp - C)))

    w1f, w2f = prep_w(w1_hwio), prep_w(w2_hwio)
    g1p, b1p, g2p, b2p = prep_p(g1), prep_p(b1), prep_p(g2), prep_p(b2)

    out = pl.pallas_call(
        basic_block_kernel,
        out_shape=jax.ShapeDtypeStruct((N, H, W, Cp), jnp.float32),
        in_specs=[pl.BlockSpec(memory_space=pltpu.MemorySpace.VMEM)] * 7,
        out_specs=pl.BlockSpec(memory_space=pltpu.MemorySpace.VMEM),
        scratch_shapes=[pltpu.VMEM((N, H + 2, W + 2, Cp), jnp.float32)],
        compiler_params=pltpu.CompilerParams(vmem_limit_bytes=32 * 1024 * 1024),
    )(xpad, w1f, g1p, b1p, w2f, g2p, b2p)

    # drop channel padding, back to NCHW
    return jnp.transpose(out[:, :, :, :C], (0, 3, 1, 2))


# ---------------- pure-JAX reference (sanity check) ----------------
def _ref_basic_block(x_nchw, w1, g1, b1, w2, g2, b2):
    x = jnp.transpose(x_nchw, (0, 2, 3, 1))
    a = jnp.maximum(x, 0.0)

    def conv(inp, w):
        return lax.conv_general_dilated(
            inp, w, window_strides=(1, 1), padding=((1, 1), (1, 1)),
            dimension_numbers=("NHWC", "HWIO", "NHWC"))

    def bn(y, g, b):
        m = jnp.mean(y, axis=(0, 1, 2), keepdims=True)
        v = jnp.mean((y - m) ** 2, axis=(0, 1, 2), keepdims=True)
        return (y - m) * lax.rsqrt(v + EPS) * g.reshape(1, 1, 1, -1) + b.reshape(1, 1, 1, -1)

    y = jnp.maximum(bn(conv(a, w1), g1, b1), 0.0)
    z = bn(conv(y, w2), g2, b2)
    return jnp.transpose(z + a, (0, 3, 1, 2))


if __name__ == "__main__":
    # inplanes = planes = 4 (stride=1, downsample=None => residual shapes match)
    N, C, H, W = 2, 4, 16, 16
    key = jax.random.PRNGKey(0)
    kx, k1, k2 = jax.random.split(key, 3)

    x = jax.random.normal(kx, (N, C, H, W), dtype=jnp.float32)
    w1 = 0.1 * jax.random.normal(k1, (3, 3, C, C), dtype=jnp.float32)   # HWIO
    w2 = 0.1 * jax.random.normal(k2, (3, 3, C, C), dtype=jnp.float32)   # HWIO
    g1 = jnp.ones((1, C), jnp.float32)
    b1 = jnp.zeros((1, C), jnp.float32)
    g2 = jnp.ones((1, C), jnp.float32)
    b2 = jnp.zeros((1, C), jnp.float32)

    out = jax.block_until_ready(basic_block(x, w1, g1, b1, w2, g2, b2))
    ref = _ref_basic_block(x, w1, g1, b1, w2, g2, b2)

    assert out.shape == (N, C, H, W)
    err = float(jnp.max(jnp.abs(out - ref)))
    assert err < 1e-3, f"mismatch vs JAX reference: {err}"

    # TODO(synk): BatchNorm running_mean/running_var buffer updates (module
    # state side-effect in training mode) are not produced; forward output only.
    print("KERNEL_OK")
</pallas_src>

<mosaic_0001>
module attributes {stable_mosaic.version = 11 : i64} {
  func.func @basic_block_kernel(%arg0: memref<2x18x18x128xf32, #tpu.memory_space<vmem>>, %arg1: memref<1152x128xf32, #tpu.memory_space<vmem>>, %arg2: memref<1x128xf32, #tpu.memory_space<vmem>>, %arg3: memref<1x128xf32, #tpu.memory_space<vmem>>, %arg4: memref<1152x128xf32, #tpu.memory_space<vmem>>, %arg5: memref<1x128xf32, #tpu.memory_space<vmem>>, %arg6: memref<1x128xf32, #tpu.memory_space<vmem>>, %arg7: memref<2x16x16x128xf32, #tpu.memory_space<vmem>>, %arg8: memref<2x18x18x128xf32, #tpu.memory_space<vmem>>) attributes {dimension_semantics = [], scalar_prefetch = 0 : i64, scratch_operands = 1 : i64, tpu.core_type = #tpu.core_type<tc>} {
    %c0 = arith.constant 0 : index
    %c0_0 = arith.constant 0 : index
    %c0_1 = arith.constant 0 : index
    %c0_2 = arith.constant 0 : index
    %0 = vector.load %arg0[%c0, %c0_0, %c0_1, %c0_2] : memref<2x18x18x128xf32, #tpu.memory_space<vmem>>, vector<2x16x16x128xf32>
    %cst = arith.constant 0.000000e+00 : f32
    %1 = vector.broadcast %cst : f32 to vector<2x16x16x128xf32>
    %2 = arith.maximumf %0, %1 : vector<2x16x16x128xf32>
    %c0_3 = arith.constant 0 : index
    %c0_4 = arith.constant 0 : index
    %c1 = arith.constant 1 : index
    %c0_5 = arith.constant 0 : index
    %3 = vector.load %arg0[%c0_3, %c0_4, %c1, %c0_5] : memref<2x18x18x128xf32, #tpu.memory_space<vmem>>, vector<2x16x16x128xf32>
    %cst_6 = arith.constant 0.000000e+00 : f32
    %4 = vector.broadcast %cst_6 : f32 to vector<2x16x16x128xf32>
    %5 = arith.maximumf %3, %4 : vector<2x16x16x128xf32>
    %c0_7 = arith.constant 0 : index
    %c0_8 = arith.constant 0 : index
    %c2 = arith.constant 2 : index
    %c0_9 = arith.constant 0 : index
    %6 = vector.load %arg0[%c0_7, %c0_8, %c2, %c0_9] : memref<2x18x18x128xf32, #tpu.memory_space<vmem>>, vector<2x16x16x128xf32>
    %cst_10 = arith.constant 0.000000e+00 : f32
    %7 = vector.broadcast %cst_10 : f32 to vector<2x16x16x128xf32>
    %8 = arith.maximumf %6, %7 : vector<2x16x16x128xf32>
    %c0_11 = arith.constant 0 : index
    %c1_12 = arith.constant 1 : index
    %c0_13 = arith.constant 0 : index
    %c0_14 = arith.constant 0 : index
    %9 = vector.load %arg0[%c0_11, %c1_12, %c0_13, %c0_14] : memref<2x18x18x128xf32, #tpu.memory_space<vmem>>, vector<2x16x16x128xf32>
    %cst_15 = arith.constant 0.000000e+00 : f32
    %10 = vector.broadcast %cst_15 : f32 to vector<2x16x16x128xf32>
    %11 = arith.maximumf %9, %10 : vector<2x16x16x128xf32>
    %c0_16 = arith.constant 0 : index
    %c1_17 = arith.constant 1 : index
    %c1_18 = arith.constant 1 : index
    %c0_19 = arith.constant 0 : index
    %12 = vector.load %arg0[%c0_16, %c1_17, %c1_18, %c0_19] : memref<2x18x18x128xf32, #tpu.memory_space<vmem>>, vector<2x16x16x128xf32>
    %cst_20 = arith.constant 0.000000e+00 : f32
    %13 = vector.broadcast %cst_20 : f32 to vector<2x16x16x128xf32>
    %14 = arith.maximumf %12, %13 : vector<2x16x16x128xf32>
    %c0_21 = arith.constant 0 : index
    %c1_22 = arith.constant 1 : index
    %c2_23 = arith.constant 2 : index
    %c0_24 = arith.constant 0 : index
    %15 = vector.load %arg0[%c0_21, %c1_22, %c2_23, %c0_24] : memref<2x18x18x128xf32, #tpu.memory_space<vmem>>, vector<2x16x16x128xf32>
    %cst_25 = arith.constant 0.000000e+00 : f32
    %16 = vector.broadcast %cst_25 : f32 to vector<2x16x16x128xf32>
    %17 = arith.maximumf %15, %16 : vector<2x16x16x128xf32>
    %c0_26 = arith.constant 0 : index
    %c2_27 = arith.constant 2 : index
    %c0_28 = arith.constant 0 : index
    %c0_29 = arith.constant 0 : index
    %18 = vector.load %arg0[%c0_26, %c2_27, %c0_28, %c0_29] : memref<2x18x18x128xf32, #tpu.memory_space<vmem>>, vector<2x16x16x128xf32>
    %cst_30 = arith.constant 0.000000e+00 : f32
    %19 = vector.broadcast %cst_30 : f32 to vector<2x16x16x128xf32>
    %20 = arith.maximumf %18, %19 : vector<2x16x16x128xf32>
    %c0_31 = arith.constant 0 : index
    %c2_32 = arith.constant 2 : index
    %c1_33 = arith.constant 1 : index
    %c0_34 = arith.constant 0 : index
    %21 = vector.load %arg0[%c0_31, %c2_32, %c1_33, %c0_34] : memref<2x18x18x128xf32, #tpu.memory_space<vmem>>, vector<2x16x16x128xf32>
    %cst_35 = arith.constant 0.000000e+00 : f32
    %22 = vector.broadcast %cst_35 : f32 to vector<2x16x16x128xf32>
    %23 = arith.maximumf %21, %22 : vector<2x16x16x128xf32>
    %c0_36 = arith.constant 0 : index
    %c2_37 = arith.constant 2 : index
    %c2_38 = arith.constant 2 : index
    %c0_39 = arith.constant 0 : index
    %24 = vector.load %arg0[%c0_36, %c2_37, %c2_38, %c0_39] : memref<2x18x18x128xf32, #tpu.memory_space<vmem>>, vector<2x16x16x128xf32>
    %cst_40 = arith.constant 0.000000e+00 : f32
    %25 = vector.broadcast %cst_40 : f32 to vector<2x16x16x128xf32>
    %26 = arith.maximumf %24, %25 : vector<2x16x16x128xf32>
    %27 = tpu.concatenate %2, %5, %8, %11, %14, %17, %20, %23, %26 in 3 : vector<2x16x16x128xf32>, vector<2x16x16x128xf32>, vector<2x16x16x128xf32>, vector<2x16x16x128xf32>, vector<2x16x16x128xf32>, vector<2x16x16x128xf32>, vector<2x16x16x128xf32>, vector<2x16x16x128xf32>, vector<2x16x16x128xf32> -> vector<2x16x16x1152xf32>
    %28 = vector.shape_cast %27 : vector<2x16x16x1152xf32> to vector<512x1152xf32>
    %c0_41 = arith.constant 0 : index
    %c0_42 = arith.constant 0 : index
    %29 = vector.load %arg1[%c0_41, %c0_42] : memref<1152x128xf32, #tpu.memory_space<vmem>>, vector<1152x128xf32>
    %cst_43 = arith.constant dense<0.000000e+00> : vector<512x128xf32>
    %30 = tpu.matmul %28, %29, %cst_43 {dimension_numbers = #tpu.dot_dimension_numbers<[1], [0], [0], [1], [0, 0, 1, 1], [], []>} : vector<512x1152xf32>, vector<1152x128xf32>, vector<512x128xf32> -> vector<512x128xf32>
    %c0_44 = arith.constant 0 : index
    %c0_45 = arith.constant 0 : index
    %31 = vector.load %arg2[%c0_44, %c0_45] : memref<1x128xf32, #tpu.memory_space<vmem>>, vector<1x128xf32>
    %c0_46 = arith.constant 0 : index
    %c0_47 = arith.constant 0 : index
    %32 = vector.load %arg3[%c0_46, %c0_47] : memref<1x128xf32, #tpu.memory_space<vmem>>, vector<1x128xf32>
    %cst_48 = arith.constant dense<0.000000e+00> : vector<128xf32>
    %33 = vector.multi_reduction <add>, %30, %cst_48 [0] : vector<512x128xf32> to vector<128xf32>
    %34 = vector.shape_cast %33 : vector<128xf32> to vector<1x128xf32>
    %35 = arith.mulf %30, %30 : vector<512x128xf32>
    %cst_49 = arith.constant dense<0.000000e+00> : vector<128xf32>
    %36 = vector.multi_reduction <add>, %35, %cst_49 [0] : vector<512x128xf32> to vector<128xf32>
    %37 = vector.shape_cast %36 : vector<128xf32> to vector<1x128xf32>
    %cst_50 = arith.constant 0.001953125 : f32
    %38 = vector.broadcast %cst_50 : f32 to vector<1x128xf32>
    %39 = arith.mulf %34, %38 : vector<1x128xf32>
    %cst_51 = arith.constant 0.001953125 : f32
    %40 = vector.broadcast %cst_51 : f32 to vector<1x128xf32>
    %41 = arith.mulf %37, %40 : vector<1x128xf32>
    %42 = arith.mulf %39, %39 : vector<1x128xf32>
    %43 = arith.subf %41, %42 : vector<1x128xf32>
    %cst_52 = arith.constant 0.000000e+00 : f32
    %44 = vector.broadcast %cst_52 : f32 to vector<1x128xf32>
    %45 = arith.maximumf %43, %44 : vector<1x128xf32>
    %cst_53 = arith.constant 9.99999974E-6 : f32
    %46 = vector.broadcast %cst_53 : f32 to vector<1x128xf32>
    %47 = arith.addf %45, %46 : vector<1x128xf32>
    %48 = math.rsqrt %47 : vector<1x128xf32>
    %49 = vector.broadcast %39 : vector<1x128xf32> to vector<512x128xf32>
    %50 = arith.subf %30, %49 : vector<512x128xf32>
    %51 = arith.mulf %48, %31 : vector<1x128xf32>
    %52 = vector.broadcast %51 : vector<1x128xf32> to vector<512x128xf32>
    %53 = arith.mulf %50, %52 : vector<512x128xf32>
    %54 = vector.broadcast %32 : vector<1x128xf32> to vector<512x128xf32>
    %55 = arith.addf %53, %54 : vector<512x128xf32>
    %cst_54 = arith.constant 0.000000e+00 : f32
    %56 = vector.broadcast %cst_54 : f32 to vector<512x128xf32>
    %57 = arith.maximumf %55, %56 : vector<512x128xf32>
    %cst_55 = arith.constant 0.000000e+00 : f32
    %58 = vector.broadcast %cst_55 : f32 to vector<2x1x18x128xf32>
    %c0_56 = arith.constant 0 : index
    %c0_57 = arith.constant 0 : index
    %c0_58 = arith.constant 0 : index
    %c0_59 = arith.constant 0 : index
    %59 = vector.load %arg8[%c0_56, %c0_57, %c0_58, %c0_59] : memref<2x18x18x128xf32, #tpu.memory_space<vmem>>, vector<2x1x18x128xf32>
    tpu.vector_store %arg8[%c0_56, %c0_57, %c0_58, %c0_59], %58 {strides = array<i32>} : memref<2x18x18x128xf32, #tpu.memory_space<vmem>>, vector<2x1x18x128xf32>,
    %cst_60 = arith.constant 0.000000e+00 : f32
    %60 = vector.broadcast %cst_60 : f32 to vector<2x1x18x128xf32>
    %c0_61 = arith.constant 0 : index
    %c17 = arith.constant 17 : index
    %c0_62 = arith.constant 0 : index
    %c0_63 = arith.constant 0 : index
    %61 = vector.load %arg8[%c0_61, %c17, %c0_62, %c0_63] : memref<2x18x18x128xf32, #tpu.memory_space<vmem>>, vector<2x1x18x128xf32>
    tpu.vector_store %arg8[%c0_61, %c17, %c0_62, %c0_63], %60 {strides = array<i32>} : memref<2x18x18x128xf32, #tpu.memory_space<vmem>>, vector<2x1x18x128xf32>,
    %cst_64 = arith.constant 0.000000e+00 : f32
    %62 = vector.broadcast %cst_64 : f32 to vector<2x16x1x128xf32>
    %c0_65 = arith.constant 0 : index
    %c1_66 = arith.constant 1 : index
    %c0_67 = arith.constant 0 : index
    %c0_68 = arith.constant 0 : index
    %63 = vector.load %arg8[%c0_65, %c1_66, %c0_67, %c0_68] : memref<2x18x18x128xf32, #tpu.memory_space<vmem>>, vector<2x16x1x128xf32>
    tpu.vector_store %arg8[%c0_65, %c1_66, %c0_67, %c0_68], %62 {strides = array<i32>} : memref<2x18x18x128xf32, #tpu.memory_space<vmem>>, vector<2x16x1x128xf32>,
    %cst_69 = arith.constant 0.000000e+00 : f32
    %64 = vector.broadcast %cst_69 : f32 to vector<2x16x1x128xf32>
    %c0_70 = arith.constant 0 : index
    %c1_71 = arith.constant 1 : index
    %c17_72 = arith.constant 17 : index
    %c0_73 = arith.constant 0 : index
    %65 = vector.load %arg8[%c0_70, %c1_71, %c17_72, %c0_73] : memref<2x18x18x128xf32, #tpu.memory_space<vmem>>, vector<2x16x1x128xf32>
    tpu.vector_store %arg8[%c0_70, %c1_71, %c17_72, %c0_73], %64 {strides = array<i32>} : memref<2x18x18x128xf32, #tpu.memory_space<vmem>>, vector<2x16x1x128xf32>,
    %66 = vector.shape_cast %57 : vector<512x128xf32> to vector<2x16x16x128xf32>
    %c0_74 = arith.constant 0 : index
    %c1_75 = arith.constant 1 : index
    %c1_76 = arith.constant 1 : index
    %c0_77 = arith.constant 0 : index
    %67 = vector.load %arg8[%c0_74, %c1_75, %c1_76, %c0_77] : memref<2x18x18x128xf32, #tpu.memory_space<vmem>>, vector<2x16x16x128xf32>
    tpu.vector_store %arg8[%c0_74, %c1_75, %c1_76, %c0_77], %66 {strides = array<i32>} : memref<2x18x18x128xf32, #tpu.memory_space<vmem>>, vector<2x16x16x128xf32>,
    %c0_78 = arith.constant 0 : index
    %c0_79 = arith.constant 0 : index
    %c0_80 = arith.constant 0 : index
    %c0_81 = arith.constant 0 : index
    %68 = vector.load %arg8[%c0_78, %c0_79, %c0_80, %c0_81] : memref<2x18x18x128xf32, #tpu.memory_space<vmem>>, vector<2x16x16x128xf32>
    %c0_82 = arith.constant 0 : index
    %c0_83 = arith.constant 0 : index
    %c1_84 = arith.constant 1 : index
    %c0_85 = arith.constant 0 : index
    %69 = vector.load %arg8[%c0_82, %c0_83, %c1_84, %c0_85] : memref<2x18x18x128xf32, #tpu.memory_space<vmem>>, vector<2x16x16x128xf32>
    %c0_86 = arith.constant 0 : index
    %c0_87 = arith.constant 0 : index
    %c2_88 = arith.constant 2 : index
    %c0_89 = arith.constant 0 : index
    %70 = vector.load %arg8[%c0_86, %c0_87, %c2_88, %c0_89] : memref<2x18x18x128xf32, #tpu.memory_space<vmem>>, vector<2x16x16x128xf32>
    %c0_90 = arith.constant 0 : index
    %c1_91 = arith.constant 1 : index
    %c0_92 = arith.constant 0 : index
    %c0_93 = arith.constant 0 : index
    %71 = vector.load %arg8[%c0_90, %c1_91, %c0_92, %c0_93] : memref<2x18x18x128xf32, #tpu.memory_space<vmem>>, vector<2x16x16x128xf32>
    %c0_94 = arith.constant 0 : index
    %c1_95 = arith.constant 1 : index
    %c1_96 = arith.constant 1 : index
    %c0_97 = arith.constant 0 : index
    %72 = vector.load %arg8[%c0_94, %c1_95, %c1_96, %c0_97] : memref<2x18x18x128xf32, #tpu.memory_space<vmem>>, vector<2x16x16x128xf32>
    %c0_98 = arith.constant 0 : index
    %c1_99 = arith.constant 1 : index
    %c2_100 = arith.constant 2 : index
    %c0_101 = arith.constant 0 : index
    %73 = vector.load %arg8[%c0_98, %c1_99, %c2_100, %c0_101] : memref<2x18x18x128xf32, #tpu.memory_space<vmem>>, vector<2x16x16x128xf32>
    %c0_102 = arith.constant 0 : index
    %c2_103 = arith.constant 2 : index
    %c0_104 = arith.constant 0 : index
    %c0_105 = arith.constant 0 : index
    %74 = vector.load %arg8[%c0_102, %c2_103, %c0_104, %c0_105] : memref<2x18x18x128xf32, #tpu.memory_space<vmem>>, vector<2x16x16x128xf32>
    %c0_106 = arith.constant 0 : index
    %c2_107 = arith.constant 2 : index
    %c1_108 = arith.constant 1 : index
    %c0_109 = arith.constant 0 : index
    %75 = vector.load %arg8[%c0_106, %c2_107, %c1_108, %c0_109] : memref<2x18x18x128xf32, #tpu.memory_space<vmem>>, vector<2x16x16x128xf32>
    %c0_110 = arith.constant 0 : index
    %c2_111 = arith.constant 2 : index
    %c2_112 = arith.constant 2 : index
    %c0_113 = arith.constant 0 : index
    %76 = vector.load %arg8[%c0_110, %c2_111, %c2_112, %c0_113] : memref<2x18x18x128xf32, #tpu.memory_space<vmem>>, vector<2x16x16x128xf32>
    %77 = tpu.concatenate %68, %69, %70, %71, %72, %73, %74, %75, %76 in 3 : vector<2x16x16x128xf32>, vector<2x16x16x128xf32>, vector<2x16x16x128xf32>, vector<2x16x16x128xf32>, vector<2x16x16x128xf32>, vector<2x16x16x128xf32>, vector<2x16x16x128xf32>, vector<2x16x16x128xf32>, vector<2x16x16x128xf32> -> vector<2x16x16x1152xf32>
    %78 = vector.shape_cast %77 : vector<2x16x16x1152xf32> to vector<512x1152xf32>
    %c0_114 = arith.constant 0 : index
    %c0_115 = arith.constant 0 : index
    %79 = vector.load %arg4[%c0_114, %c0_115] : memref<1152x128xf32, #tpu.memory_space<vmem>>, vector<1152x128xf32>
    %cst_116 = arith.constant dense<0.000000e+00> : vector<512x128xf32>
    %80 = tpu.matmul %78, %79, %cst_116 {dimension_numbers = #tpu.dot_dimension_numbers<[1], [0], [0], [1], [0, 0, 1, 1], [], []>} : vector<512x1152xf32>, vector<1152x128xf32>, vector<512x128xf32> -> vector<512x128xf32>
    %c0_117 = arith.constant 0 : index
    %c0_118 = arith.constant 0 : index
    %81 = vector.load %arg5[%c0_117, %c0_118] : memref<1x128xf32, #tpu.memory_space<vmem>>, vector<1x128xf32>
    %c0_119 = arith.constant 0 : index
    %c0_120 = arith.constant 0 : index
    %82 = vector.load %arg6[%c0_119, %c0_120] : memref<1x128xf32, #tpu.memory_space<vmem>>, vector<1x128xf32>
    %cst_121 = arith.constant dense<0.000000e+00> : vector<128xf32>
    %83 = vector.multi_reduction <add>, %80, %cst_121 [0] : vector<512x128xf32> to vector<128xf32>
    %84 = vector.shape_cast %83 : vector<128xf32> to vector<1x128xf32>
    %85 = arith.mulf %80, %80 : vector<512x128xf32>
    %cst_122 = arith.constant dense<0.000000e+00> : vector<128xf32>
    %86 = vector.multi_reduction <add>, %85, %cst_122 [0] : vector<512x128xf32> to vector<128xf32>
    %87 = vector.shape_cast %86 : vector<128xf32> to vector<1x128xf32>
    %cst_123 = arith.constant 0.001953125 : f32
    %88 = vector.broadcast %cst_123 : f32 to vector<1x128xf32>
    %89 = arith.mulf %84, %88 : vector<1x128xf32>
    %cst_124 = arith.constant 0.001953125 : f32
    %90 = vector.broadcast %cst_124 : f32 to vector<1x128xf32>
    %91 = arith.mulf %87, %90 : vector<1x128xf32>
    %92 = arith.mulf %89, %89 : vector<1x128xf32>
    %93 = arith.subf %91, %92 : vector<1x128xf32>
    %cst_125 = arith.constant 0.000000e+00 : f32
    %94 = vector.broadcast %cst_125 : f32 to vector<1x128xf32>
    %95 = arith.maximumf %93, %94 : vector<1x128xf32>
    %cst_126 = arith.constant 9.99999974E-6 : f32
    %96 = vector.broadcast %cst_126 : f32 to vector<1x128xf32>
    %97 = arith.addf %95, %96 : vector<1x128xf32>
    %98 = math.rsqrt %97 : vector<1x128xf32>
    %99 = vector.broadcast %89 : vector<1x128xf32> to vector<512x128xf32>
    %100 = arith.subf %80, %99 : vector<512x128xf32>
    %101 = arith.mulf %98, %81 : vector<1x128xf32>
    %102 = vector.broadcast %101 : vector<1x128xf32> to vector<512x128xf32>
    %103 = arith.mulf %100, %102 : vector<512x128xf32>
    %104 = vector.broadcast %82 : vector<1x128xf32> to vector<512x128xf32>
    %105 = arith.addf %103, %104 : vector<512x128xf32>
    %c0_127 = arith.constant 0 : index
    %c1_128 = arith.constant 1 : index
    %c1_129 = arith.constant 1 : index
    %c0_130 = arith.constant 0 : index
    %106 = vector.load %arg0[%c0_127, %c1_128, %c1_129, %c0_130] : memref<2x18x18x128xf32, #tpu.memory_space<vmem>>, vector<2x16x16x128xf32>
    %cst_131 = arith.constant 0.000000e+00 : f32
    %107 = vector.broadcast %cst_131 : f32 to vector<2x16x16x128xf32>
    %108 = arith.maximumf %106, %107 : vector<2x16x16x128xf32>
    %109 = vector.shape_cast %108 : vector<2x16x16x128xf32> to vector<512x128xf32>
    %110 = arith.addf %105, %109 : vector<512x128xf32>
    %111 = vector.shape_cast %110 : vector<512x128xf32> to vector<2x16x16x128xf32>
    %c0_132 = arith.constant 0 : index
    %c0_133 = arith.constant 0 : index
    %c0_134 = arith.constant 0 : index
    %c0_135 = arith.constant 0 : index
    %112 = vector.load %arg7[%c0_132, %c0_133, %c0_134, %c0_135] : memref<2x16x16x128xf32, #tpu.memory_space<vmem>>, vector<2x16x16x128xf32>
    tpu.vector_store %arg7[%c0_132, %c0_133, %c0_134, %c0_135], %111 {strides = array<i32>} : memref<2x16x16x128xf32, #tpu.memory_space<vmem>>, vector<2x16x16x128xf32>,
    return
  }
}

</mosaic_0001>

<bundles_post_ra>
// kernel: tpu_custom_call.1
= control target key start
LH: loop header
LB: loop body
LE: loop exit
PB: predicated region body
PF: predicated region fallthrough
CT: control target
= control target key end

     0   :  { %12 = vsyncpa [#allocation4], 0  ;;  %s13744_s0 = inlined_call_operand.vmem [shape: f32[2,18,18,128], index: 0, kind: input, shape index: {}]   ;;  %s13745_s1 = inlined_call_operand.vmem [shape: f32[1152,128], index: 1, kind: input, shape index: {}]   ;;  %s13746_s2 = inlined_call_operand.vmem [shape: f32[1,128], index: 2, kind: input, shape index: {}]   ;;  %s13747_s3 = inlined_call_operand.vmem [shape: f32[1,128], index: 3, kind: input, shape index: {}]   ;;  %s13748_s4 = inlined_call_operand.hbm [shape: f32[1152,128], index: 4, kind: input, shape index: {}]   ;;  %s13749_s5 = inlined_call_operand.vmem [shape: f32[1,128], index: 5, kind: input, shape index: {}]   ;;  %s13750_s6 = inlined_call_operand.vmem [shape: f32[1,128], index: 6, kind: input, shape index: {}]   ;;  %s13751_s7 = inlined_call_operand.hbm [shape: f32[2,16,16,128], index: 7, kind: output, shape index: {}]  }
   0x1   :  { %13 = vsyncpa [#allocation5], 0  ;;  %s26_s26 = sshll.u32 %s13748_s4, 4  ;;  %s7684_s27 = smov [#allocation3]   ;;  %s27_s26 = int_to_ptr.hbm [resolvable:$true] %s26_s26 }
   0x2   :  { %s28_s28 = sshll.u32 %s7684_s27, 4  ;;  %s7685_s29 = smov 128   ;;  %s29_s28 = int_to_ptr.vmem [resolvable:$true] %s28_s28 }
   0x3   :  { %s7686_s30 = smov 8  }
   0x4   :  { %34 = dma.hbm_to_vmem [thread:$0]  %s27_s26, 18432, %s29_s28, [#allocation4], %s7685_s29, %s7685_s29, %s7686_s30  }
   0x5   :  { %7680 = dma.done.wait [#allocation4], 18432  }
   0x6   :  { %7681 = vsyncadd [#allocation4], 4294948864  ;;  %v1212_v0 = vld [vmem:[%s13745_s1 + $0x78] sm:$0xff]  ;;  %v1211_v2 = vld [vmem:[%s13745_s1 + $0x70] sm:$0xff] }
   0x7   :  { %v1228_v1 = vld [vmem:[%s13745_s1 + $0xf8] sm:$0xff]  ;;  %7587 = vmatpush.msra.mxu2 %v1212_v0  ;;  %v1227_v3 = vld [vmem:[%s13745_s1 + $0xf0] sm:$0xff]  ;;  %v1210_v4 = vld [vmem:[%s13745_s1 + $0x68] sm:$0xff]  ;;  %1341 = vmatpush.msra.mxu0 %v1212_v0 }
   0x8   :  { %7603 = vmatpush.msra.mxu3 %v1228_v1  ;;  %v1226_v5 = vld [vmem:[%s13745_s1 + $0xe8] sm:$0xff]  ;;  %1550 = vmatpush.msra.mxu1 %v1228_v1  ;;  %v1209_v6 = vld [vmem:[%s13745_s1 + $0x60] sm:$0xff]  ;;  %v1208_v8 = vld [vmem:[%s13745_s1 + $0x58] sm:$0xff] }
   0x9   :  { %7588 = vmatpush.msra.mxu2 %v1211_v2  ;;  %v1225_v7 = vld [vmem:[%s13745_s1 + $0xe0] sm:$0xff]  ;;  %1342 = vmatpush.msra.mxu0 %v1211_v2  ;;  %v1224_v9 = vld [vmem:[%s13745_s1 + $0xd8] sm:$0xff]  ;;  %v1207_v10 = vld [vmem:[%s13745_s1 + $0x50] sm:$0xff] }
   0xa   :  { %7604 = vmatpush.msra.mxu3 %v1227_v3  ;;  %1551 = vmatpush.msra.mxu1 %v1227_v3  ;;  %v1223_v11 = vld [vmem:[%s13745_s1 + $0xd0] sm:$0xff]  ;;  %v1206_v12 = vld [vmem:[%s13745_s1 + $0x48] sm:$0xff]  ;;  %v1205_v14 = vld [vmem:[%s13745_s1 + $0x40] sm:$0xff] }
   0xb   :  { %7589 = vmatpush.msra.mxu2 %v1210_v4  ;;  %1343 = vmatpush.msra.mxu0 %v1210_v4  ;;  %v1222_v13 = vld [vmem:[%s13745_s1 + $0xc8] sm:$0xff]  ;;  %v1221_v15 = vld [vmem:[%s13745_s1 + $0xc0] sm:$0xff]  ;;  %v1204_v16 = vld [vmem:[%s13745_s1 + $0x38] sm:$0xff] }
   0xc   :  { %7605 = vmatpush.msra.mxu3 %v1226_v5  ;;  %1552 = vmatpush.msra.mxu1 %v1226_v5  ;;  %v1220_v17 = vld [vmem:[%s13745_s1 + $0xb8] sm:$0xff]  ;;  %v1203_v18 = vld [vmem:[%s13745_s1 + $0x30] sm:$0xff]  ;;  %v1202_v20 = vld [vmem:[%s13745_s1 + $0x28] sm:$0xff] }
   0xd   :  { %7590 = vmatpush.msra.mxu2 %v1209_v6  ;;  %1344 = vmatpush.msra.mxu0 %v1209_v6  ;;  %v1219_v19 = vld [vmem:[%s13745_s1 + $0xb0] sm:$0xff]  ;;  %v1218_v21 = vld [vmem:[%s13745_s1 + $0xa8] sm:$0xff]  ;;  %v1201_v22 = vld [vmem:[%s13745_s1 + $0x20] sm:$0xff] }
   0xe   :  { %7606 = vmatpush.msra.mxu3 %v1225_v7  ;;  %1553 = vmatpush.msra.mxu1 %v1225_v7  ;;  %v1217_v23 = vld [vmem:[%s13745_s1 + $0xa0] sm:$0xff]  ;;  %v1200_v24 = vld [vmem:[%s13745_s1 + $0x18] sm:$0xff]  ;;  %v1199_v26 = vld [vmem:[%s13745_s1 + $0x10] sm:$0xff] }
   0xf   :  { %7591 = vmatpush.msra.mxu2 %v1208_v8  ;;  %1345 = vmatpush.msra.mxu0 %v1208_v8  ;;  %v1216_v25 = vld [vmem:[%s13745_s1 + $0x98] sm:$0xff]  ;;  %v1215_v27 = vld [vmem:[%s13745_s1 + $0x90] sm:$0xff]  ;;  %v1198_v30 = vld [vmem:[%s13745_s1 + $0x8] sm:$0xff] }
  0x10   :  { %7607 = vmatpush.msra.mxu3 %v1224_v9  ;;  %1554 = vmatpush.msra.mxu1 %v1224_v9  ;;  %v75_v28 = vld [vmem:[%s13744_s0 + $0x1b0] sm:$0xff]  ;;  %v1214_v31 = vld [vmem:[%s13745_s1 + $0x88] sm:$0xff]  ;;  %v1197_v32 = vld [vmem:[%s13745_s1] sm:$0xff] }
  0x11   :  { %7592 = vmatpush.msra.mxu2 %v1207_v10  ;;  %1346 = vmatpush.msra.mxu0 %v1207_v10  ;;  %v203_v29 = vld [vmem:[%s13744_s0 + $0x1b1] sm:$0xff]  ;;  %v1213_v33 = vld [vmem:[%s13745_s1 + $0x80] sm:$0xff]  ;;  %v139_v34 = vmax.f32 %v75_v28, 0.0  ;;  %v1242_v48 = vld [vmem:[%s13745_s1 + $0x168] sm:$0xff] }
  0x12   :  { %7608 = vmatpush.msra.mxu3 %v1223_v11  ;;  %1555 = vmatpush.msra.mxu1 %v1223_v11  ;;  %v267_v35 = vmax.f32 %v203_v29, 0.0  ;;  %v43_v36 = vld [vmem:[%s13744_s0] sm:$0xff]  ;;  %v1244_v38 = vld [vmem:[%s13745_s1 + $0x178] sm:$0xff]  ;;  %v1243_v45 = vld [vmem:[%s13745_s1 + $0x170] sm:$0xff] }
  0x13   :  { %7593 = vmatpush.msra.mxu2 %v1206_v12  ;;  %1347 = vmatpush.msra.mxu0 %v1206_v12  ;;  %v171_v37 = vld [vmem:[%s13744_s0 + $0x1] sm:$0xff]  ;;  %v1260_v39 = vld [vmem:[%s13745_s1 + $0x1f8] sm:$0xff]  ;;  %v107_v40 = vmax.f32 %v43_v36, 0.0  ;;  %v1259_v46 = vld [vmem:[%s13745_s1 + $0x1f0] sm:$0xff] }
  0x14   :  { %7609 = vmatpush.msra.mxu3 %v1222_v13  ;;  %1556 = vmatpush.msra.mxu1 %v1222_v13  ;;  %v235_v41 = vmax.f32 %v171_v37, 0.0  ;;  %v76_v42 = vld [vmem:[%s13744_s0 + $0x1b8] sm:$0xff]  ;;  %v1275_v47 = vld [vmem:[%s13745_s1 + $0x270] sm:$0xff]  ;;  %v44_v51 = vld [vmem:[%s13744_s0 + $0x8] sm:$0xff] }
  0x15   :  { %7594 = vmatpush.msra.mxu2 %v1205_v14  ;;  %1348 = vmatpush.msra.mxu0 %v1205_v14  ;;  %v204_v43 = vld [vmem:[%s13744_s0 + $0x1b9] sm:$0xff]  ;;  %v140_v49 = vmax.f32 %v76_v42, 0.0  ;;  %v172_v52 = vld [vmem:[%s13744_s0 + $0x9] sm:$0xff]  ;;  %v108_v54 = vmax.f32 %v44_v51, 0.0  ;;  %v206_v4 = vld [vmem:[%s13744_s0 + $0x1d1] sm:$0xff] }
  0x16   :  { %7610 = vmatpush.msra.mxu3 %v1221_v15  ;;  %1557 = vmatpush.msra.mxu1 %v1221_v15  ;;  %v1276_v44 = vld [vmem:[%s13745_s1 + $0x278] sm:$0xff]  ;;  %v268_v50 = vmax.f32 %v204_v43, 0.0  ;;  %v1258_v53 = vld [vmem:[%s13745_s1 + $0x1e8] sm:$0xff]  ;;  %v236_v55 = vmax.f32 %v172_v52, 0.0  ;;  %v1241_v1 = vld [vmem:[%s13745_s1 + $0x160] sm:$0xff]  ;;  %v270_v6 = vmax.f32 %v206_v4, 0.0 }
  0x17   :  { %7595 = vmatpush.msra.mxu2 %v1204_v16  ;;  %1349 = vmatpush.msra.mxu0 %v1204_v16  ;;  %v1274_v56 = vld [vmem:[%s13745_s1 + $0x268] sm:$0xff]  ;;  %v45_v61 = vld [vmem:[%s13744_s0 + $0x18] sm:$0xff]  ;;  %v1257_v2 = vld [vmem:[%s13745_s1 + $0x1e0] sm:$0xff] }
  0x18   :  { %7611 = vmatpush.msra.mxu3 %v1220_v17  ;;  %1558 = vmatpush.msra.mxu1 %v1220_v17  ;;  %v77_v57 = vld [vmem:[%s13744_s0 + $0x1c8] sm:$0xff]  ;;  %v173_v62 = vld [vmem:[%s13744_s0 + $0x19] sm:$0xff]  ;;  %v109_v63 = vmax.f32 %v45_v61, 0.0  ;;  %v78_v3 = vld [vmem:[%s13744_s0 + $0x1d0] sm:$0xff] }
  0x19   :  { %7596 = vmatpush.msra.mxu2 %v1203_v18  ;;  %1350 = vmatpush.msra.mxu0 %v1203_v18  ;;  %v205_v58 = vld [vmem:[%s13744_s0 + $0x1c9] sm:$0xff]  ;;  %v141_v59 = vmax.f32 %v77_v57, 0.0  ;;  %v237_v0 = vmax.f32 %v173_v62, 0.0  ;;  %v142_v5 = vmax.f32 %v78_v3, 0.0  ;;  %v46_v7 = vld [vmem:[%s13744_s0 + $0x20] sm:$0xff]  ;;  %v175_v17 = vld [vmem:[%s13744_s0 + $0x31] sm:$0xff] }
  0x1a   :  { %7612 = vmatpush.msra.mxu3 %v1219_v19  ;;  %1559 = vmatpush.msra.mxu1 %v1219_v19  ;;  %v269_v60 = vmax.f32 %v205_v58, 0.0  ;;  %v174_v8 = vld [vmem:[%s13744_s0 + $0x21] sm:$0xff]  ;;  %v110_v9 = vmax.f32 %v46_v7, 0.0  ;;  %v47_v16 = vld [vmem:[%s13744_s0 + $0x30] sm:$0xff]  ;;  %v239_v19 = vmax.f32 %v175_v17, 0.0  ;;  %v212_v61 = vld [vmem:[%s13744_s0 + $0x219] sm:$0xff] }
  0x1b   :  { %7597 = vmatpush.msra.mxu2 %v1202_v20  ;;  %1351 = vmatpush.msra.mxu0 %v1202_v20  ;;  %v238_v10 = vmax.f32 %v174_v8, 0.0  ;;  %v1273_v11 = vld [vmem:[%s13745_s1 + $0x260] sm:$0xff]  ;;  %v111_v18 = vmax.f32 %v47_v16, 0.0  ;;  %v1240_v20 = vld [vmem:[%s13745_s1 + $0x158] sm:$0xff]  ;;  %v177_v36 = vld [vmem:[%s13744_s0 + $0x49] sm:$0xff] }
  0x1c   :  { %7613 = vmatpush.msra.mxu3 %v1218_v21  ;;  %1560 = vmatpush.msra.mxu1 %v1218_v21  ;;  %v79_v12 = vld [vmem:[%s13744_s0 + $0x1e0] sm:$0xff]  ;;  %v1256_v21 = vld [vmem:[%s13745_s1 + $0x1d8] sm:$0xff]  ;;  %v1238_v58 = vld [vmem:[%s13745_s1 + $0x148] sm:$0xff] }
  0x1d   :  { %7598 = vmatpush.msra.mxu2 %v1201_v22  ;;  %1352 = vmatpush.msra.mxu0 %v1201_v22  ;;  %v207_v13 = vld [vmem:[%s13744_s0 + $0x1e1] sm:$0xff]  ;;  %v143_v14 = vmax.f32 %v79_v12, 0.0  ;;  %v211_v51 = vld [vmem:[%s13744_s0 + $0x211] sm:$0xff] }
  0x1e   :  { %7614 = vmatpush.msra.mxu3 %v1217_v23  ;;  %1561 = vmatpush.msra.mxu1 %v1217_v23  ;;  %v271_v15 = vmax.f32 %v207_v13, 0.0  ;;  %v80_v22 = vld [vmem:[%s13744_s0 + $0x1e8] sm:$0xff]  ;;  %v1237_v13 = vld [vmem:[%s13745_s1 + $0x140] sm:$0xff]  ;;  %v214_v16 = vld [vmem:[%s13744_s0 + $0x231] sm:$0xff] }
  0x1f   :  { %7599 = vmatpush.msra.mxu2 %v1200_v24  ;;  %1353 = vmatpush.msra.mxu0 %v1200_v24  ;;  %v208_v23 = vld [vmem:[%s13744_s0 + $0x1e9] sm:$0xff]  ;;  %v144_v24 = vmax.f32 %v80_v22, 0.0  ;;  %v210_v42 = vld [vmem:[%s13744_s0 + $0x201] sm:$0xff] }
  0x20   :  { %7615 = vmatpush.msra.mxu3 %v1216_v25  ;;  %1562 = vmatpush.msra.mxu1 %v1216_v25  ;;  %v272_v25 = vmax.f32 %v208_v23, 0.0  ;;  %v1270_v4 = vld [vmem:[%s13745_s1 + $0x248] sm:$0xff]  ;;  %v1269_v23 = vld [vmem:[%s13745_s1 + $0x240] sm:$0xff] }
  0x21   :  { %7600 = vmatpush.msra.mxu2 %v1199_v26  ;;  %1354 = vmatpush.msra.mxu0 %v1199_v26  ;;  %v48_v26 = vld [vmem:[%s13744_s0 + $0x38] sm:$0xff] }
  0x22   :  { %7616 = vmatpush.msra.mxu3 %v1215_v27  ;;  %1563 = vmatpush.msra.mxu1 %v1215_v27  ;;  %v176_v27 = vld [vmem:[%s13744_s0 + $0x39] sm:$0xff]  ;;  %v112_v28 = vmax.f32 %v48_v26, 0.0 }
  0x23   :  { %7601 = vmatpush.msra.mxu2 %v1198_v30  ;;  %1355 = vmatpush.msra.mxu0 %v1198_v30  ;;  %v240_v29 = vmax.f32 %v176_v27, 0.0  ;;  %v1272_v30 = vld [vmem:[%s13745_s1 + $0x258] sm:$0xff] }
  0x24   :  { %7617 = vmatpush.msra.mxu3 %v1214_v31  ;;  %1564 = vmatpush.msra.mxu1 %v1214_v31  ;;  %v81_v31 = vld [vmem:[%s13744_s0 + $0x1f8] sm:$0xff] }
  0x25   :  { %7602 = vmatpush.msra.mxu2 %v1197_v32  ;;  %1356 = vmatpush.msra.mxu0 %v1197_v32  ;;  %v209_v32 = vld [vmem:[%s13744_s0 + $0x1f9] sm:$0xff] }
  0x26   :  { %7618 = vmatpush.msra.mxu3 %v1213_v33  ;;  %1453 = vmatmul.f32.vlgmr.msra.gmra.mxu2 %v139_v34  ;;  %v273_v34 = vmax.f32 %v209_v32, 0.0  ;;  %v1236_v32 = vld [vmem:[%s13745_s1 + $0x138] sm:$0xff] }
  0x27   :  { %1662 = vmatmul.f32.vlgmr.msra.gmra.mxu3 %v267_v35  ;;  %1759 = vmatpush.msrb.mxu2 %v1244_v38  ;;  %v49_v35 = vld [vmem:[%s13744_s0 + $0x48] sm:$0xff]  ;;  %v241_v38 = vmax.f32 %v177_v36, 0.0 }
  0x28   :  { %1968 = vmatpush.msrb.mxu3 %v1260_v39  ;;  %1565 = vmatpush.msra.mxu1 %v1213_v33  ;;  %v145_v33 = vmax.f32 %v81_v31, 0.0  ;;  %v113_v37 = vmax.f32 %v49_v35, 0.0  ;;  %v1239_v39 = vld [vmem:[%s13745_s1 + $0x150] sm:$0xff] }
  0x29   :  { %1357 = vmatmul.f32.vlgmr.msra.gmra.mxu0 %v107_v40  ;;  %1566 = vmatmul.f32.vlgmr.msra.gmra.mxu1 %v235_v41  ;;  %v1255_v40 = vld [vmem:[%s13745_s1 + $0x1d0] sm:$0xff]  ;;  %v82_v41 = vld [vmem:[%s13744_s0 + $0x200] sm:$0xff] }
  0x2a   :  { %2177 = vmatpush.msrb.mxu0 %v1276_v44  ;;  %1760 = vmatpush.msrb.mxu2 %v1243_v45  ;;  %v146_v43 = vmax.f32 %v82_v41, 0.0  ;;  %v274_v44 = vmax.f32 %v210_v42, 0.0  ;;  %v50_v45 = vld [vmem:[%s13744_s0 + $0x50] sm:$0xff]  ;;  %v1268_v42 = vld [vmem:[%s13745_s1 + $0x238] sm:$0xff] }
  0x2b   :  { %1969 = vmatpush.msrb.mxu3 %v1259_v46  ;;  %v178_v46 = vld [vmem:[%s13744_s0 + $0x51] sm:$0xff]  ;;  %v216_v35 = vld [vmem:[%s13744_s0 + $0x249] sm:$0xff] }
  0x2c   :  { %2178 = vmatpush.msrb.mxu0 %v1275_v47  ;;  %1761 = vmatpush.msrb.mxu2 %v1242_v48  ;;  %v114_v47 = vmax.f32 %v50_v45, 0.0  ;;  %v242_v48 = vmax.f32 %v178_v46, 0.0 }
  0x2d   :  { %1970 = vmatpush.msrb.mxu3 %v1258_v53  ;;  %v275_v53 = vmax.f32 %v211_v51, 0.0  ;;  %v1235_v51 = vld [vmem:[%s13745_s1 + $0x130] sm:$0xff] }
  0x2e   :  { %1456 = vmatmul.f32.gmra.mxu2 %v140_v49  ;;  %2179 = vmatpush.msrb.mxu0 %v1274_v56  ;;  %v1271_v49 = vld [vmem:[%s13745_s1 + $0x250] sm:$0xff] }
  0x2f   :  { %1665 = vmatmul.f32.gmra.mxu3 %v268_v50  ;;  %1762 = vmatpush.msrb.mxu2 %v1241_v1  ;;  %v83_v50 = vld [vmem:[%s13744_s0 + $0x210] sm:$0xff] }
  0x30   :  { %1971 = vmatpush.msrb.mxu3 %v1257_v2  ;;  %2180 = vmatpush.msrb.mxu0 %v1273_v11  ;;  %v147_v52 = vmax.f32 %v83_v50, 0.0  ;;  %v180_v1 = vld [vmem:[%s13744_s0 + $0x69] sm:$0xff] }
  0x31   :  { %1360 = vmatmul.f32.gmra.mxu0 %v108_v54  ;;  %1569 = vmatmul.f32.gmra.mxu1 %v236_v55  ;;  %v51_v54 = vld [vmem:[%s13744_s0 + $0x60] sm:$0xff]  ;;  %v244_v3 = vmax.f32 %v180_v1, 0.0 }
  0x32   :  { %1763 = vmatpush.msrb.mxu2 %v1240_v20  ;;  %1972 = vmatpush.msrb.mxu3 %v1256_v21  ;;  %v179_v55 = vld [vmem:[%s13744_s0 + $0x61] sm:$0xff]  ;;  %v115_v56 = vmax.f32 %v51_v54, 0.0 }
  0x33   :  { %2181 = vmatpush.msrb.mxu0 %v1272_v30  ;;  %v243_v57 = vmax.f32 %v179_v55, 0.0  ;;  %v182_v20 = vld [vmem:[%s13744_s0 + $0x81] sm:$0xff] }
  0x34   :  { %1764 = vmatpush.msrb.mxu2 %v1239_v39  ;;  %1973 = vmatpush.msrb.mxu3 %v1255_v40  ;;  %v246_v22 = vmax.f32 %v182_v20, 0.0  ;;  %v184_v39 = vld [vmem:[%s13744_s0 + $0x99] sm:$0xff]  ;;  %v218_v54 = vld [vmem:[%s13744_s0 + $0x261] sm:$0xff] }
  0x35   :  { %2182 = vmatpush.msrb.mxu0 %v1271_v49  ;;  %v248_v41 = vmax.f32 %v184_v39, 0.0  ;;  %v94_v39 = vld [vmem:[%s13744_s0 + $0x290] sm:$0xff] }
  0x36   :  { %1459 = vmatmul.f32.gmra.mxu2 %v141_v59  ;;  %v1254_v59 = vld [vmem:[%s13745_s1 + $0x1c8] sm:$0xff] }
  0x37   :  { %1668 = vmatmul.f32.gmra.mxu3 %v269_v60  ;;  %v84_v60 = vld [vmem:[%s13744_s0 + $0x218] sm:$0xff]  ;;  %1765 = vmatpush.msrb.mxu2 %v1238_v58 }
  0x38   :  { %1974 = vmatpush.msrb.mxu3 %v1254_v59  ;;  %v148_v62 = vmax.f32 %v84_v60, 0.0  ;;  %2183 = vmatpush.msrb.mxu0 %v1270_v4  ;;  %v186_v58 = vld [vmem:[%s13744_s0 + $0xb1] sm:$0xff] }
  0x39   :  { %1363 = vmatmul.f32.gmra.mxu0 %v109_v63  ;;  %1572 = vmatmul.f32.gmra.mxu1 %v237_v0  ;;  %v276_v63 = vmax.f32 %v212_v61, 0.0  ;;  %v52_v0 = vld [vmem:[%s13744_s0 + $0x68] sm:$0xff]  ;;  %v250_v60 = vmax.f32 %v186_v58, 0.0  ;;  %v1267_v61 = vld [vmem:[%s13745_s1 + $0x230] sm:$0xff] }
  0x3a   :  { %v116_v2 = vmax.f32 %v52_v0, 0.0  ;;  %1766 = vmatpush.msrb.mxu2 %v1237_v13  ;;  %2184 = vmatpush.msrb.mxu0 %v1269_v23  ;;  %v1266_v23 = vld [vmem:[%s13745_s1 + $0x228] sm:$0xff] }
  0x3c   :  { %1767 = vmatpush.msrb.mxu2 %v1236_v32  ;;  %2185 = vmatpush.msrb.mxu0 %v1268_v42  ;;  %v189_v32 = vld [vmem:[%s13744_s0 + $0xd9] sm:$0xff] }
  0x3e   :  { %1462 = vmatmul.f32.gmra.mxu2 %v142_v5  ;;  %v85_v5 = vld [vmem:[%s13744_s0 + $0x228] sm:$0xff]  ;;  %2186 = vmatpush.msrb.mxu0 %v1267_v61  ;;  %v191_v61 = vld [vmem:[%s13744_s0 + $0xf1] sm:$0xff] }
  0x3f   :  { %1671 = vmatmul.f32.gmra.mxu3 %v270_v6  ;;  %v213_v6 = vld [vmem:[%s13744_s0 + $0x229] sm:$0xff]  ;;  %v149_v7 = vmax.f32 %v85_v5, 0.0  ;;  %1768 = vmatpush.msrb.mxu2 %v1235_v51 }
  0x40   :  { %v277_v8 = vmax.f32 %v213_v6, 0.0  ;;  %2187 = vmatpush.msrb.mxu0 %v1266_v23  ;;  %v97_v23 = vld [vmem:[%s13744_s0 + $0x2b8] sm:$0xff] }
  0x41   :  { %1366 = vmatmul.f32.gmra.mxu0 %v110_v9  ;;  %1575 = vmatmul.f32.gmra.mxu1 %v238_v10  ;;  %v53_v9 = vld [vmem:[%s13744_s0 + $0x78] sm:$0xff] }
  0x42   :  { %v181_v10 = vld [vmem:[%s13744_s0 + $0x79] sm:$0xff]  ;;  %v117_v11 = vmax.f32 %v53_v9, 0.0  ;;  %v1250_v9 = vld [vmem:[%s13745_s1 + $0x1a8] sm:$0xff] }
  0x43   :  { %v245_v12 = vmax.f32 %v181_v10, 0.0  ;;  %v92_v10 = vld [vmem:[%s13744_s0 + $0x278] sm:$0xff] }
  0x46   :  { %1465 = vmatmul.f32.gmra.mxu2 %v143_v14  ;;  %v1253_v14 = vld [vmem:[%s13745_s1 + $0x1c0] sm:$0xff] }
  0x47   :  { %1674 = vmatmul.f32.gmra.mxu3 %v271_v15  ;;  %v86_v15 = vld [vmem:[%s13744_s0 + $0x230] sm:$0xff] }
  0x48   :  { %1975 = vmatpush.msrb.mxu3 %v1253_v14  ;;  %v150_v17 = vmax.f32 %v86_v15, 0.0  ;;  %v156_v15 = vmax.f32 %v92_v10, 0.0 }
  0x49   :  { %1369 = vmatmul.f32.gmra.mxu0 %v111_v18  ;;  %1578 = vmatmul.f32.gmra.mxu1 %v239_v19  ;;  %v278_v18 = vmax.f32 %v214_v16, 0.0  ;;  %v54_v19 = vld [vmem:[%s13744_s0 + $0x80] sm:$0xff] }
  0x4a   :  { %v118_v21 = vmax.f32 %v54_v19, 0.0 }
  0x4e   :  { %1468 = vmatmul.f32.gmra.mxu2 %v144_v24  ;;  %v87_v24 = vld [vmem:[%s13744_s0 + $0x240] sm:$0xff] }
  0x4f   :  { %1677 = vmatmul.f32.gmra.mxu3 %v272_v25  ;;  %v215_v25 = vld [vmem:[%s13744_s0 + $0x241] sm:$0xff]  ;;  %v151_v26 = vmax.f32 %v87_v24, 0.0 }
  0x50   :  { %v279_v27 = vmax.f32 %v215_v25, 0.0  ;;  %v93_v24 = vld [vmem:[%s13744_s0 + $0x288] sm:$0xff] }
  0x51   :  { %1372 = vmatmul.f32.gmra.mxu0 %v112_v28  ;;  %1581 = vmatmul.f32.gmra.mxu1 %v240_v29  ;;  %v55_v28 = vld [vmem:[%s13744_s0 + $0x90] sm:$0xff] }
  0x52   :  { %v183_v29 = vld [vmem:[%s13744_s0 + $0x91] sm:$0xff]  ;;  %v119_v30 = vmax.f32 %v55_v28, 0.0  ;;  %v221_v25 = vld [vmem:[%s13744_s0 + $0x289] sm:$0xff] }
  0x53   :  { %v247_v31 = vmax.f32 %v183_v29, 0.0  ;;  %v157_v29 = vmax.f32 %v93_v24, 0.0  ;;  %v225_v24 = vld [vmem:[%s13744_s0 + $0x2b9] sm:$0xff] }
  0x56   :  { %1471 = vmatmul.f32.gmra.mxu2 %v145_v33  ;;  %v1252_v33 = vld [vmem:[%s13745_s1 + $0x1b8] sm:$0xff] }
  0x57   :  { %1680 = vmatmul.f32.gmra.mxu3 %v273_v34  ;;  %v88_v34 = vld [vmem:[%s13744_s0 + $0x248] sm:$0xff] }
  0x58   :  { %1976 = vmatpush.msrb.mxu3 %v1252_v33  ;;  %v152_v36 = vmax.f32 %v88_v34, 0.0  ;;  %v253_v34 = vmax.f32 %v189_v32, 0.0  ;;  %v193_v32 = vld [vmem:[%s13744_s0 + $0x109] sm:$0xff] }
  0x59   :  { %1375 = vmatmul.f32.gmra.mxu0 %v113_v37  ;;  %1584 = vmatmul.f32.gmra.mxu1 %v241_v38  ;;  %v280_v37 = vmax.f32 %v216_v35, 0.0  ;;  %v56_v38 = vld [vmem:[%s13744_s0 + $0x98] sm:$0xff] }
  0x5a   :  { %v120_v40 = vmax.f32 %v56_v38, 0.0  ;;  %v1249_v38 = vld [vmem:[%s13745_s1 + $0x1a0] sm:$0xff] }
  0x5e   :  { %1474 = vmatmul.f32.gmra.mxu2 %v146_v43  ;;  %v89_v43 = vld [vmem:[%s13744_s0 + $0x258] sm:$0xff] }
  0x5f   :  { %1683 = vmatmul.f32.gmra.mxu3 %v274_v44  ;;  %v217_v44 = vld [vmem:[%s13744_s0 + $0x259] sm:$0xff]  ;;  %v153_v45 = vmax.f32 %v89_v43, 0.0 }
  0x60   :  { %v281_v46 = vmax.f32 %v217_v44, 0.0  ;;  %v158_v44 = vmax.f32 %v94_v39, 0.0  ;;  %v1231_v39 = vld [vmem:[%s13745_s1 + $0x110] sm:$0xff] }
  0x61   :  { %1378 = vmatmul.f32.gmra.mxu0 %v114_v47  ;;  %1587 = vmatmul.f32.gmra.mxu1 %v242_v48  ;;  %v57_v47 = vld [vmem:[%s13744_s0 + $0xa8] sm:$0xff] }
  0x62   :  { %v185_v48 = vld [vmem:[%s13744_s0 + $0xa9] sm:$0xff]  ;;  %v121_v49 = vmax.f32 %v57_v47, 0.0  ;;  %v190_v47 = vld [vmem:[%s13744_s0 + $0xe1] sm:$0xff] }
  0x63   :  { %v249_v50 = vmax.f32 %v185_v48, 0.0 }
  0x66   :  { %1477 = vmatmul.f32.gmra.mxu2 %v147_v52  ;;  %v1251_v52 = vld [vmem:[%s13745_s1 + $0x1b0] sm:$0xff] }
  0x67   :  { %1686 = vmatmul.f32.gmra.mxu3 %v275_v53  ;;  %v90_v53 = vld [vmem:[%s13744_s0 + $0x260] sm:$0xff] }
  0x68   :  { %1977 = vmatpush.msrb.mxu3 %v1251_v52  ;;  %v154_v55 = vmax.f32 %v90_v53, 0.0  ;;  %v1265_v52 = vld [vmem:[%s13745_s1 + $0x220] sm:$0xff] }
  0x69   :  { %1381 = vmatmul.f32.gmra.mxu0 %v115_v56  ;;  %1590 = vmatmul.f32.gmra.mxu1 %v243_v57  ;;  %v282_v56 = vmax.f32 %v218_v54, 0.0  ;;  %v58_v57 = vld [vmem:[%s13744_s0 + $0xb0] sm:$0xff]  ;;  %v95_v53 = vld [vmem:[%s13744_s0 + $0x2a0] sm:$0xff] }
  0x6a   :  { %v122_v59 = vmax.f32 %v58_v57, 0.0  ;;  %1978 = vmatpush.msrb.mxu3 %v1250_v9  ;;  %v223_v54 = vld [vmem:[%s13744_s0 + $0x2a1] sm:$0xff]  ;;  %2188 = vmatpush.msrb.mxu0 %v1265_v52  ;;  %v159_v58 = vmax.f32 %v95_v53, 0.0  ;;  %v194_v52 = vld [vmem:[%s13744_s0 + $0x111] sm:$0xff] }
  0x6c   :  { %1979 = vmatpush.msrb.mxu3 %v1249_v38 }
  0x6e   :  { %1480 = vmatmul.f32.gmra.mxu2 %v148_v62  ;;  %v91_v62 = vld [vmem:[%s13744_s0 + $0x270] sm:$0xff] }
  0x6f   :  { %1689 = vmatmul.f32.gmra.mxu3 %v276_v63  ;;  %v219_v63 = vld [vmem:[%s13744_s0 + $0x271] sm:$0xff]  ;;  %v155_v0 = vmax.f32 %v91_v62, 0.0 }
  0x70   :  { %v283_v1 = vmax.f32 %v219_v63, 0.0  ;;  %v255_v63 = vmax.f32 %v191_v61, 0.0 }
  0x71   :  { %1384 = vmatmul.f32.gmra.mxu0 %v116_v2  ;;  %1593 = vmatmul.f32.gmra.mxu1 %v244_v3  ;;  %v59_v2 = vld [vmem:[%s13744_s0 + $0xc0] sm:$0xff] }
  0x72   :  { %v187_v3 = vld [vmem:[%s13744_s0 + $0xc1] sm:$0xff]  ;;  %v123_v4 = vmax.f32 %v59_v2, 0.0  ;;  %v1232_v2 = vld [vmem:[%s13745_s1 + $0x118] sm:$0xff] }
  0x73   :  { %v251_v5 = vmax.f32 %v187_v3, 0.0  ;;  %v1248_v3 = vld [vmem:[%s13745_s1 + $0x198] sm:$0xff] }
  0x74   :  { %1980 = vmatpush.msrb.mxu3 %v1248_v3 }
  0x76   :  { %1483 = vmatmul.f32.gmra.mxu2 %v149_v7 }
  0x77   :  { %1692 = vmatmul.f32.gmra.mxu3 %v277_v8  ;;  %v1234_v8 = vld [vmem:[%s13745_s1 + $0x128] sm:$0xff] }
  0x78   :  { %1769 = vmatpush.msrb.mxu2 %v1234_v8 }
  0x79   :  { %1387 = vmatmul.f32.gmra.mxu0 %v117_v11  ;;  %1596 = vmatmul.f32.gmra.mxu1 %v245_v12  ;;  %v220_v11 = vld [vmem:[%s13744_s0 + $0x279] sm:$0xff] }
  0x7a   :  { %v284_v16 = vmax.f32 %v220_v11, 0.0 }
  0x7e   :  { %1486 = vmatmul.f32.gmra.mxu2 %v150_v17  ;;  %v60_v17 = vld [vmem:[%s13744_s0 + $0xc8] sm:$0xff] }
  0x7f   :  { %1695 = vmatmul.f32.gmra.mxu3 %v278_v18  ;;  %v188_v18 = vld [vmem:[%s13744_s0 + $0xc9] sm:$0xff]  ;;  %v124_v19 = vmax.f32 %v60_v17, 0.0 }
  0x80   :  { %v252_v20 = vmax.f32 %v188_v18, 0.0 }
  0x81   :  { %1390 = vmatmul.f32.gmra.mxu0 %v118_v21  ;;  %1599 = vmatmul.f32.gmra.mxu1 %v246_v22 }
  0x86   :  { %1489 = vmatmul.f32.gmra.mxu2 %v151_v26 }
  0x87   :  { %1698 = vmatmul.f32.gmra.mxu3 %v279_v27 }
  0x89   :  { %1393 = vmatmul.f32.gmra.mxu0 %v119_v30  ;;  %1602 = vmatmul.f32.gmra.mxu1 %v247_v31  ;;  %v285_v30 = vmax.f32 %v221_v25, 0.0  ;;  %v61_v31 = vld [vmem:[%s13744_s0 + $0xd8] sm:$0xff] }
  0x8a   :  { %v125_v33 = vmax.f32 %v61_v31, 0.0  ;;  %v65_v31 = vld [vmem:[%s13744_s0 + $0x108] sm:$0xff] }
  0x8e   :  { %1492 = vmatmul.f32.gmra.mxu2 %v152_v36 }
  0x8f   :  { %1701 = vmatmul.f32.gmra.mxu3 %v280_v37  ;;  %v1233_v37 = vld [vmem:[%s13745_s1 + $0x120] sm:$0xff] }
  0x90   :  { %1770 = vmatpush.msrb.mxu2 %v1233_v37 }
  0x91   :  { %1396 = vmatmul.f32.gmra.mxu0 %v120_v40  ;;  %1605 = vmatmul.f32.gmra.mxu1 %v248_v41  ;;  %v222_v40 = vld [vmem:[%s13744_s0 + $0x291] sm:$0xff] }
  0x92   :  { %1771 = vmatpush.msrb.mxu2 %v1232_v2 }
  0x94   :  { %1772 = vmatpush.msrb.mxu2 %v1231_v39  ;;  %v1262_v39 = vld [vmem:[%s13745_s1 + $0x208] sm:$0xff] }
  0x96   :  { %1495 = vmatmul.f32.gmra.mxu2 %v153_v45  ;;  %v286_v45 = vmax.f32 %v222_v40, 0.0  ;;  %v1247_v40 = vld [vmem:[%s13745_s1 + $0x190] sm:$0xff] }
  0x97   :  { %1704 = vmatmul.f32.gmra.mxu3 %v281_v46  ;;  %v62_v46 = vld [vmem:[%s13744_s0 + $0xe0] sm:$0xff] }
  0x98   :  { %v126_v48 = vmax.f32 %v62_v46, 0.0  ;;  %1981 = vmatpush.msrb.mxu3 %v1247_v40  ;;  %v101_v40 = vld [vmem:[%s13744_s0 + $0x2e8] sm:$0xff] }
  0x99   :  { %1399 = vmatmul.f32.gmra.mxu0 %v121_v49  ;;  %1608 = vmatmul.f32.gmra.mxu1 %v249_v50  ;;  %v254_v49 = vmax.f32 %v190_v47, 0.0 }
  0x9e   :  { %1498 = vmatmul.f32.gmra.mxu2 %v154_v55 }
  0x9f   :  { %1707 = vmatmul.f32.gmra.mxu3 %v282_v56 }
  0xa1   :  { %1402 = vmatmul.f32.gmra.mxu0 %v122_v59  ;;  %1611 = vmatmul.f32.gmra.mxu1 %v250_v60  ;;  %v287_v59 = vmax.f32 %v223_v54, 0.0  ;;  %v63_v60 = vld [vmem:[%s13744_s0 + $0xf0] sm:$0xff]  ;;  %v258_v54 = vmax.f32 %v194_v52, 0.0  ;;  %v197_v52 = vld [vmem:[%s13744_s0 + $0x139] sm:$0xff] }
  0xa2   :  { %v127_v62 = vmax.f32 %v63_v60, 0.0  ;;  %v227_v60 = vld [vmem:[%s13744_s0 + $0x2d1] sm:$0xff] }
  0xa3   :  { %v291_v3 = vmax.f32 %v227_v60, 0.0 }
  0xa6   :  { %1501 = vmatmul.f32.gmra.mxu2 %v155_v0  ;;  %v8125_v6 = vpop.f32.mrf.mxu0  ;;  %v8127_v7 = vpop.f32.mrf.mxu1 }
  0xa7   :  { %1710 = vmatmul.f32.gmra.mxu3 %v283_v1 }
  0xa9   :  { %v1454_v12 = vpop.f32.mrf.mxu2  ;;  %1405 = vmatmul.f32.gmra.mxu0 %v123_v4  ;;  %1614 = vmatmul.f32.gmra.mxu1 %v251_v5  ;;  %v96_v4 = vld [vmem:[%s13744_s0 + $0x2a8] sm:$0xff] }
  0xaa   :  { %v1663_v13 = vpop.f32.mrf.mxu3  ;;  %v224_v5 = vld [vmem:[%s13744_s0 + $0x2a9] sm:$0xff]  ;;  %v160_v11 = vmax.f32 %v96_v4, 0.0  ;;  %v67_v4 = vld [vmem:[%s13744_s0 + $0x120] sm:$0xff] }
  0xab   :  { %v8141_v14 = vadd.f32 %v1663_v13, %v1454_v12  ;;  %v288_v12 = vmax.f32 %v224_v5, 0.0  ;;  %v64_v13 = vld [vmem:[%s13744_s0 + $0xf8] sm:$0xff]  ;;  %v195_v5 = vld [vmem:[%s13744_s0 + $0x121] sm:$0xff] }
  0xad   :  { %13945 = vst [vmem:[#allocation9_spill] sm:$0xff] %v8141_v14 }
  0xae   :  { %1504 = vmatmul.f32.gmra.mxu2 %v156_v15  ;;  %v8149_v21 = vpop.f32.mrf.mxu0  ;;  %v8151_v22 = vpop.f32.mrf.mxu1  ;;  %v192_v15 = vld [vmem:[%s13744_s0 + $0xf9] sm:$0xff] }
  0xaf   :  { %1713 = vmatmul.f32.gmra.mxu3 %v284_v16  ;;  %v128_v16 = vmax.f32 %v64_v13, 0.0  ;;  %v256_v17 = vmax.f32 %v192_v15, 0.0  ;;  %v1230_v13 = vld [vmem:[%s13745_s1 + $0x108] sm:$0xff] }
  0xb0   :  { %v1246_v15 = vld [vmem:[%s13745_s1 + $0x188] sm:$0xff]  ;;  %1773 = vmatpush.msrb.mxu2 %v1230_v13 }
  0xb1   :  { %v1457_v26 = vpop.f32.mrf.mxu2  ;;  %1408 = vmatmul.f32.gmra.mxu0 %v124_v19  ;;  %1617 = vmatmul.f32.gmra.mxu1 %v252_v20  ;;  %v1264_v20 = vld [vmem:[%s13745_s1 + $0x218] sm:$0xff] }
  0xb2   :  { %v1666_v27 = vpop.f32.mrf.mxu3  ;;  %2189 = vmatpush.msrb.mxu0 %v1264_v20  ;;  %1982 = vmatpush.msrb.mxu3 %v1246_v15 }
  0xb3   :  { %v8162_v28 = vadd.f32 %v1666_v27, %v1457_v26 }
  0xb5   :  { %13946 = vst [vmem:[#allocation10_spill] sm:$0xff] %v8162_v28 }
  0xb6   :  { %1507 = vmatmul.f32.gmra.mxu2 %v157_v29  ;;  %v8170_v35 = vpop.f32.mrf.mxu0  ;;  %v8172_v36 = vpop.f32.mrf.mxu1  ;;  %v161_v29 = vmax.f32 %v97_v23, 0.0 }
  0xb7   :  { %1716 = vmatmul.f32.gmra.mxu3 %v285_v30  ;;  %v289_v30 = vmax.f32 %v225_v24, 0.0 }
  0xb9   :  { %v1460_v41 = vpop.f32.mrf.mxu2  ;;  %1411 = vmatmul.f32.gmra.mxu0 %v125_v33  ;;  %1620 = vmatmul.f32.gmra.mxu1 %v253_v34  ;;  %v129_v33 = vmax.f32 %v65_v31, 0.0  ;;  %v257_v34 = vmax.f32 %v193_v32, 0.0 }
  0xba   :  { %v1669_v42 = vpop.f32.mrf.mxu3 }
  0xbb   :  { %v8186_v43 = vadd.f32 %v1669_v42, %v1460_v41  ;;  %v98_v41 = vld [vmem:[%s13744_s0 + $0x2c0] sm:$0xff] }
  0xbc   :  { %v226_v42 = vld [vmem:[%s13744_s0 + $0x2c1] sm:$0xff]  ;;  %v162_v47 = vmax.f32 %v98_v41, 0.0  ;;  %v229_v41 = vld [vmem:[%s13744_s0 + $0x2e9] sm:$0xff] }
  0xbd   :  { %13947 = vst [vmem:[#allocation11_spill] sm:$0xff] %v8186_v43 }
  0xbe   :  { %1510 = vmatmul.f32.gmra.mxu2 %v158_v44  ;;  %v8194_v50 = vpop.f32.mrf.mxu0  ;;  %v8196_v51 = vpop.f32.mrf.mxu1 }
  0xbf   :  { %1719 = vmatmul.f32.gmra.mxu3 %v286_v45 }
  0xc1   :  { %v1463_v55 = vpop.f32.mrf.mxu2  ;;  %1414 = vmatmul.f32.gmra.mxu0 %v126_v48  ;;  %1623 = vmatmul.f32.gmra.mxu1 %v254_v49  ;;  %v290_v48 = vmax.f32 %v226_v42, 0.0  ;;  %v66_v49 = vld [vmem:[%s13744_s0 + $0x110] sm:$0xff] }
  0xc2   :  { %v1672_v56 = vpop.f32.mrf.mxu3  ;;  %v130_v53 = vmax.f32 %v66_v49, 0.0  ;;  %v293_v49 = vmax.f32 %v229_v41, 0.0  ;;  %v231_v41 = vld [vmem:[%s13744_s0 + $0x301] sm:$0xff] }
  0xc3   :  { %v8207_v57 = vadd.f32 %v1672_v56, %v1463_v55 }
  0xc5   :  { %13948 = vst [vmem:[#allocation12_spill] sm:$0xff] %v8207_v57 }
  0xc6   :  { %1513 = vmatmul.f32.gmra.mxu2 %v159_v58  ;;  %v8215_v0 = vpop.f32.mrf.mxu0  ;;  %v8217_v1 = vpop.f32.mrf.mxu1  ;;  %v1263_v58 = vld [vmem:[%s13745_s1 + $0x210] sm:$0xff] }
  0xc7   :  { %1722 = vmatmul.f32.gmra.mxu3 %v287_v59  ;;  %v99_v59 = vld [vmem:[%s13744_s0 + $0x2d0] sm:$0xff]  ;;  %2190 = vmatpush.msrb.mxu0 %v1263_v58 }
  0xc8   :  { %v163_v2 = vmax.f32 %v99_v59, 0.0  ;;  %v261_v59 = vmax.f32 %v197_v52, 0.0 }
  0xc9   :  { %v1466_v8 = vpop.f32.mrf.mxu2  ;;  %1417 = vmatmul.f32.gmra.mxu0 %v127_v62  ;;  %1626 = vmatmul.f32.gmra.mxu1 %v255_v63 }
  0xca   :  { %v1675_v9 = vpop.f32.mrf.mxu3  ;;  %2191 = vmatpush.msrb.mxu0 %v1262_v39  ;;  %v1261_v39 = vld [vmem:[%s13745_s1 + $0x200] sm:$0xff] }
  0xcb   :  { %v8231_v10 = vadd.f32 %v1675_v9, %v1466_v8  ;;  %v131_v8 = vmax.f32 %v67_v4, 0.0  ;;  %v259_v9 = vmax.f32 %v195_v5, 0.0  ;;  %v102_v4 = vld [vmem:[%s13744_s0 + $0x2f0] sm:$0xff] }
  0xcc   :  { %v230_v5 = vld [vmem:[%s13744_s0 + $0x2f1] sm:$0xff]  ;;  %2192 = vmatpush.msrb.mxu0 %v1261_v39  ;;  %v200_v39 = vld [vmem:[%s13744_s0 + $0x159] sm:$0xff] }
  0xcd   :  { %13949 = vst [vmem:[#allocation13_spill] sm:$0xff] %v8231_v10 }
  0xce   :  { %1516 = vmatmul.f32.gmra.mxu2 %v160_v11  ;;  %v8239_v18 = vpop.f32.mrf.mxu0  ;;  %v8241_v19 = vpop.f32.mrf.mxu1 }
  0xcf   :  { %1725 = vmatmul.f32.gmra.mxu3 %v288_v12 }
  0xd1   :  { %v1469_v25 = vpop.f32.mrf.mxu2  ;;  %1420 = vmatmul.f32.gmra.mxu0 %v128_v16  ;;  %1629 = vmatmul.f32.gmra.mxu1 %v256_v17  ;;  %v100_v16 = vld [vmem:[%s13744_s0 + $0x2d8] sm:$0xff] }
  0xd2   :  { %v1678_v26 = vpop.f32.mrf.mxu3  ;;  %v228_v17 = vld [vmem:[%s13744_s0 + $0x2d9] sm:$0xff] }
  0xd3   :  { %v8252_v27 = vadd.f32 %v1678_v26, %v1469_v25  ;;  %v164_v25 = vmax.f32 %v100_v16, 0.0  ;;  %v292_v26 = vmax.f32 %v228_v17, 0.0  ;;  %v166_v16 = vmax.f32 %v102_v4, 0.0 }
  0xd4   :  { %v294_v17 = vmax.f32 %v230_v5, 0.0  ;;  %v1308_v5 = vld [vmem:[%s13745_s1 + $0x378] sm:$0xff] }
  0xd5   :  { %13950 = vst [vmem:[#allocation14_spill] sm:$0xff] %v8252_v27 }
  0xd6   :  { %1519 = vmatmul.f32.gmra.mxu2 %v161_v29  ;;  %v8260_v37 = vpop.f32.mrf.mxu0  ;;  %v8262_v38 = vpop.f32.mrf.mxu1  ;;  %v68_v29 = vld [vmem:[%s13744_s0 + $0x128] sm:$0xff] }
  0xd7   :  { %1728 = vmatmul.f32.gmra.mxu3 %v289_v30  ;;  %v196_v30 = vld [vmem:[%s13744_s0 + $0x129] sm:$0xff]  ;;  %v132_v31 = vmax.f32 %v68_v29, 0.0 }
  0xd8   :  { %v260_v32 = vmax.f32 %v196_v30, 0.0 }
  0xd9   :  { %v1472_v44 = vpop.f32.mrf.mxu2  ;;  %1423 = vmatmul.f32.gmra.mxu0 %v129_v33  ;;  %1632 = vmatmul.f32.gmra.mxu1 %v257_v34 }
  0xda   :  { %v1681_v45 = vpop.f32.mrf.mxu3 }
  0xdb   :  { %v8276_v46 = vadd.f32 %v1681_v45, %v1472_v44  ;;  %v69_v45 = vld [vmem:[%s13744_s0 + $0x138] sm:$0xff] }
  0xdc   :  { %v133_v58 = vmax.f32 %v69_v45, 0.0 }
  0xdd   :  { %13951 = vst [vmem:[#allocation15_spill] sm:$0xff] %v8276_v46 }
  0xde   :  { %1522 = vmatmul.f32.gmra.mxu2 %v162_v47  ;;  %v8284_v55 = vpop.f32.mrf.mxu0  ;;  %v8286_v56 = vpop.f32.mrf.mxu1 }
  0xdf   :  { %1731 = vmatmul.f32.gmra.mxu3 %v290_v48  ;;  %v165_v48 = vmax.f32 %v101_v40, 0.0  ;;  %v103_v40 = vld [vmem:[%s13744_s0 + $0x300] sm:$0xff] }
  0xe0   :  { %v167_v52 = vmax.f32 %v103_v40, 0.0  ;;  %v1281_v40 = vld [vmem:[%s13745_s1 + $0x2a0] sm:$0xff] }
  0xe1   :  { %v1475_v61 = vpop.f32.mrf.mxu2  ;;  %1426 = vmatmul.f32.gmra.mxu0 %v130_v53  ;;  %1635 = vmatmul.f32.gmra.mxu1 %v258_v54  ;;  %v1292_v53 = vld [vmem:[%s13745_s1 + $0x2f8] sm:$0xff]  ;;  %v1291_v54 = vld [vmem:[%s13745_s1 + $0x2f0] sm:$0xff] }
  0xe2   :  { %v1684_v62 = vpop.f32.mrf.mxu3  ;;  %2386 = vmatpush.msrb.mxu1 %v1292_v53  ;;  %v295_v53 = vmax.f32 %v231_v41, 0.0 }
  0xe3   :  { %v8297_v63 = vadd.f32 %v1684_v62, %v1475_v61  ;;  %v1229_v62 = vld [vmem:[%s13745_s1 + $0x100] sm:$0xff] }
  0xe4   :  { %2387 = vmatpush.msrb.mxu1 %v1291_v54  ;;  %1774 = vmatpush.msrb.mxu2 %v1229_v62  ;;  %v71_v54 = vld [vmem:[%s13744_s0 + $0x150] sm:$0xff] }
  0xe5   :  { %13952 = vst [vmem:[#allocation16_spill] sm:$0xff] %v8297_v63  ;;  %v135_v62 = vmax.f32 %v71_v54, 0.0  ;;  %v1280_v54 = vld [vmem:[%s13745_s1 + $0x298] sm:$0xff] }
  0xe6   :  { %1525 = vmatmul.f32.gmra.mxu2 %v163_v2  ;;  %v8305_v11 = vpop.f32.mrf.mxu0  ;;  %v8307_v12 = vpop.f32.mrf.mxu1  ;;  %v1290_v2 = vld [vmem:[%s13745_s1 + $0x2e8] sm:$0xff] }
  0xe7   :  { %1734 = vmatmul.f32.gmra.mxu3 %v291_v3  ;;  %v1245_v3 = vld [vmem:[%s13745_s1 + $0x180] sm:$0xff]  ;;  %2388 = vmatpush.msrb.mxu1 %v1290_v2 }
  0xe8   :  { %1983 = vmatpush.msrb.mxu3 %v1245_v3  ;;  %2595 = vmatpush.msra.mxu2 %v1308_v5 }
  0xe9   :  { %v1478_v20 = vpop.f32.mrf.mxu2  ;;  %1429 = vmatmul.f32.gmra.mxu0 %v131_v8  ;;  %1638 = vmatmul.f32.gmra.mxu1 %v259_v9  ;;  %v1289_v8 = vld [vmem:[%s13745_s1 + $0x2e0] sm:$0xff] }
  0xea   :  { %v1687_v23 = vpop.f32.mrf.mxu3  ;;  %2389 = vmatpush.msrb.mxu1 %v1289_v8  ;;  %v1324_v8 = vld [vmem:[%s13745_s1 + $0x3f8] sm:$0xff] }
  0xeb   :  { %v8321_v24 = vadd.f32 %v1687_v23, %v1478_v20  ;;  %v70_v20 = vld [vmem:[%s13744_s0 + $0x140] sm:$0xff]  ;;  %2804 = vmatpush.msra.mxu3 %v1324_v8 }
  0xec   :  { %v198_v23 = vld [vmem:[%s13744_s0 + $0x141] sm:$0xff]  ;;  %v134_v29 = vmax.f32 %v70_v20, 0.0 }
  0xed   :  { %13953 = vst [vmem:[#allocation17_spill] sm:$0xff] %v8321_v24  ;;  %v262_v30 = vmax.f32 %v198_v23, 0.0  ;;  %v1282_v23 = vld [vmem:[%s13745_s1 + $0x2a8] sm:$0xff] }
  0xee   :  { %1528 = vmatmul.f32.gmra.mxu2 %v164_v25  ;;  %v8329_v33 = vpop.f32.mrf.mxu0  ;;  %v8331_v34 = vpop.f32.mrf.mxu1  ;;  %v1288_v25 = vld [vmem:[%s13745_s1 + $0x2d8] sm:$0xff] }
  0xef   :  { %1737 = vmatmul.f32.gmra.mxu3 %v292_v26  ;;  %2390 = vmatpush.msrb.mxu1 %v1288_v25  ;;  %v1287_v26 = vld [vmem:[%s13745_s1 + $0x2d0] sm:$0xff] }
  0xf1   :  { %v1481_v42 = vpop.f32.mrf.mxu2  ;;  %1432 = vmatmul.f32.gmra.mxu0 %v132_v31  ;;  %1641 = vmatmul.f32.gmra.mxu1 %v260_v32 }
  0xf2   :  { %v1690_v44 = vpop.f32.mrf.mxu3  ;;  %2391 = vmatpush.msrb.mxu1 %v1287_v26 }
  0xf3   :  { %v8345_v47 = vadd.f32 %v1690_v44, %v1481_v42  ;;  %v1286_v42 = vld [vmem:[%s13745_s1 + $0x2c8] sm:$0xff] }
  0xf4   :  { %2392 = vmatpush.msrb.mxu1 %v1286_v42  ;;  %v264_v42 = vmax.f32 %v200_v39, 0.0  ;;  %v1277_v39 = vld [vmem:[%s13745_s1 + $0x280] sm:$0xff] }
  0xf5   :  { %13954 = vst [vmem:[#allocation18_spill] sm:$0xff] %v8345_v47 }
  0xf6   :  { %1531 = vmatmul.f32.gmra.mxu2 %v165_v48  ;;  %v8356_v60 = vpop.f32.mrf.mxu0  ;;  %v8358_v61 = vpop.f32.mrf.mxu1  ;;  %v1285_v48 = vld [vmem:[%s13745_s1 + $0x2c0] sm:$0xff] }
  0xf7   :  { %1740 = vmatmul.f32.gmra.mxu3 %v293_v49  ;;  %2393 = vmatpush.msrb.mxu1 %v1285_v48  ;;  %v1340_v48 = vld [vmem:[%s13745_s1 + $0x478] sm:$0xff] }
  0xf8   :  { %3013 = vmatpush.msra.mxu0 %v1340_v48 }
  0xf9   :  { %v1484_v9 = vpop.f32.mrf.mxu2  ;;  %1435 = vmatmul.f32.gmra.mxu0 %v133_v58  ;;  %1644 = vmatmul.f32.gmra.mxu1 %v261_v59  ;;  %v199_v58 = vld [vmem:[%s13744_s0 + $0x151] sm:$0xff] }
  0xfa   :  { %v1693_v13 = vpop.f32.mrf.mxu3  ;;  %v1284_v59 = vld [vmem:[%s13745_s1 + $0x2b8] sm:$0xff]  ;;  %v263_v2 = vmax.f32 %v199_v58, 0.0 }
  0xfb   :  { %v8378_v15 = vadd.f32 %v1693_v13, %v1484_v9  ;;  %v104_v9 = vld [vmem:[%s13744_s0 + $0x308] sm:$0xff]  ;;  %2394 = vmatpush.msrb.mxu1 %v1284_v59 }
  0xfc   :  { %v232_v13 = vld [vmem:[%s13744_s0 + $0x309] sm:$0xff]  ;;  %v168_v26 = vmax.f32 %v104_v9, 0.0 }
  0xfd   :  { %13955 = vst [vmem:[#allocation19_spill] sm:$0xff] %v8378_v15  ;;  %v73_v9 = vld [vmem:[%s13744_s0 + $0x168] sm:$0xff] }
  0xfe   :  { %1534 = vmatmul.f32.gmra.mxu2 %v166_v16  ;;  %v8392_v31 = vpop.f32.mrf.mxu0  ;;  %v8394_v32 = vpop.f32.mrf.mxu1  ;;  %v1283_v16 = vld [vmem:[%s13745_s1 + $0x2b0] sm:$0xff] }
  0xff   :  { %1743 = vmatmul.f32.gmra.mxu3 %v294_v17  ;;  %2395 = vmatpush.msrb.mxu1 %v1283_v16  ;;  %v1278_v16 = vld [vmem:[%s13745_s1 + $0x288] sm:$0xff] }
 0x101   :  { %v1487_v44 = vpop.f32.mrf.mxu2  ;;  %1438 = vmatmul.f32.gmra.mxu0 %v134_v29  ;;  %1647 = vmatmul.f32.gmra.mxu1 %v262_v30  ;;  %v296_v29 = vmax.f32 %v232_v13, 0.0  ;;  %v72_v30 = vld [vmem:[%s13744_s0 + $0x158] sm:$0xff]  ;;  %v201_v13 = vld [vmem:[%s13744_s0 + $0x169] sm:$0xff] }
 0x102   :  { %v1696_v45 = vpop.f32.mrf.mxu3  ;;  %2396 = vmatpush.msrb.mxu1 %v1282_v23  ;;  %v136_v41 = vmax.f32 %v72_v30, 0.0  ;;  %v234_v30 = vld [vmem:[%s13744_s0 + $0x321] sm:$0xff] }
 0x103   :  { %v8411_v49 = vadd.f32 %v1696_v45, %v1487_v44 }
 0x104   :  { %2397 = vmatpush.msrb.mxu1 %v1281_v40 }
 0x105   :  { %13956 = vst [vmem:[#allocation20_spill] sm:$0xff] %v8411_v49 }
 0x106   :  { %1537 = vmatmul.f32.gmra.mxu2 %v167_v52  ;;  %v8422_v3 = vpop.f32.mrf.mxu0  ;;  %v8424_v4 = vpop.f32.mrf.mxu1  ;;  %v105_v52 = vld [vmem:[%s13744_s0 + $0x318] sm:$0xff]  ;;  %2398 = vmatpush.msrb.mxu1 %v1280_v54 }
 0x107   :  { %1746 = vmatmul.f32.gmra.mxu3 %v295_v53  ;;  %v233_v53 = vld [vmem:[%s13744_s0 + $0x319] sm:$0xff]  ;;  %v169_v5 = vmax.f32 %v105_v52, 0.0  ;;  %v298_v52 = vmax.f32 %v234_v30, 0.0  ;;  %v202_v54 = vld [vmem:[%s13744_s0 + $0x171] sm:$0xff] }
 0x108   :  { %v297_v8 = vmax.f32 %v233_v53, 0.0  ;;  %v74_v53 = vld [vmem:[%s13744_s0 + $0x170] sm:$0xff]  ;;  %v7203_v30 = vld [vmem:[%s13744_s0 + $0x19] sm:$0xff] }
 0x109   :  { %v1490_v17 = vpop.f32.mrf.mxu2  ;;  %1441 = vmatmul.f32.gmra.mxu0 %v135_v62  ;;  %1650 = vmatmul.f32.gmra.mxu1 %v263_v2  ;;  %v1279_v62 = vld [vmem:[%s13745_s1 + $0x290] sm:$0xff] }
 0x10a   :  { %v1699_v20 = vpop.f32.mrf.mxu3  ;;  %2399 = vmatpush.msrb.mxu1 %v1279_v62 }
 0x10b   :  { %v8444_v25 = vadd.f32 %v1699_v20, %v1490_v17  ;;  %v137_v17 = vmax.f32 %v73_v9, 0.0  ;;  %v265_v20 = vmax.f32 %v201_v13, 0.0  ;;  %v7139_v9 = vld [vmem:[%s13744_s0 + $0x18] sm:$0xff] }
 0x10c   :  { %2400 = vmatpush.msrb.mxu1 %v1278_v16 }
 0x10d   :  { %13957 = vst [vmem:[#allocation21_spill] sm:$0xff] %v8444_v25 }
 0x10e   :  { %1540 = vmatmul.f32.gmra.mxu2 %v168_v26  ;;  %v8455_v44 = vpop.f32.mrf.mxu0  ;;  %v8457_v45 = vpop.f32.mrf.mxu1  ;;  %2401 = vmatpush.msrb.mxu1 %v1277_v39  ;;  %v7267_v39 = vld [vmem:[%s13744_s0 + $0x1a] sm:$0xff] }
 0x10f   :  { %1749 = vmatmul.f32.gmra.mxu3 %v296_v29  ;;  %v106_v29 = vld [vmem:[%s13744_s0 + $0x320] sm:$0xff] }
 0x110   :  { %v170_v48 = vmax.f32 %v106_v29, 0.0  ;;  %v492_v29 = vmax.f32 %v7139_v9, 0.0 }
 0x111   :  { %v1493_v58 = vpop.f32.mrf.mxu2  ;;  %1444 = vmatmul.f32.gmra.mxu0 %v136_v41  ;;  %1653 = vmatmul.f32.gmra.mxu1 %v264_v42 }
 0x112   :  { %v1702_v59 = vpop.f32.mrf.mxu3 }
 0x113   :  { %v8474_v2 = vadd.f32 %v1702_v59, %v1493_v58  ;;  %v138_v58 = vmax.f32 %v74_v53, 0.0  ;;  %v266_v59 = vmax.f32 %v202_v54, 0.0  ;;  %v1307_v53 = vld [vmem:[%s13745_s1 + $0x370] sm:$0xff] }
 0x114   :  { %v1323_v54 = vld [vmem:[%s13745_s1 + $0x3f0] sm:$0xff]  ;;  %2596 = vmatpush.msra.mxu2 %v1307_v53 }
 0x115   :  { %13958 = vst [vmem:[#allocation22_spill] sm:$0xff] %v8474_v2  ;;  %2805 = vmatpush.msra.mxu3 %v1323_v54  ;;  %v1339_v54 = vld [vmem:[%s13745_s1 + $0x470] sm:$0xff] }
 0x116   :  { %1543 = vmatmul.f32.gmra.mxu2 %v169_v5  ;;  %v8485_v23 = vpop.f32.mrf.mxu0  ;;  %v8487_v26 = vpop.f32.mrf.mxu1  ;;  %3014 = vmatpush.msra.mxu0 %v1339_v54 }
 0x117   :  { %1752 = vmatmul.f32.gmra.mxu3 %v297_v8  ;;  %v299_v8 = vld [vmem:[%s13744_s0 + $0x2] sm:$0xff] }
 0x119   :  { %v1496_v40 = vpop.f32.mrf.mxu2  ;;  %1447 = vmatmul.f32.gmra.mxu0 %v137_v17  ;;  %1656 = vmatmul.f32.gmra.mxu1 %v265_v20  ;;  %v363_v20 = vmax.f32 %v299_v8, 0.0 }
 0x11a   :  { %v1705_v41 = vpop.f32.mrf.mxu3 }
 0x11b   :  { %v8498_v42 = vadd.f32 %v1705_v41, %v1496_v40  ;;  %v620_v40 = vmax.f32 %v7203_v30, 0.0  ;;  %v748_v41 = vmax.f32 %v7267_v39, 0.0  ;;  %v7268_v30 = vld [vmem:[%s13744_s0 + $0x22] sm:$0xff] }
 0x11d   :  { %13959 = vst [vmem:[#allocation23_spill] sm:$0xff] %v8498_v42 }
 0x11e   :  { %1546 = vmatmul.f32.gmra.mxu2 %v170_v48  ;;  %v8506_v62 = vpop.f32.mrf.mxu0  ;;  %v8508_v5 = vpop.f32.mrf.mxu1 }
 0x11f   :  { %1755 = vmatmul.f32.gmra.mxu3 %v298_v52 }
 0x121   :  { %v1499_v13 = vpop.f32.mrf.mxu2  ;;  %1450 = vmatmul.f32.gmra.mxu0 %v138_v58  ;;  %1659 = vmatmul.f32.gmra.mxu1 %v266_v59  ;;  %v300_v58 = vld [vmem:[%s13744_s0 + $0xa] sm:$0xff]  ;;  %v7140_v59 = vld [vmem:[%s13744_s0 + $0x20] sm:$0xff] }
 0x122   :  { %v1708_v16 = vpop.f32.mrf.mxu3 }
 0x123   :  { %v8516_v17 = vadd.f32 %v1708_v16, %v1499_v13  ;;  %v364_v16 = vmax.f32 %v300_v58, 0.0  ;;  %v7141_v58 = vld [vmem:[%s13744_s0 + $0x30] sm:$0xff] }
 0x125   :  { %13960 = vst [vmem:[#allocation24_spill] sm:$0xff] %v8516_v17  ;;  %v749_v17 = vmax.f32 %v7268_v30, 0.0 }
 0x126   :  { %1775 = vmatmul.f32.vlgmr.msrb.gmra.mxu2 %v363_v20  ;;  %v8524_v48 = vpop.f32.mrf.mxu0  ;;  %v8526_v52 = vpop.f32.mrf.mxu1  ;;  %v493_v20 = vmax.f32 %v7140_v59, 0.0 }
 0x127   :  { %1984 = vmatmul.f32.vlgmr.msrb.gmra.mxu3 %v492_v29  ;;  %v7204_v29 = vld [vmem:[%s13744_s0 + $0x21] sm:$0xff] }
 0x128   :  { %v621_v39 = vmax.f32 %v7204_v29, 0.0  ;;  %v7269_v29 = vld [vmem:[%s13744_s0 + $0x32] sm:$0xff] }
 0x129   :  { %v1502_v8 = vpop.f32.mrf.mxu2  ;;  %2193 = vmatmul.f32.vlgmr.msrb.gmra.mxu0 %v620_v40  ;;  %2402 = vmatmul.f32.vlgmr.msrb.gmra.mxu1 %v748_v41 }
 0x12a   :  { %v1711_v9 = vpop.f32.mrf.mxu3 }
 0x12b   :  { %v8540_v13 = vadd.f32 %v1711_v9, %v1502_v8 }
 0x12d   :  { %13961 = vst [vmem:[#allocation25_spill] sm:$0xff] %v8540_v13  ;;  %v750_v13 = vmax.f32 %v7269_v29, 0.0 }
 0x12e   :  { %1778 = vmatmul.f32.gmra.mxu2 %v364_v16  ;;  %v8548_v53 = vpop.f32.mrf.mxu0  ;;  %v8550_v40 = vpop.f32.mrf.mxu1  ;;  %v494_v16 = vmax.f32 %v7141_v58, 0.0 }
 0x12f   :  { %1987 = vmatmul.f32.gmra.mxu3 %v493_v20  ;;  %v7205_v20 = vld [vmem:[%s13744_s0 + $0x31] sm:$0xff] }
 0x130   :  { %v622_v30 = vmax.f32 %v7205_v20, 0.0 }
 0x131   :  { %v1505_v59 = vpop.f32.mrf.mxu2  ;;  %2196 = vmatmul.f32.gmra.mxu0 %v621_v39  ;;  %2405 = vmatmul.f32.gmra.mxu1 %v749_v17  ;;  %v7142_v39 = vld [vmem:[%s13744_s0 + $0x38] sm:$0xff] }
 0x132   :  { %v1714_v8 = vpop.f32.mrf.mxu3 }
 0x133   :  { %v8558_v9 = vadd.f32 %v1714_v8, %v1505_v59 }
 0x135   :  { %13962 = vst [vmem:[#allocation26_spill] sm:$0xff] %v8558_v9  ;;  %v495_v9 = vmax.f32 %v7142_v39, 0.0 }
 0x136   :  { %1781 = vmatmul.f32.gmra.mxu2 %v748_v41  ;;  %v8566_v54 = vpop.f32.mrf.mxu0  ;;  %v8568_v42 = vpop.f32.mrf.mxu1  ;;  %v7206_v41 = vld [vmem:[%s13744_s0 + $0x39] sm:$0xff] }
 0x137   :  { %1990 = vmatmul.f32.gmra.mxu3 %v494_v16  ;;  %v7270_v16 = vld [vmem:[%s13744_s0 + $0x3a] sm:$0xff]  ;;  %v623_v20 = vmax.f32 %v7206_v41, 0.0 }
 0x138   :  { %v751_v29 = vmax.f32 %v7270_v16, 0.0 }
 0x139   :  { %v1508_v58 = vpop.f32.mrf.mxu2  ;;  %2199 = vmatmul.f32.gmra.mxu0 %v622_v30  ;;  %2408 = vmatmul.f32.gmra.mxu1 %v750_v13  ;;  %v7143_v30 = vld [vmem:[%s13744_s0 + $0x48] sm:$0xff] }
 0x13a   :  { %v1717_v59 = vpop.f32.mrf.mxu3 }
 0x13b   :  { %v8573_v8 = vadd.f32 %v1717_v59, %v1508_v58 }
 0x13d   :  { %13963 = vst [vmem:[#allocation27_spill] sm:$0xff] %v8573_v8  ;;  %v496_v8 = vmax.f32 %v7143_v30, 0.0  ;;  %v1322_v30 = vld [vmem:[%s13745_s1 + $0x3e8] sm:$0xff] }
 0x13e   :  { %1784 = vmatmul.f32.gmra.mxu2 %v749_v17  ;;  %v8581_v2 = vpop.f32.mrf.mxu0  ;;  %v8583_v25 = vpop.f32.mrf.mxu1  ;;  %v7207_v17 = vld [vmem:[%s13744_s0 + $0x49] sm:$0xff]  ;;  %2806 = vmatpush.msra.mxu3 %v1322_v30 }
 0x13f   :  { %1993 = vmatmul.f32.gmra.mxu3 %v495_v9  ;;  %v7271_v9 = vld [vmem:[%s13744_s0 + $0x4a] sm:$0xff]  ;;  %v624_v41 = vmax.f32 %v7207_v17, 0.0 }
 0x140   :  { %v752_v16 = vmax.f32 %v7271_v9, 0.0  ;;  %v7208_v9 = vld [vmem:[%s13744_s0 + $0x51] sm:$0xff] }
 0x141   :  { %v1511_v39 = vpop.f32.mrf.mxu2  ;;  %2202 = vmatmul.f32.gmra.mxu0 %v623_v20  ;;  %2411 = vmatmul.f32.gmra.mxu1 %v751_v29  ;;  %v1306_v20 = vld [vmem:[%s13745_s1 + $0x368] sm:$0xff]  ;;  %v625_v47 = vmax.f32 %v7208_v9, 0.0 }
 0x142   :  { %v1720_v58 = vpop.f32.mrf.mxu3  ;;  %2597 = vmatpush.msra.mxu2 %v1306_v20  ;;  %v7273_v9 = vld [vmem:[%s13744_s0 + $0x62] sm:$0xff] }
 0x143   :  { %v8588_v59 = vadd.f32 %v1720_v58, %v1511_v39  ;;  %v7144_v39 = vld [vmem:[%s13744_s0 + $0x50] sm:$0xff]  ;;  %v754_v63 = vmax.f32 %v7273_v9, 0.0 }
 0x144   :  { %v497_v17 = vmax.f32 %v7144_v39, 0.0  ;;  %v7145_v39 = vld [vmem:[%s13744_s0 + $0x60] sm:$0xff] }
 0x145   :  { %13964 = vst [vmem:[#allocation28_spill] sm:$0xff] %v8588_v59  ;;  %v7272_v59 = vld [vmem:[%s13744_s0 + $0x52] sm:$0xff] }
 0x146   :  { %1787 = vmatmul.f32.gmra.mxu2 %v750_v13  ;;  %v8596_v49 = vpop.f32.mrf.mxu0  ;;  %v8598_v15 = vpop.f32.mrf.mxu1  ;;  %v753_v24 = vmax.f32 %v7272_v59, 0.0 }
 0x147   :  { %1996 = vmatmul.f32.gmra.mxu3 %v496_v8 }
 0x149   :  { %v1514_v13 = vpop.f32.mrf.mxu2  ;;  %2205 = vmatmul.f32.gmra.mxu0 %v624_v41  ;;  %2414 = vmatmul.f32.gmra.mxu1 %v752_v16  ;;  %v1338_v41 = vld [vmem:[%s13745_s1 + $0x468] sm:$0xff] }
 0x14a   :  { %v1723_v8 = vpop.f32.mrf.mxu3  ;;  %3015 = vmatpush.msra.mxu0 %v1338_v41 }
 0x14b   :  { %v8609_v58 = vadd.f32 %v1723_v8, %v1514_v13 }
 0x14d   :  { %13965 = vst [vmem:[#allocation29_spill] sm:$0xff] %v8609_v58 }
 0x14e   :  { %1790 = vmatmul.f32.gmra.mxu2 %v751_v29  ;;  %v8617_v20 = vpop.f32.mrf.mxu0  ;;  %v8619_v30 = vpop.f32.mrf.mxu1  ;;  %v498_v29 = vmax.f32 %v7145_v39, 0.0 }
 0x14f   :  { %1999 = vmatmul.f32.gmra.mxu3 %v497_v17  ;;  %v7209_v17 = vld [vmem:[%s13744_s0 + $0x61] sm:$0xff] }
 0x150   :  { %v626_v58 = vmax.f32 %v7209_v17, 0.0 }
 0x151   :  { %v1517_v13 = vpop.f32.mrf.mxu2  ;;  %2208 = vmatmul.f32.gmra.mxu0 %v625_v47  ;;  %2417 = vmatmul.f32.gmra.mxu1 %v753_v24  ;;  %v7146_v47 = vld [vmem:[%s13744_s0 + $0x68] sm:$0xff] }
 0x152   :  { %v1726_v8 = vpop.f32.mrf.mxu3 }
 0x153   :  { %v8627_v59 = vadd.f32 %v1726_v8, %v1517_v13 }
 0x155   :  { %13966 = vst [vmem:[#allocation30_spill] sm:$0xff] %v8627_v59  ;;  %v499_v59 = vmax.f32 %v7146_v47, 0.0 }
 0x156   :  { %1793 = vmatmul.f32.gmra.mxu2 %v752_v16  ;;  %v8635_v41 = vpop.f32.mrf.mxu0  ;;  %v8637_v46 = vpop.f32.mrf.mxu1  ;;  %v7210_v16 = vld [vmem:[%s13744_s0 + $0x69] sm:$0xff] }
 0x157   :  { %2002 = vmatmul.f32.gmra.mxu3 %v498_v29  ;;  %v7274_v29 = vld [vmem:[%s13744_s0 + $0x6a] sm:$0xff]  ;;  %v627_v17 = vmax.f32 %v7210_v16, 0.0 }
 0x158   :  { %v755_v9 = vmax.f32 %v7274_v29, 0.0 }
 0x159   :  { %v1520_v39 = vpop.f32.mrf.mxu2  ;;  %2211 = vmatmul.f32.gmra.mxu0 %v626_v58  ;;  %2420 = vmatmul.f32.gmra.mxu1 %v754_v63  ;;  %v7147_v58 = vld [vmem:[%s13744_s0 + $0x78] sm:$0xff] }
 0x15a   :  { %v1729_v13 = vpop.f32.mrf.mxu3 }
 0x15b   :  { %v8642_v8 = vadd.f32 %v1729_v13, %v1520_v39 }
 0x15d   :  { %13967 = vst [vmem:[#allocation31_spill] sm:$0xff] %v8642_v8  ;;  %v500_v8 = vmax.f32 %v7147_v58, 0.0  ;;  %v1321_v58 = vld [vmem:[%s13745_s1 + $0x3e0] sm:$0xff] }
 0x15e   :  { %1796 = vmatmul.f32.gmra.mxu2 %v753_v24  ;;  %v8650_v27 = vpop.f32.mrf.mxu0  ;;  %v8652_v10 = vpop.f32.mrf.mxu1  ;;  %v7211_v24 = vld [vmem:[%s13744_s0 + $0x79] sm:$0xff]  ;;  %2807 = vmatpush.msra.mxu3 %v1321_v58 }
 0x15f   :  { %2005 = vmatmul.f32.gmra.mxu3 %v499_v59  ;;  %13968 = vst [vmem:[#allocation32_spill] sm:$0xff] %v8652_v10  ;;  %v7275_v59 = vld [vmem:[%s13744_s0 + $0x7a] sm:$0xff]  ;;  %v628_v16 = vmax.f32 %v7211_v24, 0.0 }
 0x160   :  { %v756_v29 = vmax.f32 %v7275_v59, 0.0  ;;  %v7212_v59 = vld [vmem:[%s13744_s0 + $0x81] sm:$0xff] }
 0x161   :  { %v1523_v47 = vpop.f32.mrf.mxu2  ;;  %2214 = vmatmul.f32.gmra.mxu0 %v627_v17  ;;  %2423 = vmatmul.f32.gmra.mxu1 %v755_v9  ;;  %v1305_v17 = vld [vmem:[%s13745_s1 + $0x360] sm:$0xff]  ;;  %v629_v28 = vmax.f32 %v7212_v59, 0.0  ;;  %v7277_v59 = vld [vmem:[%s13744_s0 + $0x92] sm:$0xff] }
 0x162   :  { %v1732_v39 = vpop.f32.mrf.mxu3  ;;  %2598 = vmatpush.msra.mxu2 %v1305_v17 }
 0x163   :  { %v8657_v13 = vadd.f32 %v1732_v39, %v1523_v47  ;;  %v7148_v47 = vld [vmem:[%s13744_s0 + $0x80] sm:$0xff] }
 0x164   :  { %v501_v24 = vmax.f32 %v7148_v47, 0.0  ;;  %v7149_v47 = vld [vmem:[%s13744_s0 + $0x90] sm:$0xff] }
 0x165   :  { %13969 = vst [vmem:[#allocation33_spill] sm:$0xff] %v8657_v13  ;;  %v7276_v13 = vld [vmem:[%s13744_s0 + $0x82] sm:$0xff] }
 0x166   :  { %1799 = vmatmul.f32.gmra.mxu2 %v754_v63  ;;  %v8665_v57 = vpop.f32.mrf.mxu0  ;;  %v8667_v43 = vpop.f32.mrf.mxu1  ;;  %v757_v14 = vmax.f32 %v7276_v13, 0.0 }
 0x167   :  { %2008 = vmatmul.f32.gmra.mxu3 %v500_v8  ;;  %13970 = vst [vmem:[#allocation34_spill] sm:$0xff] %v8665_v57 }
 0x168   :  { %13971 = vst [vmem:[#allocation35_spill] sm:$0xff] %v8667_v43 }
 0x169   :  { %v1526_v63 = vpop.f32.mrf.mxu2  ;;  %2217 = vmatmul.f32.gmra.mxu0 %v628_v16  ;;  %2426 = vmatmul.f32.gmra.mxu1 %v756_v29  ;;  %v1337_v16 = vld [vmem:[%s13745_s1 + $0x460] sm:$0xff] }
 0x16a   :  { %v1735_v8 = vpop.f32.mrf.mxu3  ;;  %3016 = vmatpush.msra.mxu0 %v1337_v16 }
 0x16b   :  { %v8678_v39 = vadd.f32 %v1735_v8, %v1526_v63 }
 0x16d   :  { %13972 = vst [vmem:[#allocation36_spill] sm:$0xff] %v8678_v39 }
 0x16e   :  { %1802 = vmatmul.f32.gmra.mxu2 %v755_v9  ;;  %v8686_v17 = vpop.f32.mrf.mxu0  ;;  %v8688_v58 = vpop.f32.mrf.mxu1  ;;  %v502_v9 = vmax.f32 %v7149_v47, 0.0 }
 0x16f   :  { %2011 = vmatmul.f32.gmra.mxu3 %v501_v24  ;;  %13973 = vst [vmem:[#allocation37_spill] sm:$0xff] %v8686_v17  ;;  %v7213_v24 = vld [vmem:[%s13744_s0 + $0x91] sm:$0xff] }
 0x170   :  { %13974 = vst [vmem:[#allocation38_spill] sm:$0xff] %v8688_v58  ;;  %v630_v39 = vmax.f32 %v7213_v24, 0.0  ;;  %v758_v58 = vmax.f32 %v7277_v59, 0.0 }
 0x171   :  { %v1529_v63 = vpop.f32.mrf.mxu2  ;;  %2220 = vmatmul.f32.gmra.mxu0 %v629_v28  ;;  %2429 = vmatmul.f32.gmra.mxu1 %v757_v14  ;;  %v7150_v28 = vld [vmem:[%s13744_s0 + $0x98] sm:$0xff] }
 0x172   :  { %v1738_v8 = vpop.f32.mrf.mxu3 }
 0x173   :  { %v8696_v13 = vadd.f32 %v1738_v8, %v1529_v63 }
 0x175   :  { %13975 = vst [vmem:[#allocation39_spill] sm:$0xff] %v8696_v13  ;;  %v503_v13 = vmax.f32 %v7150_v28, 0.0 }
 0x176   :  { %1805 = vmatmul.f32.gmra.mxu2 %v756_v29  ;;  %v8704_v16 = vpop.f32.mrf.mxu0  ;;  %v8706_v17 = vpop.f32.mrf.mxu1  ;;  %v7214_v29 = vld [vmem:[%s13744_s0 + $0x99] sm:$0xff] }
 0x177   :  { %2014 = vmatmul.f32.gmra.mxu3 %v502_v9  ;;  %13976 = vst [vmem:[#allocation40_spill] sm:$0xff] %v8704_v16  ;;  %v7278_v9 = vld [vmem:[%s13744_s0 + $0x9a] sm:$0xff]  ;;  %v631_v24 = vmax.f32 %v7214_v29, 0.0 }
 0x178   :  { %13977 = vst [vmem:[#allocation41_spill] sm:$0xff] %v8706_v17  ;;  %v759_v59 = vmax.f32 %v7278_v9, 0.0 }
 0x179   :  { %v1532_v47 = vpop.f32.mrf.mxu2  ;;  %2223 = vmatmul.f32.gmra.mxu0 %v630_v39  ;;  %2432 = vmatmul.f32.gmra.mxu1 %v758_v58  ;;  %v7151_v39 = vld [vmem:[%s13744_s0 + $0xa8] sm:$0xff] }
 0x17a   :  { %v1741_v63 = vpop.f32.mrf.mxu3 }
 0x17b   :  { %v8711_v8 = vadd.f32 %v1741_v63, %v1532_v47 }
 0x17d   :  { %13978 = vst [vmem:[#allocation42_spill] sm:$0xff] %v8711_v8  ;;  %v504_v8 = vmax.f32 %v7151_v39, 0.0  ;;  %v1320_v39 = vld [vmem:[%s13745_s1 + $0x3d8] sm:$0xff] }
 0x17e   :  { %1808 = vmatmul.f32.gmra.mxu2 %v757_v14  ;;  %v8719_v17 = vpop.f32.mrf.mxu0  ;;  %v8721_v16 = vpop.f32.mrf.mxu1  ;;  %v7215_v14 = vld [vmem:[%s13744_s0 + $0xa9] sm:$0xff]  ;;  %2808 = vmatpush.msra.mxu3 %v1320_v39 }
 0x17f   :  { %2017 = vmatmul.f32.gmra.mxu3 %v503_v13  ;;  %13979 = vst [vmem:[#allocation43_spill] sm:$0xff] %v8719_v17  ;;  %v7279_v13 = vld [vmem:[%s13744_s0 + $0xaa] sm:$0xff]  ;;  %v632_v29 = vmax.f32 %v7215_v14, 0.0 }
 0x180   :  { %13980 = vst [vmem:[#allocation44_spill] sm:$0xff] %v8721_v16  ;;  %v760_v9 = vmax.f32 %v7279_v13, 0.0  ;;  %v7216_v13 = vld [vmem:[%s13744_s0 + $0xb1] sm:$0xff] }
 0x181   :  { %v1535_v28 = vpop.f32.mrf.mxu2  ;;  %2226 = vmatmul.f32.gmra.mxu0 %v631_v24  ;;  %2435 = vmatmul.f32.gmra.mxu1 %v759_v59  ;;  %v1304_v24 = vld [vmem:[%s13745_s1 + $0x358] sm:$0xff] }
 0x182   :  { %v1744_v47 = vpop.f32.mrf.mxu3  ;;  %2599 = vmatpush.msra.mxu2 %v1304_v24 }
 0x183   :  { %v8726_v63 = vadd.f32 %v1744_v47, %v1535_v28  ;;  %v7152_v28 = vld [vmem:[%s13744_s0 + $0xb0] sm:$0xff] }
 0x184   :  { %v505_v14 = vmax.f32 %v7152_v28, 0.0  ;;  %v1336_v28 = vld [vmem:[%s13745_s1 + $0x458] sm:$0xff] }
 0x185   :  { %13981 = vst [vmem:[#allocation45_spill] sm:$0xff] %v8726_v63  ;;  %v7280_v63 = vld [vmem:[%s13744_s0 + $0xb2] sm:$0xff]  ;;  %3017 = vmatpush.msra.mxu0 %v1336_v28  ;;  %v7282_v28 = vld [vmem:[%s13744_s0 + $0xca] sm:$0xff] }
 0x186   :  { %1811 = vmatmul.f32.gmra.mxu2 %v758_v58  ;;  %v8734_v16 = vpop.f32.mrf.mxu0  ;;  %v8736_v17 = vpop.f32.mrf.mxu1 }
 0x187   :  { %2020 = vmatmul.f32.gmra.mxu3 %v504_v8  ;;  %13982 = vst [vmem:[#allocation46_spill] sm:$0xff] %v8734_v16  ;;  %v761_v16 = vmax.f32 %v7280_v63, 0.0  ;;  %v7217_v63 = vld [vmem:[%s13744_s0 + $0xc1] sm:$0xff] }
 0x188   :  { %13983 = vst [vmem:[#allocation47_spill] sm:$0xff] %v8736_v17  ;;  %v633_v17 = vmax.f32 %v7216_v13, 0.0 }
 0x189   :  { %v1538_v58 = vpop.f32.mrf.mxu2  ;;  %2229 = vmatmul.f32.gmra.mxu0 %v632_v29  ;;  %2438 = vmatmul.f32.gmra.mxu1 %v760_v9  ;;  %v7153_v29 = vld [vmem:[%s13744_s0 + $0xc0] sm:$0xff] }
 0x18a   :  { %v1747_v8 = vpop.f32.mrf.mxu3 }
 0x18b   :  { %v8747_v47 = vadd.f32 %v1747_v8, %v1538_v58 }
 0x18d   :  { %13984 = vst [vmem:[#allocation48_spill] sm:$0xff] %v8747_v47  ;;  %v634_v47 = vmax.f32 %v7217_v63, 0.0  ;;  %v763_v63 = vmax.f32 %v7282_v28, 0.0 }
 0x18e   :  { %1814 = vmatmul.f32.gmra.mxu2 %v759_v59  ;;  %v8755_v24 = vpop.f32.mrf.mxu0  ;;  %v8757_v39 = vpop.f32.mrf.mxu1  ;;  %v506_v59 = vmax.f32 %v7153_v29, 0.0  ;;  %v7154_v29 = vld [vmem:[%s13744_s0 + $0xc8] sm:$0xff] }
 0x18f   :  { %2023 = vmatmul.f32.gmra.mxu3 %v505_v14  ;;  %13985 = vst [vmem:[#allocation49_spill] sm:$0xff] %v8755_v24  ;;  %v7281_v14 = vld [vmem:[%s13744_s0 + $0xc2] sm:$0xff]  ;;  %v507_v43 = vmax.f32 %v7154_v29, 0.0 }
 0x190   :  { %13986 = vst [vmem:[#allocation50_spill] sm:$0xff] %v8757_v39  ;;  %v762_v39 = vmax.f32 %v7281_v14, 0.0 }
 0x191   :  { %v1541_v58 = vpop.f32.mrf.mxu2  ;;  %2232 = vmatmul.f32.gmra.mxu0 %v633_v17  ;;  %2441 = vmatmul.f32.gmra.mxu1 %v761_v16 }
 0x192   :  { %v1750_v8 = vpop.f32.mrf.mxu3 }
 0x193   :  { %v8765_v13 = vadd.f32 %v1750_v8, %v1541_v58 }
 0x195   :  { %13987 = vst [vmem:[#allocation51_spill] sm:$0xff] %v8765_v13 }
 0x196   :  { %1817 = vmatmul.f32.gmra.mxu2 %v760_v9  ;;  %v8773_v24 = vpop.f32.mrf.mxu0  ;;  %v8775_v17 = vpop.f32.mrf.mxu1  ;;  %v7218_v9 = vld [vmem:[%s13744_s0 + $0xc9] sm:$0xff] }
 0x197   :  { %2026 = vmatmul.f32.gmra.mxu3 %v506_v59  ;;  %13988 = vst [vmem:[#allocation52_spill] sm:$0xff] %v8773_v24  ;;  %v635_v59 = vmax.f32 %v7218_v9, 0.0 }
 0x198   :  { %13989 = vst [vmem:[#allocation53_spill] sm:$0xff] %v8775_v17 }
 0x199   :  { %v1544_v58 = vpop.f32.mrf.mxu2  ;;  %2235 = vmatmul.f32.gmra.mxu0 %v634_v47  ;;  %2444 = vmatmul.f32.gmra.mxu1 %v762_v39  ;;  %v7155_v47 = vld [vmem:[%s13744_s0 + $0xd8] sm:$0xff] }
 0x19a   :  { %v1753_v8 = vpop.f32.mrf.mxu3 }
 0x19b   :  { %v8780_v13 = vadd.f32 %v1753_v8, %v1544_v58 }
 0x19d   :  { %13990 = vst [vmem:[#allocation54_spill] sm:$0xff] %v8780_v13  ;;  %v508_v13 = vmax.f32 %v7155_v47, 0.0  ;;  %v7156_v47 = vld [vmem:[%s13744_s0 + $0xe0] sm:$0xff] }
 0x19e   :  { %1820 = vmatmul.f32.gmra.mxu2 %v761_v16  ;;  %v8788_v14 = vpop.f32.mrf.mxu0  ;;  %v8790_v17 = vpop.f32.mrf.mxu1  ;;  %v7219_v16 = vld [vmem:[%s13744_s0 + $0xd9] sm:$0xff] }
 0x19f   :  { %2029 = vmatmul.f32.gmra.mxu3 %v507_v43  ;;  %13991 = vst [vmem:[#allocation55_spill] sm:$0xff] %v8788_v14  ;;  %v7283_v43 = vld [vmem:[%s13744_s0 + $0xda] sm:$0xff]  ;;  %v636_v9 = vmax.f32 %v7219_v16, 0.0 }
 0x1a0   :  { %13992 = vst [vmem:[#allocation56_spill] sm:$0xff] %v8790_v17  ;;  %v764_v28 = vmax.f32 %v7283_v43, 0.0  ;;  %v509_v43 = vmax.f32 %v7156_v47, 0.0  ;;  %v7157_v47 = vld [vmem:[%s13744_s0 + $0xf0] sm:$0xff] }
 0x1a1   :  { %v1547_v29 = vpop.f32.mrf.mxu2  ;;  %2238 = vmatmul.f32.gmra.mxu0 %v635_v59  ;;  %2447 = vmatmul.f32.gmra.mxu1 %v763_v63  ;;  %v1303_v59 = vld [vmem:[%s13745_s1 + $0x350] sm:$0xff] }
 0x1a2   :  { %v1756_v58 = vpop.f32.mrf.mxu3  ;;  %2600 = vmatpush.msra.mxu2 %v1303_v59  ;;  %v7284_v59 = vld [vmem:[%s13744_s0 + $0xe2] sm:$0xff] }
 0x1a3   :  { %v8795_v8 = vadd.f32 %v1756_v58, %v1547_v29  ;;  %v1568_v29 = vadd.f32 %v8127_v7, %v8125_v6  ;;  %v1319_v58 = vld [vmem:[%s13745_s1 + $0x3d0] sm:$0xff]  ;;  %v765_v24 = vmax.f32 %v7284_v59, 0.0 }
 0x1a4   :  { %2809 = vmatpush.msra.mxu3 %v1319_v58  ;;  %v1335_v58 = vld [vmem:[%s13745_s1 + $0x450] sm:$0xff] }
 0x1a5   :  { %13993 = vst [vmem:[#allocation57_spill] sm:$0xff] %v8795_v8  ;;  %v7220_v8 = vld [vmem:[%s13744_s0 + $0xe1] sm:$0xff]  ;;  %3018 = vmatpush.msra.mxu0 %v1335_v58 }
 0x1a6   :  { %1823 = vmatmul.f32.gmra.mxu2 %v762_v39  ;;  %v2194_v17 = vpop.f32.mrf.mxu0  ;;  %v2403_v14 = vpop.f32.mrf.mxu1  ;;  %v637_v7 = vmax.f32 %v7220_v8, 0.0 }
 0x1a7   :  { %2032 = vmatmul.f32.gmra.mxu3 %v508_v13 }
 0x1a9   :  { %v1776_v39 = vpop.f32.mrf.mxu2  ;;  %2241 = vmatmul.f32.gmra.mxu0 %v636_v9  ;;  %2450 = vmatmul.f32.gmra.mxu1 %v764_v28 }
 0x1aa   :  { %v1985_v13 = vpop.f32.mrf.mxu3  ;;  %v1777_v16 = vadd.f32 %v1776_v39, %v1568_v29  ;;  %v1571_v29 = vadd.f32 %v8151_v22, %v8149_v21  ;;  %v7285_v21 = vld [vmem:[%s13744_s0 + $0xf2] sm:$0xff] }
 0x1ac   :  { %v1986_v6 = vadd.f32 %v1985_v13, %v1777_v16  ;;  %v7221_v16 = vld [vmem:[%s13744_s0 + $0xf1] sm:$0xff] }
 0x1ae   :  { %v2195_v57 = vadd.f32 %v2194_v17, %v1986_v6  ;;  %1826 = vmatmul.f32.gmra.mxu2 %v763_v63  ;;  %v2197_v10 = vpop.f32.mrf.mxu0  ;;  %v2406_v9 = vpop.f32.mrf.mxu1  ;;  %v510_v63 = vmax.f32 %v7157_v47, 0.0  ;;  %v1574_v47 = vadd.f32 %v8172_v36, %v8170_v35 }
 0x1af   :  { %2035 = vmatmul.f32.gmra.mxu3 %v509_v43 }
 0x1b0   :  { %v8825_v39 = vadd.f32 %v2403_v14, %v2195_v57  ;;  %v638_v57 = vmax.f32 %v7221_v16, 0.0  ;;  %v766_v14 = vmax.f32 %v7285_v21, 0.0  ;;  %v7159_v21 = vld [vmem:[%s13744_s0 + $0x108] sm:$0xff] }
 0x1b1   :  { %v1779_v8 = vpop.f32.mrf.mxu2  ;;  %2244 = vmatmul.f32.gmra.mxu0 %v637_v7  ;;  %2453 = vmatmul.f32.gmra.mxu1 %v765_v24  ;;  %v7158_v7 = vld [vmem:[%s13744_s0 + $0xf8] sm:$0xff] }
 0x1b2   :  { %13994 = vst [vmem:[#allocation58_spill] sm:$0xff] %v8825_v39  ;;  %v1988_v13 = vpop.f32.mrf.mxu3  ;;  %v1780_v17 = vadd.f32 %v1779_v8, %v1571_v29 }
 0x1b4   :  { %v1989_v22 = vadd.f32 %v1988_v13, %v1780_v17  ;;  %v511_v13 = vmax.f32 %v7158_v7, 0.0 }
 0x1b6   :  { %v2198_v43 = vadd.f32 %v2197_v10, %v1989_v22  ;;  %1829 = vmatmul.f32.gmra.mxu2 %v764_v28  ;;  %v2200_v59 = vpop.f32.mrf.mxu0  ;;  %v2409_v6 = vpop.f32.mrf.mxu1  ;;  %v7222_v10 = vld [vmem:[%s13744_s0 + $0xf9] sm:$0xff]  ;;  %v1577_v22 = vadd.f32 %v8196_v51, %v8194_v50 }
 0x1b7   :  { %2038 = vmatmul.f32.gmra.mxu3 %v510_v63  ;;  %v7286_v28 = vld [vmem:[%s13744_s0 + $0xfa] sm:$0xff]  ;;  %v639_v63 = vmax.f32 %v7222_v10, 0.0  ;;  %v1302_v10 = vld [vmem:[%s13745_s1 + $0x348] sm:$0xff] }
 0x1b8   :  { %v8841_v29 = vadd.f32 %v2406_v9, %v2198_v43  ;;  %v767_v16 = vmax.f32 %v7286_v28, 0.0  ;;  %v7160_v28 = vld [vmem:[%s13744_s0 + $0x110] sm:$0xff]  ;;  %2601 = vmatpush.msra.mxu2 %v1302_v10 }
 0x1b9   :  { %v1782_v8 = vpop.f32.mrf.mxu2  ;;  %2247 = vmatmul.f32.gmra.mxu0 %v638_v57  ;;  %2456 = vmatmul.f32.gmra.mxu1 %v766_v14 }
 0x1ba   :  { %v1991_v39 = vpop.f32.mrf.mxu3  ;;  %v1783_v58 = vadd.f32 %v1782_v8, %v1574_v47  ;;  %v512_v47 = vmax.f32 %v7159_v21, 0.0 }
 0x1bc   :  { %v1992_v17 = vadd.f32 %v1991_v39, %v1783_v58 }
 0x1be   :  { %v2201_v35 = vadd.f32 %v2200_v59, %v1992_v17  ;;  %1832 = vmatmul.f32.gmra.mxu2 %v765_v24  ;;  %v2203_v36 = vpop.f32.mrf.mxu0  ;;  %v2412_v9 = vpop.f32.mrf.mxu1  ;;  %v7223_v24 = vld [vmem:[%s13744_s0 + $0x109] sm:$0xff]  ;;  %v1580_v17 = vadd.f32 %v8217_v1, %v8215_v0  ;;  %v7288_v0 = vld [vmem:[%s13744_s0 + $0x112] sm:$0xff] }
 0x1bf   :  { %2041 = vmatmul.f32.gmra.mxu3 %v511_v13  ;;  %v7287_v59 = vld [vmem:[%s13744_s0 + $0x10a] sm:$0xff]  ;;  %v640_v58 = vmax.f32 %v7223_v24, 0.0 }
 0x1c0   :  { %v8854_v57 = vadd.f32 %v2409_v6, %v2201_v35  ;;  %v768_v13 = vmax.f32 %v7287_v59, 0.0  ;;  %v7161_v59 = vld [vmem:[%s13744_s0 + $0x120] sm:$0xff] }
 0x1c1   :  { %v1785_v43 = vpop.f32.mrf.mxu2  ;;  %2250 = vmatmul.f32.gmra.mxu0 %v639_v63  ;;  %2459 = vmatmul.f32.gmra.mxu1 %v767_v16 }
 0x1c2   :  { %v1994_v7 = vpop.f32.mrf.mxu3  ;;  %v1786_v39 = vadd.f32 %v1785_v43, %v1577_v22  ;;  %v513_v22 = vmax.f32 %v7160_v28, 0.0  ;;  %v7224_v43 = vld [vmem:[%s13744_s0 + $0x111] sm:$0xff] }
 0x1c4   :  { %v1995_v8 = vadd.f32 %v1994_v7, %v1786_v39  ;;  %v769_v7 = vmax.f32 %v7288_v0, 0.0 }
 0x1c6   :  { %v2204_v50 = vadd.f32 %v2203_v36, %v1995_v8  ;;  %1835 = vmatmul.f32.gmra.mxu2 %v766_v14  ;;  %v2206_v51 = vpop.f32.mrf.mxu0  ;;  %v2415_v6 = vpop.f32.mrf.mxu1  ;;  %v1318_v14 = vld [vmem:[%s13745_s1 + $0x3c8] sm:$0xff]  ;;  %v1583_v8 = vadd.f32 %v8241_v19, %v8239_v18 }
 0x1c7   :  { %2044 = vmatmul.f32.gmra.mxu3 %v512_v47  ;;  %v7289_v18 = vld [vmem:[%s13744_s0 + $0x122] sm:$0xff] }
 0x1c8   :  { %v8870_v63 = vadd.f32 %v2412_v9, %v2204_v50  ;;  %2810 = vmatpush.msra.mxu3 %v1318_v14  ;;  %v641_v9 = vmax.f32 %v7224_v43, 0.0  ;;  %v1334_v50 = vld [vmem:[%s13745_s1 + $0x448] sm:$0xff]  ;;  %v770_v14 = vmax.f32 %v7289_v18, 0.0  ;;  %v1586_v43 = vadd.f32 %v8262_v38, %v8260_v37 }
 0x1c9   :  { %v1788_v35 = vpop.f32.mrf.mxu2  ;;  %2253 = vmatmul.f32.gmra.mxu0 %v640_v58  ;;  %2462 = vmatmul.f32.gmra.mxu1 %v768_v13 }
 0x1ca   :  { %v1997_v36 = vpop.f32.mrf.mxu3  ;;  %v1789_v21 = vadd.f32 %v1788_v35, %v1580_v17  ;;  %v7225_v17 = vld [vmem:[%s13744_s0 + $0x121] sm:$0xff]  ;;  %3019 = vmatpush.msra.mxu0 %v1334_v50 }
 0x1cc   :  { %v1998_v1 = vadd.f32 %v1997_v36, %v1789_v21 }
 0x1ce   :  { %v2207_v39 = vadd.f32 %v2206_v51, %v1998_v1  ;;  %1838 = vmatmul.f32.gmra.mxu2 %v767_v16  ;;  %v2209_v47 = vpop.f32.mrf.mxu0  ;;  %v2418_v24 = vpop.f32.mrf.mxu1  ;;  %v514_v51 = vmax.f32 %v7161_v59, 0.0 }
 0x1cf   :  { %2047 = vmatmul.f32.gmra.mxu3 %v513_v22  ;;  %v7162_v22 = vld [vmem:[%s13744_s0 + $0x128] sm:$0xff] }
 0x1d0   :  { %v8886_v58 = vadd.f32 %v2415_v6, %v2207_v39  ;;  %v642_v6 = vmax.f32 %v7225_v17, 0.0  ;;  %v515_v59 = vmax.f32 %v7162_v22, 0.0 }
 0x1d1   :  { %v1791_v10 = vpop.f32.mrf.mxu2  ;;  %2256 = vmatmul.f32.gmra.mxu0 %v641_v9  ;;  %2465 = vmatmul.f32.gmra.mxu1 %v769_v7 }
 0x1d2   :  { %v2000_v28 = vpop.f32.mrf.mxu3  ;;  %v1792_v16 = vadd.f32 %v1791_v10, %v1583_v8 }
 0x1d4   :  { %v2001_v19 = vadd.f32 %v2000_v28, %v1792_v16  ;;  %v7163_v28 = vld [vmem:[%s13744_s0 + $0x138] sm:$0xff]  ;;  %v1589_v16 = vadd.f32 %v8286_v56, %v8284_v55 }
 0x1d6   :  { %v2210_v35 = vadd.f32 %v2209_v47, %v2001_v19  ;;  %1841 = vmatmul.f32.gmra.mxu2 %v768_v13  ;;  %v2212_v36 = vpop.f32.mrf.mxu0  ;;  %v2421_v21 = vpop.f32.mrf.mxu1  ;;  %v7226_v13 = vld [vmem:[%s13744_s0 + $0x129] sm:$0xff] }
 0x1d7   :  { %2050 = vmatmul.f32.gmra.mxu3 %v514_v51  ;;  %v7290_v47 = vld [vmem:[%s13744_s0 + $0x12a] sm:$0xff]  ;;  %v643_v50 = vmax.f32 %v7226_v13, 0.0 }
 0x1d8   :  { %v8902_v0 = vadd.f32 %v2418_v24, %v2210_v35  ;;  %v771_v10 = vmax.f32 %v7290_v47, 0.0  ;;  %v7291_v35 = vld [vmem:[%s13744_s0 + $0x13a] sm:$0xff] }
 0x1d9   :  { %v1794_v1 = vpop.f32.mrf.mxu2  ;;  %2259 = vmatmul.f32.gmra.mxu0 %v642_v6  ;;  %2468 = vmatmul.f32.gmra.mxu1 %v770_v14  ;;  %v516_v6 = vmax.f32 %v7163_v28, 0.0 }
 0x1da   :  { %v2003_v9 = vpop.f32.mrf.mxu3  ;;  %v1795_v39 = vadd.f32 %v1794_v1, %v1586_v43  ;;  %v772_v43 = vmax.f32 %v7291_v35, 0.0  ;;  %v1301_v1 = vld [vmem:[%s13745_s1 + $0x340] sm:$0xff] }
 0x1db   :  { %2602 = vmatpush.msra.mxu2 %v1301_v1 }
 0x1dc   :  { %v2004_v8 = vadd.f32 %v2003_v9, %v1795_v39  ;;  %v7164_v9 = vld [vmem:[%s13744_s0 + $0x140] sm:$0xff]  ;;  %v1592_v39 = vadd.f32 %v8307_v12, %v8305_v11 }
 0x1dd   :  { %v7292_v11 = vld [vmem:[%s13744_s0 + $0x142] sm:$0xff] }
 0x1de   :  { %v2213_v37 = vadd.f32 %v2212_v36, %v2004_v8  ;;  %1844 = vmatmul.f32.gmra.mxu2 %v769_v7  ;;  %v2215_v38 = vpop.f32.mrf.mxu0  ;;  %v2424_v24 = vpop.f32.mrf.mxu1  ;;  %v7227_v7 = vld [vmem:[%s13744_s0 + $0x139] sm:$0xff] }
 0x1df   :  { %2053 = vmatmul.f32.gmra.mxu3 %v515_v59  ;;  %v644_v22 = vmax.f32 %v7227_v7, 0.0  ;;  %v1333_v7 = vld [vmem:[%s13745_s1 + $0x440] sm:$0xff] }
 0x1e0   :  { %v8915_v51 = vadd.f32 %v2421_v21, %v2213_v37  ;;  %v7228_v37 = vld [vmem:[%s13744_s0 + $0x141] sm:$0xff]  ;;  %3020 = vmatpush.msra.mxu0 %v1333_v7 }
 0x1e1   :  { %v1797_v17 = vpop.f32.mrf.mxu2  ;;  %2262 = vmatmul.f32.gmra.mxu0 %v643_v50  ;;  %2471 = vmatmul.f32.gmra.mxu1 %v771_v10  ;;  %v517_v50 = vmax.f32 %v7164_v9, 0.0 }
 0x1e2   :  { %v2006_v18 = vpop.f32.mrf.mxu3  ;;  %v1798_v19 = vadd.f32 %v1797_v17, %v1589_v16 }
 0x1e4   :  { %v2007_v36 = vadd.f32 %v2006_v18, %v1798_v19  ;;  %v7165_v18 = vld [vmem:[%s13744_s0 + $0x150] sm:$0xff]  ;;  %v1595_v19 = vadd.f32 %v8331_v34, %v8329_v33 }
 0x1e5   :  { %v7293_v33 = vld [vmem:[%s13744_s0 + $0x152] sm:$0xff] }
 0x1e6   :  { %v2216_v55 = vadd.f32 %v2215_v38, %v2007_v36  ;;  %1847 = vmatmul.f32.gmra.mxu2 %v770_v14  ;;  %v2218_v56 = vpop.f32.mrf.mxu0  ;;  %v2427_v21 = vpop.f32.mrf.mxu1  ;;  %v1317_v14 = vld [vmem:[%s13745_s1 + $0x3c0] sm:$0xff]  ;;  %v645_v38 = vmax.f32 %v7228_v37, 0.0 }
 0x1e7   :  { %2056 = vmatmul.f32.gmra.mxu3 %v516_v6 }
 0x1e8   :  { %v8931_v59 = vadd.f32 %v2424_v24, %v2216_v55  ;;  %2811 = vmatpush.msra.mxu3 %v1317_v14  ;;  %v773_v24 = vmax.f32 %v7292_v11, 0.0  ;;  %v7229_v55 = vld [vmem:[%s13744_s0 + $0x151] sm:$0xff] }
 0x1e9   :  { %v1800_v13 = vpop.f32.mrf.mxu2  ;;  %2265 = vmatmul.f32.gmra.mxu0 %v644_v22  ;;  %2474 = vmatmul.f32.gmra.mxu1 %v772_v43  ;;  %v518_v22 = vmax.f32 %v7165_v18, 0.0  ;;  %v7166_v14 = vld [vmem:[%s13744_s0 + $0x158] sm:$0xff]  ;;  %v7167_v18 = vld [vmem:[%s13744_s0 + $0x168] sm:$0xff] }
 0x1ea   :  { %v2009_v47 = vpop.f32.mrf.mxu3  ;;  %v1801_v8 = vadd.f32 %v1800_v13, %v1592_v39  ;;  %v1598_v13 = vadd.f32 %v8358_v61, %v8356_v60  ;;  %v519_v11 = vmax.f32 %v7166_v14, 0.0  ;;  %v1604_v14 = vadd.f32 %v8424_v4, %v8422_v3  ;;  %v7296_v3 = vld [vmem:[%s13744_s0 + $0x172] sm:$0xff] }
 0x1ec   :  { %v2010_v12 = vadd.f32 %v2009_v47, %v1801_v8 }
 0x1ee   :  { %v2219_v28 = vadd.f32 %v2218_v56, %v2010_v12  ;;  %1850 = vmatmul.f32.gmra.mxu2 %v771_v10  ;;  %v2221_v16 = vpop.f32.mrf.mxu0  ;;  %v2430_v17 = vpop.f32.mrf.mxu1  ;;  %v646_v56 = vmax.f32 %v7229_v55, 0.0  ;;  %v7294_v12 = vld [vmem:[%s13744_s0 + $0x15a] sm:$0xff]  ;;  %v7295_v55 = vld [vmem:[%s13744_s0 + $0x16a] sm:$0xff] }
 0x1ef   :  { %2059 = vmatmul.f32.gmra.mxu3 %v517_v50 }
 0x1f0   :  { %v8947_v6 = vadd.f32 %v2427_v21, %v2219_v28  ;;  %v774_v21 = vmax.f32 %v7293_v33, 0.0 }
 0x1f1   :  { %v1803_v35 = vpop.f32.mrf.mxu2  ;;  %2268 = vmatmul.f32.gmra.mxu0 %v645_v38  ;;  %2477 = vmatmul.f32.gmra.mxu1 %v773_v24 }
 0x1f2   :  { %v2012_v36 = vpop.f32.mrf.mxu3  ;;  %v1804_v10 = vadd.f32 %v1803_v35, %v1595_v19  ;;  %v1601_v19 = vadd.f32 %v8394_v32, %v8392_v31 }
 0x1f4   :  { %v2013_v34 = vadd.f32 %v2012_v36, %v1804_v10 }
 0x1f6   :  { %v2222_v1 = vadd.f32 %v2221_v16, %v2013_v34  ;;  %1853 = vmatmul.f32.gmra.mxu2 %v772_v43  ;;  %v2224_v9 = vpop.f32.mrf.mxu0  ;;  %v2433_v39 = vpop.f32.mrf.mxu1  ;;  %v7230_v43 = vld [vmem:[%s13744_s0 + $0x159] sm:$0xff]  ;;  %v775_v16 = vmax.f32 %v7294_v12, 0.0 }
 0x1f7   :  { %2062 = vmatmul.f32.gmra.mxu3 %v518_v22  ;;  %v647_v28 = vmax.f32 %v7230_v43, 0.0  ;;  %v520_v22 = vmax.f32 %v7167_v18, 0.0  ;;  %v7232_v43 = vld [vmem:[%s13744_s0 + $0x171] sm:$0xff]  ;;  %v1607_v18 = vadd.f32 %v8457_v45, %v8455_v44  ;;  %v7297_v44 = vld [vmem:[%s13744_s0 + $0x182] sm:$0xff] }
 0x1f8   :  { %v8963_v47 = vadd.f32 %v2430_v17, %v2222_v1  ;;  %v649_v12 = vmax.f32 %v7232_v43, 0.0 }
 0x1f9   :  { %v1806_v8 = vpop.f32.mrf.mxu2  ;;  %2271 = vmatmul.f32.gmra.mxu0 %v646_v56  ;;  %2480 = vmatmul.f32.gmra.mxu1 %v774_v21  ;;  %v776_v56 = vmax.f32 %v7295_v55, 0.0 }
 0x1fa   :  { %v2015_v50 = vpop.f32.mrf.mxu3  ;;  %v1807_v37 = vadd.f32 %v1806_v8, %v1598_v13 }
 0x1fc   :  { %v2016_v38 = vadd.f32 %v2015_v50, %v1807_v37 }
 0x1fe   :  { %v2225_v60 = vadd.f32 %v2224_v9, %v2016_v38  ;;  %1856 = vmatmul.f32.gmra.mxu2 %v773_v24  ;;  %v2227_v61 = vpop.f32.mrf.mxu0  ;;  %v2436_v17 = vpop.f32.mrf.mxu1  ;;  %v7231_v24 = vld [vmem:[%s13744_s0 + $0x169] sm:$0xff]  ;;  %v1300_v9 = vld [vmem:[%s13745_s1 + $0x338] sm:$0xff]  ;;  %v777_v38 = vmax.f32 %v7296_v3, 0.0 }
 0x1ff   :  { %2065 = vmatmul.f32.gmra.mxu3 %v519_v11  ;;  %v648_v34 = vmax.f32 %v7231_v24, 0.0  ;;  %2603 = vmatpush.msra.mxu2 %v1300_v9  ;;  %v7233_v24 = vld [vmem:[%s13744_s0 + $0x181] sm:$0xff]  ;;  %v1610_v9 = vadd.f32 %v8487_v26, %v8485_v23 }
 0x200   :  { %v8976_v7 = vadd.f32 %v2433_v39, %v2225_v60  ;;  %v7168_v39 = vld [vmem:[%s13744_s0 + $0x170] sm:$0xff]  ;;  %v650_v55 = vmax.f32 %v7233_v24, 0.0 }
 0x201   :  { %v1809_v35 = vpop.f32.mrf.mxu2  ;;  %2274 = vmatmul.f32.gmra.mxu0 %v647_v28  ;;  %2483 = vmatmul.f32.gmra.mxu1 %v775_v16  ;;  %v521_v11 = vmax.f32 %v7168_v39, 0.0 }
 0x202   :  { %v2018_v36 = vpop.f32.mrf.mxu3  ;;  %v1810_v10 = vadd.f32 %v1809_v35, %v1601_v19  ;;  %v1332_v35 = vld [vmem:[%s13745_s1 + $0x438] sm:$0xff] }
 0x203   :  { %3021 = vmatpush.msra.mxu0 %v1332_v35 }
 0x204   :  { %v2019_v33 = vadd.f32 %v2018_v36, %v1810_v10 }
 0x206   :  { %v2228_v31 = vadd.f32 %v2227_v61, %v2019_v33  ;;  %1859 = vmatmul.f32.gmra.mxu2 %v774_v21  ;;  %v2230_v32 = vpop.f32.mrf.mxu0  ;;  %v2439_v1 = vpop.f32.mrf.mxu1  ;;  %v1316_v21 = vld [vmem:[%s13745_s1 + $0x3b8] sm:$0xff]  ;;  %v778_v33 = vmax.f32 %v7297_v44, 0.0 }
 0x207   :  { %2068 = vmatmul.f32.gmra.mxu3 %v520_v22 }
 0x208   :  { %v8992_v13 = vadd.f32 %v2436_v17, %v2228_v31  ;;  %2812 = vmatpush.msra.mxu3 %v1316_v21  ;;  %v7169_v17 = vld [vmem:[%s13744_s0 + $0x180] sm:$0xff] }
 0x209   :  { %v1812_v8 = vpop.f32.mrf.mxu2  ;;  %2277 = vmatmul.f32.gmra.mxu0 %v648_v34  ;;  %2486 = vmatmul.f32.gmra.mxu1 %v776_v56  ;;  %v522_v22 = vmax.f32 %v7169_v17, 0.0 }
 0x20a   :  { %v2021_v50 = vpop.f32.mrf.mxu3  ;;  %v1813_v37 = vadd.f32 %v1812_v8, %v1604_v14 }
 0x20c   :  { %v2022_v4 = vadd.f32 %v2021_v50, %v1813_v37  ;;  %v7298_v37 = vld [vmem:[%s13744_s0 + $0x18a] sm:$0xff] }
 0x20d   :  { %v779_v3 = vmax.f32 %v7298_v37, 0.0 }
 0x20e   :  { %v2231_v28 = vadd.f32 %v2230_v32, %v2022_v4  ;;  %1862 = vmatmul.f32.gmra.mxu2 %v775_v16  ;;  %v2233_v60 = vpop.f32.mrf.mxu0  ;;  %v2442_v61 = vpop.f32.mrf.mxu1 }
 0x20f   :  { %2071 = vmatmul.f32.gmra.mxu3 %v521_v11 }
 0x210   :  { %v9008_v19 = vadd.f32 %v2439_v1, %v2231_v28  ;;  %v7170_v1 = vld [vmem:[%s13744_s0 + $0x188] sm:$0xff] }
 0x211   :  { %v1815_v36 = vpop.f32.mrf.mxu2  ;;  %2280 = vmatmul.f32.gmra.mxu0 %v649_v12  ;;  %2489 = vmatmul.f32.gmra.mxu1 %v777_v38  ;;  %v523_v50 = vmax.f32 %v7170_v1, 0.0  ;;  %v331_v12 = vld [vmem:[%s13744_s0 + $0x1b2] sm:$0xff]  ;;  %v7171_v28 = vld [vmem:[%s13744_s0 + $0x1c8] sm:$0xff] }
 0x212   :  { %v2024_v10 = vpop.f32.mrf.mxu3  ;;  %v1816_v16 = vadd.f32 %v1815_v36, %v1607_v18  ;;  %v395_v35 = vmax.f32 %v331_v12, 0.0  ;;  %v524_v36 = vmax.f32 %v7171_v28, 0.0  ;;  %v1315_v1 = vld [vmem:[%s13745_s1 + $0x3b0] sm:$0xff] }
 0x213   :  { %2813 = vmatpush.msra.mxu3 %v1315_v1  ;;  %v1331_v28 = vld [vmem:[%s13745_s1 + $0x430] sm:$0xff] }
 0x214   :  { %v2025_v45 = vadd.f32 %v2024_v10, %v1816_v16  ;;  %v7235_v10 = vld [vmem:[%s13744_s0 + $0x1c9] sm:$0xff]  ;;  %3022 = vmatpush.msra.mxu0 %v1331_v28 }
 0x215   :  { %v7299_v16 = vld [vmem:[%s13744_s0 + $0x1ca] sm:$0xff]  ;;  %v652_v24 = vmax.f32 %v7235_v10, 0.0 }
 0x216   :  { %v2234_v34 = vadd.f32 %v2233_v60, %v2025_v45  ;;  %1865 = vmatmul.f32.gmra.mxu2 %v776_v56  ;;  %v2236_v31 = vpop.f32.mrf.mxu0  ;;  %v2445_v32 = vpop.f32.mrf.mxu1  ;;  %v7234_v56 = vld [vmem:[%s13744_s0 + $0x189] sm:$0xff]  ;;  %v1613_v60 = vadd.f32 %v8508_v5, %v8506_v62  ;;  %v780_v62 = vmax.f32 %v7299_v16, 0.0 }
 0x217   :  { %2074 = vmatmul.f32.gmra.mxu3 %v522_v22  ;;  %v651_v43 = vmax.f32 %v7234_v56, 0.0  ;;  %v7236_v56 = vld [vmem:[%s13744_s0 + $0x1d1] sm:$0xff] }
 0x218   :  { %v9024_v39 = vadd.f32 %v2442_v61, %v2234_v34  ;;  %v7172_v34 = vld [vmem:[%s13744_s0 + $0x1d0] sm:$0xff]  ;;  %v653_v37 = vmax.f32 %v7236_v56, 0.0  ;;  %v1625_v56 = vadd.f32 %v8583_v25, %v8581_v2 }
 0x219   :  { %v1818_v14 = vpop.f32.mrf.mxu2  ;;  %2283 = vmatmul.f32.gmra.mxu0 %v650_v55  ;;  %2492 = vmatmul.f32.gmra.mxu1 %v778_v33  ;;  %v1299_v55 = vld [vmem:[%s13745_s1 + $0x330] sm:$0xff]  ;;  %v332_v33 = vld [vmem:[%s13744_s0 + $0x1ba] sm:$0xff] }
 0x21a   :  { %v2027_v21 = vpop.f32.mrf.mxu3  ;;  %v1819_v8 = vadd.f32 %v1818_v14, %v1610_v9  ;;  %2604 = vmatpush.msra.mxu2 %v1299_v55  ;;  %v7302_v1 = vld [vmem:[%s13744_s0 + $0x1ea] sm:$0xff] }
 0x21c   :  { %v2028_v11 = vadd.f32 %v2027_v21, %v1819_v8  ;;  %v396_v8 = vmax.f32 %v332_v33, 0.0 }
 0x21e   :  { %v2237_v23 = vadd.f32 %v2236_v31, %v2028_v11  ;;  %1868 = vmatmul.f32.gmra.mxu2 %v777_v38  ;;  %v2239_v26 = vpop.f32.mrf.mxu0  ;;  %v2448_v4 = vpop.f32.mrf.mxu1  ;;  %v1616_v31 = vadd.f32 %v8526_v52, %v8524_v48  ;;  %v7300_v48 = vld [vmem:[%s13744_s0 + $0x1d2] sm:$0xff] }
 0x21f   :  { %2077 = vmatmul.f32.gmra.mxu3 %v523_v50  ;;  %v525_v50 = vmax.f32 %v7172_v34, 0.0  ;;  %v781_v11 = vmax.f32 %v7300_v48, 0.0 }
 0x220   :  { %v9040_v61 = vadd.f32 %v2445_v32, %v2237_v23 }
 0x221   :  { %v1821_v17 = vpop.f32.mrf.mxu2  ;;  %2286 = vmatmul.f32.gmra.mxu0 %v651_v43  ;;  %2495 = vmatmul.f32.gmra.mxu1 %v779_v3 }
 0x222   :  { %v2030_v18 = vpop.f32.mrf.mxu3  ;;  %v1822_v38 = vadd.f32 %v1821_v17, %v1613_v60 }
 0x224   :  { %v2031_v22 = vadd.f32 %v2030_v18, %v1822_v38 }
 0x226   :  { %v2240_v5 = vadd.f32 %v2239_v26, %v2031_v22  ;;  %1871 = vmatmul.f32.gmra.mxu2 %v395_v35  ;;  %v2242_v44 = vpop.f32.mrf.mxu0  ;;  %v2451_v45 = vpop.f32.mrf.mxu1  ;;  %v7173_v26 = vld [vmem:[%s13744_s0 + $0x1e0] sm:$0xff] }
 0x227   :  { %2080 = vmatmul.f32.gmra.mxu3 %v524_v36  ;;  %v526_v38 = vmax.f32 %v7173_v26, 0.0  ;;  %v7237_v35 = vld [vmem:[%s13744_s0 + $0x1e1] sm:$0xff] }
 0x228   :  { %v9059_v32 = vadd.f32 %v2448_v4, %v2240_v5  ;;  %v1619_v4 = vadd.f32 %v8550_v40, %v8548_v53  ;;  %v7301_v53 = vld [vmem:[%s13744_s0 + $0x1e2] sm:$0xff]  ;;  %v654_v36 = vmax.f32 %v7237_v35, 0.0 }
 0x229   :  { %v1824_v9 = vpop.f32.mrf.mxu2  ;;  %2289 = vmatmul.f32.gmra.mxu0 %v652_v24  ;;  %2498 = vmatmul.f32.gmra.mxu1 %v780_v62  ;;  %v782_v10 = vmax.f32 %v7301_v53, 0.0  ;;  %v7174_v5 = vld [vmem:[%s13744_s0 + $0x1e8] sm:$0xff] }
 0x22a   :  { %v2033_v14 = vpop.f32.mrf.mxu3  ;;  %v1825_v21 = vadd.f32 %v1824_v9, %v1616_v31  ;;  %v527_v31 = vmax.f32 %v7174_v5, 0.0  ;;  %v1314_v53 = vld [vmem:[%s13745_s1 + $0x3a8] sm:$0xff] }
 0x22b   :  { %2814 = vmatpush.msra.mxu3 %v1314_v53  ;;  %v7179_v53 = vld [vmem:[%s13744_s0 + $0x228] sm:$0xff] }
 0x22c   :  { %v2034_v52 = vadd.f32 %v2033_v14, %v1825_v21  ;;  %v783_v21 = vmax.f32 %v7302_v1, 0.0  ;;  %v1330_v1 = vld [vmem:[%s13745_s1 + $0x428] sm:$0xff] }
 0x22d   :  { %3023 = vmatpush.msra.mxu0 %v1330_v1  ;;  %v1297_v1 = vld [vmem:[%s13745_s1 + $0x320] sm:$0xff] }
 0x22e   :  { %v2243_v43 = vadd.f32 %v2242_v44, %v2034_v52  ;;  %1874 = vmatmul.f32.gmra.mxu2 %v396_v8  ;;  %v2245_v3 = vpop.f32.mrf.mxu0  ;;  %v2454_v23 = vpop.f32.mrf.mxu1  ;;  %v1622_v44 = vadd.f32 %v8568_v42, %v8566_v54 }
 0x22f   :  { %2083 = vmatmul.f32.gmra.mxu3 %v525_v50  ;;  %v7175_v50 = vld [vmem:[%s13744_s0 + $0x1f8] sm:$0xff] }
 0x230   :  { %v9075_v12 = vadd.f32 %v2451_v45, %v2243_v43 }
 0x231   :  { %v1827_v60 = vpop.f32.mrf.mxu2  ;;  %2292 = vmatmul.f32.gmra.mxu0 %v653_v37  ;;  %2501 = vmatmul.f32.gmra.mxu1 %v781_v11 }
 0x232   :  { %v2036_v17 = vpop.f32.mrf.mxu3  ;;  %v1828_v18 = vadd.f32 %v1827_v60, %v1619_v4 }
 0x234   :  { %v2037_v40 = vadd.f32 %v2036_v17, %v1828_v18  ;;  %v1298_v17 = vld [vmem:[%s13745_s1 + $0x328] sm:$0xff]  ;;  %v7176_v18 = vld [vmem:[%s13744_s0 + $0x200] sm:$0xff] }
 0x235   :  { %2605 = vmatpush.msra.mxu2 %v1298_v17 }
 0x236   :  { %v2246_v16 = vadd.f32 %v2245_v3, %v2037_v40  ;;  %1877 = vmatmul.f32.gmra.mxu2 %v780_v62  ;;  %v2248_v22 = vpop.f32.mrf.mxu0  ;;  %v2457_v24 = vpop.f32.mrf.mxu1  ;;  %v7238_v62 = vld [vmem:[%s13744_s0 + $0x1e9] sm:$0xff]  ;;  %v528_v3 = vmax.f32 %v7175_v50, 0.0 }
 0x237   :  { %2086 = vmatmul.f32.gmra.mxu3 %v526_v38  ;;  %v655_v14 = vmax.f32 %v7238_v62, 0.0  ;;  %v1628_v38 = vadd.f32 %v8598_v15, %v8596_v49  ;;  %v7304_v15 = vld [vmem:[%s13744_s0 + $0x202] sm:$0xff]  ;;  %2606 = vmatpush.msra.mxu2 %v1297_v1 }
 0x238   :  { %v9091_v45 = vadd.f32 %v2454_v23, %v2246_v16  ;;  %v7303_v23 = vld [vmem:[%s13744_s0 + $0x1fa] sm:$0xff]  ;;  %v529_v16 = vmax.f32 %v7176_v18, 0.0  ;;  %v785_v5 = vmax.f32 %v7304_v15, 0.0 }
 0x239   :  { %v1830_v55 = vpop.f32.mrf.mxu2  ;;  %2295 = vmatmul.f32.gmra.mxu0 %v654_v36  ;;  %2504 = vmatmul.f32.gmra.mxu1 %v782_v10  ;;  %v784_v28 = vmax.f32 %v7303_v23, 0.0 }
 0x23a   :  { %v2039_v33 = vpop.f32.mrf.mxu3  ;;  %v1831_v34 = vadd.f32 %v1830_v55, %v1622_v44 }
 0x23c   :  { %v2040_v9 = vadd.f32 %v2039_v33, %v1831_v34  ;;  %v7177_v34 = vld [vmem:[%s13744_s0 + $0x210] sm:$0xff] }
 0x23e   :  { %v2249_v42 = vadd.f32 %v2248_v22, %v2040_v9  ;;  %1880 = vmatmul.f32.gmra.mxu2 %v781_v11  ;;  %v2251_v54 = vpop.f32.mrf.mxu0  ;;  %v2460_v8 = vpop.f32.mrf.mxu1  ;;  %v7239_v11 = vld [vmem:[%s13744_s0 + $0x1f9] sm:$0xff]  ;;  %v7240_v22 = vld [vmem:[%s13744_s0 + $0x201] sm:$0xff] }
 0x23f   :  { %2089 = vmatmul.f32.gmra.mxu3 %v527_v31  ;;  %v656_v4 = vmax.f32 %v7239_v11, 0.0  ;;  %v1631_v31 = vadd.f32 %v8619_v30, %v8617_v20  ;;  %v7305_v20 = vld [vmem:[%s13744_s0 + $0x212] sm:$0xff] }
 0x240   :  { %v9104_v48 = vadd.f32 %v2457_v24, %v2249_v42  ;;  %v657_v24 = vmax.f32 %v7240_v22, 0.0  ;;  %v530_v42 = vmax.f32 %v7177_v34, 0.0  ;;  %v786_v50 = vmax.f32 %v7305_v20, 0.0  ;;  %v1313_v20 = vld [vmem:[%s13745_s1 + $0x3a0] sm:$0xff] }
 0x241   :  { %v1833_v52 = vpop.f32.mrf.mxu2  ;;  %2298 = vmatmul.f32.gmra.mxu0 %v655_v14  ;;  %2507 = vmatmul.f32.gmra.mxu1 %v783_v21 }
 0x242   :  { %v2042_v37 = vpop.f32.mrf.mxu3  ;;  %v1834_v43 = vadd.f32 %v1833_v52, %v1625_v56  ;;  %2815 = vmatpush.msra.mxu3 %v1313_v20  ;;  %v7310_v20 = vld [vmem:[%s13744_s0 + $0x24a] sm:$0xff] }
 0x244   :  { %v2043_v26 = vadd.f32 %v2042_v37, %v1834_v43  ;;  %v7178_v43 = vld [vmem:[%s13744_s0 + $0x218] sm:$0xff] }
 0x246   :  { %v2252_v25 = vadd.f32 %v2251_v54, %v2043_v26  ;;  %1883 = vmatmul.f32.gmra.mxu2 %v782_v10  ;;  %v2254_v2 = vpop.f32.mrf.mxu0  ;;  %v2463_v60 = vpop.f32.mrf.mxu1  ;;  %v7241_v54 = vld [vmem:[%s13744_s0 + $0x211] sm:$0xff] }
 0x247   :  { %2092 = vmatmul.f32.gmra.mxu3 %v528_v3  ;;  %v1634_v3 = vadd.f32 %v8637_v46, %v8635_v41 }
 0x248   :  { %v9120_v35 = vadd.f32 %v2460_v8, %v2252_v25  ;;  %v658_v8 = vmax.f32 %v7241_v54, 0.0  ;;  %v531_v25 = vmax.f32 %v7178_v43, 0.0 }
 0x249   :  { %v1836_v40 = vpop.f32.mrf.mxu2  ;;  %2301 = vmatmul.f32.gmra.mxu0 %v656_v4  ;;  %2510 = vmatmul.f32.gmra.mxu1 %v784_v28 }
 0x24a   :  { %v2045_v36 = vpop.f32.mrf.mxu3  ;;  %v1837_v10 = vadd.f32 %v1836_v40, %v1628_v38  ;;  %v13995_v40 = vld [vmem:[#allocation32_spill] sm:$0xff] }
 0x24c   :  { %v2046_v49 = vadd.f32 %v2045_v36, %v1837_v10  ;;  %v1637_v36 = vadd.f32 %v13995_v40, %v8650_v27 }
 0x24e   :  { %v2255_v44 = vadd.f32 %v2254_v2, %v2046_v49  ;;  %1886 = vmatmul.f32.gmra.mxu2 %v783_v21  ;;  %v2257_v55 = vpop.f32.mrf.mxu0  ;;  %v2466_v33 = vpop.f32.mrf.mxu1  ;;  %v7306_v2 = vld [vmem:[%s13744_s0 + $0x21a] sm:$0xff]  ;;  %v532_v49 = vmax.f32 %v7179_v53, 0.0 }
 0x24f   :  { %2095 = vmatmul.f32.gmra.mxu3 %v529_v16  ;;  %v787_v18 = vmax.f32 %v7306_v2, 0.0  ;;  %v13998_v2 = vld [vmem:[#allocation37_spill] sm:$0xff] }
 0x250   :  { %v9136_v62 = vadd.f32 %v2463_v60, %v2255_v44 }
 0x251   :  { %v1839_v9 = vpop.f32.mrf.mxu2  ;;  %2304 = vmatmul.f32.gmra.mxu0 %v657_v24  ;;  %2513 = vmatmul.f32.gmra.mxu1 %v785_v5  ;;  %v7243_v24 = vld [vmem:[%s13744_s0 + $0x229] sm:$0xff] }
 0x252   :  { %v2048_v14 = vpop.f32.mrf.mxu3  ;;  %v1840_v21 = vadd.f32 %v1839_v9, %v1631_v31  ;;  %v7180_v9 = vld [vmem:[%s13744_s0 + $0x230] sm:$0xff] }
 0x254   :  { %v2049_v30 = vadd.f32 %v2048_v14, %v1840_v21  ;;  %v13996_v14 = vld [vmem:[#allocation34_spill] sm:$0xff]  ;;  %v13997_v21 = vld [vmem:[#allocation35_spill] sm:$0xff] }
 0x256   :  { %v2258_v56 = vadd.f32 %v2257_v55, %v2049_v30  ;;  %1889 = vmatmul.f32.gmra.mxu2 %v784_v28  ;;  %v2260_v52 = vpop.f32.mrf.mxu0  ;;  %v2469_v37 = vpop.f32.mrf.mxu1  ;;  %v7242_v28 = vld [vmem:[%s13744_s0 + $0x219] sm:$0xff]  ;;  %v660_v55 = vmax.f32 %v7243_v24, 0.0 }
 0x257   :  { %2098 = vmatmul.f32.gmra.mxu3 %v530_v42  ;;  %v659_v17 = vmax.f32 %v7242_v28, 0.0  ;;  %v1640_v42 = vadd.f32 %v13997_v21, %v13996_v14  ;;  %v7181_v28 = vld [vmem:[%s13744_s0 + $0x240] sm:$0xff] }
 0x258   :  { %v9152_v11 = vadd.f32 %v2466_v33, %v2258_v56  ;;  %v533_v56 = vmax.f32 %v7180_v9, 0.0  ;;  %v534_v40 = vmax.f32 %v7181_v28, 0.0 }
 0x259   :  { %v1842_v23 = vpop.f32.mrf.mxu2  ;;  %2307 = vmatmul.f32.gmra.mxu0 %v658_v8  ;;  %2516 = vmatmul.f32.gmra.mxu1 %v786_v50 }
 0x25a   :  { %v2051_v26 = vpop.f32.mrf.mxu3  ;;  %v1843_v4 = vadd.f32 %v1842_v23, %v1634_v3 }
 0x25c   :  { %v2052_v60 = vadd.f32 %v2051_v26, %v1843_v4 }
 0x25e   :  { %v2261_v46 = vadd.f32 %v2260_v52, %v2052_v60  ;;  %1892 = vmatmul.f32.gmra.mxu2 %v785_v5  ;;  %v2263_v41 = vpop.f32.mrf.mxu0  ;;  %v2472_v38 = vpop.f32.mrf.mxu1  ;;  %v7307_v5 = vld [vmem:[%s13744_s0 + $0x22a] sm:$0xff] }
 0x25f   :  { %2101 = vmatmul.f32.gmra.mxu3 %v531_v25  ;;  %v788_v33 = vmax.f32 %v7307_v5, 0.0  ;;  %v7244_v52 = vld [vmem:[%s13744_s0 + $0x231] sm:$0xff]  ;;  %v13999_v60 = vld [vmem:[#allocation38_spill] sm:$0xff] }
 0x260   :  { %v9165_v10 = vadd.f32 %v2469_v37, %v2261_v46  ;;  %v7308_v37 = vld [vmem:[%s13744_s0 + $0x232] sm:$0xff]  ;;  %v661_v3 = vmax.f32 %v7244_v52, 0.0 }
 0x261   :  { %v1845_v16 = vpop.f32.mrf.mxu2  ;;  %2310 = vmatmul.f32.gmra.mxu0 %v659_v17  ;;  %2519 = vmatmul.f32.gmra.mxu1 %v787_v18  ;;  %v789_v23 = vmax.f32 %v7308_v37, 0.0  ;;  %v1643_v17 = vadd.f32 %v13999_v60, %v13998_v2 }
 0x262   :  { %v2054_v22 = vpop.f32.mrf.mxu3  ;;  %v1846_v15 = vadd.f32 %v1845_v16, %v1637_v36  ;;  %v7245_v36 = vld [vmem:[%s13744_s0 + $0x241] sm:$0xff] }
 0x263   :  { %v7309_v16 = vld [vmem:[%s13744_s0 + $0x242] sm:$0xff] }
 0x264   :  { %v2055_v44 = vadd.f32 %v2054_v22, %v1846_v15  ;;  %v662_v15 = vmax.f32 %v7245_v36, 0.0 }
 0x266   :  { %v2264_v27 = vadd.f32 %v2263_v41, %v2055_v44  ;;  %1895 = vmatmul.f32.gmra.mxu2 %v786_v50  ;;  %v2266_v34 = vpop.f32.mrf.mxu0  ;;  %v2475_v31 = vpop.f32.mrf.mxu1  ;;  %v1329_v41 = vld [vmem:[%s13745_s1 + $0x420] sm:$0xff] }
 0x267   :  { %2104 = vmatmul.f32.gmra.mxu3 %v532_v49  ;;  %3024 = vmatpush.msra.mxu0 %v1329_v41  ;;  %v790_v49 = vmax.f32 %v7309_v16, 0.0  ;;  %v7311_v41 = vld [vmem:[%s13744_s0 + $0x25a] sm:$0xff] }
 0x268   :  { %v9181_v54 = vadd.f32 %v2472_v38, %v2264_v27  ;;  %v14000_v27 = vld [vmem:[#allocation40_spill] sm:$0xff] }
 0x269   :  { %v1848_v30 = vpop.f32.mrf.mxu2  ;;  %2313 = vmatmul.f32.gmra.mxu0 %v660_v55  ;;  %2522 = vmatmul.f32.gmra.mxu1 %v788_v33  ;;  %v7182_v55 = vld [vmem:[%s13744_s0 + $0x248] sm:$0xff] }
 0x26a   :  { %v2057_v8 = vpop.f32.mrf.mxu3  ;;  %v1849_v50 = vadd.f32 %v1848_v30, %v1640_v42  ;;  %v535_v42 = vmax.f32 %v7182_v55, 0.0 }
 0x26c   :  { %v2058_v43 = vadd.f32 %v2057_v8, %v1849_v50  ;;  %v791_v50 = vmax.f32 %v7310_v20, 0.0 }
 0x26e   :  { %v2267_v26 = vadd.f32 %v2266_v34, %v2058_v43  ;;  %1898 = vmatmul.f32.gmra.mxu2 %v787_v18  ;;  %v2269_v4 = vpop.f32.mrf.mxu0  ;;  %v2478_v25 = vpop.f32.mrf.mxu1  ;;  %v14001_v34 = vld [vmem:[#allocation41_spill] sm:$0xff]  ;;  %v7183_v43 = vld [vmem:[%s13744_s0 + $0x258] sm:$0xff] }
 0x26f   :  { %2107 = vmatmul.f32.gmra.mxu3 %v533_v56 }
 0x270   :  { %v9197_v46 = vadd.f32 %v2475_v31, %v2267_v26  ;;  %v1646_v31 = vadd.f32 %v14001_v34, %v14000_v27  ;;  %v14003_v26 = vld [vmem:[#allocation44_spill] sm:$0xff] }
 0x271   :  { %v1851_v38 = vpop.f32.mrf.mxu2  ;;  %2316 = vmatmul.f32.gmra.mxu0 %v661_v3  ;;  %2525 = vmatmul.f32.gmra.mxu1 %v789_v23  ;;  %v14002_v3 = vld [vmem:[#allocation43_spill] sm:$0xff] }
 0x272   :  { %v2060_v53 = vpop.f32.mrf.mxu3  ;;  %v1852_v18 = vadd.f32 %v1851_v38, %v1643_v17  ;;  %v536_v17 = vmax.f32 %v7183_v43, 0.0  ;;  %v14007_v43 = vld [vmem:[#allocation50_spill] sm:$0xff] }
 0x274   :  { %v2061_v22 = vadd.f32 %v2060_v53, %v1852_v18  ;;  %v792_v18 = vmax.f32 %v7311_v41, 0.0 }
 0x276   :  { %v2270_v24 = vadd.f32 %v2269_v4, %v2061_v22  ;;  %1901 = vmatmul.f32.gmra.mxu2 %v788_v33  ;;  %v2272_v5 = vpop.f32.mrf.mxu0  ;;  %v2481_v44 = vpop.f32.mrf.mxu1  ;;  %v7246_v33 = vld [vmem:[%s13744_s0 + $0x249] sm:$0xff]  ;;  %v1649_v4 = vadd.f32 %v14003_v26, %v14002_v3  ;;  %v1296_v22 = vld [vmem:[%s13745_s1 + $0x318] sm:$0xff] }
 0x277   :  { %2110 = vmatmul.f32.gmra.mxu3 %v534_v40  ;;  %v663_v8 = vmax.f32 %v7246_v33, 0.0  ;;  %2607 = vmatpush.msra.mxu2 %v1296_v22  ;;  %v7186_v22 = vld [vmem:[%s13744_s0 + $0x278] sm:$0xff] }
 0x278   :  { %v9213_v1 = vadd.f32 %v2478_v25, %v2270_v24  ;;  %v14004_v24 = vld [vmem:[#allocation46_spill] sm:$0xff] }
 0x279   :  { %v1854_v9 = vpop.f32.mrf.mxu2  ;;  %2319 = vmatmul.f32.gmra.mxu0 %v662_v15  ;;  %2528 = vmatmul.f32.gmra.mxu1 %v790_v49  ;;  %v7184_v15 = vld [vmem:[%s13744_s0 + $0x260] sm:$0xff] }
 0x27a   :  { %v2063_v14 = vpop.f32.mrf.mxu3  ;;  %v1855_v21 = vadd.f32 %v1854_v9, %v1646_v31  ;;  %v537_v9 = vmax.f32 %v7184_v15, 0.0  ;;  %v14008_v15 = vld [vmem:[#allocation52_spill] sm:$0xff] }
 0x27c   :  { %v2064_v30 = vadd.f32 %v2063_v14, %v1855_v21  ;;  %v7248_v14 = vld [vmem:[%s13744_s0 + $0x261] sm:$0xff] }
 0x27d   :  { %v7312_v21 = vld [vmem:[%s13744_s0 + $0x262] sm:$0xff]  ;;  %v665_v33 = vmax.f32 %v7248_v14, 0.0 }
 0x27e   :  { %v2273_v56 = vadd.f32 %v2272_v5, %v2064_v30  ;;  %1904 = vmatmul.f32.gmra.mxu2 %v789_v23  ;;  %v2275_v52 = vpop.f32.mrf.mxu0  ;;  %v2484_v37 = vpop.f32.mrf.mxu1  ;;  %v7247_v23 = vld [vmem:[%s13744_s0 + $0x259] sm:$0xff]  ;;  %v14005_v5 = vld [vmem:[#allocation47_spill] sm:$0xff]  ;;  %v793_v20 = vmax.f32 %v7312_v21, 0.0 }
 0x27f   :  { %2113 = vmatmul.f32.gmra.mxu3 %v535_v42  ;;  %v664_v53 = vmax.f32 %v7247_v23, 0.0  ;;  %v7313_v23 = vld [vmem:[%s13744_s0 + $0x272] sm:$0xff] }
 0x280   :  { %v9226_v25 = vadd.f32 %v2481_v44, %v2273_v56  ;;  %v1652_v44 = vadd.f32 %v14005_v5, %v14004_v24  ;;  %v14009_v24 = vld [vmem:[#allocation53_spill] sm:$0xff] }
 0x281   :  { %v1857_v28 = vpop.f32.mrf.mxu2  ;;  %2322 = vmatmul.f32.gmra.mxu0 %v663_v8  ;;  %2531 = vmatmul.f32.gmra.mxu1 %v791_v50  ;;  %v1658_v5 = vadd.f32 %v14009_v24, %v14008_v15  ;;  %v1311_v24 = vld [vmem:[%s13745_s1 + $0x390] sm:$0xff] }
 0x282   :  { %v2066_v2 = vpop.f32.mrf.mxu3  ;;  %v1858_v60 = vadd.f32 %v1857_v28, %v1649_v4  ;;  %v1328_v4 = vld [vmem:[%s13745_s1 + $0x418] sm:$0xff] }
 0x283   :  { %3025 = vmatpush.msra.mxu0 %v1328_v4 }
 0x284   :  { %v2067_v38 = vadd.f32 %v2066_v2, %v1858_v60 }
 0x286   :  { %v2276_v40 = vadd.f32 %v2275_v52, %v2067_v38  ;;  %1907 = vmatmul.f32.gmra.mxu2 %v790_v49  ;;  %v2278_v36 = vpop.f32.mrf.mxu0  ;;  %v2487_v16 = vpop.f32.mrf.mxu1  ;;  %v1312_v49 = vld [vmem:[%s13745_s1 + $0x398] sm:$0xff]  ;;  %v7185_v52 = vld [vmem:[%s13744_s0 + $0x270] sm:$0xff] }
 0x287   :  { %2116 = vmatmul.f32.gmra.mxu3 %v536_v17  ;;  %v538_v60 = vmax.f32 %v7185_v52, 0.0  ;;  %v7249_v17 = vld [vmem:[%s13744_s0 + $0x271] sm:$0xff] }
 0x288   :  { %v9242_v55 = vadd.f32 %v2484_v37, %v2276_v40  ;;  %2816 = vmatpush.msra.mxu3 %v1312_v49  ;;  %v14006_v37 = vld [vmem:[#allocation49_spill] sm:$0xff]  ;;  %v666_v38 = vmax.f32 %v7249_v17, 0.0  ;;  %v14010_v52 = vld [vmem:[#allocation55_spill] sm:$0xff] }
 0x289   :  { %v1860_v27 = vpop.f32.mrf.mxu2  ;;  %2325 = vmatmul.f32.gmra.mxu0 %v664_v53  ;;  %2534 = vmatmul.f32.gmra.mxu1 %v792_v18  ;;  %v1655_v3 = vadd.f32 %v14007_v43, %v14006_v37  ;;  %v794_v53 = vmax.f32 %v7313_v23, 0.0  ;;  %v14011_v37 = vld [vmem:[#allocation56_spill] sm:$0xff] }
 0x28a   :  { %v2069_v34 = vpop.f32.mrf.mxu3  ;;  %v1861_v31 = vadd.f32 %v1860_v27, %v1652_v44  ;;  %v1661_v43 = vadd.f32 %v14011_v37, %v14010_v52  ;;  %2817 = vmatpush.msra.mxu3 %v1311_v24  ;;  %v1327_v37 = vld [vmem:[%s13745_s1 + $0x410] sm:$0xff] }
 0x28b   :  { %3026 = vmatpush.msra.mxu0 %v1327_v37 }
 0x28c   :  { %v2070_v42 = vadd.f32 %v2069_v34, %v1861_v31  ;;  %v539_v31 = vmax.f32 %v7186_v22, 0.0  ;;  %v7188_v22 = vld [vmem:[%s13744_s0 + $0x290] sm:$0xff] }
 0x28e   :  { %v2279_v30 = vadd.f32 %v2278_v36, %v2070_v42  ;;  %1910 = vmatmul.f32.gmra.mxu2 %v791_v50  ;;  %v2281_v8 = vpop.f32.mrf.mxu0  ;;  %v2490_v56 = vpop.f32.mrf.mxu1 }
 0x28f   :  { %2119 = vmatmul.f32.gmra.mxu3 %v537_v9  ;;  %v7314_v9 = vld [vmem:[%s13744_s0 + $0x27a] sm:$0xff] }
 0x290   :  { %v9258_v26 = vadd.f32 %v2487_v16, %v2279_v30  ;;  %v795_v42 = vmax.f32 %v7314_v9, 0.0 }
 0x291   :  { %v1863_v28 = vpop.f32.mrf.mxu2  ;;  %2328 = vmatmul.f32.gmra.mxu0 %v665_v33  ;;  %2537 = vmatmul.f32.gmra.mxu1 %v793_v20 }
 0x292   :  { %v2072_v2 = vpop.f32.mrf.mxu3  ;;  %v1864_v50 = vadd.f32 %v1863_v28, %v1655_v3 }
 0x294   :  { %v2073_v41 = vadd.f32 %v2072_v2, %v1864_v50 }
 0x296   :  { %v2282_v40 = vadd.f32 %v2281_v8, %v2073_v41  ;;  %1913 = vmatmul.f32.gmra.mxu2 %v792_v18  ;;  %v2284_v36 = vpop.f32.mrf.mxu0  ;;  %v2493_v16 = vpop.f32.mrf.mxu1  ;;  %v7250_v18 = vld [vmem:[%s13744_s0 + $0x279] sm:$0xff] }
 0x297   :  { %2122 = vmatmul.f32.gmra.mxu3 %v538_v60  ;;  %v667_v21 = vmax.f32 %v7250_v18, 0.0  ;;  %v7315_v60 = vld [vmem:[%s13744_s0 + $0x28a] sm:$0xff]  ;;  %v7316_v18 = vld [vmem:[%s13744_s0 + $0x292] sm:$0xff] }
 0x298   :  { %v9274_v44 = vadd.f32 %v2490_v56, %v2282_v40  ;;  %v7187_v56 = vld [vmem:[%s13744_s0 + $0x288] sm:$0xff]  ;;  %v796_v41 = vmax.f32 %v7315_v60, 0.0 }
 0x299   :  { %v1866_v49 = vpop.f32.mrf.mxu2  ;;  %2331 = vmatmul.f32.gmra.mxu0 %v666_v38  ;;  %2540 = vmatmul.f32.gmra.mxu1 %v794_v53  ;;  %v540_v50 = vmax.f32 %v7187_v56, 0.0  ;;  %v7189_v56 = vld [vmem:[%s13744_s0 + $0x2a0] sm:$0xff] }
 0x29a   :  { %v2075_v27 = vpop.f32.mrf.mxu3  ;;  %v1867_v34 = vadd.f32 %v1866_v49, %v1658_v5  ;;  %v14012_v49 = vld [vmem:[#allocation9_spill] sm:$0xff] }
 0x29c   :  { %v2076_v14 = vadd.f32 %v2075_v27, %v1867_v34  ;;  %v541_v34 = vmax.f32 %v7188_v22, 0.0 }
 0x29e   :  { %v2285_v33 = vadd.f32 %v2284_v36, %v2076_v14  ;;  %1916 = vmatmul.f32.gmra.mxu2 %v793_v20  ;;  %v2287_v30 = vpop.f32.mrf.mxu0  ;;  %v2496_v8 = vpop.f32.mrf.mxu1  ;;  %v7251_v20 = vld [vmem:[%s13744_s0 + $0x289] sm:$0xff] }
 0x29f   :  { %2125 = vmatmul.f32.gmra.mxu3 %v539_v31  ;;  %v668_v23 = vmax.f32 %v7251_v20, 0.0  ;;  %v7252_v31 = vld [vmem:[%s13744_s0 + $0x291] sm:$0xff]  ;;  %v7317_v20 = vld [vmem:[%s13744_s0 + $0x2a2] sm:$0xff] }
 0x2a0   :  { %v9287_v3 = vadd.f32 %v2493_v16, %v2285_v33  ;;  %v1295_v16 = vld [vmem:[%s13745_s1 + $0x310] sm:$0xff]  ;;  %v669_v14 = vmax.f32 %v7252_v31, 0.0 }
 0x2a1   :  { %v1869_v4 = vpop.f32.mrf.mxu2  ;;  %2334 = vmatmul.f32.gmra.mxu0 %v667_v21  ;;  %2543 = vmatmul.f32.gmra.mxu1 %v795_v42  ;;  %v797_v21 = vmax.f32 %v7316_v18, 0.0 }
 0x2a2   :  { %v2078_v28 = vpop.f32.mrf.mxu3  ;;  %v1870_v2 = vadd.f32 %v1869_v4, %v1661_v43  ;;  %2608 = vmatpush.msra.mxu2 %v1295_v16  ;;  %v7190_v16 = vld [vmem:[%s13744_s0 + $0x2a8] sm:$0xff] }
 0x2a4   :  { %v2079_v17 = vadd.f32 %v2078_v28, %v1870_v2  ;;  %v14013_v28 = vld [vmem:[#allocation10_spill] sm:$0xff] }
 0x2a6   :  { %v2288_v38 = vadd.f32 %v2287_v30, %v2079_v17  ;;  %1919 = vmatmul.f32.gmra.mxu2 %v794_v53  ;;  %v2290_v40 = vpop.f32.mrf.mxu0  ;;  %v2499_v36 = vpop.f32.mrf.mxu1 }
 0x2a7   :  { %2128 = vmatmul.f32.gmra.mxu3 %v540_v50  ;;  %v7253_v50 = vld [vmem:[%s13744_s0 + $0x2a1] sm:$0xff] }
 0x2a8   :  { %v9301_v15 = vadd.f32 %v2496_v8, %v2288_v38  ;;  %v670_v17 = vmax.f32 %v7253_v50, 0.0 }
 0x2a9   :  { %v1872_v5 = vpop.f32.mrf.mxu2  ;;  %2337 = vmatmul.f32.gmra.mxu0 %v668_v23  ;;  %2546 = vmatmul.f32.gmra.mxu1 %v796_v41  ;;  %v798_v23 = vmax.f32 %v7317_v20, 0.0 }
 0x2aa   :  { %v2081_v53 = vpop.f32.mrf.mxu3  ;;  %v1873_v27 = vadd.f32 %v1872_v5, %v14012_v49 }
 0x2ac   :  { %v2082_v9 = vadd.f32 %v2081_v53, %v1873_v27  ;;  %v14014_v53 = vld [vmem:[#allocation11_spill] sm:$0xff]  ;;  %v543_v27 = vmax.f32 %v7190_v16, 0.0  ;;  %v7192_v16 = vld [vmem:[%s13744_s0 + $0x2c0] sm:$0xff] }
 0x2ae   :  { %v2291_v33 = vadd.f32 %v2290_v40, %v2082_v9  ;;  %1922 = vmatmul.f32.gmra.mxu2 %v795_v42  ;;  %v2293_v30 = vpop.f32.mrf.mxu0  ;;  %v2502_v8 = vpop.f32.mrf.mxu1  ;;  %v542_v42 = vmax.f32 %v7189_v56, 0.0 }
 0x2af   :  { %2131 = vmatmul.f32.gmra.mxu3 %v541_v34  ;;  %v7318_v34 = vld [vmem:[%s13744_s0 + $0x2aa] sm:$0xff] }
 0x2b0   :  { %v9316_v52 = vadd.f32 %v2499_v36, %v2291_v33  ;;  %v799_v9 = vmax.f32 %v7318_v34, 0.0  ;;  %v7256_v34 = vld [vmem:[%s13744_s0 + $0x2c1] sm:$0xff] }
 0x2b1   :  { %v1875_v43 = vpop.f32.mrf.mxu2  ;;  %2340 = vmatmul.f32.gmra.mxu0 %v669_v14  ;;  %2549 = vmatmul.f32.gmra.mxu1 %v797_v21 }
 0x2b2   :  { %v2084_v4 = vpop.f32.mrf.mxu3  ;;  %v1876_v2 = vadd.f32 %v1875_v43, %v14013_v28 }
 0x2b4   :  { %v2085_v60 = vadd.f32 %v2084_v4, %v1876_v2  ;;  %v14015_v4 = vld [vmem:[#allocation12_spill] sm:$0xff] }
 0x2b6   :  { %v2294_v38 = vadd.f32 %v2293_v30, %v2085_v60  ;;  %1925 = vmatmul.f32.gmra.mxu2 %v796_v41  ;;  %v2296_v40 = vpop.f32.mrf.mxu0  ;;  %v2505_v36 = vpop.f32.mrf.mxu1  ;;  %v7254_v41 = vld [vmem:[%s13744_s0 + $0x2a9] sm:$0xff] }
 0x2b7   :  { %2134 = vmatmul.f32.gmra.mxu3 %v542_v42  ;;  %v671_v18 = vmax.f32 %v7254_v41, 0.0  ;;  %v7319_v42 = vld [vmem:[%s13744_s0 + $0x2ba] sm:$0xff]  ;;  %v545_v41 = vmax.f32 %v7192_v16, 0.0 }
 0x2b8   :  { %v9331_v22 = vadd.f32 %v2502_v8, %v2294_v38  ;;  %v7191_v8 = vld [vmem:[%s13744_s0 + $0x2b8] sm:$0xff]  ;;  %v800_v60 = vmax.f32 %v7319_v42, 0.0  ;;  %v14017_v42 = vld [vmem:[#allocation14_spill] sm:$0xff] }
 0x2b9   :  { %v1878_v24 = vpop.f32.mrf.mxu2  ;;  %2343 = vmatmul.f32.gmra.mxu0 %v670_v17  ;;  %2552 = vmatmul.f32.gmra.mxu1 %v798_v23  ;;  %v544_v2 = vmax.f32 %v7191_v8, 0.0 }
 0x2ba   :  { %v2087_v5 = vpop.f32.mrf.mxu3  ;;  %v1879_v49 = vadd.f32 %v1878_v24, %v14014_v53 }
 0x2bc   :  { %v2088_v31 = vadd.f32 %v2087_v5, %v1879_v49  ;;  %v1310_v5 = vld [vmem:[%s13745_s1 + $0x388] sm:$0xff]  ;;  %v14016_v49 = vld [vmem:[#allocation13_spill] sm:$0xff] }
 0x2bd   :  { %2818 = vmatpush.msra.mxu3 %v1310_v5 }
 0x2be   :  { %v2297_v14 = vadd.f32 %v2296_v40, %v2088_v31  ;;  %1928 = vmatmul.f32.gmra.mxu2 %v797_v21  ;;  %v2299_v33 = vpop.f32.mrf.mxu0  ;;  %v2508_v30 = vpop.f32.mrf.mxu1  ;;  %v7255_v21 = vld [vmem:[%s13744_s0 + $0x2b9] sm:$0xff]  ;;  %v7320_v31 = vld [vmem:[%s13744_s0 + $0x2c2] sm:$0xff] }
 0x2bf   :  { %2137 = vmatmul.f32.gmra.mxu3 %v543_v27  ;;  %v672_v20 = vmax.f32 %v7255_v21, 0.0 }
 0x2c0   :  { %v9343_v56 = vadd.f32 %v2505_v36, %v2297_v14  ;;  %v1294_v36 = vld [vmem:[%s13745_s1 + $0x308] sm:$0xff]  ;;  %v673_v14 = vmax.f32 %v7256_v34, 0.0 }
 0x2c1   :  { %v1881_v37 = vpop.f32.mrf.mxu2  ;;  %2346 = vmatmul.f32.gmra.mxu0 %v671_v18  ;;  %2555 = vmatmul.f32.gmra.mxu1 %v799_v9 }
 0x2c2   :  { %v2090_v43 = vpop.f32.mrf.mxu3  ;;  %v1882_v28 = vadd.f32 %v1881_v37, %v14015_v4  ;;  %2609 = vmatpush.msra.mxu2 %v1294_v36  ;;  %v7193_v37 = vld [vmem:[%s13744_s0 + $0x2d0] sm:$0xff] }
 0x2c4   :  { %v2091_v50 = vadd.f32 %v2090_v43, %v1882_v28  ;;  %v1326_v28 = vld [vmem:[%s13745_s1 + $0x408] sm:$0xff] }
 0x2c5   :  { %3027 = vmatpush.msra.mxu0 %v1326_v28 }
 0x2c6   :  { %v2300_v17 = vadd.f32 %v2299_v33, %v2091_v50  ;;  %1931 = vmatmul.f32.gmra.mxu2 %v798_v23  ;;  %v2302_v38 = vpop.f32.mrf.mxu0  ;;  %v2511_v40 = vpop.f32.mrf.mxu1  ;;  %v801_v33 = vmax.f32 %v7320_v31, 0.0 }
 0x2c7   :  { %2140 = vmatmul.f32.gmra.mxu3 %v544_v2 }
 0x2c8   :  { %v9358_v24 = vadd.f32 %v2508_v30, %v2300_v17  ;;  %v7321_v17 = vld [vmem:[%s13744_s0 + $0x2d2] sm:$0xff] }
 0x2c9   :  { %v1884_v53 = vpop.f32.mrf.mxu2  ;;  %2349 = vmatmul.f32.gmra.mxu0 %v672_v20  ;;  %2558 = vmatmul.f32.gmra.mxu1 %v800_v60  ;;  %v7257_v20 = vld [vmem:[%s13744_s0 + $0x2d1] sm:$0xff]  ;;  %v802_v36 = vmax.f32 %v7321_v17, 0.0 }
 0x2ca   :  { %v2093_v23 = vpop.f32.mrf.mxu3  ;;  %v1885_v27 = vadd.f32 %v1884_v53, %v14016_v49  ;;  %v7194_v53 = vld [vmem:[%s13744_s0 + $0x2d8] sm:$0xff] }
 0x2cb   :  { %v547_v31 = vmax.f32 %v7194_v53, 0.0 }
 0x2cc   :  { %v2094_v18 = vadd.f32 %v2093_v23, %v1885_v27 }
 0x2ce   :  { %v2303_v30 = vadd.f32 %v2302_v38, %v2094_v18  ;;  %1934 = vmatmul.f32.gmra.mxu2 %v799_v9  ;;  %v2305_v8 = vpop.f32.mrf.mxu0  ;;  %v2514_v4 = vpop.f32.mrf.mxu1  ;;  %v546_v9 = vmax.f32 %v7193_v37, 0.0  ;;  %v7258_v18 = vld [vmem:[%s13744_s0 + $0x2d9] sm:$0xff] }
 0x2cf   :  { %2143 = vmatmul.f32.gmra.mxu3 %v545_v41  ;;  %v14018_v41 = vld [vmem:[#allocation15_spill] sm:$0xff] }
 0x2d0   :  { %v9373_v43 = vadd.f32 %v2511_v40, %v2303_v30  ;;  %v674_v40 = vmax.f32 %v7257_v20, 0.0 }
 0x2d1   :  { %v1887_v2 = vpop.f32.mrf.mxu2  ;;  %2352 = vmatmul.f32.gmra.mxu0 %v673_v14  ;;  %2561 = vmatmul.f32.gmra.mxu1 %v801_v33 }
 0x2d2   :  { %v2096_v21 = vpop.f32.mrf.mxu3  ;;  %v1888_v50 = vadd.f32 %v1887_v2, %v14017_v42  ;;  %v7195_v2 = vld [vmem:[%s13744_s0 + $0x2e8] sm:$0xff] }
 0x2d3   :  { %v548_v17 = vmax.f32 %v7195_v2, 0.0 }
 0x2d4   :  { %v2097_v38 = vadd.f32 %v2096_v21, %v1888_v50 }
 0x2d6   :  { %v2306_v16 = vadd.f32 %v2305_v8, %v2097_v38  ;;  %1937 = vmatmul.f32.gmra.mxu2 %v800_v60  ;;  %v2308_v5 = vpop.f32.mrf.mxu0  ;;  %v7322_v60 = vld [vmem:[%s13744_s0 + $0x2da] sm:$0xff]  ;;  %v2517_v14 = vpop.f32.mrf.mxu1  ;;  %v675_v8 = vmax.f32 %v7258_v18, 0.0  ;;  %v7259_v38 = vld [vmem:[%s13744_s0 + $0x2e9] sm:$0xff] }
 0x2d7   :  { %2146 = vmatmul.f32.gmra.mxu3 %v546_v9  ;;  %v803_v37 = vmax.f32 %v7322_v60, 0.0  ;;  %v14019_v9 = vld [vmem:[#allocation16_spill] sm:$0xff]  ;;  %v1309_v18 = vld [vmem:[%s13745_s1 + $0x380] sm:$0xff] }
 0x2d8   :  { %v9388_v23 = vadd.f32 %v2514_v4, %v2306_v16  ;;  %2819 = vmatpush.msra.mxu3 %v1309_v18 }
 0x2d9   :  { %v1890_v49 = vpop.f32.mrf.mxu2  ;;  %2355 = vmatmul.f32.gmra.mxu0 %v674_v40  ;;  %2564 = vmatmul.f32.gmra.mxu1 %v802_v36 }
 0x2da   :  { %v2099_v27 = vpop.f32.mrf.mxu3  ;;  %v1891_v34 = vadd.f32 %v1890_v49, %v14018_v41  ;;  %v1293_v41 = vld [vmem:[%s13745_s1 + $0x300] sm:$0xff] }
 0x2db   :  { %2610 = vmatpush.msra.mxu2 %v1293_v41 }
 0x2dc   :  { %v2100_v30 = vadd.f32 %v2099_v27, %v1891_v34  ;;  %v7196_v34 = vld [vmem:[%s13744_s0 + $0x2f0] sm:$0xff] }
 0x2de   :  { %v2309_v4 = vadd.f32 %v2308_v5, %v2100_v30  ;;  %1940 = vmatmul.f32.gmra.mxu2 %v801_v33  ;;  %v2311_v28 = vpop.f32.mrf.mxu0  ;;  %v7323_v33 = vld [vmem:[%s13744_s0 + $0x2ea] sm:$0xff]  ;;  %v2520_v16 = vpop.f32.mrf.mxu1  ;;  %v676_v5 = vmax.f32 %v7259_v38, 0.0  ;;  %v1325_v38 = vld [vmem:[%s13745_s1 + $0x400] sm:$0xff] }
 0x2df   :  { %2149 = vmatmul.f32.gmra.mxu3 %v547_v31  ;;  %v804_v53 = vmax.f32 %v7323_v33, 0.0  ;;  %3028 = vmatpush.msra.mxu0 %v1325_v38 }
 0x2e0   :  { %v9400_v21 = vadd.f32 %v2517_v14, %v2309_v4  ;;  %v7260_v4 = vld [vmem:[%s13744_s0 + $0x2f1] sm:$0xff] }
 0x2e1   :  { %v1893_v42 = vpop.f32.mrf.mxu2  ;;  %2358 = vmatmul.f32.gmra.mxu0 %v675_v8  ;;  %2567 = vmatmul.f32.gmra.mxu1 %v803_v37  ;;  %v549_v8 = vmax.f32 %v7196_v34, 0.0 }
 0x2e2   :  { %v2102_v50 = vpop.f32.mrf.mxu3  ;;  %v1894_v20 = vadd.f32 %v1893_v42, %v14019_v9  ;;  %v677_v42 = vmax.f32 %v7260_v4, 0.0  ;;  %v14022_v4 = vld [vmem:[#allocation19_spill] sm:$0xff] }
 0x2e4   :  { %v2103_v40 = vadd.f32 %v2102_v50, %v1894_v20 }
 0x2e6   :  { %v2312_v49 = vadd.f32 %v2311_v28, %v2103_v40  ;;  %1943 = vmatmul.f32.gmra.mxu2 %v802_v36  ;;  %v2314_v27 = vpop.f32.mrf.mxu0  ;;  %v14020_v36 = vld [vmem:[#allocation17_spill] sm:$0xff]  ;;  %v7324_v28 = vld [vmem:[%s13744_s0 + $0x2f2] sm:$0xff] }
 0x2e7   :  { %2152 = vmatmul.f32.gmra.mxu3 %v548_v17  ;;  %v805_v50 = vmax.f32 %v7324_v28, 0.0  ;;  %v7197_v17 = vld [vmem:[%s13744_s0 + $0x300] sm:$0xff] }
 0x2e8   :  { %v9415_v31 = vadd.f32 %v2520_v16, %v2312_v49  ;;  %v14021_v16 = vld [vmem:[#allocation18_spill] sm:$0xff]  ;;  %v550_v49 = vmax.f32 %v7197_v17, 0.0 }
 0x2e9   :  { %v1896_v60 = vpop.f32.mrf.mxu2  ;;  %2361 = vmatmul.f32.gmra.mxu0 %v676_v5  ;;  %2570 = vmatmul.f32.gmra.mxu1 %v804_v53 }
 0x2ea   :  { %v2105_v14 = vpop.f32.mrf.mxu3  ;;  %v1897_v30 = vadd.f32 %v1896_v60, %v14020_v36  ;;  %v7198_v36 = vld [vmem:[%s13744_s0 + $0x308] sm:$0xff] }
 0x2ec   :  { %v2106_v2 = vadd.f32 %v2105_v14, %v1897_v30 }
 0x2ee   :  { %v9427_v9 = vadd.f32 %v2314_v27, %v2106_v2  ;;  %1946 = vmatmul.f32.gmra.mxu2 %v803_v37  ;;  %v2317_v20 = vpop.f32.mrf.mxu0  ;;  %v7261_v37 = vld [vmem:[%s13744_s0 + $0x301] sm:$0xff]  ;;  %v551_v2 = vmax.f32 %v7198_v36, 0.0 }
 0x2ef   :  { %2155 = vmatmul.f32.gmra.mxu3 %v549_v8  ;;  %v7325_v27 = vld [vmem:[%s13744_s0 + $0x302] sm:$0xff]  ;;  %v678_v34 = vmax.f32 %v7261_v37, 0.0  ;;  %v14023_v37 = vld [vmem:[#allocation20_spill] sm:$0xff] }
 0x2f0   :  { %v806_v18 = vmax.f32 %v7325_v27, 0.0 }
 0x2f1   :  { %v1899_v33 = vpop.f32.mrf.mxu2  ;;  %2364 = vmatmul.f32.gmra.mxu0 %v677_v42  ;;  %2573 = vmatmul.f32.gmra.mxu1 %v805_v50  ;;  %v7262_v42 = vld [vmem:[%s13744_s0 + $0x309] sm:$0xff] }
 0x2f2   :  { %v2108_v40 = vpop.f32.mrf.mxu3  ;;  %v1900_v5 = vadd.f32 %v1899_v33, %v14021_v16  ;;  %v679_v17 = vmax.f32 %v7262_v42, 0.0  ;;  %v7199_v16 = vld [vmem:[%s13744_s0 + $0x318] sm:$0xff] }
 0x2f4   :  { %v2109_v41 = vadd.f32 %v2108_v40, %v1900_v5 }
 0x2f6   :  { %v9442_v60 = vadd.f32 %v2317_v20, %v2109_v41  ;;  %1949 = vmatmul.f32.gmra.mxu2 %v804_v53  ;;  %v2320_v14 = vpop.f32.mrf.mxu0  ;;  %v7326_v53 = vld [vmem:[%s13744_s0 + $0x30a] sm:$0xff]  ;;  %v552_v41 = vmax.f32 %v7199_v16, 0.0  ;;  %v7264_v16 = vld [vmem:[%s13744_s0 + $0x321] sm:$0xff] }
 0x2f7   :  { %2158 = vmatmul.f32.gmra.mxu3 %v550_v49  ;;  %v807_v38 = vmax.f32 %v7326_v53, 0.0  ;;  %v14024_v53 = vld [vmem:[#allocation21_spill] sm:$0xff] }
 0x2f9   :  { %v1902_v30 = vpop.f32.mrf.mxu2  ;;  %2367 = vmatmul.f32.gmra.mxu0 %v678_v34  ;;  %2576 = vmatmul.f32.gmra.mxu1 %v806_v18  ;;  %v7263_v34 = vld [vmem:[%s13744_s0 + $0x319] sm:$0xff] }
 0x2fa   :  { %v2111_v8 = vpop.f32.mrf.mxu3  ;;  %v1903_v28 = vadd.f32 %v1902_v30, %v14022_v4  ;;  %v680_v36 = vmax.f32 %v7263_v34, 0.0 }
 0x2fc   :  { %v2112_v20 = vadd.f32 %v2111_v8, %v1903_v28  ;;  %v7200_v28 = vld [vmem:[%s13744_s0 + $0x320] sm:$0xff] }
 0x2fe   :  { %v9454_v33 = vadd.f32 %v2320_v14, %v2112_v20  ;;  %1952 = vmatmul.f32.gmra.mxu2 %v805_v50  ;;  %v2323_v40 = vpop.f32.mrf.mxu0  ;;  %v7327_v50 = vld [vmem:[%s13744_s0 + $0x31a] sm:$0xff] }
 0x2ff   :  { %2161 = vmatmul.f32.gmra.mxu3 %v551_v2  ;;  %v808_v30 = vmax.f32 %v7327_v50, 0.0 }
 0x301   :  { %v1905_v5 = vpop.f32.mrf.mxu2  ;;  %2370 = vmatmul.f32.gmra.mxu0 %v679_v17  ;;  %2579 = vmatmul.f32.gmra.mxu1 %v807_v38  ;;  %v553_v17 = vmax.f32 %v7200_v28, 0.0 }
 0x302   :  { %v2114_v49 = vpop.f32.mrf.mxu3  ;;  %v1906_v27 = vadd.f32 %v1905_v5, %v14023_v37  ;;  %v681_v5 = vmax.f32 %v7264_v16, 0.0  ;;  %v7202_v16 = vld [vmem:[%s13744_s0 + $0x338] sm:$0xff] }
 0x304   :  { %v2115_v14 = vadd.f32 %v2114_v49, %v1906_v27 }
 0x306   :  { %v9466_v8 = vadd.f32 %v2323_v40, %v2115_v14  ;;  %1955 = vmatmul.f32.gmra.mxu2 %v806_v18  ;;  %v2326_v4 = vpop.f32.mrf.mxu0  ;;  %v7328_v18 = vld [vmem:[%s13744_s0 + $0x322] sm:$0xff] }
 0x307   :  { %2164 = vmatmul.f32.gmra.mxu3 %v552_v41  ;;  %v809_v49 = vmax.f32 %v7328_v18, 0.0  ;;  %v7201_v41 = vld [vmem:[%s13744_s0 + $0x330] sm:$0xff]  ;;  %v14026_v14 = vld [vmem:[#allocation22_spill] sm:$0xff] }
 0x308   :  { %v554_v28 = vmax.f32 %v7201_v41, 0.0 }
 0x309   :  { %v1908_v2 = vpop.f32.mrf.mxu2  ;;  %2373 = vmatmul.f32.gmra.mxu0 %v680_v36  ;;  %2582 = vmatmul.f32.gmra.mxu1 %v808_v30 }
 0x30a   :  { %v2117_v42 = vpop.f32.mrf.mxu3  ;;  %v1909_v20 = vadd.f32 %v1908_v2, %v14024_v53  ;;  %v7265_v2 = vld [vmem:[%s13744_s0 + $0x331] sm:$0xff] }
 0x30c   :  { %v2118_v40 = vadd.f32 %v2117_v42, %v1909_v20  ;;  %v682_v42 = vmax.f32 %v7265_v2, 0.0 }
 0x30e   :  { %v9478_v37 = vadd.f32 %v2326_v4, %v2118_v40  ;;  %1958 = vmatmul.f32.gmra.mxu2 %v807_v38  ;;  %v2329_v27 = vpop.f32.mrf.mxu0  ;;  %v7329_v38 = vld [vmem:[%s13744_s0 + $0x332] sm:$0xff] }
 0x30f   :  { %2167 = vmatmul.f32.gmra.mxu3 %v553_v17  ;;  %v810_v53 = vmax.f32 %v7329_v38, 0.0  ;;  %v7331_v38 = vld [vmem:[%s13744_s0 + $0x30] sm:$0xff] }
 0x310   :  { %14025 = vst [vmem:[#allocation32_spill] sm:$0xff] %v9478_v37 }
 0x311   :  { %v1911_v34 = vpop.f32.mrf.mxu2  ;;  %2376 = vmatmul.f32.gmra.mxu0 %v681_v5  ;;  %2585 = vmatmul.f32.gmra.mxu1 %v809_v49  ;;  %v14028_v5 = vld [vmem:[#allocation23_spill] sm:$0xff] }
 0x312   :  { %v2120_v50 = vpop.f32.mrf.mxu3  ;;  %v1912_v36 = vadd.f32 %v1911_v34, %v14026_v14  ;;  %v555_v34 = vmax.f32 %v7202_v16, 0.0  ;;  %v14030_v16 = vld [vmem:[#allocation24_spill] sm:$0xff] }
 0x314   :  { %v2121_v4 = vadd.f32 %v2120_v50, %v1912_v36  ;;  %v7266_v50 = vld [vmem:[%s13744_s0 + $0x339] sm:$0xff] }
 0x315   :  { %v683_v14 = vmax.f32 %v7266_v50, 0.0 }
 0x316   :  { %v9490_v20 = vadd.f32 %v2329_v27, %v2121_v4  ;;  %1961 = vmatmul.f32.gmra.mxu2 %v808_v30  ;;  %v2332_v17 = vpop.f32.mrf.mxu0  ;;  %v7330_v30 = vld [vmem:[%s13744_s0 + $0x33a] sm:$0xff]  ;;  %v7395_v4 = vld [vmem:[%s13744_s0 + $0x31] sm:$0xff] }
 0x317   :  { %2170 = vmatmul.f32.gmra.mxu3 %v554_v28  ;;  %v811_v36 = vmax.f32 %v7330_v30, 0.0  ;;  %v7332_v30 = vld [vmem:[%s13744_s0 + $0x38] sm:$0xff] }
 0x318   :  { %14027 = vst [vmem:[#allocation34_spill] sm:$0xff] %v9490_v20 }
 0x319   :  { %v1914_v18 = vpop.f32.mrf.mxu2  ;;  %2379 = vmatmul.f32.gmra.mxu0 %v682_v42  ;;  %2588 = vmatmul.f32.gmra.mxu1 %v810_v53 }
 0x31a   :  { %v2123_v40 = vpop.f32.mrf.mxu3  ;;  %v1915_v41 = vadd.f32 %v1914_v18, %v14028_v5 }
 0x31c   :  { %v2124_v27 = vadd.f32 %v2123_v40, %v1915_v41  ;;  %v877_v40 = vmax.f32 %v7331_v38, 0.0  ;;  %v14032_v38 = vld [vmem:[#allocation25_spill] sm:$0xff] }
 0x31e   :  { %v9502_v28 = vadd.f32 %v2332_v17, %v2124_v27  ;;  %1964 = vmatmul.f32.gmra.mxu2 %v809_v49  ;;  %v2335_v2 = vpop.f32.mrf.mxu0  ;;  %v1005_v17 = vmax.f32 %v7395_v4, 0.0  ;;  %v7459_v49 = vld [vmem:[%s13744_s0 + $0x32] sm:$0xff] }
 0x31f   :  { %2173 = vmatmul.f32.gmra.mxu3 %v555_v34  ;;  %v1133_v41 = vmax.f32 %v7459_v49, 0.0  ;;  %v7396_v27 = vld [vmem:[%s13744_s0 + $0x39] sm:$0xff]  ;;  %v7333_v49 = vld [vmem:[%s13744_s0 + $0x48] sm:$0xff] }
 0x320   :  { %14029 = vst [vmem:[#allocation35_spill] sm:$0xff] %v9502_v28 }
 0x321   :  { %v1917_v42 = vpop.f32.mrf.mxu2  ;;  %2382 = vmatmul.f32.gmra.mxu0 %v683_v14  ;;  %2591 = vmatmul.f32.gmra.mxu1 %v811_v36 }
 0x322   :  { %v2126_v53 = vpop.f32.mrf.mxu3  ;;  %v1918_v18 = vadd.f32 %v1917_v42, %v14030_v16  ;;  %v878_v42 = vmax.f32 %v7332_v30, 0.0 }
 0x324   :  { %v2127_v5 = vadd.f32 %v2126_v53, %v1918_v18  ;;  %v1006_v53 = vmax.f32 %v7396_v27, 0.0  ;;  %v14034_v27 = vld [vmem:[#allocation26_spill] sm:$0xff] }
 0x326   :  { %v9514_v34 = vadd.f32 %v2335_v2, %v2127_v5  ;;  %2611 = vmatmul.f32.vlgmr.msra.gmra.mxu2 %v877_v40  ;;  %v2338_v50 = vpop.f32.mrf.mxu0  ;;  %v7460_v2 = vld [vmem:[%s13744_s0 + $0x3a] sm:$0xff]  ;;  %v7397_v5 = vld [vmem:[%s13744_s0 + $0x49] sm:$0xff] }
 0x327   :  { %2820 = vmatmul.f32.vlgmr.msra.gmra.mxu3 %v1005_v17  ;;  %v1134_v18 = vmax.f32 %v7460_v2, 0.0 }
 0x328   :  { %14031 = vst [vmem:[#allocation37_spill] sm:$0xff] %v9514_v34  ;;  %v7384_v34 = vld [vmem:[%s13744_s0 + $0x2d8] sm:$0xff] }
 0x329   :  { %v1920_v14 = vpop.f32.mrf.mxu2  ;;  %3029 = vmatmul.f32.vlgmr.msra.gmra.mxu0 %v1133_v41 }
 0x32a   :  { %v2129_v36 = vpop.f32.mrf.mxu3  ;;  %v1921_v4 = vadd.f32 %v1920_v14, %v14032_v38  ;;  %v1007_v38 = vmax.f32 %v7397_v5, 0.0 }
 0x32c   :  { %v2130_v16 = vadd.f32 %v2129_v36, %v1921_v4  ;;  %v879_v36 = vmax.f32 %v7333_v49, 0.0 }
 0x32e   :  { %v9526_v40 = vadd.f32 %v2338_v50, %v2130_v16  ;;  %2614 = vmatmul.f32.gmra.mxu2 %v878_v42  ;;  %v2341_v17 = vpop.f32.mrf.mxu0  ;;  %v7461_v50 = vld [vmem:[%s13744_s0 + $0x4a] sm:$0xff] }
 0x32f   :  { %2823 = vmatmul.f32.gmra.mxu3 %v1006_v53  ;;  %v1135_v42 = vmax.f32 %v7461_v50, 0.0  ;;  %v7334_v16 = vld [vmem:[%s13744_s0 + $0x50] sm:$0xff] }
 0x330   :  { %14033 = vst [vmem:[#allocation38_spill] sm:$0xff] %v9526_v40 }
 0x331   :  { %v1923_v41 = vpop.f32.mrf.mxu2  ;;  %3032 = vmatmul.f32.gmra.mxu0 %v1134_v18  ;;  %v7398_v18 = vld [vmem:[%s13744_s0 + $0x51] sm:$0xff] }
 0x332   :  { %v2132_v30 = vpop.f32.mrf.mxu3  ;;  %v1924_v14 = vadd.f32 %v1923_v41, %v14034_v27  ;;  %v14036_v41 = vld [vmem:[#allocation27_spill] sm:$0xff] }
 0x334   :  { %v2133_v4 = vadd.f32 %v2132_v30, %v1924_v14  ;;  %v880_v30 = vmax.f32 %v7334_v16, 0.0  ;;  %v1008_v14 = vmax.f32 %v7398_v18, 0.0 }
 0x336   :  { %v9538_v53 = vadd.f32 %v2341_v17, %v2133_v4  ;;  %2617 = vmatmul.f32.gmra.mxu2 %v879_v36  ;;  %v2344_v2 = vpop.f32.mrf.mxu0  ;;  %v7462_v17 = vld [vmem:[%s13744_s0 + $0x52] sm:$0xff] }
 0x337   :  { %2826 = vmatmul.f32.gmra.mxu3 %v1007_v38  ;;  %v1136_v38 = vmax.f32 %v7462_v17, 0.0 }
 0x338   :  { %14035 = vst [vmem:[#allocation40_spill] sm:$0xff] %v9538_v53  ;;  %v7335_v53 = vld [vmem:[%s13744_s0 + $0x60] sm:$0xff] }
 0x339   :  { %v1926_v49 = vpop.f32.mrf.mxu2  ;;  %3035 = vmatmul.f32.gmra.mxu0 %v1135_v42  ;;  %v7399_v42 = vld [vmem:[%s13744_s0 + $0x61] sm:$0xff] }
 0x33a   :  { %v2135_v5 = vpop.f32.mrf.mxu3  ;;  %v1927_v27 = vadd.f32 %v1926_v49, %v14036_v41  ;;  %v14038_v49 = vld [vmem:[#allocation28_spill] sm:$0xff] }
 0x33c   :  { %v2136_v36 = vadd.f32 %v2135_v5, %v1927_v27  ;;  %v881_v5 = vmax.f32 %v7335_v53, 0.0  ;;  %v1009_v27 = vmax.f32 %v7399_v42, 0.0  ;;  %v7400_v53 = vld [vmem:[%s13744_s0 + $0x69] sm:$0xff] }
 0x33e   :  { %v9550_v50 = vadd.f32 %v2344_v2, %v2136_v36  ;;  %2620 = vmatmul.f32.gmra.mxu2 %v880_v30  ;;  %v2347_v4 = vpop.f32.mrf.mxu0  ;;  %v7463_v2 = vld [vmem:[%s13744_s0 + $0x62] sm:$0xff] }
 0x33f   :  { %2829 = vmatmul.f32.gmra.mxu3 %v1008_v14  ;;  %v1137_v14 = vmax.f32 %v7463_v2, 0.0 }
 0x340   :  { %14037 = vst [vmem:[#allocation41_spill] sm:$0xff] %v9550_v50  ;;  %v7336_v50 = vld [vmem:[%s13744_s0 + $0x68] sm:$0xff] }
 0x341   :  { %v1929_v16 = vpop.f32.mrf.mxu2  ;;  %3038 = vmatmul.f32.gmra.mxu0 %v1136_v38 }
 0x342   :  { %v2138_v18 = vpop.f32.mrf.mxu3  ;;  %v1930_v41 = vadd.f32 %v1929_v16, %v14038_v49  ;;  %v14040_v16 = vld [vmem:[#allocation29_spill] sm:$0xff] }
 0x344   :  { %v2139_v30 = vadd.f32 %v2138_v18, %v1930_v41  ;;  %v882_v18 = vmax.f32 %v7336_v50, 0.0  ;;  %v1010_v41 = vmax.f32 %v7400_v53, 0.0  ;;  %v7401_v50 = vld [vmem:[%s13744_s0 + $0x79] sm:$0xff] }
 0x346   :  { %v9562_v17 = vadd.f32 %v2347_v4, %v2139_v30  ;;  %2623 = vmatmul.f32.gmra.mxu2 %v881_v5  ;;  %v2350_v36 = vpop.f32.mrf.mxu0  ;;  %v7464_v4 = vld [vmem:[%s13744_s0 + $0x6a] sm:$0xff] }
 0x347   :  { %2832 = vmatmul.f32.gmra.mxu3 %v1009_v27  ;;  %v1138_v27 = vmax.f32 %v7464_v4, 0.0 }
 0x348   :  { %14039 = vst [vmem:[#allocation43_spill] sm:$0xff] %v9562_v17  ;;  %v7337_v17 = vld [vmem:[%s13744_s0 + $0x78] sm:$0xff] }
 0x349   :  { %v1932_v38 = vpop.f32.mrf.mxu2  ;;  %3041 = vmatmul.f32.gmra.mxu0 %v1137_v14 }
 0x34a   :  { %v2141_v42 = vpop.f32.mrf.mxu3  ;;  %v1933_v49 = vadd.f32 %v1932_v38, %v14040_v16  ;;  %v14042_v38 = vld [vmem:[#allocation30_spill] sm:$0xff] }
 0x34c   :  { %v2142_v5 = vadd.f32 %v2141_v42, %v1933_v49  ;;  %v883_v42 = vmax.f32 %v7337_v17, 0.0  ;;  %v1011_v49 = vmax.f32 %v7401_v50, 0.0  ;;  %v7402_v17 = vld [vmem:[%s13744_s0 + $0x81] sm:$0xff] }
 0x34e   :  { %v9574_v2 = vadd.f32 %v2350_v36, %v2142_v5  ;;  %2626 = vmatmul.f32.gmra.mxu2 %v882_v18  ;;  %v2353_v30 = vpop.f32.mrf.mxu0  ;;  %v7465_v36 = vld [vmem:[%s13744_s0 + $0x7a] sm:$0xff] }
 0x34f   :  { %2835 = vmatmul.f32.gmra.mxu3 %v1010_v41  ;;  %v1139_v41 = vmax.f32 %v7465_v36, 0.0 }
 0x350   :  { %14041 = vst [vmem:[#allocation44_spill] sm:$0xff] %v9574_v2  ;;  %v7338_v2 = vld [vmem:[%s13744_s0 + $0x80] sm:$0xff] }
 0x351   :  { %v1935_v14 = vpop.f32.mrf.mxu2  ;;  %3044 = vmatmul.f32.gmra.mxu0 %v1138_v27 }
 0x352   :  { %v2144_v53 = vpop.f32.mrf.mxu3  ;;  %v1936_v16 = vadd.f32 %v1935_v14, %v14042_v38  ;;  %v14044_v14 = vld [vmem:[#allocation31_spill] sm:$0xff] }
 0x354   :  { %v2145_v18 = vadd.f32 %v2144_v53, %v1936_v16  ;;  %v884_v53 = vmax.f32 %v7338_v2, 0.0  ;;  %v1012_v16 = vmax.f32 %v7402_v17, 0.0  ;;  %v7403_v2 = vld [vmem:[%s13744_s0 + $0x91] sm:$0xff] }
 0x356   :  { %v9586_v4 = vadd.f32 %v2353_v30, %v2145_v18  ;;  %2629 = vmatmul.f32.gmra.mxu2 %v883_v42  ;;  %v2356_v5 = vpop.f32.mrf.mxu0  ;;  %v7466_v30 = vld [vmem:[%s13744_s0 + $0x82] sm:$0xff] }
 0x357   :  { %2838 = vmatmul.f32.gmra.mxu3 %v1011_v49  ;;  %v1140_v49 = vmax.f32 %v7466_v30, 0.0 }
 0x358   :  { %14043 = vst [vmem:[#allocation46_spill] sm:$0xff] %v9586_v4  ;;  %v7339_v4 = vld [vmem:[%s13744_s0 + $0x90] sm:$0xff] }
 0x359   :  { %v1938_v27 = vpop.f32.mrf.mxu2  ;;  %3047 = vmatmul.f32.gmra.mxu0 %v1139_v41 }
 0x35a   :  { %v2147_v50 = vpop.f32.mrf.mxu3  ;;  %v1939_v38 = vadd.f32 %v1938_v27, %v14044_v14  ;;  %v14046_v27 = vld [vmem:[#allocation33_spill] sm:$0xff] }
 0x35c   :  { %v2148_v42 = vadd.f32 %v2147_v50, %v1939_v38  ;;  %v885_v50 = vmax.f32 %v7339_v4, 0.0  ;;  %v1013_v38 = vmax.f32 %v7403_v2, 0.0  ;;  %v7404_v4 = vld [vmem:[%s13744_s0 + $0x99] sm:$0xff] }
 0x35e   :  { %v9598_v36 = vadd.f32 %v2356_v5, %v2148_v42  ;;  %2632 = vmatmul.f32.gmra.mxu2 %v884_v53  ;;  %v2359_v18 = vpop.f32.mrf.mxu0  ;;  %v7467_v5 = vld [vmem:[%s13744_s0 + $0x92] sm:$0xff] }
 0x35f   :  { %2841 = vmatmul.f32.gmra.mxu3 %v1012_v16  ;;  %v1141_v16 = vmax.f32 %v7467_v5, 0.0 }
 0x360   :  { %14045 = vst [vmem:[#allocation47_spill] sm:$0xff] %v9598_v36  ;;  %v7340_v36 = vld [vmem:[%s13744_s0 + $0x98] sm:$0xff] }
 0x361   :  { %v1941_v41 = vpop.f32.mrf.mxu2  ;;  %3050 = vmatmul.f32.gmra.mxu0 %v1140_v49 }
 0x362   :  { %v2150_v17 = vpop.f32.mrf.mxu3  ;;  %v1942_v14 = vadd.f32 %v1941_v41, %v14046_v27  ;;  %v14048_v41 = vld [vmem:[#allocation36_spill] sm:$0xff] }
 0x364   :  { %v2151_v53 = vadd.f32 %v2150_v17, %v1942_v14  ;;  %v886_v17 = vmax.f32 %v7340_v36, 0.0  ;;  %v1014_v14 = vmax.f32 %v7404_v4, 0.0  ;;  %v7405_v36 = vld [vmem:[%s13744_s0 + $0xa9] sm:$0xff] }
 0x366   :  { %v9610_v30 = vadd.f32 %v2359_v18, %v2151_v53  ;;  %2635 = vmatmul.f32.gmra.mxu2 %v885_v50  ;;  %v2362_v42 = vpop.f32.mrf.mxu0  ;;  %v7468_v18 = vld [vmem:[%s13744_s0 + $0x9a] sm:$0xff] }
 0x367   :  { %2844 = vmatmul.f32.gmra.mxu3 %v1013_v38  ;;  %v1142_v38 = vmax.f32 %v7468_v18, 0.0 }
 0x368   :  { %14047 = vst [vmem:[#allocation49_spill] sm:$0xff] %v9610_v30  ;;  %v7341_v30 = vld [vmem:[%s13744_s0 + $0xa8] sm:$0xff] }
 0x369   :  { %v1944_v49 = vpop.f32.mrf.mxu2  ;;  %3053 = vmatmul.f32.gmra.mxu0 %v1141_v16 }
 0x36a   :  { %v2153_v2 = vpop.f32.mrf.mxu3  ;;  %v1945_v27 = vadd.f32 %v1944_v49, %v14048_v41  ;;  %v14050_v49 = vld [vmem:[#allocation39_spill] sm:$0xff] }
 0x36c   :  { %v2154_v50 = vadd.f32 %v2153_v2, %v1945_v27  ;;  %v887_v2 = vmax.f32 %v7341_v30, 0.0  ;;  %v1015_v27 = vmax.f32 %v7405_v36, 0.0  ;;  %v7406_v30 = vld [vmem:[%s13744_s0 + $0xb1] sm:$0xff] }
 0x36e   :  { %v9622_v5 = vadd.f32 %v2362_v42, %v2154_v50  ;;  %2638 = vmatmul.f32.gmra.mxu2 %v886_v17  ;;  %v2365_v53 = vpop.f32.mrf.mxu0  ;;  %v7469_v42 = vld [vmem:[%s13744_s0 + $0xaa] sm:$0xff] }
 0x36f   :  { %2847 = vmatmul.f32.gmra.mxu3 %v1014_v14  ;;  %v1143_v14 = vmax.f32 %v7469_v42, 0.0 }
 0x370   :  { %14049 = vst [vmem:[#allocation50_spill] sm:$0xff] %v9622_v5  ;;  %v7342_v5 = vld [vmem:[%s13744_s0 + $0xb0] sm:$0xff] }
 0x371   :  { %v1947_v16 = vpop.f32.mrf.mxu2  ;;  %3056 = vmatmul.f32.gmra.mxu0 %v1142_v38 }
 0x372   :  { %v2156_v4 = vpop.f32.mrf.mxu3  ;;  %v1948_v41 = vadd.f32 %v1947_v16, %v14050_v49  ;;  %v14052_v16 = vld [vmem:[#allocation42_spill] sm:$0xff] }
 0x374   :  { %v2157_v17 = vadd.f32 %v2156_v4, %v1948_v41  ;;  %v888_v4 = vmax.f32 %v7342_v5, 0.0  ;;  %v1016_v41 = vmax.f32 %v7406_v30, 0.0  ;;  %v7407_v5 = vld [vmem:[%s13744_s0 + $0xc1] sm:$0xff] }
 0x376   :  { %v9634_v18 = vadd.f32 %v2365_v53, %v2157_v17  ;;  %2641 = vmatmul.f32.gmra.mxu2 %v887_v2  ;;  %v2368_v50 = vpop.f32.mrf.mxu0  ;;  %v7470_v53 = vld [vmem:[%s13744_s0 + $0xb2] sm:$0xff] }
 0x377   :  { %2850 = vmatmul.f32.gmra.mxu3 %v1015_v27  ;;  %v1144_v27 = vmax.f32 %v7470_v53, 0.0 }
 0x378   :  { %14051 = vst [vmem:[#allocation52_spill] sm:$0xff] %v9634_v18  ;;  %v7343_v18 = vld [vmem:[%s13744_s0 + $0xc0] sm:$0xff] }
 0x379   :  { %v1950_v38 = vpop.f32.mrf.mxu2  ;;  %3059 = vmatmul.f32.gmra.mxu0 %v1143_v14 }
 0x37a   :  { %v2159_v36 = vpop.f32.mrf.mxu3  ;;  %v1951_v49 = vadd.f32 %v1950_v38, %v14052_v16  ;;  %v14054_v38 = vld [vmem:[#allocation45_spill] sm:$0xff] }
 0x37c   :  { %v2160_v2 = vadd.f32 %v2159_v36, %v1951_v49  ;;  %v889_v36 = vmax.f32 %v7343_v18, 0.0  ;;  %v1017_v49 = vmax.f32 %v7407_v5, 0.0  ;;  %v7408_v18 = vld [vmem:[%s13744_s0 + $0xc9] sm:$0xff] }
 0x37e   :  { %v9646_v42 = vadd.f32 %v2368_v50, %v2160_v2  ;;  %2644 = vmatmul.f32.gmra.mxu2 %v888_v4  ;;  %v2371_v17 = vpop.f32.mrf.mxu0  ;;  %v7471_v50 = vld [vmem:[%s13744_s0 + $0xc2] sm:$0xff] }
 0x37f   :  { %2853 = vmatmul.f32.gmra.mxu3 %v1016_v41  ;;  %v1145_v41 = vmax.f32 %v7471_v50, 0.0 }
 0x380   :  { %14053 = vst [vmem:[#allocation53_spill] sm:$0xff] %v9646_v42  ;;  %v7344_v42 = vld [vmem:[%s13744_s0 + $0xc8] sm:$0xff] }
 0x381   :  { %v1953_v14 = vpop.f32.mrf.mxu2  ;;  %3062 = vmatmul.f32.gmra.mxu0 %v1144_v27 }
 0x382   :  { %v2162_v30 = vpop.f32.mrf.mxu3  ;;  %v1954_v16 = vadd.f32 %v1953_v14, %v14054_v38  ;;  %v14056_v14 = vld [vmem:[#allocation48_spill] sm:$0xff] }
 0x384   :  { %v2163_v4 = vadd.f32 %v2162_v30, %v1954_v16  ;;  %v890_v30 = vmax.f32 %v7344_v42, 0.0  ;;  %v1018_v16 = vmax.f32 %v7408_v18, 0.0  ;;  %v7409_v42 = vld [vmem:[%s13744_s0 + $0xd9] sm:$0xff] }
 0x386   :  { %v9658_v53 = vadd.f32 %v2371_v17, %v2163_v4  ;;  %2647 = vmatmul.f32.gmra.mxu2 %v889_v36  ;;  %v2374_v2 = vpop.f32.mrf.mxu0  ;;  %v7472_v17 = vld [vmem:[%s13744_s0 + $0xca] sm:$0xff] }
 0x387   :  { %2856 = vmatmul.f32.gmra.mxu3 %v1017_v49  ;;  %v1146_v49 = vmax.f32 %v7472_v17, 0.0 }
 0x388   :  { %14055 = vst [vmem:[#allocation55_spill] sm:$0xff] %v9658_v53  ;;  %v7345_v53 = vld [vmem:[%s13744_s0 + $0xd8] sm:$0xff] }
 0x389   :  { %v1956_v27 = vpop.f32.mrf.mxu2  ;;  %3065 = vmatmul.f32.gmra.mxu0 %v1145_v41 }
 0x38a   :  { %v2165_v5 = vpop.f32.mrf.mxu3  ;;  %v1957_v38 = vadd.f32 %v1956_v27, %v14056_v14  ;;  %v14058_v27 = vld [vmem:[#allocation51_spill] sm:$0xff] }
 0x38c   :  { %v2166_v36 = vadd.f32 %v2165_v5, %v1957_v38  ;;  %v891_v5 = vmax.f32 %v7345_v53, 0.0  ;;  %v1019_v38 = vmax.f32 %v7409_v42, 0.0  ;;  %v7410_v53 = vld [vmem:[%s13744_s0 + $0xe1] sm:$0xff] }
 0x38e   :  { %v9670_v50 = vadd.f32 %v2374_v2, %v2166_v36  ;;  %2650 = vmatmul.f32.gmra.mxu2 %v890_v30  ;;  %v2377_v4 = vpop.f32.mrf.mxu0  ;;  %v7473_v2 = vld [vmem:[%s13744_s0 + $0xda] sm:$0xff] }
 0x38f   :  { %2859 = vmatmul.f32.gmra.mxu3 %v1018_v16  ;;  %v1147_v16 = vmax.f32 %v7473_v2, 0.0 }
 0x390   :  { %14057 = vst [vmem:[#allocation56_spill] sm:$0xff] %v9670_v50  ;;  %v7346_v50 = vld [vmem:[%s13744_s0 + $0xe0] sm:$0xff] }
 0x391   :  { %v1959_v41 = vpop.f32.mrf.mxu2  ;;  %3068 = vmatmul.f32.gmra.mxu0 %v1146_v49 }
 0x392   :  { %v2168_v18 = vpop.f32.mrf.mxu3  ;;  %v1960_v14 = vadd.f32 %v1959_v41, %v14058_v27  ;;  %v14060_v41 = vld [vmem:[#allocation54_spill] sm:$0xff] }
 0x394   :  { %v2169_v30 = vadd.f32 %v2168_v18, %v1960_v14  ;;  %v892_v18 = vmax.f32 %v7346_v50, 0.0  ;;  %v1020_v14 = vmax.f32 %v7410_v53, 0.0  ;;  %v7411_v50 = vld [vmem:[%s13744_s0 + $0xf1] sm:$0xff] }
 0x396   :  { %v9682_v17 = vadd.f32 %v2377_v4, %v2169_v30  ;;  %2653 = vmatmul.f32.gmra.mxu2 %v891_v5  ;;  %v2380_v36 = vpop.f32.mrf.mxu0  ;;  %v7474_v4 = vld [vmem:[%s13744_s0 + $0xe2] sm:$0xff] }
 0x397   :  { %2862 = vmatmul.f32.gmra.mxu3 %v1019_v38  ;;  %v1148_v38 = vmax.f32 %v7474_v4, 0.0 }
 0x398   :  { %14059 = vst [vmem:[#allocation9_spill] sm:$0xff] %v9682_v17  ;;  %v7347_v17 = vld [vmem:[%s13744_s0 + $0xf0] sm:$0xff] }
 0x399   :  { %v1962_v49 = vpop.f32.mrf.mxu2  ;;  %3071 = vmatmul.f32.gmra.mxu0 %v1147_v16 }
 0x39a   :  { %v2171_v42 = vpop.f32.mrf.mxu3  ;;  %v1963_v27 = vadd.f32 %v1962_v49, %v14060_v41  ;;  %v14062_v49 = vld [vmem:[#allocation57_spill] sm:$0xff] }
 0x39c   :  { %v2172_v5 = vadd.f32 %v2171_v42, %v1963_v27  ;;  %v893_v42 = vmax.f32 %v7347_v17, 0.0  ;;  %v1021_v27 = vmax.f32 %v7411_v50, 0.0  ;;  %v7412_v17 = vld [vmem:[%s13744_s0 + $0xf9] sm:$0xff] }
 0x39e   :  { %v9694_v2 = vadd.f32 %v2380_v36, %v2172_v5  ;;  %2656 = vmatmul.f32.gmra.mxu2 %v892_v18  ;;  %v2383_v30 = vpop.f32.mrf.mxu0  ;;  %v7475_v36 = vld [vmem:[%s13744_s0 + $0xf2] sm:$0xff] }
 0x39f   :  { %2865 = vmatmul.f32.gmra.mxu3 %v1020_v14  ;;  %v1149_v14 = vmax.f32 %v7475_v36, 0.0 }
 0x3a0   :  { %14061 = vst [vmem:[#allocation10_spill] sm:$0xff] %v9694_v2  ;;  %v7348_v2 = vld [vmem:[%s13744_s0 + $0xf8] sm:$0xff] }
 0x3a1   :  { %v1965_v16 = vpop.f32.mrf.mxu2  ;;  %3074 = vmatmul.f32.gmra.mxu0 %v1148_v38 }
 0x3a2   :  { %v2174_v53 = vpop.f32.mrf.mxu3  ;;  %v1966_v41 = vadd.f32 %v1965_v16, %v14062_v49  ;;  %v14064_v16 = vld [vmem:[#allocation58_spill] sm:$0xff] }
 0x3a4   :  { %v2175_v18 = vadd.f32 %v2174_v53, %v1966_v41  ;;  %v894_v53 = vmax.f32 %v7348_v2, 0.0  ;;  %v1022_v41 = vmax.f32 %v7412_v17, 0.0  ;;  %v7413_v2 = vld [vmem:[%s13744_s0 + $0x109] sm:$0xff] }
 0x3a6   :  { %v9706_v4 = vadd.f32 %v2383_v30, %v2175_v18  ;;  %2659 = vmatmul.f32.gmra.mxu2 %v893_v42  ;;  %v3030_v5 = vpop.f32.mrf.mxu0  ;;  %v7476_v30 = vld [vmem:[%s13744_s0 + $0xfa] sm:$0xff] }
 0x3a7   :  { %2868 = vmatmul.f32.gmra.mxu3 %v1021_v27  ;;  %v1150_v27 = vmax.f32 %v7476_v30, 0.0 }
 0x3a8   :  { %14063 = vst [vmem:[#allocation11_spill] sm:$0xff] %v9706_v4  ;;  %v7349_v4 = vld [vmem:[%s13744_s0 + $0x108] sm:$0xff] }
 0x3a9   :  { %v2612_v38 = vpop.f32.mrf.mxu2  ;;  %3077 = vmatmul.f32.gmra.mxu0 %v1149_v14 }
 0x3aa   :  { %v2821_v50 = vpop.f32.mrf.mxu3  ;;  %v2613_v49 = vadd.f32 %v2612_v38, %v14064_v16  ;;  %v1023_v16 = vmax.f32 %v7413_v2, 0.0 }
 0x3ac   :  { %v2822_v42 = vadd.f32 %v2821_v50, %v2613_v49  ;;  %v895_v50 = vmax.f32 %v7349_v4, 0.0 }
 0x3ae   :  { %v9718_v36 = vadd.f32 %v3030_v5, %v2822_v42  ;;  %2662 = vmatmul.f32.gmra.mxu2 %v894_v53  ;;  %v3033_v18 = vpop.f32.mrf.mxu0  ;;  %v7477_v5 = vld [vmem:[%s13744_s0 + $0x10a] sm:$0xff]  ;;  %v4437_v53 = vld [vmem:[#allocation3 + $0x78] sm:$0xff] }
 0x3af   :  { %2871 = vmatmul.f32.gmra.mxu3 %v1022_v41  ;;  %v1151_v41 = vmax.f32 %v7477_v5, 0.0  ;;  %4566 = vmatpush.msra.mxu1 %v4437_v53  ;;  %v7351_v53 = vld [vmem:[%s13744_s0 + $0x120] sm:$0xff] }
 0x3b0   :  { %14065 = vst [vmem:[#allocation12_spill] sm:$0xff] %v9718_v36 }
 0x3b1   :  { %v2615_v14 = vpop.f32.mrf.mxu2  ;;  %3080 = vmatmul.f32.gmra.mxu0 %v1150_v27  ;;  %v7350_v27 = vld [vmem:[%s13744_s0 + $0x110] sm:$0xff] }
 0x3b2   :  { %v2824_v17 = vpop.f32.mrf.mxu3  ;;  %v2616_v38 = vadd.f32 %v2615_v14, %v8841_v29  ;;  %v7414_v29 = vld [vmem:[%s13744_s0 + $0x111] sm:$0xff] }
 0x3b4   :  { %v2825_v49 = vadd.f32 %v2824_v17, %v2616_v38  ;;  %v896_v17 = vmax.f32 %v7350_v27, 0.0  ;;  %v1024_v38 = vmax.f32 %v7414_v29, 0.0 }
 0x3b6   :  { %v9730_v30 = vadd.f32 %v3033_v18, %v2825_v49  ;;  %2665 = vmatmul.f32.gmra.mxu2 %v895_v50  ;;  %v3036_v42 = vpop.f32.mrf.mxu0  ;;  %v7478_v18 = vld [vmem:[%s13744_s0 + $0x112] sm:$0xff] }
 0x3b7   :  { %2874 = vmatmul.f32.gmra.mxu3 %v1023_v16  ;;  %v1152_v16 = vmax.f32 %v7478_v18, 0.0 }
 0x3b8   :  { %14066 = vst [vmem:[#allocation13_spill] sm:$0xff] %v9730_v30 }
 0x3b9   :  { %v2618_v4 = vpop.f32.mrf.mxu2  ;;  %3083 = vmatmul.f32.gmra.mxu0 %v1151_v41 }
 0x3ba   :  { %v2827_v2 = vpop.f32.mrf.mxu3  ;;  %v2619_v14 = vadd.f32 %v2618_v4, %v8854_v57  ;;  %v7415_v57 = vld [vmem:[%s13744_s0 + $0x121] sm:$0xff]  ;;  %v897_v4 = vmax.f32 %v7351_v53, 0.0 }
 0x3bc   :  { %v2828_v50 = vadd.f32 %v2827_v2, %v2619_v14  ;;  %v1025_v2 = vmax.f32 %v7415_v57, 0.0 }
 0x3be   :  { %v9742_v5 = vadd.f32 %v3036_v42, %v2828_v50  ;;  %2668 = vmatmul.f32.gmra.mxu2 %v896_v17  ;;  %v3039_v49 = vpop.f32.mrf.mxu0  ;;  %v7479_v42 = vld [vmem:[%s13744_s0 + $0x122] sm:$0xff] }
 0x3bf   :  { %2877 = vmatmul.f32.gmra.mxu3 %v1024_v38  ;;  %v1153_v17 = vmax.f32 %v7479_v42, 0.0  ;;  %v7352_v50 = vld [vmem:[%s13744_s0 + $0x128] sm:$0xff] }
 0x3c0   :  { %14067 = vst [vmem:[#allocation14_spill] sm:$0xff] %v9742_v5 }
 0x3c1   :  { %v2621_v41 = vpop.f32.mrf.mxu2  ;;  %3086 = vmatmul.f32.gmra.mxu0 %v1152_v16 }
 0x3c2   :  { %v2830_v27 = vpop.f32.mrf.mxu3  ;;  %v2622_v29 = vadd.f32 %v2621_v41, %v8870_v63  ;;  %v7416_v63 = vld [vmem:[%s13744_s0 + $0x129] sm:$0xff]  ;;  %v898_v41 = vmax.f32 %v7352_v50, 0.0 }
 0x3c4   :  { %v2831_v14 = vadd.f32 %v2830_v27, %v2622_v29  ;;  %v1026_v27 = vmax.f32 %v7416_v63, 0.0 }
 0x3c6   :  { %v9754_v38 = vadd.f32 %v3039_v49, %v2831_v14  ;;  %2671 = vmatmul.f32.gmra.mxu2 %v897_v4  ;;  %v3042_v18 = vpop.f32.mrf.mxu0  ;;  %v7480_v49 = vld [vmem:[%s13744_s0 + $0x12a] sm:$0xff]  ;;  %v7353_v14 = vld [vmem:[%s13744_s0 + $0x138] sm:$0xff] }
 0x3c7   :  { %2880 = vmatmul.f32.gmra.mxu3 %v1025_v2  ;;  %v1154_v4 = vmax.f32 %v7480_v49, 0.0 }
 0x3c8   :  { %14068 = vst [vmem:[#allocation15_spill] sm:$0xff] %v9754_v38 }
 0x3c9   :  { %v2624_v16 = vpop.f32.mrf.mxu2  ;;  %3089 = vmatmul.f32.gmra.mxu0 %v1153_v17 }
 0x3ca   :  { %v2833_v53 = vpop.f32.mrf.mxu3  ;;  %v2625_v57 = vadd.f32 %v2624_v16, %v8886_v58  ;;  %v7417_v58 = vld [vmem:[%s13744_s0 + $0x139] sm:$0xff]  ;;  %v899_v16 = vmax.f32 %v7353_v14, 0.0 }
 0x3cc   :  { %v2834_v29 = vadd.f32 %v2833_v53, %v2625_v57  ;;  %v1027_v53 = vmax.f32 %v7417_v58, 0.0 }
 0x3ce   :  { %v9766_v2 = vadd.f32 %v3042_v18, %v2834_v29  ;;  %2674 = vmatmul.f32.gmra.mxu2 %v898_v41  ;;  %v3045_v42 = vpop.f32.mrf.mxu0  ;;  %v7481_v18 = vld [vmem:[%s13744_s0 + $0x13a] sm:$0xff]  ;;  %v4436_v41 = vld [vmem:[#allocation3 + $0x70] sm:$0xff] }
 0x3cf   :  { %2883 = vmatmul.f32.gmra.mxu3 %v1026_v27  ;;  %v1155_v27 = vmax.f32 %v7481_v18, 0.0  ;;  %4567 = vmatpush.msra.mxu1 %v4436_v41  ;;  %v7355_v41 = vld [vmem:[%s13744_s0 + $0x150] sm:$0xff] }
 0x3d0   :  { %14069 = vst [vmem:[#allocation16_spill] sm:$0xff] %v9766_v2  ;;  %v3297_v37 = vmul.f32 %v9766_v2, %v9766_v2 }
 0x3d1   :  { %v2627_v17 = vpop.f32.mrf.mxu2  ;;  %3092 = vmatmul.f32.gmra.mxu0 %v1154_v4  ;;  %v7354_v4 = vld [vmem:[%s13744_s0 + $0x140] sm:$0xff] }
 0x3d2   :  { %v2836_v50 = vpop.f32.mrf.mxu3  ;;  %v2628_v63 = vadd.f32 %v2627_v17, %v8902_v0  ;;  %v7418_v0 = vld [vmem:[%s13744_s0 + $0x141] sm:$0xff] }
 0x3d4   :  { %v2837_v57 = vadd.f32 %v2836_v50, %v2628_v63  ;;  %v900_v50 = vmax.f32 %v7354_v4, 0.0  ;;  %v1028_v63 = vmax.f32 %v7418_v0, 0.0 }
 0x3d6   :  { %v9778_v49 = vadd.f32 %v3045_v42, %v2837_v57  ;;  %2677 = vmatmul.f32.gmra.mxu2 %v899_v16  ;;  %v3048_v29 = vpop.f32.mrf.mxu0  ;;  %v7482_v42 = vld [vmem:[%s13744_s0 + $0x142] sm:$0xff] }
 0x3d7   :  { %2886 = vmatmul.f32.gmra.mxu3 %v1027_v53  ;;  %v1156_v53 = vmax.f32 %v7482_v42, 0.0 }
 0x3d8   :  { %14070 = vst [vmem:[#allocation17_spill] sm:$0xff] %v9778_v49 }
 0x3d9   :  { %v2630_v14 = vpop.f32.mrf.mxu2  ;;  %3095 = vmatmul.f32.gmra.mxu0 %v1155_v27 }
 0x3da   :  { %v2839_v58 = vpop.f32.mrf.mxu3  ;;  %v2631_v17 = vadd.f32 %v2630_v14, %v8915_v51  ;;  %v7419_v51 = vld [vmem:[%s13744_s0 + $0x151] sm:$0xff]  ;;  %v901_v14 = vmax.f32 %v7355_v41, 0.0 }
 0x3dc   :  { %v2840_v16 = vadd.f32 %v2839_v58, %v2631_v17  ;;  %v1029_v58 = vmax.f32 %v7419_v51, 0.0 }
 0x3de   :  { %v9790_v18 = vadd.f32 %v3048_v29, %v2840_v16  ;;  %2680 = vmatmul.f32.gmra.mxu2 %v900_v50  ;;  %v3051_v57 = vpop.f32.mrf.mxu0  ;;  %v7483_v29 = vld [vmem:[%s13744_s0 + $0x152] sm:$0xff] }
 0x3df   :  { %2889 = vmatmul.f32.gmra.mxu3 %v1028_v63  ;;  %v1157_v50 = vmax.f32 %v7483_v29, 0.0  ;;  %v7356_v16 = vld [vmem:[%s13744_s0 + $0x158] sm:$0xff] }
 0x3e0   :  { %14071 = vst [vmem:[#allocation18_spill] sm:$0xff] %v9790_v18 }
 0x3e1   :  { %v2633_v27 = vpop.f32.mrf.mxu2  ;;  %3098 = vmatmul.f32.gmra.mxu0 %v1156_v53 }
 0x3e2   :  { %v2842_v4 = vpop.f32.mrf.mxu3  ;;  %v2634_v0 = vadd.f32 %v2633_v27, %v8931_v59  ;;  %v7420_v59 = vld [vmem:[%s13744_s0 + $0x159] sm:$0xff]  ;;  %v902_v27 = vmax.f32 %v7356_v16, 0.0 }
 0x3e4   :  { %v2843_v17 = vadd.f32 %v2842_v4, %v2634_v0  ;;  %v1030_v4 = vmax.f32 %v7420_v59, 0.0 }
 0x3e6   :  { %v9802_v63 = vadd.f32 %v3051_v57, %v2843_v17  ;;  %2683 = vmatmul.f32.gmra.mxu2 %v901_v14  ;;  %v3054_v42 = vpop.f32.mrf.mxu0  ;;  %v7484_v57 = vld [vmem:[%s13744_s0 + $0x15a] sm:$0xff]  ;;  %v7357_v17 = vld [vmem:[%s13744_s0 + $0x168] sm:$0xff] }
 0x3e7   :  { %2892 = vmatmul.f32.gmra.mxu3 %v1029_v58  ;;  %v1158_v14 = vmax.f32 %v7484_v57, 0.0 }
 0x3e8   :  { %14072 = vst [vmem:[#allocation19_spill] sm:$0xff] %v9802_v63 }
 0x3e9   :  { %v2636_v53 = vpop.f32.mrf.mxu2  ;;  %3101 = vmatmul.f32.gmra.mxu0 %v1157_v50 }
 0x3ea   :  { %v2845_v41 = vpop.f32.mrf.mxu3  ;;  %v2637_v51 = vadd.f32 %v2636_v53, %v8947_v6  ;;  %v7421_v6 = vld [vmem:[%s13744_s0 + $0x169] sm:$0xff]  ;;  %v903_v53 = vmax.f32 %v7357_v17, 0.0 }
 0x3ec   :  { %v2846_v0 = vadd.f32 %v2845_v41, %v2637_v51  ;;  %v1031_v41 = vmax.f32 %v7421_v6, 0.0 }
 0x3ee   :  { %v9814_v58 = vadd.f32 %v3054_v42, %v2846_v0  ;;  %2686 = vmatmul.f32.gmra.mxu2 %v902_v27  ;;  %v3057_v29 = vpop.f32.mrf.mxu0  ;;  %v7485_v42 = vld [vmem:[%s13744_s0 + $0x16a] sm:$0xff] }
 0x3ef   :  { %2895 = vmatmul.f32.gmra.mxu3 %v1030_v4  ;;  %v4435_v27 = vld [vmem:[#allocation3 + $0x68] sm:$0xff]  ;;  %v1159_v4 = vmax.f32 %v7485_v42, 0.0 }
 0x3f0   :  { %14073 = vst [vmem:[#allocation20_spill] sm:$0xff] %v9814_v58  ;;  %4568 = vmatpush.msra.mxu1 %v4435_v27  ;;  %v7359_v27 = vld [vmem:[%s13744_s0 + $0x180] sm:$0xff] }
 0x3f1   :  { %v2639_v50 = vpop.f32.mrf.mxu2  ;;  %3104 = vmatmul.f32.gmra.mxu0 %v1158_v14  ;;  %v7358_v14 = vld [vmem:[%s13744_s0 + $0x170] sm:$0xff] }
 0x3f2   :  { %v2848_v16 = vpop.f32.mrf.mxu3  ;;  %v2640_v59 = vadd.f32 %v2639_v50, %v8963_v47  ;;  %v7422_v47 = vld [vmem:[%s13744_s0 + $0x171] sm:$0xff] }
 0x3f4   :  { %v2849_v51 = vadd.f32 %v2848_v16, %v2640_v59  ;;  %v904_v16 = vmax.f32 %v7358_v14, 0.0  ;;  %v1032_v59 = vmax.f32 %v7422_v47, 0.0 }
 0x3f6   :  { %v9826_v57 = vadd.f32 %v3057_v29, %v2849_v51  ;;  %2689 = vmatmul.f32.gmra.mxu2 %v903_v53  ;;  %v3060_v0 = vpop.f32.mrf.mxu0  ;;  %v7486_v29 = vld [vmem:[%s13744_s0 + $0x172] sm:$0xff] }
 0x3f7   :  { %2898 = vmatmul.f32.gmra.mxu3 %v1031_v41  ;;  %v1160_v41 = vmax.f32 %v7486_v29, 0.0 }
 0x3f8   :  { %14074 = vst [vmem:[#allocation21_spill] sm:$0xff] %v9826_v57 }
 0x3f9   :  { %v2642_v17 = vpop.f32.mrf.mxu2  ;;  %3107 = vmatmul.f32.gmra.mxu0 %v1159_v4 }
 0x3fa   :  { %v2851_v6 = vpop.f32.mrf.mxu3  ;;  %v2643_v50 = vadd.f32 %v2642_v17, %v8976_v7  ;;  %v7423_v7 = vld [vmem:[%s13744_s0 + $0x181] sm:$0xff]  ;;  %v905_v17 = vmax.f32 %v7359_v27, 0.0 }
 0x3fc   :  { %v2852_v53 = vadd.f32 %v2851_v6, %v2643_v50  ;;  %v1033_v6 = vmax.f32 %v7423_v7, 0.0 }
 0x3fe   :  { %v9838_v42 = vadd.f32 %v3060_v0, %v2852_v53  ;;  %2692 = vmatmul.f32.gmra.mxu2 %v904_v16  ;;  %v3063_v51 = vpop.f32.mrf.mxu0  ;;  %v7487_v0 = vld [vmem:[%s13744_s0 + $0x182] sm:$0xff] }
 0x3ff   :  { %2901 = vmatmul.f32.gmra.mxu3 %v1032_v59  ;;  %v1161_v16 = vmax.f32 %v7487_v0, 0.0  ;;  %v7360_v53 = vld [vmem:[%s13744_s0 + $0x188] sm:$0xff] }
 0x400   :  { %14075 = vst [vmem:[#allocation22_spill] sm:$0xff] %v9838_v42 }
 0x401   :  { %v2645_v4 = vpop.f32.mrf.mxu2  ;;  %3110 = vmatmul.f32.gmra.mxu0 %v1160_v41 }
 0x402   :  { %v2854_v14 = vpop.f32.mrf.mxu3  ;;  %v2646_v47 = vadd.f32 %v2645_v4, %v8992_v13  ;;  %v7424_v13 = vld [vmem:[%s13744_s0 + $0x189] sm:$0xff]  ;;  %v906_v4 = vmax.f32 %v7360_v53, 0.0 }
 0x404   :  { %v2855_v50 = vadd.f32 %v2854_v14, %v2646_v47  ;;  %v1034_v14 = vmax.f32 %v7424_v13, 0.0 }
 0x406   :  { %v9850_v59 = vadd.f32 %v3063_v51, %v2855_v50  ;;  %2695 = vmatmul.f32.gmra.mxu2 %v905_v17  ;;  %v3066_v29 = vpop.f32.mrf.mxu0  ;;  %v7488_v51 = vld [vmem:[%s13744_s0 + $0x18a] sm:$0xff]  ;;  %v7361_v50 = vld [vmem:[%s13744_s0 + $0x198] sm:$0xff] }
 0x407   :  { %2904 = vmatmul.f32.gmra.mxu3 %v1033_v6  ;;  %v1162_v17 = vmax.f32 %v7488_v51, 0.0 }
 0x408   :  { %14076 = vst [vmem:[#allocation23_spill] sm:$0xff] %v9850_v59 }
 0x409   :  { %v2648_v41 = vpop.f32.mrf.mxu2  ;;  %3113 = vmatmul.f32.gmra.mxu0 %v1161_v16 }
 0x40a   :  { %v2857_v27 = vpop.f32.mrf.mxu3  ;;  %v2649_v7 = vadd.f32 %v2648_v41, %v9008_v19  ;;  %v7425_v19 = vld [vmem:[%s13744_s0 + $0x199] sm:$0xff]  ;;  %v907_v41 = vmax.f32 %v7361_v50, 0.0 }
 0x40c   :  { %v2858_v47 = vadd.f32 %v2857_v27, %v2649_v7  ;;  %v1035_v27 = vmax.f32 %v7425_v19, 0.0 }
 0x40e   :  { %v9862_v6 = vadd.f32 %v3066_v29, %v2858_v47  ;;  %2698 = vmatmul.f32.gmra.mxu2 %v906_v4  ;;  %v3069_v0 = vpop.f32.mrf.mxu0  ;;  %v7489_v29 = vld [vmem:[%s13744_s0 + $0x19a] sm:$0xff] }
 0x40f   :  { %2907 = vmatmul.f32.gmra.mxu3 %v1034_v14  ;;  %v4434_v4 = vld [vmem:[#allocation3 + $0x60] sm:$0xff]  ;;  %v1163_v14 = vmax.f32 %v7489_v29, 0.0 }
 0x410   :  { %14077 = vst [vmem:[#allocation24_spill] sm:$0xff] %v9862_v6  ;;  %4569 = vmatpush.msra.mxu1 %v4434_v4  ;;  %v7363_v4 = vld [vmem:[%s13744_s0 + $0x1e0] sm:$0xff] }
 0x411   :  { %v2651_v16 = vpop.f32.mrf.mxu2  ;;  %3116 = vmatmul.f32.gmra.mxu0 %v1162_v17  ;;  %v7362_v17 = vld [vmem:[%s13744_s0 + $0x1a0] sm:$0xff] }
 0x412   :  { %v2860_v53 = vpop.f32.mrf.mxu3  ;;  %v2652_v13 = vadd.f32 %v2651_v16, %v9024_v39  ;;  %v7426_v39 = vld [vmem:[%s13744_s0 + $0x1a1] sm:$0xff] }
 0x414   :  { %v2861_v7 = vadd.f32 %v2860_v53, %v2652_v13  ;;  %v908_v53 = vmax.f32 %v7362_v17, 0.0  ;;  %v1036_v13 = vmax.f32 %v7426_v39, 0.0 }
 0x416   :  { %v9874_v51 = vadd.f32 %v3069_v0, %v2861_v7  ;;  %2701 = vmatmul.f32.gmra.mxu2 %v907_v41  ;;  %v3072_v47 = vpop.f32.mrf.mxu0  ;;  %v7490_v0 = vld [vmem:[%s13744_s0 + $0x1a2] sm:$0xff] }
 0x417   :  { %2910 = vmatmul.f32.gmra.mxu3 %v1035_v27  ;;  %v1164_v27 = vmax.f32 %v7490_v0, 0.0 }
 0x418   :  { %14078 = vst [vmem:[#allocation25_spill] sm:$0xff] %v9874_v51 }
 0x419   :  { %v2654_v50 = vpop.f32.mrf.mxu2  ;;  %3119 = vmatmul.f32.gmra.mxu0 %v1163_v14 }
 0x41a   :  { %v2863_v19 = vpop.f32.mrf.mxu3  ;;  %v2655_v16 = vadd.f32 %v2654_v50, %v9040_v61  ;;  %v7427_v61 = vld [vmem:[%s13744_s0 + $0x1e1] sm:$0xff]  ;;  %v909_v50 = vmax.f32 %v7363_v4, 0.0 }
 0x41c   :  { %v2864_v41 = vadd.f32 %v2863_v19, %v2655_v16  ;;  %v1037_v19 = vmax.f32 %v7427_v61, 0.0 }
 0x41e   :  { %v9886_v29 = vadd.f32 %v3072_v47, %v2864_v41  ;;  %2704 = vmatmul.f32.gmra.mxu2 %v908_v53  ;;  %v3075_v7 = vpop.f32.mrf.mxu0  ;;  %v7491_v47 = vld [vmem:[%s13744_s0 + $0x1e2] sm:$0xff] }
 0x41f   :  { %2913 = vmatmul.f32.gmra.mxu3 %v1036_v13  ;;  %v1165_v53 = vmax.f32 %v7491_v47, 0.0  ;;  %v7364_v41 = vld [vmem:[%s13744_s0 + $0x1e8] sm:$0xff] }
 0x420   :  { %14079 = vst [vmem:[#allocation26_spill] sm:$0xff] %v9886_v29 }
 0x421   :  { %v2657_v14 = vpop.f32.mrf.mxu2  ;;  %3122 = vmatmul.f32.gmra.mxu0 %v1164_v27 }
 0x422   :  { %v2866_v17 = vpop.f32.mrf.mxu3  ;;  %v2658_v39 = vadd.f32 %v2657_v14, %v9059_v32  ;;  %v7428_v32 = vld [vmem:[%s13744_s0 + $0x1e9] sm:$0xff]  ;;  %v910_v14 = vmax.f32 %v7364_v41, 0.0 }
 0x424   :  { %v2867_v16 = vadd.f32 %v2866_v17, %v2658_v39  ;;  %v1038_v17 = vmax.f32 %v7428_v32, 0.0 }
 0x426   :  { %v9898_v13 = vadd.f32 %v3075_v7, %v2867_v16  ;;  %2707 = vmatmul.f32.gmra.mxu2 %v909_v50  ;;  %v3078_v0 = vpop.f32.mrf.mxu0  ;;  %v7492_v7 = vld [vmem:[%s13744_s0 + $0x1ea] sm:$0xff]  ;;  %v7365_v16 = vld [vmem:[%s13744_s0 + $0x1f8] sm:$0xff] }
 0x427   :  { %2916 = vmatmul.f32.gmra.mxu3 %v1037_v19  ;;  %v1166_v50 = vmax.f32 %v7492_v7, 0.0 }
 0x428   :  { %14080 = vst [vmem:[#allocation27_spill] sm:$0xff] %v9898_v13 }
 0x429   :  { %v2660_v27 = vpop.f32.mrf.mxu2  ;;  %3125 = vmatmul.f32.gmra.mxu0 %v1165_v53 }
 0x42a   :  { %v2869_v4 = vpop.f32.mrf.mxu3  ;;  %v2661_v61 = vadd.f32 %v2660_v27, %v9075_v12  ;;  %v7429_v12 = vld [vmem:[%s13744_s0 + $0x1f9] sm:$0xff]  ;;  %v911_v27 = vmax.f32 %v7365_v16, 0.0 }
 0x42c   :  { %v2870_v39 = vadd.f32 %v2869_v4, %v2661_v61  ;;  %v1039_v4 = vmax.f32 %v7429_v12, 0.0 }
 0x42e   :  { %v9910_v19 = vadd.f32 %v3078_v0, %v2870_v39  ;;  %2710 = vmatmul.f32.gmra.mxu2 %v910_v14  ;;  %v3081_v47 = vpop.f32.mrf.mxu0  ;;  %v7493_v0 = vld [vmem:[%s13744_s0 + $0x1fa] sm:$0xff] }
 0x42f   :  { %2919 = vmatmul.f32.gmra.mxu3 %v1038_v17  ;;  %v4433_v14 = vld [vmem:[#allocation3 + $0x58] sm:$0xff]  ;;  %v1167_v17 = vmax.f32 %v7493_v0, 0.0 }
 0x430   :  { %14081 = vst [vmem:[#allocation28_spill] sm:$0xff] %v9910_v19  ;;  %4570 = vmatpush.msra.mxu1 %v4433_v14  ;;  %v7367_v14 = vld [vmem:[%s13744_s0 + $0x210] sm:$0xff] }
 0x431   :  { %v2663_v53 = vpop.f32.mrf.mxu2  ;;  %3128 = vmatmul.f32.gmra.mxu0 %v1166_v50  ;;  %v7366_v50 = vld [vmem:[%s13744_s0 + $0x200] sm:$0xff] }
 0x432   :  { %v2872_v41 = vpop.f32.mrf.mxu3  ;;  %v2664_v32 = vadd.f32 %v2663_v53, %v9091_v45  ;;  %v7430_v45 = vld [vmem:[%s13744_s0 + $0x201] sm:$0xff] }
 0x434   :  { %v2873_v61 = vadd.f32 %v2872_v41, %v2664_v32  ;;  %v912_v41 = vmax.f32 %v7366_v50, 0.0  ;;  %v1040_v32 = vmax.f32 %v7430_v45, 0.0 }
 0x436   :  { %v9922_v7 = vadd.f32 %v3081_v47, %v2873_v61  ;;  %2713 = vmatmul.f32.gmra.mxu2 %v911_v27  ;;  %v3084_v39 = vpop.f32.mrf.mxu0  ;;  %v7494_v47 = vld [vmem:[%s13744_s0 + $0x202] sm:$0xff] }
 0x437   :  { %2922 = vmatmul.f32.gmra.mxu3 %v1039_v4  ;;  %v1168_v4 = vmax.f32 %v7494_v47, 0.0 }
 0x438   :  { %14082 = vst [vmem:[#allocation29_spill] sm:$0xff] %v9922_v7 }
 0x439   :  { %v2666_v16 = vpop.f32.mrf.mxu2  ;;  %3131 = vmatmul.f32.gmra.mxu0 %v1167_v17 }
 0x43a   :  { %v2875_v12 = vpop.f32.mrf.mxu3  ;;  %v2667_v53 = vadd.f32 %v2666_v16, %v9104_v48  ;;  %v7431_v48 = vld [vmem:[%s13744_s0 + $0x211] sm:$0xff]  ;;  %v913_v16 = vmax.f32 %v7367_v14, 0.0 }
 0x43c   :  { %v2876_v27 = vadd.f32 %v2875_v12, %v2667_v53  ;;  %v1041_v12 = vmax.f32 %v7431_v48, 0.0 }
 0x43e   :  { %v9934_v0 = vadd.f32 %v3084_v39, %v2876_v27  ;;  %2716 = vmatmul.f32.gmra.mxu2 %v912_v41  ;;  %v3087_v61 = vpop.f32.mrf.mxu0  ;;  %v7495_v39 = vld [vmem:[%s13744_s0 + $0x212] sm:$0xff] }
 0x43f   :  { %2925 = vmatmul.f32.gmra.mxu3 %v1040_v32  ;;  %v1169_v41 = vmax.f32 %v7495_v39, 0.0  ;;  %v7368_v27 = vld [vmem:[%s13744_s0 + $0x218] sm:$0xff] }
 0x440   :  { %14083 = vst [vmem:[#allocation30_spill] sm:$0xff] %v9934_v0 }
 0x441   :  { %v2669_v17 = vpop.f32.mrf.mxu2  ;;  %3134 = vmatmul.f32.gmra.mxu0 %v1168_v4 }
 0x442   :  { %v2878_v50 = vpop.f32.mrf.mxu3  ;;  %v2670_v45 = vadd.f32 %v2669_v17, %v9120_v35  ;;  %v7432_v35 = vld [vmem:[%s13744_s0 + $0x219] sm:$0xff]  ;;  %v914_v17 = vmax.f32 %v7368_v27, 0.0 }
 0x444   :  { %v2879_v53 = vadd.f32 %v2878_v50, %v2670_v45  ;;  %v1042_v50 = vmax.f32 %v7432_v35, 0.0 }
 0x446   :  { %v9946_v32 = vadd.f32 %v3087_v61, %v2879_v53  ;;  %2719 = vmatmul.f32.gmra.mxu2 %v913_v16  ;;  %v3090_v47 = vpop.f32.mrf.mxu0  ;;  %v7496_v61 = vld [vmem:[%s13744_s0 + $0x21a] sm:$0xff]  ;;  %v7369_v53 = vld [vmem:[%s13744_s0 + $0x228] sm:$0xff] }
 0x447   :  { %2928 = vmatmul.f32.gmra.mxu3 %v1041_v12  ;;  %v1170_v16 = vmax.f32 %v7496_v61, 0.0 }
 0x448   :  { %14084 = vst [vmem:[#allocation31_spill] sm:$0xff] %v9946_v32 }
 0x449   :  { %v2672_v4 = vpop.f32.mrf.mxu2  ;;  %3137 = vmatmul.f32.gmra.mxu0 %v1169_v41 }
 0x44a   :  { %v2881_v14 = vpop.f32.mrf.mxu3  ;;  %v2673_v48 = vadd.f32 %v2672_v4, %v9136_v62  ;;  %v7433_v62 = vld [vmem:[%s13744_s0 + $0x229] sm:$0xff]  ;;  %v915_v4 = vmax.f32 %v7369_v53, 0.0 }
 0x44c   :  { %v2882_v45 = vadd.f32 %v2881_v14, %v2673_v48  ;;  %v1043_v14 = vmax.f32 %v7433_v62, 0.0 }
 0x44e   :  { %v9958_v12 = vadd.f32 %v3090_v47, %v2882_v45  ;;  %2722 = vmatmul.f32.gmra.mxu2 %v914_v17  ;;  %v3093_v39 = vpop.f32.mrf.mxu0  ;;  %v7497_v47 = vld [vmem:[%s13744_s0 + $0x22a] sm:$0xff] }
 0x44f   :  { %2931 = vmatmul.f32.gmra.mxu3 %v1042_v50  ;;  %v4432_v17 = vld [vmem:[#allocation3 + $0x50] sm:$0xff]  ;;  %v1171_v50 = vmax.f32 %v7497_v47, 0.0 }
 0x450   :  { %14085 = vst [vmem:[#allocation33_spill] sm:$0xff] %v9958_v12  ;;  %4571 = vmatpush.msra.mxu1 %v4432_v17  ;;  %v7371_v17 = vld [vmem:[%s13744_s0 + $0x240] sm:$0xff] }
 0x451   :  { %v2675_v41 = vpop.f32.mrf.mxu2  ;;  %3140 = vmatmul.f32.gmra.mxu0 %v1170_v16  ;;  %v7370_v16 = vld [vmem:[%s13744_s0 + $0x230] sm:$0xff] }
 0x452   :  { %v2884_v27 = vpop.f32.mrf.mxu3  ;;  %v2676_v35 = vadd.f32 %v2675_v41, %v9152_v11  ;;  %v7434_v11 = vld [vmem:[%s13744_s0 + $0x231] sm:$0xff] }
 0x454   :  { %v2885_v48 = vadd.f32 %v2884_v27, %v2676_v35  ;;  %v916_v27 = vmax.f32 %v7370_v16, 0.0  ;;  %v1044_v35 = vmax.f32 %v7434_v11, 0.0 }
 0x456   :  { %v9970_v61 = vadd.f32 %v3093_v39, %v2885_v48  ;;  %2725 = vmatmul.f32.gmra.mxu2 %v915_v4  ;;  %v3096_v45 = vpop.f32.mrf.mxu0  ;;  %v7498_v39 = vld [vmem:[%s13744_s0 + $0x232] sm:$0xff] }
 0x457   :  { %2934 = vmatmul.f32.gmra.mxu3 %v1043_v14  ;;  %v1172_v14 = vmax.f32 %v7498_v39, 0.0 }
 0x458   :  { %14086 = vst [vmem:[#allocation36_spill] sm:$0xff] %v9970_v61 }
 0x459   :  { %v2678_v53 = vpop.f32.mrf.mxu2  ;;  %3143 = vmatmul.f32.gmra.mxu0 %v1171_v50 }
 0x45a   :  { %v2887_v62 = vpop.f32.mrf.mxu3  ;;  %v2679_v41 = vadd.f32 %v2678_v53, %v9165_v10  ;;  %v7435_v10 = vld [vmem:[%s13744_s0 + $0x241] sm:$0xff]  ;;  %v917_v53 = vmax.f32 %v7371_v17, 0.0 }
 0x45c   :  { %v2888_v4 = vadd.f32 %v2887_v62, %v2679_v41  ;;  %v1045_v62 = vmax.f32 %v7435_v10, 0.0 }
 0x45e   :  { %v9982_v47 = vadd.f32 %v3096_v45, %v2888_v4  ;;  %2728 = vmatmul.f32.gmra.mxu2 %v916_v27  ;;  %v3099_v48 = vpop.f32.mrf.mxu0  ;;  %v7499_v45 = vld [vmem:[%s13744_s0 + $0x242] sm:$0xff] }
 0x45f   :  { %2937 = vmatmul.f32.gmra.mxu3 %v1044_v35  ;;  %v1173_v27 = vmax.f32 %v7499_v45, 0.0  ;;  %v7372_v4 = vld [vmem:[%s13744_s0 + $0x248] sm:$0xff] }
 0x460   :  { %14087 = vst [vmem:[#allocation39_spill] sm:$0xff] %v9982_v47 }
 0x461   :  { %v2681_v50 = vpop.f32.mrf.mxu2  ;;  %3146 = vmatmul.f32.gmra.mxu0 %v1172_v14 }
 0x462   :  { %v2890_v16 = vpop.f32.mrf.mxu3  ;;  %v2682_v11 = vadd.f32 %v2681_v50, %v9181_v54  ;;  %v7436_v54 = vld [vmem:[%s13744_s0 + $0x249] sm:$0xff]  ;;  %v918_v50 = vmax.f32 %v7372_v4, 0.0 }
 0x464   :  { %v2891_v41 = vadd.f32 %v2890_v16, %v2682_v11  ;;  %v1046_v16 = vmax.f32 %v7436_v54, 0.0 }
 0x466   :  { %v9994_v35 = vadd.f32 %v3099_v48, %v2891_v41  ;;  %2731 = vmatmul.f32.gmra.mxu2 %v917_v53  ;;  %v3102_v39 = vpop.f32.mrf.mxu0  ;;  %v7500_v48 = vld [vmem:[%s13744_s0 + $0x24a] sm:$0xff]  ;;  %v7373_v41 = vld [vmem:[%s13744_s0 + $0x258] sm:$0xff] }
 0x467   :  { %2940 = vmatmul.f32.gmra.mxu3 %v1045_v62  ;;  %v1174_v53 = vmax.f32 %v7500_v48, 0.0 }
 0x468   :  { %14088 = vst [vmem:[#allocation42_spill] sm:$0xff] %v9994_v35 }
 0x469   :  { %v2684_v14 = vpop.f32.mrf.mxu2  ;;  %3149 = vmatmul.f32.gmra.mxu0 %v1173_v27 }
 0x46a   :  { %v2893_v17 = vpop.f32.mrf.mxu3  ;;  %v2685_v10 = vadd.f32 %v2684_v14, %v9197_v46  ;;  %v7437_v46 = vld [vmem:[%s13744_s0 + $0x259] sm:$0xff]  ;;  %v919_v14 = vmax.f32 %v7373_v41, 0.0 }
 0x46c   :  { %v2894_v11 = vadd.f32 %v2893_v17, %v2685_v10  ;;  %v1047_v17 = vmax.f32 %v7437_v46, 0.0 }
 0x46e   :  { %v10006_v62 = vadd.f32 %v3102_v39, %v2894_v11  ;;  %2734 = vmatmul.f32.gmra.mxu2 %v918_v50  ;;  %v3105_v45 = vpop.f32.mrf.mxu0  ;;  %v7501_v39 = vld [vmem:[%s13744_s0 + $0x25a] sm:$0xff]  ;;  %v4431_v50 = vld [vmem:[#allocation3 + $0x48] sm:$0xff] }
 0x46f   :  { %2943 = vmatmul.f32.gmra.mxu3 %v1046_v16  ;;  %v1175_v16 = vmax.f32 %v7501_v39, 0.0  ;;  %4572 = vmatpush.msra.mxu1 %v4431_v50  ;;  %v7375_v50 = vld [vmem:[%s13744_s0 + $0x270] sm:$0xff] }
 0x470   :  { %14089 = vst [vmem:[#allocation45_spill] sm:$0xff] %v10006_v62 }
 0x471   :  { %v2687_v27 = vpop.f32.mrf.mxu2  ;;  %3152 = vmatmul.f32.gmra.mxu0 %v1174_v53  ;;  %v7374_v53 = vld [vmem:[%s13744_s0 + $0x260] sm:$0xff] }
 0x472   :  { %v2896_v4 = vpop.f32.mrf.mxu3  ;;  %v2688_v54 = vadd.f32 %v2687_v27, %v9213_v1  ;;  %v7438_v1 = vld [vmem:[%s13744_s0 + $0x261] sm:$0xff] }
 0x474   :  { %v2897_v10 = vadd.f32 %v2896_v4, %v2688_v54  ;;  %v920_v4 = vmax.f32 %v7374_v53, 0.0  ;;  %v1048_v54 = vmax.f32 %v7438_v1, 0.0 }
 0x476   :  { %v10018_v48 = vadd.f32 %v3105_v45, %v2897_v10  ;;  %2737 = vmatmul.f32.gmra.mxu2 %v919_v14  ;;  %v3108_v11 = vpop.f32.mrf.mxu0  ;;  %v7502_v45 = vld [vmem:[%s13744_s0 + $0x262] sm:$0xff] }
 0x477   :  { %2946 = vmatmul.f32.gmra.mxu3 %v1047_v17  ;;  %v1176_v17 = vmax.f32 %v7502_v45, 0.0 }
 0x478   :  { %14090 = vst [vmem:[#allocation48_spill] sm:$0xff] %v10018_v48 }
 0x479   :  { %v2690_v41 = vpop.f32.mrf.mxu2  ;;  %3155 = vmatmul.f32.gmra.mxu0 %v1175_v16 }
 0x47a   :  { %v2899_v46 = vpop.f32.mrf.mxu3  ;;  %v2691_v27 = vadd.f32 %v2690_v41, %v9226_v25  ;;  %v7439_v25 = vld [vmem:[%s13744_s0 + $0x271] sm:$0xff]  ;;  %v921_v41 = vmax.f32 %v7375_v50, 0.0 }
 0x47c   :  { %v2900_v14 = vadd.f32 %v2899_v46, %v2691_v27  ;;  %v1049_v46 = vmax.f32 %v7439_v25, 0.0 }
 0x47e   :  { %v10030_v39 = vadd.f32 %v3108_v11, %v2900_v14  ;;  %2740 = vmatmul.f32.gmra.mxu2 %v920_v4  ;;  %v3111_v10 = vpop.f32.mrf.mxu0  ;;  %v7503_v11 = vld [vmem:[%s13744_s0 + $0x272] sm:$0xff] }
 0x47f   :  { %2949 = vmatmul.f32.gmra.mxu3 %v1048_v54  ;;  %v1177_v4 = vmax.f32 %v7503_v11, 0.0  ;;  %v7376_v14 = vld [vmem:[%s13744_s0 + $0x278] sm:$0xff] }
 0x480   :  { %14091 = vst [vmem:[#allocation51_spill] sm:$0xff] %v10030_v39 }
 0x481   :  { %v2693_v16 = vpop.f32.mrf.mxu2  ;;  %3158 = vmatmul.f32.gmra.mxu0 %v1176_v17 }
 0x482   :  { %v2902_v53 = vpop.f32.mrf.mxu3  ;;  %v2694_v1 = vadd.f32 %v2693_v16, %v9242_v55  ;;  %v7440_v55 = vld [vmem:[%s13744_s0 + $0x279] sm:$0xff]  ;;  %v922_v16 = vmax.f32 %v7376_v14, 0.0 }
 0x484   :  { %v2903_v27 = vadd.f32 %v2902_v53, %v2694_v1  ;;  %v1050_v53 = vmax.f32 %v7440_v55, 0.0 }
 0x486   :  { %v10042_v54 = vadd.f32 %v3111_v10, %v2903_v27  ;;  %2743 = vmatmul.f32.gmra.mxu2 %v921_v41  ;;  %v3114_v45 = vpop.f32.mrf.mxu0  ;;  %v7504_v10 = vld [vmem:[%s13744_s0 + $0x27a] sm:$0xff]  ;;  %v7377_v27 = vld [vmem:[%s13744_s0 + $0x288] sm:$0xff] }
 0x487   :  { %2952 = vmatmul.f32.gmra.mxu3 %v1049_v46  ;;  %v1178_v41 = vmax.f32 %v7504_v10, 0.0 }
 0x488   :  { %14092 = vst [vmem:[#allocation54_spill] sm:$0xff] %v10042_v54 }
 0x489   :  { %v2696_v17 = vpop.f32.mrf.mxu2  ;;  %3161 = vmatmul.f32.gmra.mxu0 %v1177_v4 }
 0x48a   :  { %v2905_v50 = vpop.f32.mrf.mxu3  ;;  %v2697_v25 = vadd.f32 %v2696_v17, %v9258_v26  ;;  %v7441_v26 = vld [vmem:[%s13744_s0 + $0x289] sm:$0xff]  ;;  %v923_v17 = vmax.f32 %v7377_v27, 0.0 }
 0x48c   :  { %v2906_v1 = vadd.f32 %v2905_v50, %v2697_v25  ;;  %v1051_v50 = vmax.f32 %v7441_v26, 0.0 }
 0x48e   :  { %v10054_v46 = vadd.f32 %v3114_v45, %v2906_v1  ;;  %2746 = vmatmul.f32.gmra.mxu2 %v922_v16  ;;  %v3117_v11 = vpop.f32.mrf.mxu0  ;;  %v7505_v45 = vld [vmem:[%s13744_s0 + $0x28a] sm:$0xff]  ;;  %v4430_v16 = vld [vmem:[#allocation3 + $0x40] sm:$0xff] }
 0x48f   :  { %2955 = vmatmul.f32.gmra.mxu3 %v1050_v53  ;;  %v1179_v53 = vmax.f32 %v7505_v45, 0.0  ;;  %4573 = vmatpush.msra.mxu1 %v4430_v16  ;;  %v7379_v16 = vld [vmem:[%s13744_s0 + $0x2a0] sm:$0xff] }
 0x490   :  { %14093 = vst [vmem:[#allocation57_spill] sm:$0xff] %v10054_v46 }
 0x491   :  { %v2699_v4 = vpop.f32.mrf.mxu2  ;;  %3164 = vmatmul.f32.gmra.mxu0 %v1178_v41  ;;  %v7378_v41 = vld [vmem:[%s13744_s0 + $0x290] sm:$0xff] }
 0x492   :  { %v2908_v14 = vpop.f32.mrf.mxu3  ;;  %v2700_v55 = vadd.f32 %v2699_v4, %v9274_v44  ;;  %v7442_v44 = vld [vmem:[%s13744_s0 + $0x291] sm:$0xff] }
 0x494   :  { %v2909_v25 = vadd.f32 %v2908_v14, %v2700_v55  ;;  %v924_v14 = vmax.f32 %v7378_v41, 0.0  ;;  %v1052_v55 = vmax.f32 %v7442_v44, 0.0 }
 0x496   :  { %v10066_v10 = vadd.f32 %v3117_v11, %v2909_v25  ;;  %2749 = vmatmul.f32.gmra.mxu2 %v923_v17  ;;  %v3120_v1 = vpop.f32.mrf.mxu0  ;;  %v7506_v11 = vld [vmem:[%s13744_s0 + $0x292] sm:$0xff] }
 0x497   :  { %2958 = vmatmul.f32.gmra.mxu3 %v1051_v50  ;;  %v1180_v50 = vmax.f32 %v7506_v11, 0.0 }
 0x498   :  { %14094 = vst [vmem:[#allocation58_spill] sm:$0xff] %v10066_v10 }
 0x499   :  { %v2702_v27 = vpop.f32.mrf.mxu2  ;;  %3167 = vmatmul.f32.gmra.mxu0 %v1179_v53 }
 0x49a   :  { %v2911_v26 = vpop.f32.mrf.mxu3  ;;  %v2703_v4 = vadd.f32 %v2702_v27, %v9287_v3  ;;  %v7443_v3 = vld [vmem:[%s13744_s0 + $0x2a1] sm:$0xff]  ;;  %v925_v27 = vmax.f32 %v7379_v16, 0.0 }
 0x49c   :  { %v2912_v17 = vadd.f32 %v2911_v26, %v2703_v4  ;;  %v1053_v26 = vmax.f32 %v7443_v3, 0.0 }
 0x49e   :  { %v10078_v45 = vadd.f32 %v3120_v1, %v2912_v17  ;;  %2752 = vmatmul.f32.gmra.mxu2 %v924_v14  ;;  %v3123_v25 = vpop.f32.mrf.mxu0  ;;  %v7507_v1 = vld [vmem:[%s13744_s0 + $0x2a2] sm:$0xff] }
 0x49f   :  { %2961 = vmatmul.f32.gmra.mxu3 %v1052_v55  ;;  %v1181_v14 = vmax.f32 %v7507_v1, 0.0  ;;  %v7380_v17 = vld [vmem:[%s13744_s0 + $0x2a8] sm:$0xff] }
 0x4a0   :  { %14095 = vst [vmem:[#allocation59_spill] sm:$0xff] %v10078_v45 }
 0x4a1   :  { %v2705_v53 = vpop.f32.mrf.mxu2  ;;  %3170 = vmatmul.f32.gmra.mxu0 %v1180_v50 }
 0x4a2   :  { %v2914_v41 = vpop.f32.mrf.mxu3  ;;  %v2706_v44 = vadd.f32 %v2705_v53, %v9301_v15  ;;  %v7444_v15 = vld [vmem:[%s13744_s0 + $0x2a9] sm:$0xff]  ;;  %v926_v53 = vmax.f32 %v7380_v17, 0.0 }
 0x4a4   :  { %v2915_v4 = vadd.f32 %v2914_v41, %v2706_v44  ;;  %v1054_v41 = vmax.f32 %v7444_v15, 0.0 }
 0x4a6   :  { %v10090_v55 = vadd.f32 %v3123_v25, %v2915_v4  ;;  %2755 = vmatmul.f32.gmra.mxu2 %v925_v27  ;;  %v3126_v11 = vpop.f32.mrf.mxu0  ;;  %v7508_v25 = vld [vmem:[%s13744_s0 + $0x2aa] sm:$0xff]  ;;  %v7381_v4 = vld [vmem:[%s13744_s0 + $0x2b8] sm:$0xff] }
 0x4a7   :  { %2964 = vmatmul.f32.gmra.mxu3 %v1053_v26  ;;  %v1182_v27 = vmax.f32 %v7508_v25, 0.0  ;;  %v10114_v25 = vpop.f32.mrf.mxu1 }
 0x4a8   :  { %14096 = vst [vmem:[#allocation60_spill] sm:$0xff] %v10090_v55 }
 0x4a9   :  { %v2708_v50 = vpop.f32.mrf.mxu2  ;;  %3173 = vmatmul.f32.gmra.mxu0 %v1181_v14 }
 0x4aa   :  { %v2917_v16 = vpop.f32.mrf.mxu3  ;;  %v2709_v3 = vadd.f32 %v2708_v50, %v9316_v52  ;;  %v7445_v52 = vld [vmem:[%s13744_s0 + $0x2b9] sm:$0xff]  ;;  %v927_v50 = vmax.f32 %v7381_v4, 0.0 }
 0x4ac   :  { %v2918_v44 = vadd.f32 %v2917_v16, %v2709_v3  ;;  %v1055_v16 = vmax.f32 %v7445_v52, 0.0 }
 0x4ae   :  { %v10102_v26 = vadd.f32 %v3126_v11, %v2918_v44  ;;  %2758 = vmatmul.f32.gmra.mxu2 %v926_v53  ;;  %v3129_v1 = vpop.f32.mrf.mxu0  ;;  %v7509_v11 = vld [vmem:[%s13744_s0 + $0x2ba] sm:$0xff] }
 0x4af   :  { %2967 = vmatmul.f32.gmra.mxu3 %v1054_v41  ;;  %v4429_v53 = vld [vmem:[#allocation3 + $0x38] sm:$0xff]  ;;  %v1183_v41 = vmax.f32 %v7509_v11, 0.0 }
 0x4b0   :  { %14097 = vst [vmem:[#allocation61_spill] sm:$0xff] %v10102_v26  ;;  %4574 = vmatpush.msra.mxu1 %v4429_v53  ;;  %v7383_v53 = vld [vmem:[%s13744_s0 + $0x2d0] sm:$0xff] }
 0x4b1   :  { %v2711_v14 = vpop.f32.mrf.mxu2  ;;  %3176 = vmatmul.f32.gmra.mxu0 %v1182_v27  ;;  %v7446_v27 = vld [vmem:[%s13744_s0 + $0x2c1] sm:$0xff] }
 0x4b2   :  { %v2920_v17 = vpop.f32.mrf.mxu3  ;;  %v2712_v15 = vadd.f32 %v2711_v14, %v9331_v22  ;;  %v7382_v22 = vld [vmem:[%s13744_s0 + $0x2c0] sm:$0xff] }
 0x4b4   :  { %v2921_v3 = vadd.f32 %v2920_v17, %v2712_v15  ;;  %v928_v17 = vmax.f32 %v7382_v22, 0.0  ;;  %v1056_v15 = vmax.f32 %v7446_v27, 0.0 }
 0x4b6   :  { %v10116_v44 = vadd.f32 %v3129_v1, %v2921_v3  ;;  %2761 = vmatmul.f32.gmra.mxu2 %v927_v50  ;;  %v3132_v40 = vpop.f32.mrf.mxu0  ;;  %v7510_v1 = vld [vmem:[%s13744_s0 + $0x2c2] sm:$0xff] }
 0x4b7   :  { %2970 = vmatmul.f32.gmra.mxu3 %v1055_v16  ;;  %v1184_v16 = vmax.f32 %v7510_v1, 0.0 }
 0x4b8   :  { %14098 = vst [vmem:[#allocation62_spill] sm:$0xff] %v10116_v44 }
 0x4b9   :  { %v2714_v4 = vpop.f32.mrf.mxu2  ;;  %3179 = vmatmul.f32.gmra.mxu0 %v1183_v41  ;;  %v10136_v41 = vpop.f32.mrf.mxu1 }
 0x4ba   :  { %v2923_v52 = vpop.f32.mrf.mxu3  ;;  %v2715_v14 = vadd.f32 %v2714_v4, %v9343_v56  ;;  %v7447_v56 = vld [vmem:[%s13744_s0 + $0x2d1] sm:$0xff] }
 0x4bc   :  { %v2924_v50 = vadd.f32 %v2923_v52, %v2715_v14  ;;  %v1057_v52 = vmax.f32 %v7447_v56, 0.0  ;;  %v7511_v14 = vld [vmem:[%s13744_s0 + $0x2d2] sm:$0xff] }
 0x4be   :  { %v10128_v11 = vadd.f32 %v3132_v40, %v2924_v50  ;;  %2764 = vmatmul.f32.gmra.mxu2 %v928_v17  ;;  %v3135_v3 = vpop.f32.mrf.mxu0  ;;  %v929_v40 = vmax.f32 %v7383_v53, 0.0 }
 0x4bf   :  { %2973 = vmatmul.f32.gmra.mxu3 %v1056_v15  ;;  %v1185_v15 = vmax.f32 %v7511_v14, 0.0 }
 0x4c0   :  { %14099 = vst [vmem:[#allocation63_spill] sm:$0xff] %v10128_v11 }
 0x4c1   :  { %v2717_v22 = vpop.f32.mrf.mxu2  ;;  %3182 = vmatmul.f32.gmra.mxu0 %v1184_v16  ;;  %v10150_v56 = vpop.f32.mrf.mxu1 }
 0x4c2   :  { %v2926_v27 = vpop.f32.mrf.mxu3  ;;  %v2718_v4 = vadd.f32 %v2717_v22, %v9358_v24  ;;  %v7448_v24 = vld [vmem:[%s13744_s0 + $0x2d9] sm:$0xff] }
 0x4c4   :  { %v2927_v17 = vadd.f32 %v2926_v27, %v2718_v4  ;;  %v1058_v27 = vmax.f32 %v7448_v24, 0.0  ;;  %v7512_v4 = vld [vmem:[%s13744_s0 + $0x2da] sm:$0xff] }
 0x4c6   :  { %v10142_v1 = vadd.f32 %v3135_v3, %v2927_v17  ;;  %2767 = vmatmul.f32.gmra.mxu2 %v929_v40  ;;  %v3138_v50 = vpop.f32.mrf.mxu0  ;;  %v930_v3 = vmax.f32 %v7384_v34, 0.0 }
 0x4c7   :  { %2976 = vmatmul.f32.gmra.mxu3 %v1057_v52  ;;  %v1186_v52 = vmax.f32 %v7512_v4, 0.0  ;;  %v4428_v4 = vld [vmem:[#allocation3 + $0x30] sm:$0xff] }
 0x4c8   :  { %14100 = vst [vmem:[#allocation64_spill] sm:$0xff] %v10142_v1  ;;  %4575 = vmatpush.msra.mxu1 %v4428_v4 }
 0x4c9   :  { %v2720_v16 = vpop.f32.mrf.mxu2  ;;  %3185 = vmatmul.f32.gmra.mxu0 %v1185_v15  ;;  %v7385_v15 = vld [vmem:[%s13744_s0 + $0x2e8] sm:$0xff] }
 0x4ca   :  { %v2929_v53 = vpop.f32.mrf.mxu3  ;;  %v2721_v22 = vadd.f32 %v2720_v16, %v9373_v43  ;;  %v7449_v43 = vld [vmem:[%s13744_s0 + $0x2e9] sm:$0xff] }
 0x4cc   :  { %v2930_v40 = vadd.f32 %v2929_v53, %v2721_v22  ;;  %v931_v53 = vmax.f32 %v7385_v15, 0.0  ;;  %v1059_v22 = vmax.f32 %v7449_v43, 0.0 }
 0x4ce   :  { %v10156_v14 = vadd.f32 %v3138_v50, %v2930_v40  ;;  %2770 = vmatmul.f32.gmra.mxu2 %v930_v3  ;;  %v3141_v17 = vpop.f32.mrf.mxu0  ;;  %v7513_v50 = vld [vmem:[%s13744_s0 + $0x2ea] sm:$0xff]  ;;  %v10168_v3 = vpop.f32.mrf.mxu1 }
 0x4cf   :  { %2979 = vmatmul.f32.gmra.mxu3 %v1058_v27  ;;  %v1187_v40 = vmax.f32 %v7513_v50, 0.0 }
 0x4d0   :  { %14101 = vst [vmem:[#allocation65_spill] sm:$0xff] %v10156_v14 }
 0x4d1   :  { %v2723_v34 = vpop.f32.mrf.mxu2  ;;  %3188 = vmatmul.f32.gmra.mxu0 %v1186_v52  ;;  %v7450_v52 = vld [vmem:[%s13744_s0 + $0x2f1] sm:$0xff] }
 0x4d2   :  { %v2932_v24 = vpop.f32.mrf.mxu3  ;;  %v2724_v16 = vadd.f32 %v2723_v34, %v9388_v23  ;;  %v7386_v23 = vld [vmem:[%s13744_s0 + $0x2f0] sm:$0xff] }
 0x4d4   :  { %v2933_v27 = vadd.f32 %v2932_v24, %v2724_v16  ;;  %v932_v24 = vmax.f32 %v7386_v23, 0.0  ;;  %v1060_v16 = vmax.f32 %v7450_v52, 0.0 }
 0x4d6   :  { %v10170_v28 = vadd.f32 %v3141_v17, %v2933_v27  ;;  %2773 = vmatmul.f32.gmra.mxu2 %v931_v53  ;;  %v3144_v20 = vpop.f32.mrf.mxu0  ;;  %v7514_v17 = vld [vmem:[%s13744_s0 + $0x2f2] sm:$0xff]  ;;  %v10182_v50 = vpop.f32.mrf.mxu1 }
 0x4d7   :  { %2982 = vmatmul.f32.gmra.mxu3 %v1059_v22  ;;  %v1188_v22 = vmax.f32 %v7514_v17, 0.0  ;;  %14103 = vst [vmem:[#allocation67_spill] sm:$0xff] %v10182_v50 }
 0x4d8   :  { %14102 = vst [vmem:[#allocation66_spill] sm:$0xff] %v10170_v28 }
 0x4d9   :  { %v2726_v15 = vpop.f32.mrf.mxu2  ;;  %3191 = vmatmul.f32.gmra.mxu0 %v1187_v40  ;;  %v7387_v40 = vld [vmem:[%s13744_s0 + $0x300] sm:$0xff] }
 0x4da   :  { %v2935_v43 = vpop.f32.mrf.mxu3  ;;  %v2727_v34 = vadd.f32 %v2726_v15, %v9400_v21  ;;  %v7451_v21 = vld [vmem:[%s13744_s0 + $0x301] sm:$0xff] }
 0x4dc   :  { %v2936_v53 = vadd.f32 %v2935_v43, %v2727_v34  ;;  %v933_v43 = vmax.f32 %v7387_v40, 0.0  ;;  %v1061_v34 = vmax.f32 %v7451_v21, 0.0 }
 0x4de   :  { %v10184_v27 = vadd.f32 %v3144_v20, %v2936_v53  ;;  %2776 = vmatmul.f32.gmra.mxu2 %v932_v24  ;;  %v3147_v4 = vpop.f32.mrf.mxu0  ;;  %v7515_v20 = vld [vmem:[%s13744_s0 + $0x302] sm:$0xff]  ;;  %v10206_v40 = vpop.f32.mrf.mxu1 }
 0x4df   :  { %2985 = vmatmul.f32.gmra.mxu3 %v1060_v16  ;;  %v1189_v16 = vmax.f32 %v7515_v20, 0.0  ;;  %14107 = vst [vmem:[#allocation71_spill] sm:$0xff] %v10206_v40  ;;  %v7389_v20 = vld [vmem:[%s13744_s0 + $0x318] sm:$0xff] }
 0x4e0   :  { %14104 = vst [vmem:[#allocation68_spill] sm:$0xff] %v10184_v27  ;;  %v7391_v27 = vld [vmem:[%s13744_s0 + $0x330] sm:$0xff] }
 0x4e1   :  { %v2729_v23 = vpop.f32.mrf.mxu2  ;;  %3194 = vmatmul.f32.gmra.mxu0 %v1188_v22  ;;  %v7388_v22 = vld [vmem:[%s13744_s0 + $0x308] sm:$0xff] }
 0x4e2   :  { %v2938_v52 = vpop.f32.mrf.mxu3  ;;  %v2730_v15 = vadd.f32 %v2729_v23, %v9415_v31  ;;  %v7452_v31 = vld [vmem:[%s13744_s0 + $0x309] sm:$0xff] }
 0x4e4   :  { %v2939_v24 = vadd.f32 %v2938_v52, %v2730_v15  ;;  %v1062_v52 = vmax.f32 %v7452_v31, 0.0  ;;  %v7516_v15 = vld [vmem:[%s13744_s0 + $0x30a] sm:$0xff] }
 0x4e6   :  { %v10196_v17 = vadd.f32 %v3147_v4, %v2939_v24  ;;  %2779 = vmatmul.f32.gmra.mxu2 %v933_v43  ;;  %v10198_v53 = vpop.f32.mrf.mxu0  ;;  %v934_v4 = vmax.f32 %v7388_v22, 0.0  ;;  %v1190_v43 = vmax.f32 %v7516_v15, 0.0  ;;  %v7453_v24 = vld [vmem:[%s13744_s0 + $0x319] sm:$0xff]  ;;  %v10227_v31 = vpop.f32.mrf.mxu1  ;;  %v935_v15 = vmax.f32 %v7389_v20, 0.0 }
 0x4e7   :  { %2988 = vmatmul.f32.gmra.mxu3 %v1061_v34  ;;  %14106 = vst [vmem:[#allocation70_spill] sm:$0xff] %v10198_v53  ;;  %v7390_v53 = vld [vmem:[%s13744_s0 + $0x320] sm:$0xff] }
 0x4e8   :  { %14105 = vst [vmem:[#allocation69_spill] sm:$0xff] %v10196_v17 }
 0x4e9   :  { %v10208_v21 = vpop.f32.mrf.mxu2  ;;  %3197 = vmatmul.f32.gmra.mxu0 %v1189_v16  ;;  %14110 = vst [vmem:[#allocation74_spill] sm:$0xff] %v10227_v31  ;;  %v936_v31 = vmax.f32 %v7390_v53, 0.0 }
 0x4ea   :  { %v10210_v23 = vpop.f32.mrf.mxu3 }
 0x4ee   :  { %2782 = vmatmul.f32.gmra.mxu2 %v934_v4  ;;  %v10215_v34 = vpop.f32.mrf.mxu0  ;;  %v1063_v4 = vmax.f32 %v7453_v24, 0.0 }
 0x4ef   :  { %2991 = vmatmul.f32.gmra.mxu3 %v1062_v52  ;;  %14108 = vst [vmem:[#allocation72_spill] sm:$0xff] %v10215_v34  ;;  %v7517_v52 = vld [vmem:[%s13744_s0 + $0x31a] sm:$0xff]  ;;  %v4427_v34 = vld [vmem:[#allocation3 + $0x28] sm:$0xff] }
 0x4f0   :  { %v1191_v17 = vmax.f32 %v7517_v52, 0.0  ;;  %4576 = vmatpush.msra.mxu1 %v4427_v34  ;;  %v7518_v34 = vld [vmem:[%s13744_s0 + $0x322] sm:$0xff] }
 0x4f1   :  { %v10223_v16 = vpop.f32.mrf.mxu2  ;;  %3200 = vmatmul.f32.gmra.mxu0 %v1190_v43  ;;  %v7454_v43 = vld [vmem:[%s13744_s0 + $0x321] sm:$0xff] }
 0x4f2   :  { %v10225_v22 = vpop.f32.mrf.mxu3  ;;  %v1064_v52 = vmax.f32 %v7454_v43, 0.0 }
 0x4f3   :  { %14109 = vst [vmem:[#allocation73_spill] sm:$0xff] %v10225_v22 }
 0x4f6   :  { %2785 = vmatmul.f32.gmra.mxu2 %v935_v15  ;;  %v10232_v40 = vpop.f32.mrf.mxu0  ;;  %v10247_v15 = vpop.f32.mrf.mxu1 }
 0x4f7   :  { %2994 = vmatmul.f32.gmra.mxu3 %v1063_v4  ;;  %14111 = vst [vmem:[#allocation75_spill] sm:$0xff] %v10232_v40  ;;  %v1192_v4 = vmax.f32 %v7518_v34, 0.0 }
 0x4f8   :  { %14113 = vst [vmem:[#allocation77_spill] sm:$0xff] %v10247_v15 }
 0x4f9   :  { %v10240_v20 = vpop.f32.mrf.mxu2  ;;  %3203 = vmatmul.f32.gmra.mxu0 %v1191_v17  ;;  %v7455_v17 = vld [vmem:[%s13744_s0 + $0x331] sm:$0xff] }
 0x4fa   :  { %v10242_v24 = vpop.f32.mrf.mxu3  ;;  %v1065_v15 = vmax.f32 %v7455_v17, 0.0 }
 0x4fb   :  { %14112 = vst [vmem:[#allocation76_spill] sm:$0xff] %v10242_v24  ;;  %v937_v24 = vmax.f32 %v7391_v27, 0.0  ;;  %v7456_v27 = vld [vmem:[%s13744_s0 + $0x339] sm:$0xff] }
 0x4fe   :  { %2788 = vmatmul.f32.gmra.mxu2 %v936_v31  ;;  %v10249_v40 = vpop.f32.mrf.mxu0  ;;  %v7519_v31 = vld [vmem:[%s13744_s0 + $0x332] sm:$0xff]  ;;  %v10264_v34 = vpop.f32.mrf.mxu1 }
 0x4ff   :  { %2997 = vmatmul.f32.gmra.mxu3 %v1064_v52  ;;  %14114 = vst [vmem:[#allocation78_spill] sm:$0xff] %v10249_v40  ;;  %v1193_v52 = vmax.f32 %v7519_v31, 0.0 }
 0x500   :  { %14117 = vst [vmem:[#allocation81_spill] sm:$0xff] %v10264_v34  ;;  %v7393_v34 = vld [vmem:[%s13744_s0 + $0x348] sm:$0xff] }
 0x501   :  { %v10257_v53 = vpop.f32.mrf.mxu2  ;;  %3206 = vmatmul.f32.gmra.mxu0 %v1192_v4 }
 0x502   :  { %14115 = vst [vmem:[#allocation79_spill] sm:$0xff] %v10257_v53  ;;  %v10259_v43 = vpop.f32.mrf.mxu3  ;;  %v7392_v53 = vld [vmem:[%s13744_s0 + $0x338] sm:$0xff] }
 0x503   :  { %14116 = vst [vmem:[#allocation80_spill] sm:$0xff] %v10259_v43  ;;  %v938_v31 = vmax.f32 %v7392_v53, 0.0  ;;  %v1066_v43 = vmax.f32 %v7456_v27, 0.0 }
 0x506   :  { %2791 = vmatmul.f32.gmra.mxu2 %v937_v24  ;;  %v10266_v40 = vpop.f32.mrf.mxu0  ;;  %v7520_v24 = vld [vmem:[%s13744_s0 + $0x33a] sm:$0xff] }
 0x507   :  { %3000 = vmatmul.f32.gmra.mxu3 %v1065_v15  ;;  %14118 = vst [vmem:[#allocation82_spill] sm:$0xff] %v10266_v40  ;;  %v1194_v15 = vmax.f32 %v7520_v24, 0.0  ;;  %v939_v24 = vmax.f32 %v7393_v34, 0.0  ;;  %v7458_v34 = vld [vmem:[%s13744_s0 + $0x351] sm:$0xff] }
 0x509   :  { %v10274_v4 = vpop.f32.mrf.mxu2  ;;  %3209 = vmatmul.f32.gmra.mxu0 %v1193_v52  ;;  %v10289_v52 = vpop.f32.mrf.mxu1 }
 0x50a   :  { %14119 = vst [vmem:[#allocation83_spill] sm:$0xff] %v10274_v4  ;;  %v10276_v17 = vpop.f32.mrf.mxu3 }
 0x50b   :  { %14120 = vst [vmem:[#allocation84_spill] sm:$0xff] %v10276_v17  ;;  %v7457_v17 = vld [vmem:[%s13744_s0 + $0x349] sm:$0xff] }
 0x50c   :  { %14122 = vst [vmem:[#allocation86_spill] sm:$0xff] %v10289_v52  ;;  %v7394_v52 = vld [vmem:[%s13744_s0 + $0x350] sm:$0xff] }
 0x50e   :  { %2794 = vmatmul.f32.gmra.mxu2 %v938_v31  ;;  %v10281_v40 = vpop.f32.mrf.mxu0  ;;  %v1067_v31 = vmax.f32 %v7457_v17, 0.0 }
 0x50f   :  { %3003 = vmatmul.f32.gmra.mxu3 %v1066_v43  ;;  %14121 = vst [vmem:[#allocation85_spill] sm:$0xff] %v10281_v40  ;;  %v7521_v43 = vld [vmem:[%s13744_s0 + $0x34a] sm:$0xff]  ;;  %v4426_v40 = vld [vmem:[#allocation3 + $0x20] sm:$0xff] }
 0x510   :  { %v1195_v4 = vmax.f32 %v7521_v43, 0.0  ;;  %4577 = vmatpush.msra.mxu1 %v4426_v40  ;;  %v940_v40 = vmax.f32 %v7394_v52, 0.0  ;;  %v3294_v43 = vmul.f32 %v9730_v30, %v9730_v30  ;;  %v3224_v52 = vadd.f32 %v9730_v30, %v9718_v36 }
 0x511   :  { %v10291_v53 = vpop.f32.mrf.mxu2  ;;  %3212 = vmatmul.f32.gmra.mxu0 %v1194_v15 }
 0x512   :  { %14123 = vst [vmem:[#allocation87_spill] sm:$0xff] %v10291_v53  ;;  %v10293_v27 = vpop.f32.mrf.mxu3 }
 0x513   :  { %14124 = vst [vmem:[#allocation88_spill] sm:$0xff] %v10293_v27  ;;  %v10310_v27 = vpop.f32.mrf.mxu1 }
 0x514   :  { %14128 = vst [vmem:[#allocation92_spill] sm:$0xff] %v10310_v27  ;;  %v3296_v27 = vmul.f32 %v9754_v38, %v9754_v38 }
 0x516   :  { %2797 = vmatmul.f32.gmra.mxu2 %v939_v24  ;;  %v10298_v22 = vpop.f32.mrf.mxu0  ;;  %v1068_v24 = vmax.f32 %v7458_v34, 0.0 }
 0x517   :  { %3006 = vmatmul.f32.gmra.mxu3 %v1067_v31  ;;  %14125 = vst [vmem:[#allocation89_spill] sm:$0xff] %v10298_v22  ;;  %v7522_v31 = vld [vmem:[%s13744_s0 + $0x352] sm:$0xff]  ;;  %v3293_v22 = vmul.f32 %v9718_v36, %v9718_v36 }
 0x518   :  { %v1196_v53 = vmax.f32 %v7522_v31, 0.0 }
 0x519   :  { %v10306_v17 = vpop.f32.mrf.mxu2  ;;  %3215 = vmatmul.f32.gmra.mxu0 %v1195_v4  ;;  %v3357_v34 = vadd.f32 %v3294_v43, %v3293_v22  ;;  %v3298_v22 = vmul.f32 %v9778_v49, %v9778_v49 }
 0x51a   :  { %14126 = vst [vmem:[#allocation90_spill] sm:$0xff] %v10306_v17  ;;  %v10308_v15 = vpop.f32.mrf.mxu3  ;;  %v3295_v17 = vmul.f32 %v9742_v5, %v9742_v5 }
 0x51b   :  { %14127 = vst [vmem:[#allocation91_spill] sm:$0xff] %v10308_v15  ;;  %v3225_v15 = vadd.f32 %v3224_v52, %v9742_v5  ;;  %v10337_v43 = vpop.f32.mrf.mxu1 }
 0x51c   :  { %v3358_v50 = vadd.f32 %v3357_v34, %v3295_v17  ;;  %v3299_v17 = vmul.f32 %v9790_v18, %v9790_v18 }
 0x51e   :  { %2800 = vmatmul.f32.gmra.mxu2 %v940_v40  ;;  %v10321_v4 = vpop.f32.mrf.mxu0  ;;  %v3226_v40 = vadd.f32 %v3225_v15, %v9754_v38  ;;  %v3301_v15 = vmul.f32 %v9814_v58, %v9814_v58 }
 0x51f   :  { %3009 = vmatmul.f32.gmra.mxu3 %v1068_v24  ;;  %v3359_v24 = vadd.f32 %v3358_v50, %v3296_v27 }
 0x520   :  { %v3227_v30 = vadd.f32 %v3226_v40, %v9766_v2 }
 0x521   :  { %v10330_v28 = vpop.f32.mrf.mxu2  ;;  %3218 = vmatmul.f32.gmra.mxu0 %v1196_v53  ;;  %v3360_v52 = vadd.f32 %v3359_v24, %v3297_v37  ;;  %v3300_v53 = vmul.f32 %v9802_v63, %v9802_v63 }
 0x522   :  { %v10332_v31 = vpop.f32.mrf.mxu3  ;;  %v3228_v5 = vadd.f32 %v3227_v30, %v9778_v49  ;;  %v3302_v30 = vmul.f32 %v9826_v57, %v9826_v57 }
 0x523   :  { %v3361_v36 = vadd.f32 %v3360_v52, %v3298_v22 }
 0x524   :  { %v3229_v50 = vadd.f32 %v3228_v5, %v9790_v18  ;;  %v3303_v5 = vmul.f32 %v9838_v42, %v9838_v42 }
 0x525   :  { %v3362_v27 = vadd.f32 %v3361_v36, %v3299_v17  ;;  %v10360_v36 = vpop.f32.mrf.mxu1 }
 0x526   :  { %v10342_v34 = vpop.f32.mrf.mxu0  ;;  %v3230_v40 = vadd.f32 %v3229_v50, %v9802_v63  ;;  %v3304_v50 = vmul.f32 %v9850_v59, %v9850_v59 }
 0x527   :  { %v3363_v24 = vadd.f32 %v3362_v27, %v3300_v53 }
 0x528   :  { %v3231_v22 = vadd.f32 %v3230_v40, %v9814_v58  ;;  %v3305_v40 = vmul.f32 %v9862_v6, %v9862_v6 }
 0x529   :  { %v10350_v38 = vpop.f32.mrf.mxu2  ;;  %v3364_v52 = vadd.f32 %v3363_v24, %v3301_v15 }
 0x52a   :  { %v10352_v37 = vpop.f32.mrf.mxu3  ;;  %v3232_v18 = vadd.f32 %v3231_v22, %v9826_v57  ;;  %v3306_v22 = vmul.f32 %v9874_v51, %v9874_v51 }
 0x52b   :  { %v3365_v49 = vadd.f32 %v3364_v52, %v3302_v30  ;;  %v4425_v30 = vld [vmem:[#allocation3 + $0x18] sm:$0xff] }
 0x52c   :  { %v3233_v53 = vadd.f32 %v3232_v18, %v9838_v42  ;;  %4578 = vmatpush.msra.mxu1 %v4425_v30 }
 0x52d   :  { %v3366_v27 = vadd.f32 %v3365_v49, %v3303_v5  ;;  %v3307_v49 = vmul.f32 %v9886_v29, %v9886_v29 }
 0x52e   :  { %v10362_v17 = vpop.f32.mrf.mxu0  ;;  %v3234_v58 = vadd.f32 %v3233_v53, %v9850_v59  ;;  %v3308_v53 = vmul.f32 %v9898_v13, %v9898_v13 }
 0x52f   :  { %v3367_v63 = vadd.f32 %v3366_v27, %v3304_v50  ;;  %v10385_v50 = vpop.f32.mrf.mxu1 }
 0x530   :  { %v3235_v52 = vadd.f32 %v3234_v58, %v9862_v6 }
 0x531   :  { %v10370_v15 = vpop.f32.mrf.mxu2  ;;  %v3368_v57 = vadd.f32 %v3367_v63, %v3305_v40  ;;  %v3309_v63 = vmul.f32 %v9910_v19, %v9910_v19 }
 0x532   :  { %v10372_v24 = vpop.f32.mrf.mxu3  ;;  %v3236_v5 = vadd.f32 %v3235_v52, %v9874_v51  ;;  %v3312_v51 = vmul.f32 %v9946_v32, %v9946_v32 }
 0x533   :  { %v3369_v42 = vadd.f32 %v3368_v57, %v3306_v22  ;;  %v3310_v57 = vmul.f32 %v9922_v7, %v9922_v7 }
 0x534   :  { %v3237_v27 = vadd.f32 %v3236_v5, %v9886_v29  ;;  %v3311_v5 = vmul.f32 %v9934_v0, %v9934_v0 }
 0x535   :  { %v3370_v59 = vadd.f32 %v3369_v42, %v3307_v49 }
 0x536   :  { %v10380_v18 = vpop.f32.mrf.mxu0  ;;  %v3238_v30 = vadd.f32 %v3237_v27, %v9898_v13 }
 0x537   :  { %v3371_v6 = vadd.f32 %v3370_v59, %v3308_v53  ;;  %v3313_v53 = vmul.f32 %v9958_v12, %v9958_v12 }
 0x538   :  { %v3239_v22 = vadd.f32 %v3238_v30, %v9910_v19 }
 0x539   :  { %v10390_v58 = vpop.f32.mrf.mxu2  ;;  %v3372_v52 = vadd.f32 %v3371_v6, %v3309_v63  ;;  %v10412_v63 = vpop.f32.mrf.mxu1 }
 0x53a   :  { %v10392_v40 = vpop.f32.mrf.mxu3  ;;  %v3240_v49 = vadd.f32 %v3239_v22, %v9922_v7  ;;  %v3316_v7 = vmul.f32 %v9994_v35, %v9994_v35 }
 0x53b   :  { %v3373_v29 = vadd.f32 %v3372_v52, %v3310_v57  ;;  %v3314_v57 = vmul.f32 %v9970_v61, %v9970_v61 }
 0x53c   :  { %v3241_v27 = vadd.f32 %v3240_v49, %v9934_v0 }
 0x53d   :  { %v3374_v59 = vadd.f32 %v3373_v29, %v3311_v5  ;;  %v3315_v29 = vmul.f32 %v9982_v47, %v9982_v47 }
 0x53e   :  { %v10400_v42 = vpop.f32.mrf.mxu0  ;;  %v3242_v30 = vadd.f32 %v3241_v27, %v9946_v32 }
 0x53f   :  { %v3375_v19 = vadd.f32 %v3374_v59, %v3312_v51  ;;  %v3317_v59 = vmul.f32 %v10006_v62, %v10006_v62 }
 0x540   :  { %v3243_v22 = vadd.f32 %v3242_v30, %v9958_v12 }
 0x541   :  { %v10408_v13 = vpop.f32.mrf.mxu2  ;;  %v3376_v52 = vadd.f32 %v3375_v19, %v3313_v53 }
 0x542   :  { %v10410_v6 = vpop.f32.mrf.mxu3  ;;  %v3244_v49 = vadd.f32 %v3243_v22, %v9970_v61  ;;  %v3318_v22 = vmul.f32 %v10018_v48, %v10018_v48 }
 0x543   :  { %v3377_v0 = vadd.f32 %v3376_v52, %v3314_v57  ;;  %v10435_v57 = vpop.f32.mrf.mxu1 }
 0x544   :  { %v3245_v27 = vadd.f32 %v3244_v49, %v9982_v47 }
 0x545   :  { %v3378_v51 = vadd.f32 %v3377_v0, %v3315_v29  ;;  %v3319_v0 = vmul.f32 %v10030_v39, %v10030_v39 }
 0x546   :  { %v10420_v5 = vpop.f32.mrf.mxu0  ;;  %v3246_v53 = vadd.f32 %v3245_v27, %v9994_v35  ;;  %v3320_v27 = vmul.f32 %v10042_v54, %v10042_v54  ;;  %v3321_v35 = vmul.f32 %v10054_v46, %v10054_v46 }
 0x547   :  { %v3379_v30 = vadd.f32 %v3378_v51, %v3316_v7 }
 0x548   :  { %v3247_v52 = vadd.f32 %v3246_v53, %v10006_v62 }
 0x549   :  { %v10428_v32 = vpop.f32.mrf.mxu2  ;;  %v3380_v61 = vadd.f32 %v3379_v30, %v3317_v59 }
 0x54a   :  { %v10430_v19 = vpop.f32.mrf.mxu3  ;;  %v3248_v49 = vadd.f32 %v3247_v52, %v10018_v48  ;;  %v3322_v52 = vmul.f32 %v10066_v10, %v10066_v10 }
 0x54b   :  { %v3381_v47 = vadd.f32 %v3380_v61, %v3318_v22  ;;  %v4424_v61 = vld [vmem:[#allocation3 + $0x10] sm:$0xff] }
 0x54c   :  { %v3249_v7 = vadd.f32 %v3248_v49, %v10030_v39  ;;  %4579 = vmatpush.msra.mxu1 %v4424_v61  ;;  %v2524_v61 = vadd.f32 %v10114_v25, %v9427_v9 }
 0x54d   :  { %v3382_v51 = vadd.f32 %v3381_v47, %v3319_v0  ;;  %v3323_v47 = vmul.f32 %v10078_v45, %v10078_v45  ;;  %v10458_v0 = vpop.f32.mrf.mxu1 }
 0x54e   :  { %v10440_v29 = vpop.f32.mrf.mxu0  ;;  %v3250_v53 = vadd.f32 %v3249_v7, %v10042_v54  ;;  %v14140_v54 = vld [vmem:[#allocation83_spill] sm:$0xff] }
 0x54f   :  { %v3383_v30 = vadd.f32 %v3382_v51, %v3320_v27  ;;  %v3324_v27 = vmul.f32 %v10090_v55, %v10090_v55 }
 0x550   :  { %v3251_v22 = vadd.f32 %v3250_v53, %v10054_v46 }
 0x551   :  { %v10448_v12 = vpop.f32.mrf.mxu2  ;;  %v3384_v48 = vadd.f32 %v3383_v30, %v3321_v35  ;;  %v3325_v35 = vmul.f32 %v10102_v26, %v10102_v26 }
 0x552   :  { %v10450_v59 = vpop.f32.mrf.mxu3  ;;  %v3252_v39 = vadd.f32 %v3251_v22, %v10066_v10 }
 0x553   :  { %v3385_v62 = vadd.f32 %v3384_v48, %v3322_v52  ;;  %v3326_v48 = vmul.f32 %v10116_v44, %v10116_v44 }
 0x554   :  { %v3253_v7 = vadd.f32 %v3252_v39, %v10078_v45  ;;  %v2527_v45 = vadd.f32 %v10136_v41, %v9442_v60  ;;  %v3329_v60 = vmul.f32 %v10156_v14, %v10156_v14 }
 0x555   :  { %v3386_v51 = vadd.f32 %v3385_v62, %v3323_v47  ;;  %v3327_v62 = vmul.f32 %v10128_v11, %v10128_v11  ;;  %v2733_v47 = vadd.f32 %v10208_v21, %v2524_v61 }
 0x556   :  { %v10460_v49 = vpop.f32.mrf.mxu0  ;;  %v3254_v46 = vadd.f32 %v3253_v7, %v10090_v55  ;;  %v10490_v7 = vpop.f32.mrf.mxu1  ;;  %v14135_v55 = vld [vmem:[#allocation68_spill] sm:$0xff] }
 0x557   :  { %v3387_v22 = vadd.f32 %v3386_v51, %v3324_v27  ;;  %v3328_v27 = vmul.f32 %v10142_v1, %v10142_v1  ;;  %v2736_v51 = vadd.f32 %v10223_v16, %v2527_v45  ;;  %v2942_v41 = vadd.f32 %v10210_v23, %v2733_v47  ;;  %v14130_v16 = vld [vmem:[#allocation66_spill] sm:$0xff]  ;;  %v14134_v47 = vld [vmem:[#allocation79_spill] sm:$0xff] }
 0x558   :  { %v3255_v52 = vadd.f32 %v3254_v46, %v10102_v26  ;;  %v2530_v46 = vadd.f32 %v10150_v56, %v9454_v33 }
 0x559   :  { %v10468_v53 = vpop.f32.mrf.mxu2  ;;  %v3388_v39 = vadd.f32 %v3387_v22, %v3325_v35 }
 0x55a   :  { %v10470_v30 = vpop.f32.mrf.mxu3  ;;  %v3256_v9 = vadd.f32 %v3255_v52, %v10116_v44  ;;  %v2739_v33 = vadd.f32 %v10240_v20, %v2530_v46  ;;  %v3330_v52 = vmul.f32 %v14130_v16, %v14130_v16  ;;  %v14138_v46 = vld [vmem:[#allocation71_spill] sm:$0xff] }
 0x55b   :  { %v3389_v25 = vadd.f32 %v3388_v39, %v3326_v48  ;;  %v2533_v48 = vadd.f32 %v10168_v3, %v9466_v8  ;;  %v14131_v39 = vld [vmem:[#allocation32_spill] sm:$0xff]  ;;  %v3331_v8 = vmul.f32 %v14135_v55, %v14135_v55  ;;  %v14136_v3 = vld [vmem:[#allocation70_spill] sm:$0xff] }
 0x55c   :  { %v3257_v21 = vadd.f32 %v3256_v9, %v10128_v11  ;;  %v10515_v20 = vadd.f32 %v14136_v3, %v2942_v41  ;;  %v14145_v41 = vld [vmem:[#allocation72_spill] sm:$0xff] }
 0x55d   :  { %v3390_v35 = vadd.f32 %v3389_v25, %v3327_v62  ;;  %v14132_v62 = vld [vmem:[#allocation67_spill] sm:$0xff]  ;;  %v14133_v25 = vld [vmem:[#allocation73_spill] sm:$0xff]  ;;  %v2742_v11 = vadd.f32 %v14134_v47, %v2533_v48 }
 0x55e   :  { %v10483_v10 = vpop.f32.mrf.mxu0  ;;  %v3258_v56 = vadd.f32 %v3257_v21, %v10142_v1  ;;  %v2536_v9 = vadd.f32 %v14132_v62, %v14131_v39  ;;  %v2945_v23 = vadd.f32 %v14133_v25, %v2736_v51  ;;  %v14144_v25 = vld [vmem:[#allocation74_spill] sm:$0xff] }
 0x55f   :  { %14129 = vst [vmem:[#allocation93_spill] sm:$0xff] %v10483_v10  ;;  %v3391_v45 = vadd.f32 %v3390_v35, %v3328_v27  ;;  %v14137_v27 = vld [vmem:[#allocation34_spill] sm:$0xff]  ;;  %v14139_v35 = vld [vmem:[#allocation76_spill] sm:$0xff] }
 0x560   :  { %v3259_v44 = vadd.f32 %v3258_v56, %v10156_v14  ;;  %v2539_v21 = vadd.f32 %v14138_v46, %v14137_v27  ;;  %v2948_v1 = vadd.f32 %v14139_v35, %v2739_v33  ;;  %v2745_v39 = vadd.f32 %v14140_v54, %v2536_v9  ;;  %v14142_v56 = vld [vmem:[#allocation69_spill] sm:$0xff]  ;;  %v14146_v14 = vld [vmem:[#allocation80_spill] sm:$0xff]  ;;  %v14147_v46 = vld [vmem:[#allocation87_spill] sm:$0xff] }
 0x561   :  { %v10497_v61 = vpop.f32.mrf.mxu2  ;;  %v3392_v26 = vadd.f32 %v3391_v45, %v3329_v60  ;;  %v3332_v60 = vmul.f32 %v14142_v56, %v14142_v56  ;;  %v14143_v45 = vld [vmem:[#allocation35_spill] sm:$0xff]  ;;  %v10529_v3 = vadd.f32 %v14145_v41, %v2945_v23  ;;  %v2951_v27 = vadd.f32 %v14146_v14, %v2742_v11  ;;  %v14149_v35 = vld [vmem:[#allocation37_spill] sm:$0xff]  ;;  %v14152_v11 = vld [vmem:[#allocation84_spill] sm:$0xff] }
 0x562   :  { %v10499_v22 = vpop.f32.mrf.mxu3  ;;  %v3260_v51 = vadd.f32 %v3259_v44, %v14130_v16  ;;  %v2542_v47 = vadd.f32 %v14144_v25, %v14143_v45  ;;  %v2748_v33 = vadd.f32 %v14147_v46, %v2539_v21  ;;  %v3333_v44 = vmul.f32 %v10515_v20, %v10515_v20  ;;  %v14150_v16 = vld [vmem:[#allocation77_spill] sm:$0xff]  ;;  %v10542_v25 = vpop.f32.mrf.mxu1  ;;  %v14151_v23 = vld [vmem:[#allocation75_spill] sm:$0xff]  ;;  %v14153_v21 = vld [vmem:[#allocation90_spill] sm:$0xff] }
 0x563   :  { %v3393_v48 = vadd.f32 %v3392_v26, %v3330_v52  ;;  %v2545_v45 = vadd.f32 %v14150_v16, %v14149_v35  ;;  %v10545_v41 = vadd.f32 %v14151_v23, %v2948_v1  ;;  %v2954_v14 = vadd.f32 %v14152_v11, %v2745_v39  ;;  %v14156_v10 = vld [vmem:[#allocation78_spill] sm:$0xff]  ;;  %v14157_v35 = vld [vmem:[#allocation88_spill] sm:$0xff] }
 0x564   :  { %v3261_v54 = vadd.f32 %v3260_v51, %v14135_v55  ;;  %v2751_v51 = vadd.f32 %v14153_v21, %v2542_v47  ;;  %v10555_v16 = vadd.f32 %v14156_v10, %v2951_v27  ;;  %v14158_v11 = vld [vmem:[#allocation82_spill] sm:$0xff]  ;;  %v14160_v10 = vld [vmem:[#allocation40_spill] sm:$0xff] }
 0x565   :  { %v3394_v9 = vadd.f32 %v3393_v48, %v3331_v8  ;;  %v14154_v8 = vld [vmem:[#allocation38_spill] sm:$0xff]  ;;  %v14155_v48 = vld [vmem:[#allocation81_spill] sm:$0xff]  ;;  %v2754_v1 = vadd.f32 %v10330_v28, %v2545_v45  ;;  %v3335_v47 = vmul.f32 %v10545_v41, %v10545_v41  ;;  %v10563_v21 = vadd.f32 %v14158_v11, %v2954_v14 }
 0x566   :  { %v10521_v62 = vpop.f32.mrf.mxu0  ;;  %v2548_v46 = vadd.f32 %v14155_v48, %v14154_v8  ;;  %v3262_v55 = vadd.f32 %v3261_v54, %v14142_v56  ;;  %v14161_v27 = vld [vmem:[#allocation86_spill] sm:$0xff]  ;;  %v14163_v48 = vld [vmem:[#allocation41_spill] sm:$0xff] }
 0x567   :  { %14141 = vst [vmem:[#allocation32_spill] sm:$0xff] %v10521_v62  ;;  %v3395_v2 = vadd.f32 %v3394_v9, %v3332_v60  ;;  %v3334_v62 = vmul.f32 %v10529_v3, %v10529_v3  ;;  %v14159_v60 = vld [vmem:[#allocation91_spill] sm:$0xff]  ;;  %v2963_v14 = vadd.f32 %v10332_v31, %v2754_v1 }
 0x568   :  { %v3263_v39 = vadd.f32 %v3262_v55, %v10515_v20  ;;  %v2960_v54 = vadd.f32 %v14159_v60, %v2751_v51  ;;  %v2757_v9 = vadd.f32 %v10350_v38, %v2548_v46  ;;  %v14162_v55 = vld [vmem:[#allocation85_spill] sm:$0xff]  ;;  %v14164_v51 = vld [vmem:[#allocation92_spill] sm:$0xff]  ;;  %v14166_v1 = vld [vmem:[#allocation43_spill] sm:$0xff] }
 0x569   :  { %v10536_v26 = vpop.f32.mrf.mxu2  ;;  %v3396_v23 = vadd.f32 %v3395_v2, %v3333_v44  ;;  %v3336_v2 = vmul.f32 %v10555_v16, %v10555_v16 }
 0x56a   :  { %v10538_v52 = vpop.f32.mrf.mxu3  ;;  %v3264_v28 = vadd.f32 %v3263_v39, %v10529_v3  ;;  %v3337_v39 = vmul.f32 %v10563_v21, %v10563_v21  ;;  %v2966_v31 = vadd.f32 %v10352_v37, %v2757_v9 }
 0x56b   :  { %14148 = vst [vmem:[#allocation67_spill] sm:$0xff] %v10538_v52  ;;  %v2957_v52 = vadd.f32 %v14157_v35, %v2748_v33  ;;  %v2551_v33 = vadd.f32 %v14161_v27, %v14160_v10  ;;  %v3397_v45 = vadd.f32 %v3396_v23, %v3334_v62  ;;  %v2554_v35 = vadd.f32 %v14164_v51, %v14163_v48  ;;  %v14165_v23 = vld [vmem:[#allocation89_spill] sm:$0xff] }
 0x56c   :  { %v3265_v38 = vadd.f32 %v3264_v28, %v10545_v41  ;;  %v2557_v10 = vadd.f32 %v10337_v43, %v14166_v1  ;;  %v10611_v51 = vadd.f32 %v10342_v34, %v2966_v31 }
 0x56d   :  { %v10575_v44 = vadd.f32 %v14162_v55, %v2957_v52  ;;  %v2760_v46 = vadd.f32 %v10370_v15, %v2551_v33  ;;  %v3398_v62 = vadd.f32 %v3397_v45, %v3335_v47  ;;  %v10589_v52 = vadd.f32 %v14165_v23, %v2960_v54  ;;  %v10596_v33 = vpop.f32.mrf.mxu1  ;;  %v4423_v54 = vld [vmem:[#allocation3 + $0x8] sm:$0xff]  ;;  %v14167_v55 = vld [vmem:[#allocation44_spill] sm:$0xff] }
 0x56e   :  { %v10567_v8 = vpop.f32.mrf.mxu0  ;;  %v3266_v27 = vadd.f32 %v3265_v38, %v10555_v16  ;;  %v2763_v15 = vadd.f32 %v10390_v58, %v2554_v35  ;;  %v10601_v45 = vadd.f32 %v10321_v4, %v2963_v14  ;;  %v2560_v37 = vadd.f32 %v10360_v36, %v14167_v55  ;;  %4580 = vmatpush.msra.mxu1 %v4423_v54  ;;  %v14168_v14 = vld [vmem:[#allocation46_spill] sm:$0xff] }
 0x56f   :  { %v3399_v28 = vadd.f32 %v3398_v62, %v3336_v2  ;;  %v3338_v47 = vmul.f32 %v10575_v44, %v10575_v44  ;;  %v2969_v43 = vadd.f32 %v10372_v24, %v2760_v46  ;;  %v2766_v48 = vadd.f32 %v10408_v13, %v2557_v10  ;;  %v14169_v13 = vld [vmem:[#allocation47_spill] sm:$0xff] }
 0x570   :  { %v3267_v9 = vadd.f32 %v3266_v27, %v10563_v21  ;;  %v3339_v2 = vmul.f32 %v10589_v52, %v10589_v52  ;;  %v2563_v35 = vadd.f32 %v10385_v50, %v14168_v14  ;;  %v2972_v38 = vadd.f32 %v10392_v40, %v2763_v15  ;;  %v14172_v14 = vld [vmem:[#allocation52_spill] sm:$0xff] }
 0x571   :  { %v10582_v11 = vpop.f32.mrf.mxu2  ;;  %v3400_v58 = vadd.f32 %v3399_v28, %v3337_v39  ;;  %v2769_v24 = vadd.f32 %v10428_v32, %v2560_v37  ;;  %v2566_v46 = vadd.f32 %v10412_v63, %v14169_v13  ;;  %v3340_v39 = vmul.f32 %v10601_v45, %v10601_v45  ;;  %v14170_v28 = vld [vmem:[#allocation49_spill] sm:$0xff] }
 0x572   :  { %v10584_v60 = vpop.f32.mrf.mxu3  ;;  %v3268_v36 = vadd.f32 %v3267_v9, %v10575_v44  ;;  %v10626_v23 = vadd.f32 %v10362_v17, %v2969_v43  ;;  %v2975_v50 = vadd.f32 %v10410_v6, %v2766_v48  ;;  %v2772_v31 = vadd.f32 %v10448_v12, %v2563_v35 }
 0x573   :  { %v3401_v62 = vadd.f32 %v3400_v58, %v3338_v47  ;;  %v3341_v32 = vmul.f32 %v10611_v51, %v10611_v51  ;;  %v10634_v27 = vadd.f32 %v10380_v18, %v2972_v38  ;;  %v2978_v15 = vadd.f32 %v10430_v19, %v2769_v24  ;;  %v14171_v18 = vld [vmem:[#allocation50_spill] sm:$0xff] }
 0x574   :  { %v3269_v34 = vadd.f32 %v3268_v36, %v10589_v52  ;;  %v2775_v17 = vadd.f32 %v10468_v53, %v2566_v46  ;;  %v2569_v6 = vadd.f32 %v10435_v57, %v14170_v28  ;;  %v3342_v54 = vmul.f32 %v10626_v23, %v10626_v23 }
 0x575   :  { %v3402_v10 = vadd.f32 %v3401_v62, %v3339_v2  ;;  %v10644_v55 = vadd.f32 %v10400_v42, %v2975_v50  ;;  %v2981_v37 = vadd.f32 %v10450_v59, %v2772_v31  ;;  %v2572_v9 = vadd.f32 %v10458_v0, %v14171_v18  ;;  %v2583_v19 = vpop.f32.mrf.mxu1  ;;  %v14175_v31 = vld [vmem:[#allocation67_spill] sm:$0xff] }
 0x576   :  { %v10613_v4 = vpop.f32.mrf.mxu0  ;;  %v3270_v63 = vadd.f32 %v3269_v34, %v10601_v45  ;;  %v2778_v53 = vadd.f32 %v10497_v61, %v2569_v6  ;;  %v3343_v58 = vmul.f32 %v10634_v27, %v10634_v27  ;;  %v10654_v2 = vadd.f32 %v10420_v5, %v2978_v15  ;;  %v14173_v5 = vld [vmem:[#allocation53_spill] sm:$0xff] }
 0x577   :  { %v3403_v47 = vadd.f32 %v3402_v10, %v3340_v39  ;;  %v2984_v42 = vadd.f32 %v10470_v30, %v2775_v17  ;;  %v2575_v59 = vadd.f32 %v10490_v7, %v14172_v14  ;;  %v2781_v0 = vadd.f32 %v10536_v26, %v2572_v9 }
 0x578   :  { %v3271_v12 = vadd.f32 %v3270_v63, %v10611_v51  ;;  %v3344_v61 = vmul.f32 %v10644_v55, %v10644_v55  ;;  %v10664_v38 = vadd.f32 %v10440_v29, %v2981_v37  ;;  %v2578_v46 = vadd.f32 %v10542_v25, %v14173_v5  ;;  %v14174_v29 = vld [vmem:[#allocation55_spill] sm:$0xff]  ;;  %v14176_v63 = vld [vmem:[#allocation93_spill] sm:$0xff]  ;;  %v14178_v37 = vld [vmem:[#allocation32_spill] sm:$0xff] }
 0x579   :  { %v2786_v1 = vpop.f32.mrf.mxu2  ;;  %v3404_v43 = vadd.f32 %v3403_v47, %v3341_v32  ;;  %v2987_v30 = vadd.f32 %v10499_v22, %v2778_v53  ;;  %v2784_v7 = vadd.f32 %v10582_v11, %v2575_v59  ;;  %v3345_v39 = vmul.f32 %v10654_v2, %v10654_v2 }
 0x57a   :  { %v2995_v40 = vpop.f32.mrf.mxu3  ;;  %v3272_v57 = vadd.f32 %v3271_v12, %v10626_v23  ;;  %v10674_v34 = vadd.f32 %v10460_v49, %v2984_v42  ;;  %v2581_v50 = vadd.f32 %v10596_v33, %v14174_v29  ;;  %v2990_v10 = vadd.f32 %v14175_v31, %v2781_v0 }
 0x57b   :  { %v3405_v35 = vadd.f32 %v3404_v43, %v3342_v54  ;;  %v2787_v32 = vadd.f32 %v2786_v1, %v2578_v46  ;;  %v3346_v11 = vmul.f32 %v10664_v38, %v10664_v38  ;;  %v10683_v15 = vadd.f32 %v14176_v63, %v2987_v30  ;;  %v14177_v1 = vld [vmem:[#allocation56_spill] sm:$0xff]  ;;  %v14179_v46 = vld [vmem:[#allocation9_spill] sm:$0xff] }
 0x57c   :  { %v3273_v36 = vadd.f32 %v3272_v57, %v10634_v27  ;;  %v2993_v17 = vadd.f32 %v10584_v60, %v2784_v7  ;;  %v3347_v33 = vmul.f32 %v10674_v34, %v10674_v34  ;;  %v2584_v12 = vadd.f32 %v2583_v19, %v14177_v1 }
 0x57d   :  { %v3406_v62 = vadd.f32 %v3405_v35, %v3343_v58  ;;  %v2586_v54 = vpop.f32.mrf.mxu1  ;;  %v10691_v18 = vadd.f32 %v14178_v37, %v2990_v10  ;;  %v2996_v9 = vadd.f32 %v2995_v40, %v2787_v32  ;;  %v3348_v58 = vmul.f32 %v10683_v15, %v10683_v15 }
 0x57e   :  { %v3207_v48 = vpop.f32.mrf.mxu0  ;;  %v3274_v26 = vadd.f32 %v3273_v36, %v10644_v55  ;;  %v10697_v42 = vadd.f32 %v10567_v8, %v2993_v17  ;;  %v2587_v30 = vadd.f32 %v2586_v54, %v14179_v46 }
 0x57f   :  { %v3407_v25 = vadd.f32 %v3406_v62, %v3344_v61  ;;  %v3349_v35 = vmul.f32 %v10691_v18, %v10691_v18  ;;  %v10703_v40 = vadd.f32 %v10613_v4, %v2996_v9 }
 0x580   :  { %v3275_v22 = vadd.f32 %v3274_v26, %v10654_v2  ;;  %v3350_v5 = vmul.f32 %v10697_v42, %v10697_v42 }
 0x581   :  { %v2789_v24 = vpop.f32.mrf.mxu2  ;;  %v3408_v6 = vadd.f32 %v3407_v25, %v3345_v39  ;;  %v3351_v26 = vmul.f32 %v10703_v40, %v10703_v40 }
 0x582   :  { %v2998_v13 = vpop.f32.mrf.mxu3  ;;  %v2790_v28 = vadd.f32 %v2789_v24, %v2581_v50  ;;  %v3276_v47 = vadd.f32 %v3275_v22, %v10664_v38 }
 0x583   :  { %v3409_v43 = vadd.f32 %v3408_v6, %v3346_v11  ;;  %v14182_v6 = vld [vmem:[#allocation10_spill] sm:$0xff] }
 0x584   :  { %v3277_v53 = vadd.f32 %v3276_v47, %v10674_v34  ;;  %v2999_v14 = vadd.f32 %v2998_v13, %v2790_v28 }
 0x585   :  { %v3410_v0 = vadd.f32 %v3409_v43, %v3347_v33  ;;  %v2589_v32 = vpop.f32.mrf.mxu1 }
 0x586   :  { %v3210_v49 = vpop.f32.mrf.mxu0  ;;  %v3278_v19 = vadd.f32 %v3277_v53, %v10683_v15  ;;  %v10708_v8 = vadd.f32 %v3207_v48, %v2999_v14  ;;  %v2590_v47 = vadd.f32 %v2589_v32, %v14182_v6  ;;  %v4453_v14 = vld [vmem:[#allocation3 + $0xf8] sm:$0xff] }
 0x587   :  { %v3411_v61 = vadd.f32 %v3410_v0, %v3348_v58  ;;  %4775 = vmatpush.msrb.mxu2 %v4453_v14  ;;  %v4469_v32 = vld [vmem:[#allocation3 + $0x178] sm:$0xff] }
 0x588   :  { %v3279_v24 = vadd.f32 %v3278_v19, %v10691_v18  ;;  %v3352_v48 = vmul.f32 %v10708_v8, %v10708_v8  ;;  %4984 = vmatpush.msrb.mxu3 %v4469_v32  ;;  %v14196_v32 = vld [vmem:[#allocation23_spill] sm:$0xff]  ;;  %v14223_v14 = vld [vmem:[#allocation68_spill] sm:$0xff] }
 0x589   :  { %v2792_v57 = vpop.f32.mrf.mxu2  ;;  %v3412_v7 = vadd.f32 %v3411_v61, %v3349_v35 }
 0x58a   :  { %v3001_v60 = vpop.f32.mrf.mxu3  ;;  %v2793_v59 = vadd.f32 %v2792_v57, %v2584_v12  ;;  %v3280_v62 = vadd.f32 %v3279_v24, %v10697_v42 }
 0x58b   :  { %v3413_v50 = vadd.f32 %v3412_v7, %v3350_v5 }
 0x58c   :  { %v3002_v36 = vadd.f32 %v3001_v60, %v2793_v59  ;;  %v3281_v31 = vadd.f32 %v3280_v62, %v10703_v40  ;;  %v14184_v59 = vld [vmem:[#allocation11_spill] sm:$0xff] }
 0x58d   :  { %v3414_v25 = vadd.f32 %v3413_v50, %v3351_v26  ;;  %v2592_v60 = vpop.f32.mrf.mxu1 }
 0x58e   :  { %v3213_v13 = vpop.f32.mrf.mxu0  ;;  %v10714_v4 = vadd.f32 %v3210_v49, %v3002_v36  ;;  %v3282_v22 = vadd.f32 %v3281_v31, %v10708_v8  ;;  %v2593_v0 = vadd.f32 %v2592_v60, %v14184_v59  ;;  %v4452_v36 = vld [vmem:[#allocation3 + $0xf0] sm:$0xff]  ;;  %v14186_v60 = vld [vmem:[#allocation13_spill] sm:$0xff]  ;;  %v14187_v59 = vld [vmem:[#allocation14_spill] sm:$0xff] }
 0x58f   :  { %v3415_v17 = vadd.f32 %v3414_v25, %v3352_v48  ;;  %4776 = vmatpush.msrb.mxu2 %v4452_v36  ;;  %v14189_v36 = vld [vmem:[#allocation16_spill] sm:$0xff] }
 0x590   :  { %14180 = vst [vmem:[#allocation73_spill] sm:$0xff] %v10714_v4  ;;  %v3353_v11 = vmul.f32 %v10714_v4, %v10714_v4  ;;  %v3283_v28 = vadd.f32 %v3282_v22, %v10714_v4  ;;  %v14220_v4 = vld [vmem:[#allocation64_spill] sm:$0xff] }
 0x591   :  { %v2795_v39 = vpop.f32.mrf.mxu2 }
 0x592   :  { %v3004_v29 = vpop.f32.mrf.mxu3  ;;  %v2796_v10 = vadd.f32 %v2795_v39, %v2587_v30  ;;  %v3416_v33 = vadd.f32 %v3415_v17, %v3353_v11 }
 0x594   :  { %v3005_v63 = vadd.f32 %v3004_v29, %v2796_v10 }
 0x596   :  { %v10723_v49 = vadd.f32 %v3213_v13, %v3005_v63  ;;  %v3216_v54 = vpop.f32.mrf.mxu0 }
 0x598   :  { %14181 = vst [vmem:[#allocation79_spill] sm:$0xff] %v10723_v49  ;;  %v3284_v1 = vadd.f32 %v3283_v28, %v10723_v49  ;;  %v3354_v12 = vmul.f32 %v10723_v49, %v10723_v49  ;;  %v14214_v49 = vld [vmem:[#allocation58_spill] sm:$0xff] }
 0x599   :  { %v2798_v37 = vpop.f32.mrf.mxu2 }
 0x59a   :  { %v3007_v9 = vpop.f32.mrf.mxu3  ;;  %v3417_v43 = vadd.f32 %v3416_v33, %v3354_v12  ;;  %v2799_v53 = vadd.f32 %v2798_v37, %v2590_v47  ;;  %v4451_v37 = vld [vmem:[#allocation3 + $0xe8] sm:$0xff]  ;;  %v14219_v12 = vld [vmem:[#allocation63_spill] sm:$0xff] }
 0x59b   :  { %4777 = vmatpush.msrb.mxu2 %v4451_v37  ;;  %v14201_v37 = vld [vmem:[#allocation28_spill] sm:$0xff] }
 0x59c   :  { %v3008_v57 = vadd.f32 %v3007_v9, %v2799_v53  ;;  %v14185_v53 = vld [vmem:[#allocation12_spill] sm:$0xff] }
 0x59e   :  { %v10729_v58 = vadd.f32 %v3216_v54, %v3008_v57  ;;  %v3219_v46 = vpop.f32.mrf.mxu0  ;;  %v14218_v57 = vld [vmem:[#allocation62_spill] sm:$0xff] }
 0x5a0   :  { %14183 = vst [vmem:[#allocation70_spill] sm:$0xff] %v10729_v58  ;;  %v3285_v19 = vadd.f32 %v3284_v1, %v10729_v58  ;;  %v3355_v35 = vmul.f32 %v10729_v58, %v10729_v58 }
 0x5a1   :  { %v2801_v61 = vpop.f32.mrf.mxu2 }
 0x5a2   :  { %v3010_v24 = vpop.f32.mrf.mxu3  ;;  %v3418_v5 = vadd.f32 %v3417_v43, %v3355_v35  ;;  %v2802_v13 = vadd.f32 %v2801_v61, %v2593_v0 }
 0x5a4   :  { %v3011_v30 = vadd.f32 %v3010_v24, %v2802_v13  ;;  %v14190_v24 = vld [vmem:[#allocation17_spill] sm:$0xff]  ;;  %v14191_v13 = vld [vmem:[#allocation18_spill] sm:$0xff] }
 0x5a6   :  { %v10735_v7 = vadd.f32 %v3219_v46, %v3011_v30  ;;  %v14192_v30 = vld [vmem:[#allocation19_spill] sm:$0xff] }
 0x5a8   :  { %v3286_v62 = vadd.f32 %v3285_v19, %v10735_v7  ;;  %v3356_v26 = vmul.f32 %v10735_v7, %v10735_v7  ;;  %v14188_v19 = vld [vmem:[#allocation15_spill] sm:$0xff] }
 0x5aa   :  { %v3287_v39 = vrot.slane %v3286_v62, 4  ;;  %v3419_v29 = vadd.f32 %v3418_v5, %v3356_v26  ;;  %v14193_v26 = vld [vmem:[#allocation20_spill] sm:$0xff]  ;;  %v14222_v5 = vld [vmem:[#allocation66_spill] sm:$0xff] }
 0x5ac   :  { %v3288_v50 = vadd.f32 %v3287_v39, %v3286_v62  ;;  %v3420_v31 = vrot.slane %v3419_v29, 4 }
 0x5ae   :  { %v3289_v48 = vrot.slane %v3288_v50, 2  ;;  %v3421_v10 = vadd.f32 %v3420_v31, %v3419_v29  ;;  %v14208_v31 = vld [vmem:[#allocation42_spill] sm:$0xff] }
 0x5b0   :  { %v3290_v25 = vadd.f32 %v3289_v48, %v3288_v50  ;;  %v3422_v22 = vrot.slane %v3421_v10, 2  ;;  %v14194_v50 = vld [vmem:[#allocation21_spill] sm:$0xff]  ;;  %v14195_v48 = vld [vmem:[#allocation22_spill] sm:$0xff] }
 0x5b2   :  { %v3291_v11 = vrot.slane %v3290_v25, 1  ;;  %v3423_v63 = vadd.f32 %v3422_v22, %v3421_v10  ;;  %v14197_v22 = vld [vmem:[#allocation24_spill] sm:$0xff]  ;;  %v14202_v10 = vld [vmem:[#allocation29_spill] sm:$0xff] }
 0x5b4   :  { %v3292_v17 = vadd.f32 %v3291_v11, %v3290_v25  ;;  %v3424_v28 = vrot.slane %v3423_v63, 1  ;;  %v14203_v25 = vld [vmem:[#allocation30_spill] sm:$0xff]  ;;  %v14204_v11 = vld [vmem:[#allocation31_spill] sm:$0xff] }
 0x5b6   :  { %v3425_v6 = vadd.f32 %v3424_v28, %v3423_v63  ;;  %v10740_v47 = vmul.f32 0.001953125, %v3292_v17  ;;  %v14198_v17 = vld [vmem:[#allocation25_spill] sm:$0xff] }
 0x5b7   :  { %v14205_v28 = vld [vmem:[#allocation33_spill] sm:$0xff] }
 0x5b8   :  { %v3427_v33 = vmul.f32 0.001953125, %v3425_v6  ;;  %v3428_v1 = vmul.f32 %v10740_v47, %v10740_v47  ;;  %v14199_v6 = vld [vmem:[#allocation26_spill] sm:$0xff] }
 0x5ba   :  { %v3429_v54 = vsub.f32 %v3427_v33, %v3428_v1  ;;  %v14200_v1 = vld [vmem:[#allocation27_spill] sm:$0xff]  ;;  %v14206_v33 = vld [vmem:[#allocation36_spill] sm:$0xff] }
 0x5bc   :  { %v3430_v9 = vmax.f32 %v3429_v54, 0.0  ;;  %v14224_v54 = vsub.f32 %v10735_v7, %v10740_v47  ;;  %v14228_v7 = vsub.f32 %v14188_v19, %v10740_v47 }
 0x5be   :  { %v3431_v43 = vadd.f32 1e-05, %v3430_v9  ;;  %v14207_v9 = vld [vmem:[#allocation39_spill] sm:$0xff] }
 0x5c0   :  { %7626 = vrsqrt.f32 %v3431_v43  ;;  %vm3438_vm0 = vweird.f32 %v3431_v43 }
 0x5c6   :  { %v7627_v29 = vpop.eup %7626 }
 0x5c7   :  { %v3433_v63 = vmul.f32 %v7627_v29, %v3431_v43  ;;  %vm3439_vm1 = vweird.f32 %v7627_v29 }
 0x5c8   :  { %vm3440_vm2 = vmor %vm3438_vm0, %vm3439_vm1 }
 0x5c9   :  { %v3434_v46 = vmul.f32 %v7627_v29, %v3433_v63 }
 0x5cb   :  { %v3435_v62 = vmul.f32 0.5, %v3434_v46 }
 0x5cd   :  { %v3436_v46 = vsub.f32 1.5, %v3435_v62  ;;  %v3222_v62 = vld [vmem:[%s13746_s2] sm:$0x1] }
 0x5cf   :  { %v3437_v61 = vmul.f32 %v7627_v29, %v3436_v46 }
 0x5d1   :  { %v3441_v58 = vsel %vm3440_vm2, %v7627_v29, %v3437_v61  ;;  %v14225_v29 = vsub.f32 %v14185_v53, %v10740_v47 }
 0x5d2   :  { %v3506_v39 = vmul.f32 %v3441_v58, %v3222_v62  ;;  %v10865_v62 = vld [vmem:[%s13747_s3] ss:$0 sm:$0xff]  ;;  %v14226_v58 = vsub.f32 %v14186_v60, %v10740_v47  ;;  %s7126_s3 = sshll.u32 %s13751_s7, 4  ;;  %s7127_s3 = int_to_ptr.hbm [resolvable:$true] %s7126_s3 }
 0x5d4   :  { %v10867_v46 = vperm.slane %v3506_v39, 0  ;;  %v14227_v39 = vsub.f32 %v14187_v59, %v10740_v47 }
 0x5d6   :  { %v3571_v61 = vmul.f32 %v10867_v46, %v14224_v54  ;;  %v10891_v0 = vmul.f32 %v10867_v46, %v14225_v29  ;;  %v10897_v43 = vmul.f32 %v10867_v46, %v14226_v58  ;;  %v10903_v63 = vmul.f32 %v10867_v46, %v14227_v39 }
 0x5d7   :  { %v10909_v53 = vmul.f32 %v10867_v46, %v14228_v7  ;;  %v14229_v54 = vsub.f32 %v14189_v36, %v10740_v47  ;;  %v14230_v29 = vsub.f32 %v14190_v24, %v10740_v47  ;;  %v14231_v58 = vsub.f32 %v14191_v13, %v10740_v47 }
 0x5d8   :  { %v3638_v39 = vadd.f32 %v10865_v62, %v3571_v61  ;;  %v14232_v36 = vsub.f32 %v14192_v30, %v10740_v47  ;;  %v14233_v24 = vsub.f32 %v14193_v26, %v10740_v47  ;;  %v14234_v13 = vsub.f32 %v14194_v50, %v10740_v47 }
 0x5d9   :  { %v10915_v60 = vmul.f32 %v10867_v46, %v14229_v54  ;;  %v10921_v59 = vmul.f32 %v10867_v46, %v14230_v29  ;;  %v10927_v19 = vmul.f32 %v10867_v46, %v14231_v58  ;;  %v14235_v61 = vsub.f32 %v14195_v48, %v10740_v47 }
 0x5da   :  { %v10934_v7 = vmul.f32 %v10867_v46, %v14232_v36  ;;  %v10940_v54 = vmul.f32 %v10867_v46, %v14233_v24  ;;  %v10946_v29 = vmul.f32 %v10867_v46, %v14234_v13  ;;  %v14236_v58 = vsub.f32 %v14196_v32, %v10740_v47 }
 0x5db   :  { %v10952_v30 = vmul.f32 %v10867_v46, %v14235_v61  ;;  %v14237_v36 = vsub.f32 %v14197_v22, %v10740_v47  ;;  %v14238_v24 = vsub.f32 %v14198_v17, %v10740_v47  ;;  %v3702_v13 = vmax.f32 %v3638_v39, 0.0 }
 0x5dc   :  { %v10958_v26 = vmul.f32 %v10867_v46, %v14236_v58  ;;  %v14239_v61 = vsub.f32 %v14199_v6, %v10740_v47  ;;  %v14240_v58 = vsub.f32 %v14200_v1, %v10740_v47  ;;  %v14242_v39 = vsub.f32 %v14202_v10, %v10740_v47 }
 0x5dd   :  { %v10964_v50 = vmul.f32 %v10867_v46, %v14237_v36  ;;  %v10970_v48 = vmul.f32 %v10867_v46, %v14238_v24  ;;  %v14241_v36 = vsub.f32 %v14201_v37, %v10740_v47  ;;  %v14243_v24 = vsub.f32 %v14203_v25, %v10740_v47  ;;  %3844 = vst [vmem:[#allocation2 + $0x339] sm:$0xff] %v3702_v13 }
 0x5de   :  { %v10976_v32 = vmul.f32 %v10867_v46, %v14239_v61  ;;  %v10982_v22 = vmul.f32 %v10867_v46, %v14240_v58  ;;  %v10994_v6 = vmul.f32 %v10867_v46, %v14242_v39  ;;  %v14244_v61 = vsub.f32 %v14204_v11, %v10740_v47 }
 0x5df   :  { %v10988_v17 = vmul.f32 %v10867_v46, %v14241_v36  ;;  %v11000_v1 = vmul.f32 %v10867_v46, %v14243_v24  ;;  %v14245_v58 = vsub.f32 %v14205_v28, %v10740_v47  ;;  %v14246_v36 = vsub.f32 %v14206_v33, %v10740_v47 }
 0x5e0   :  { %v11006_v37 = vmul.f32 %v10867_v46, %v14244_v61  ;;  %v14247_v39 = vsub.f32 %v14207_v9, %v10740_v47  ;;  %v14248_v24 = vsub.f32 %v14208_v31, %v10740_v47  ;;  %v14250_v61 = vld [vmem:[#allocation45_spill] sm:$0xff] }
 0x5e1   :  { %v11012_v10 = vmul.f32 %v10867_v46, %v14245_v58  ;;  %v11018_v25 = vmul.f32 %v10867_v46, %v14246_v36  ;;  %v14251_v13 = vsub.f32 %v14250_v61, %v10740_v47  ;;  %v14253_v58 = vld [vmem:[#allocation48_spill] sm:$0xff] }
 0x5e2   :  { %v11024_v11 = vmul.f32 %v10867_v46, %v14247_v39  ;;  %v11030_v28 = vmul.f32 %v10867_v46, %v14248_v24  ;;  %v14254_v36 = vsub.f32 %v14253_v58, %v10740_v47  ;;  %v14256_v39 = vld [vmem:[#allocation51_spill] sm:$0xff]  ;;  %v14259_v24 = vld [vmem:[#allocation54_spill] sm:$0xff] }
 0x5e3   :  { %v11036_v33 = vmul.f32 %v10867_v46, %v14251_v13  ;;  %v14257_v35 = vsub.f32 %v14256_v39, %v10740_v47  ;;  %v14262_v13 = vld [vmem:[#allocation57_spill] sm:$0xff] }
 0x5e4   :  { %14249 = vst [vmem:[#allocation34_spill] sm:$0xff] %v11030_v28  ;;  %v11042_v9 = vmul.f32 %v10867_v46, %v14254_v36  ;;  %v14260_v28 = vsub.f32 %v14259_v24, %v10740_v47  ;;  %v14265_v36 = vsub.f32 %v14214_v49, %v10740_v47 }
 0x5e5   :  { %14252 = vst [vmem:[#allocation71_spill] sm:$0xff] %v11036_v33  ;;  %v11048_v31 = vmul.f32 %v10867_v46, %v14257_v35  ;;  %v14263_v33 = vsub.f32 %v14262_v13, %v10740_v47  ;;  %v14267_v35 = vld [vmem:[#allocation59_spill] sm:$0xff] }
 0x5e6   :  { %14255 = vst [vmem:[#allocation76_spill] sm:$0xff] %v11042_v9  ;;  %v11054_v61 = vmul.f32 %v10867_v46, %v14260_v28  ;;  %v11066_v39 = vmul.f32 %v10867_v46, %v14265_v36  ;;  %v14270_v28 = vld [vmem:[#allocation60_spill] sm:$0xff]  ;;  %v14276_v36 = vsub.f32 %v14218_v57, %v10740_v47  ;;  %v14283_v57 = vsub.f32 %v14222_v5, %v10740_v47  ;;  %v4450_v9 = vld [vmem:[#allocation3 + $0xe0] sm:$0xff] }
 0x5e7   :  { %14258 = vst [vmem:[#allocation83_spill] sm:$0xff] %v11048_v31  ;;  %v11060_v58 = vmul.f32 %v10867_v46, %v14263_v33  ;;  %v14268_v31 = vsub.f32 %v14267_v35, %v10740_v47  ;;  %v14273_v33 = vld [vmem:[#allocation61_spill] sm:$0xff]  ;;  %v14287_v5 = vsub.f32 %v10529_v3, %v10740_v47  ;;  %v14291_v3 = vsub.f32 %v10575_v44, %v10740_v47 }
 0x5e8   :  { %14261 = vst [vmem:[#allocation69_spill] sm:$0xff] %v11054_v61  ;;  %v14271_v61 = vsub.f32 %v14270_v28, %v10740_v47  ;;  %v11090_v35 = vmul.f32 %v10867_v46, %v14276_v36  ;;  %v3545_v36 = vmul.f32 %v10867_v46, %v14283_v57  ;;  %v14295_v44 = vsub.f32 %v10626_v23, %v10740_v47 }
 0x5e9   :  { %14264 = vst [vmem:[#allocation35_spill] sm:$0xff] %v11060_v58  ;;  %v11072_v24 = vmul.f32 %v10867_v46, %v14268_v31  ;;  %v14274_v58 = vsub.f32 %v14273_v33, %v10740_v47  ;;  %v14278_v31 = vsub.f32 %v14219_v12, %v10740_v47  ;;  %v14284_v12 = vsub.f32 %v14223_v14, %v10740_v47 }
 0x5ea   :  { %14266 = vst [vmem:[#allocation74_spill] sm:$0xff] %v11066_v39  ;;  %v11078_v13 = vmul.f32 %v10867_v46, %v14271_v61  ;;  %v14280_v61 = vsub.f32 %v14220_v4, %v10740_v47  ;;  %v14285_v4 = vsub.f32 %v14142_v56, %v10740_v47  ;;  %v3549_v57 = vmul.f32 %v10867_v46, %v14287_v5  ;;  %v4468_v39 = vld [vmem:[#allocation3 + $0x170] sm:$0xff] }
 0x5eb   :  { %14269 = vst [vmem:[#allocation72_spill] sm:$0xff] %v11072_v24  ;;  %v11084_v49 = vmul.f32 %v10867_v46, %v14274_v58  ;;  %v11096_v28 = vmul.f32 %v10867_v46, %v14278_v31  ;;  %v3546_v31 = vmul.f32 %v10867_v46, %v14284_v12  ;;  %v14288_v14 = vsub.f32 %v10545_v41, %v10740_v47  ;;  %v14310_v24 = vld [vmem:[#allocation70_spill] sm:$0xff] }
 0x5ec   :  { %14272 = vst [vmem:[#allocation80_spill] sm:$0xff] %v11078_v13  ;;  %v3543_v33 = vmul.f32 %v10867_v46, %v14280_v61  ;;  %v14281_v13 = vld [vmem:[#allocation65_spill] sm:$0xff]  ;;  %v3547_v61 = vmul.f32 %v10867_v46, %v14285_v4  ;;  %v14289_v56 = vsub.f32 %v10555_v16, %v10740_v47  ;;  %v3553_v5 = vmul.f32 %v10867_v46, %v14291_v3 }
 0x5ed   :  { %14275 = vst [vmem:[#allocation87_spill] sm:$0xff] %v11084_v49  ;;  %v14282_v58 = vsub.f32 %v14281_v13, %v10740_v47  ;;  %v14286_v13 = vsub.f32 %v10515_v20, %v10740_v47  ;;  %v3550_v12 = vmul.f32 %v10867_v46, %v14288_v14  ;;  %v14290_v20 = vsub.f32 %v10563_v21, %v10740_v47 }
 0x5ee   :  { %14277 = vst [vmem:[#allocation37_spill] sm:$0xff] %v11090_v35  ;;  %v3551_v4 = vmul.f32 %v10867_v46, %v14289_v56  ;;  %v14292_v41 = vsub.f32 %v10589_v52, %v10740_v47  ;;  %v14293_v16 = vsub.f32 %v10601_v45, %v10740_v47  ;;  %v14294_v21 = vsub.f32 %v10611_v51, %v10740_v47  ;;  %v14308_v35 = vld [vmem:[#allocation79_spill] sm:$0xff] }
 0x5ef   :  { %14279 = vst [vmem:[#allocation77_spill] sm:$0xff] %v11096_v28  ;;  %v3544_v49 = vmul.f32 %v10867_v46, %v14282_v58  ;;  %v3548_v58 = vmul.f32 %v10867_v46, %v14286_v13  ;;  %v3552_v13 = vmul.f32 %v10867_v46, %v14290_v20  ;;  %v3557_v3 = vmul.f32 %v10867_v46, %v14295_v44  ;;  %v14306_v28 = vld [vmem:[#allocation73_spill] sm:$0xff] }
 0x5f0   :  { %v3554_v14 = vmul.f32 %v10867_v46, %v14292_v41  ;;  %v3555_v56 = vmul.f32 %v10867_v46, %v14293_v16  ;;  %v3556_v20 = vmul.f32 %v10867_v46, %v14294_v21  ;;  %v14296_v52 = vsub.f32 %v10634_v27, %v10740_v47  ;;  %4985 = vmatpush.msrb.mxu3 %v4468_v39 }
 0x5f1   :  { %v14297_v45 = vsub.f32 %v10644_v55, %v10740_v47  ;;  %v14298_v51 = vsub.f32 %v10654_v2, %v10740_v47  ;;  %v14299_v23 = vsub.f32 %v10664_v38, %v10740_v47  ;;  %v14300_v27 = vsub.f32 %v10674_v34, %v10740_v47  ;;  %4778 = vmatpush.msrb.mxu2 %v4450_v9 }
 0x5f2   :  { %v3558_v41 = vmul.f32 %v10867_v46, %v14296_v52  ;;  %v14301_v55 = vsub.f32 %v10683_v15, %v10740_v47  ;;  %v14302_v2 = vsub.f32 %v10691_v18, %v10740_v47  ;;  %v14303_v38 = vsub.f32 %v10697_v42, %v10740_v47 }
 0x5f3   :  { %v3559_v16 = vmul.f32 %v10867_v46, %v14297_v45  ;;  %v3560_v21 = vmul.f32 %v10867_v46, %v14298_v51  ;;  %v3561_v44 = vmul.f32 %v10867_v46, %v14299_v23  ;;  %v3562_v52 = vmul.f32 %v10867_v46, %v14300_v27 }
 0x5f4   :  { %v3563_v45 = vmul.f32 %v10867_v46, %v14301_v55  ;;  %v3564_v51 = vmul.f32 %v10867_v46, %v14302_v2  ;;  %v3565_v23 = vmul.f32 %v10867_v46, %v14303_v38  ;;  %v14304_v34 = vsub.f32 %v10703_v40, %v10740_v47 }
 0x5f5   :  { %v14305_v15 = vsub.f32 %v10708_v8, %v10740_v47  ;;  %v14307_v18 = vsub.f32 %v14306_v28, %v10740_v47  ;;  %v14309_v42 = vsub.f32 %v14308_v35, %v10740_v47  ;;  %v14311_v40 = vsub.f32 %v14310_v24, %v10740_v47  ;;  %v4449_v24 = vld [vmem:[#allocation3 + $0xd8] sm:$0xff] }
 0x5f6   :  { %v3566_v27 = vmul.f32 %v10867_v46, %v14304_v34  ;;  %v11212_v8 = vadd.f32 %v10865_v62, %v10891_v0  ;;  %v11216_v28 = vadd.f32 %v10865_v62, %v10897_v43  ;;  %v11220_v35 = vadd.f32 %v10865_v62, %v10903_v63  ;;  %v4467_v43 = vld [vmem:[#allocation3 + $0x168] sm:$0xff]  ;;  %4779 = vmatpush.msrb.mxu2 %v4449_v24 }
 0x5f7   :  { %v3567_v55 = vmul.f32 %v10867_v46, %v14305_v15  ;;  %v3568_v2 = vmul.f32 %v10867_v46, %v14307_v18  ;;  %v3569_v38 = vmul.f32 %v10867_v46, %v14309_v42  ;;  %v3570_v34 = vmul.f32 %v10867_v46, %v14311_v40  ;;  %4986 = vmatpush.msrb.mxu3 %v4467_v43 }
 0x5f8   :  { %v11224_v47 = vadd.f32 %v10865_v62, %v10909_v53  ;;  %v11228_v46 = vadd.f32 %v10865_v62, %v10915_v60  ;;  %v11232_v0 = vadd.f32 %v10865_v62, %v10921_v59  ;;  %v11236_v39 = vadd.f32 %v10865_v62, %v10927_v19 }
 0x5f9   :  { %v11239_v63 = vadd.f32 %v10865_v62, %v3543_v33  ;;  %v11242_v53 = vadd.f32 %v10865_v62, %v3544_v49  ;;  %v11245_v60 = vadd.f32 %v10865_v62, %v3545_v36  ;;  %v11248_v59 = vadd.f32 %v10865_v62, %v3546_v31  ;;  %v4466_v33 = vld [vmem:[#allocation3 + $0x160] sm:$0xff]  ;;  %v4448_v49 = vld [vmem:[#allocation3 + $0xd0] sm:$0xff] }
 0x5fa   :  { %v11251_v9 = vadd.f32 %v10865_v62, %v3547_v61  ;;  %v11254_v15 = vadd.f32 %v10865_v62, %v3548_v58  ;;  %v11257_v19 = vadd.f32 %v10865_v62, %v3549_v57  ;;  %v11260_v18 = vadd.f32 %v10865_v62, %v3550_v12  ;;  %4987 = vmatpush.msrb.mxu3 %v4466_v33 }
 0x5fb   :  { %v11263_v36 = vadd.f32 %v10865_v62, %v3551_v4  ;;  %v11266_v31 = vadd.f32 %v10865_v62, %v3552_v13  ;;  %v11269_v61 = vadd.f32 %v10865_v62, %v3553_v5  ;;  %v11272_v58 = vadd.f32 %v10865_v62, %v3554_v14  ;;  %4780 = vmatpush.msrb.mxu2 %v4448_v49  ;;  %v4465_v4 = vld [vmem:[#allocation3 + $0x158] sm:$0xff]  ;;  %v4447_v13 = vld [vmem:[#allocation3 + $0xc8] sm:$0xff] }
 0x5fc   :  { %v11275_v57 = vadd.f32 %v10865_v62, %v3555_v56  ;;  %v11278_v42 = vadd.f32 %v10865_v62, %v3556_v20  ;;  %v11281_v12 = vadd.f32 %v10865_v62, %v3557_v3  ;;  %v11284_v40 = vadd.f32 %v10865_v62, %v3558_v41  ;;  %4988 = vmatpush.msrb.mxu3 %v4465_v4  ;;  %v4463_v49 = vld [vmem:[#allocation3 + $0x148] sm:$0xff] }
 0x5fd   :  { %v11287_v5 = vadd.f32 %v10865_v62, %v3559_v16  ;;  %v11290_v14 = vadd.f32 %v10865_v62, %v3560_v21  ;;  %v11293_v56 = vadd.f32 %v10865_v62, %v3561_v44  ;;  %v11296_v20 = vadd.f32 %v10865_v62, %v3562_v52  ;;  %4781 = vmatpush.msrb.mxu2 %v4447_v13  ;;  %v4464_v16 = vld [vmem:[#allocation3 + $0x150] sm:$0xff]  ;;  %v4446_v21 = vld [vmem:[#allocation3 + $0xc0] sm:$0xff] }
 0x5fe   :  { %v11299_v3 = vadd.f32 %v10865_v62, %v3563_v45  ;;  %v11302_v43 = vadd.f32 %v10865_v62, %v3564_v51  ;;  %v11305_v41 = vadd.f32 %v10865_v62, %v3565_v23  ;;  %v11308_v24 = vadd.f32 %v10865_v62, %v3566_v27  ;;  %4989 = vmatpush.msrb.mxu3 %v4464_v16  ;;  %v4462_v13 = vld [vmem:[#allocation3 + $0x140] sm:$0xff] }
 0x5ff   :  { %v11311_v44 = vadd.f32 %v10865_v62, %v3567_v55  ;;  %v11314_v52 = vadd.f32 %v10865_v62, %v3568_v2  ;;  %v11317_v45 = vadd.f32 %v10865_v62, %v3569_v38  ;;  %v11320_v51 = vadd.f32 %v10865_v62, %v3570_v34  ;;  %4782 = vmatpush.msrb.mxu2 %v4446_v21  ;;  %v4445_v55 = vld [vmem:[#allocation3 + $0xb8] sm:$0xff]  ;;  %v4444_v21 = vld [vmem:[#allocation3 + $0xb0] sm:$0xff] }
 0x600   :  { %v13834_v23 = vmax.f32 %v11212_v8, 0.0  ;;  %v13835_v33 = vmax.f32 %v11216_v28, 0.0  ;;  %v13836_v27 = vmax.f32 %v11220_v35, 0.0  ;;  %v11327_v2 = vadd.f32 %v10865_v62, %v10934_v7  ;;  %4990 = vmatpush.msrb.mxu3 %v4463_v49 }
 0x601   :  { %v13837_v38 = vmax.f32 %v11224_v47, 0.0  ;;  %v11332_v34 = vadd.f32 %v10865_v62, %v10940_v54  ;;  %v13838_v4 = vmax.f32 %v11228_v46, 0.0  ;;  %4783 = vmatpush.msrb.mxu2 %v4445_v55  ;;  %v11339_v16 = vadd.f32 %v10865_v62, %v10946_v29  ;;  %v4461_v55 = vld [vmem:[#allocation3 + $0x138] sm:$0xff] }
 0x602   :  { %3781 = vst [vmem:[#allocation2 + $0x19] sm:$0xff] %v13834_v23  ;;  %v13839_v7 = vmax.f32 %v11232_v0, 0.0  ;;  %4991 = vmatpush.msrb.mxu3 %v4462_v13  ;;  %v11346_v54 = vadd.f32 %v10865_v62, %v10952_v30  ;;  %v13840_v49 = vmax.f32 %v11236_v39, 0.0  ;;  %v11353_v29 = vadd.f32 %v10865_v62, %v10958_v26  ;;  %v4443_v13 = vld [vmem:[#allocation3 + $0xa8] sm:$0xff] }
 0x603   :  { %3782 = vst [vmem:[#allocation2 + $0x21] sm:$0xff] %v13835_v33  ;;  %4784 = vmatpush.msrb.mxu2 %v4444_v21  ;;  %v13841_v23 = vmax.f32 %v11327_v2, 0.0  ;;  %v11360_v30 = vadd.f32 %v10865_v62, %v10964_v50  ;;  %v13842_v33 = vmax.f32 %v11332_v34, 0.0  ;;  %v4460_v21 = vld [vmem:[#allocation3 + $0x130] sm:$0xff]  ;;  %v11367_v26 = vadd.f32 %v10865_v62, %v10970_v48 }
 0x604   :  { %3783 = vst [vmem:[#allocation2 + $0x31] sm:$0xff] %v13836_v27  ;;  %4992 = vmatpush.msrb.mxu3 %v4461_v55  ;;  %v13843_v27 = vmax.f32 %v11339_v16, 0.0  ;;  %v4442_v55 = vld [vmem:[#allocation3 + $0xa0] sm:$0xff]  ;;  %v11374_v50 = vadd.f32 %v10865_v62, %v10976_v32  ;;  %v11381_v48 = vadd.f32 %v10865_v62, %v10982_v22  ;;  %v11388_v32 = vadd.f32 %v10865_v62, %v10988_v17 }
 0x605   :  { %3784 = vst [vmem:[#allocation2 + $0x39] sm:$0xff] %v13837_v38  ;;  %4785 = vmatpush.msrb.mxu2 %v4443_v13  ;;  %v13844_v38 = vmax.f32 %v11346_v54, 0.0  ;;  %v4459_v13 = vld [vmem:[#allocation3 + $0x128] sm:$0xff]  ;;  %v11395_v22 = vadd.f32 %v10865_v62, %v10994_v6  ;;  %v11402_v17 = vadd.f32 %v10865_v62, %v11000_v1  ;;  %v11409_v6 = vadd.f32 %v10865_v62, %v11006_v37 }
 0x606   :  { %3785 = vst [vmem:[#allocation2 + $0x49] sm:$0xff] %v13838_v4  ;;  %4993 = vmatpush.msrb.mxu3 %v4460_v21  ;;  %v13845_v4 = vmax.f32 %v11353_v29, 0.0  ;;  %v4485_v21 = vld [vmem:[#allocation3 + $0x1f8] sm:$0xff]  ;;  %v11416_v1 = vadd.f32 %v10865_v62, %v11012_v10  ;;  %v11423_v37 = vadd.f32 %v10865_v62, %v11018_v25  ;;  %v11430_v10 = vadd.f32 %v10865_v62, %v11024_v11  ;;  %v4456_v25 = vld [vmem:[#allocation3 + $0x110] sm:$0xff]  ;;  %v4438_v11 = vld [vmem:[#allocation3 + $0x80] sm:$0xff] }
 0x607   :  { %14312 = vst [vmem:[#allocation75_spill] sm:$0xff] %v11367_v26  ;;  %4786 = vmatpush.msrb.mxu2 %v4442_v55  ;;  %5193 = vmatpush.msrb.mxu0 %v4485_v21  ;;  %v4441_v55 = vld [vmem:[#allocation3 + $0x98] sm:$0xff]  ;;  %v4484_v21 = vld [vmem:[#allocation3 + $0x1f0] sm:$0xff] }
 0x608   :  { %3786 = vst [vmem:[#allocation2 + $0x51] sm:$0xff] %v13839_v7  ;;  %4994 = vmatpush.msrb.mxu3 %v4459_v13  ;;  %v13846_v7 = vmax.f32 %v11360_v30, 0.0  ;;  %v4458_v13 = vld [vmem:[#allocation3 + $0x120] sm:$0xff] }
 0x609   :  { %14313 = vst [vmem:[#allocation84_spill] sm:$0xff] %v11374_v50  ;;  %4787 = vmatpush.msrb.mxu2 %v4441_v55  ;;  %5194 = vmatpush.msrb.mxu0 %v4484_v21  ;;  %v4440_v55 = vld [vmem:[#allocation3 + $0x90] sm:$0xff]  ;;  %v4483_v21 = vld [vmem:[#allocation3 + $0x1e8] sm:$0xff] }
 0x60a   :  { %3787 = vst [vmem:[#allocation2 + $0x61] sm:$0xff] %v13840_v49  ;;  %v13847_v49 = vmax.f32 %v11367_v26, 0.0  ;;  %4995 = vmatpush.msrb.mxu3 %v4458_v13  ;;  %v4457_v13 = vld [vmem:[#allocation3 + $0x118] sm:$0xff]  ;;  %v14324_v26 = vmax.f32 %v11388_v32, 0.0 }
 0x60b   :  { %3788 = vst [vmem:[#allocation2 + $0x69] sm:$0xff] %v13841_v23  ;;  %v13849_v23 = vmax.f32 %v11374_v50, 0.0  ;;  %4788 = vmatpush.msrb.mxu2 %v4440_v55  ;;  %5195 = vmatpush.msrb.mxu0 %v4483_v21  ;;  %v4439_v55 = vld [vmem:[#allocation3 + $0x88] sm:$0xff]  ;;  %v14323_v50 = vld [vmem:[#allocation71_spill] sm:$0xff] }
 0x60c   :  { %14314 = vst [vmem:[#allocation90_spill] sm:$0xff] %v11388_v32  ;;  %4996 = vmatpush.msrb.mxu3 %v4457_v13  ;;  %v11444_v21 = vadd.f32 %v10865_v62, %v14323_v50  ;;  %v14328_v32 = vmax.f32 %v11402_v17, 0.0 }
 0x60d   :  { %3789 = vst [vmem:[#allocation2 + $0x79] sm:$0xff] %v13842_v33  ;;  %v13851_v33 = vmax.f32 %v11381_v48, 0.0  ;;  %4789 = vmatpush.msrb.mxu2 %v4439_v55  ;;  %v14330_v55 = vmax.f32 %v11409_v6, 0.0 }
 0x60e   :  { %14315 = vst [vmem:[#allocation38_spill] sm:$0xff] %v11395_v22  ;;  %4997 = vmatpush.msrb.mxu3 %v4456_v25  ;;  %v14326_v25 = vmax.f32 %v11395_v22, 0.0  ;;  %v14343_v22 = vld [vmem:[#allocation77_spill] sm:$0xff] }
 0x60f   :  { %3790 = vst [vmem:[#allocation2 + $0x81] sm:$0xff] %v13843_v27  ;;  %v14321_v27 = vld [vmem:[#allocation34_spill] sm:$0xff]  ;;  %4790 = vmatpush.msrb.mxu2 %v4438_v11  ;;  %v13858_v11 = vmov 0.0  }
 0x610   :  { %14316 = vst [vmem:[#allocation81_spill] sm:$0xff] %v11402_v17  ;;  %v14333_v17 = vld [vmem:[#allocation74_spill] sm:$0xff] }
 0x611   :  { %3791 = vst [vmem:[#allocation2 + $0x91] sm:$0xff] %v13844_v38  ;;  %v11437_v38 = vadd.f32 %v10865_v62, %v14321_v27  ;;  %v14325_v27 = vld [vmem:[#allocation76_spill] sm:$0xff] }
 0x612   :  { %14317 = vst [vmem:[#allocation78_spill] sm:$0xff] %v11409_v6  ;;  %v11451_v13 = vadd.f32 %v10865_v62, %v14325_v27  ;;  %v14335_v27 = vld [vmem:[#allocation72_spill] sm:$0xff] }
 0x613   :  { %3792 = vst [vmem:[#allocation2 + $0x99] sm:$0xff] %v13845_v4  ;;  %v4481_v4 = vld [vmem:[#allocation3 + $0x1d8] sm:$0xff] }
 0x614   :  { %14318 = vst [vmem:[#allocation88_spill] sm:$0xff] %v11416_v1 }
 0x615   :  { %3793 = vst [vmem:[#allocation2 + $0xa9] sm:$0xff] %v13846_v7  ;;  %v4482_v7 = vld [vmem:[#allocation3 + $0x1e0] sm:$0xff] }
 0x616   :  { %14319 = vst [vmem:[#allocation82_spill] sm:$0xff] %v11423_v37  ;;  %5196 = vmatpush.msrb.mxu0 %v4482_v7  ;;  %v14329_v7 = vld [vmem:[#allocation69_spill] sm:$0xff] }
 0x617   :  { %3794 = vst [vmem:[#allocation2 + $0xb1] sm:$0xff] %v13847_v49  ;;  %v4455_v49 = vld [vmem:[#allocation3 + $0x108] sm:$0xff] }
 0x618   :  { %14320 = vst [vmem:[#allocation91_spill] sm:$0xff] %v11430_v10  ;;  %4998 = vmatpush.msrb.mxu3 %v4455_v49  ;;  %5197 = vmatpush.msrb.mxu0 %v4481_v4  ;;  %v3604_v4 = vadd.f32 %v10865_v62, %v14333_v17 }
 0x619   :  { %3795 = vst [vmem:[#allocation2 + $0xc1] sm:$0xff] %v13849_v23  ;;  %v4422_v23 = vld [vmem:[#allocation3] sm:$0xff] }
 0x61a   :  { %14322 = vst [vmem:[#allocation40_spill] sm:$0xff] %v11437_v38  ;;  %4581 = vmatpush.msra.mxu1 %v4422_v23 }
 0x61b   :  { %3796 = vst [vmem:[#allocation2 + $0xc9] sm:$0xff] %v13851_v33  ;;  %v14327_v33 = vld [vmem:[#allocation83_spill] sm:$0xff]  ;;  %4582 = vmatmul.f32.vlgmr.msra.gmra.mxu1 %v13858_v11  ;;  %v14342_v11 = vmax.f32 %v11451_v13, 0.0 }
 0x61c   :  { %3797 = vst [vmem:[#allocation2 + $0xd9] sm:$0xff] %v14324_v26  ;;  %v3601_v50 = vadd.f32 %v10865_v62, %v14327_v33  ;;  %v3602_v26 = vadd.f32 %v10865_v62, %v14329_v7  ;;  %v14332_v33 = vmax.f32 %v11416_v1, 0.0  ;;  %v14334_v7 = vmax.f32 %v11423_v37, 0.0  ;;  %v14339_v37 = vld [vmem:[#allocation87_spill] sm:$0xff] }
 0x61d   :  { %3798 = vst [vmem:[#allocation2 + $0xe1] sm:$0xff] %v14326_v25  ;;  %v14331_v25 = vld [vmem:[#allocation35_spill] sm:$0xff]  ;;  %v3607_v23 = vadd.f32 %v10865_v62, %v14339_v37 }
 0x61e   :  { %3799 = vst [vmem:[#allocation2 + $0xf1] sm:$0xff] %v14328_v32  ;;  %v3603_v49 = vadd.f32 %v10865_v62, %v14331_v25  ;;  %v3665_v6 = vmax.f32 %v3601_v50, 0.0  ;;  %v14336_v25 = vmax.f32 %v11430_v10, 0.0  ;;  %v3666_v17 = vmax.f32 %v3602_v26, 0.0  ;;  %v14341_v50 = vld [vmem:[#allocation37_spill] sm:$0xff] }
 0x61f   :  { %3800 = vst [vmem:[#allocation2 + $0xf9] sm:$0xff] %v14330_v55  ;;  %v3605_v55 = vadd.f32 %v10865_v62, %v14335_v27  ;;  %v14338_v32 = vmax.f32 %v11437_v38, 0.0  ;;  %v14340_v27 = vmax.f32 %v11444_v21, 0.0  ;;  %v3668_v10 = vmax.f32 %v3604_v4, 0.0 }
 0x620   :  { %3801 = vst [vmem:[#allocation2 + $0x109] sm:$0xff] %v14332_v33  ;;  %v14337_v33 = vld [vmem:[#allocation80_spill] sm:$0xff]  ;;  %v3609_v26 = vadd.f32 %v10865_v62, %v14343_v22  ;;  %v3671_v38 = vmax.f32 %v3607_v23, 0.0  ;;  %v3674_v4 = vmax.f32 %v11239_v63, 0.0  ;;  %v3677_v22 = vmax.f32 %v11248_v59, 0.0  ;;  %v4475_v23 = vld [vmem:[#allocation3 + $0x1a8] sm:$0xff] }
 0x621   :  { %3802 = vst [vmem:[#allocation2 + $0x111] sm:$0xff] %v14334_v7  ;;  %v3606_v1 = vadd.f32 %v10865_v62, %v14337_v33  ;;  %v3667_v7 = vmax.f32 %v3603_v49, 0.0  ;;  %v3669_v33 = vmax.f32 %v3605_v55, 0.0  ;;  %v3681_v63 = vmax.f32 %v11260_v18, 0.0  ;;  %v4476_v55 = vld [vmem:[#allocation3 + $0x1b0] sm:$0xff] }
 0x622   :  { %3803 = vst [vmem:[#allocation2 + $0x121] sm:$0xff] %v14336_v25  ;;  %v3608_v25 = vadd.f32 %v10865_v62, %v14341_v50  ;;  %v3673_v49 = vmax.f32 %v3609_v26, 0.0  ;;  %v3676_v62 = vmax.f32 %v11245_v60, 0.0  ;;  %v3683_v60 = vmax.f32 %v11266_v31, 0.0  ;;  %v4501_v50 = vld [vmem:[#allocation3 + $0x278] sm:$0xff]  ;;  %v4472_v26 = vld [vmem:[#allocation3 + $0x190] sm:$0xff] }
 0x623   :  { %3804 = vst [vmem:[#allocation2 + $0x129] sm:$0xff] %v14338_v32  ;;  %v3670_v32 = vmax.f32 %v3606_v1, 0.0  ;;  %v3679_v1 = vmax.f32 %v11254_v15, 0.0  ;;  %v3684_v59 = vmax.f32 %v11269_v61, 0.0  ;;  %v3686_v15 = vmax.f32 %v11275_v57, 0.0  ;;  %5402 = vmatpush.msrb.mxu1 %v4501_v50 }
 0x624   :  { %3805 = vst [vmem:[#allocation2 + $0x139] sm:$0xff] %v14340_v27  ;;  %v3672_v37 = vmax.f32 %v3608_v25, 0.0  ;;  %v14344_v27 = vmov 0.0   ;;  %v3688_v18 = vmax.f32 %v11281_v12, 0.0  ;;  %v3690_v31 = vmax.f32 %v11287_v5, 0.0  ;;  %v4473_v25 = vld [vmem:[#allocation3 + $0x198] sm:$0xff] }
 0x625   :  { %3806 = vst [vmem:[#allocation2 + $0x141] sm:$0xff] %v14342_v11  ;;  %4585 = vmatmul.f32.gmra.mxu1 %v14344_v27  ;;  %v3675_v11 = vmax.f32 %v11242_v53, 0.0  ;;  %v3682_v53 = vmax.f32 %v11263_v36, 0.0  ;;  %v3689_v36 = vmax.f32 %v11284_v40, 0.0  ;;  %v3691_v61 = vmax.f32 %v11290_v14, 0.0 }
 0x626   :  { %3807 = vst [vmem:[#allocation2 + $0x151] sm:$0xff] %v3665_v6  ;;  %v3678_v6 = vmax.f32 %v11251_v9, 0.0  ;;  %v3685_v9 = vmax.f32 %v11272_v58, 0.0  ;;  %v3692_v58 = vmax.f32 %v11293_v56, 0.0  ;;  %v3693_v57 = vmax.f32 %v11296_v20, 0.0 }
 0x627   :  { %3808 = vst [vmem:[#allocation2 + $0x159] sm:$0xff] %v3666_v17  ;;  %v3695_v12 = vmax.f32 %v11302_v43, 0.0  ;;  %v3696_v40 = vmax.f32 %v11305_v41, 0.0  ;;  %v3697_v5 = vmax.f32 %v11308_v24, 0.0  ;;  %v3698_v14 = vmax.f32 %v11311_v44, 0.0  ;;  %v4454_v41 = vld [vmem:[#allocation3 + $0x100] sm:$0xff] }
 0x628   :  { %3809 = vst [vmem:[#allocation2 + $0x169] sm:$0xff] %v3667_v7  ;;  %v3699_v56 = vmax.f32 %v11314_v52, 0.0  ;;  %v3700_v20 = vmax.f32 %v11317_v45, 0.0  ;;  %v4480_v24 = vld [vmem:[#allocation3 + $0x1d0] sm:$0xff]  ;;  %4999 = vmatpush.msrb.mxu3 %v4454_v41  ;;  %v4479_v52 = vld [vmem:[#allocation3 + $0x1c8] sm:$0xff]  ;;  %v4478_v45 = vld [vmem:[#allocation3 + $0x1c0] sm:$0xff] }
 0x629   :  { %3810 = vst [vmem:[#allocation2 + $0x171] sm:$0xff] %v3668_v10  ;;  %v3680_v10 = vmax.f32 %v11257_v19, 0.0  ;;  %v3687_v19 = vmax.f32 %v11278_v42, 0.0  ;;  %v3694_v42 = vmax.f32 %v11299_v3, 0.0  ;;  %v3701_v3 = vmax.f32 %v11320_v51, 0.0  ;;  %5198 = vmatpush.msrb.mxu0 %v4480_v24  ;;  %v4474_v7 = vld [vmem:[#allocation3 + $0x1a0] sm:$0xff] }
 0x62a   :  { %3811 = vst [vmem:[#allocation2 + $0x181] sm:$0xff] %v3669_v33  ;;  %v14345_v33 = vmax.f32 %v11212_v8, 0.0  ;;  %v14346_v8 = vmax.f32 %v11216_v28, 0.0  ;;  %v14347_v28 = vmax.f32 %v11220_v35, 0.0  ;;  %v14348_v35 = vmax.f32 %v11224_v47, 0.0  ;;  %v3987_v41 = vld [vmem:[#allocation2 + $0xaa] sm:$0xff] }
 0x62b   :  { %3812 = vst [vmem:[#allocation2 + $0x189] sm:$0xff] %v3670_v32  ;;  %5199 = vmatpush.msrb.mxu0 %v4479_v52  ;;  %v14349_v47 = vmax.f32 %v11228_v46, 0.0  ;;  %v3981_v46 = vld [vmem:[#allocation2 + $0x62] sm:$0xff]  ;;  %v14358_v24 = vld [vmem:[#allocation75_spill] sm:$0xff]  ;;  %v14362_v50 = vmax.f32 %v11381_v48, 0.0  ;;  %v3991_v48 = vld [vmem:[#allocation2 + $0xda] sm:$0xff] }
 0x62c   :  { %3813 = vst [vmem:[#allocation2 + $0x1c9] sm:$0xff] %v3671_v38  ;;  %v4477_v38 = vld [vmem:[#allocation3 + $0x1b8] sm:$0xff] }
 0x62d   :  { %3814 = vst [vmem:[#allocation2 + $0x1d1] sm:$0xff] %v3672_v37  ;;  %5200 = vmatpush.msrb.mxu0 %v4478_v45  ;;  %v4471_v37 = vld [vmem:[#allocation3 + $0x188] sm:$0xff] }
 0x62e   :  { %3815 = vst [vmem:[#allocation2 + $0x1e1] sm:$0xff] %v3673_v49  ;;  %v3975_v49 = vld [vmem:[#allocation2 + $0x1a] sm:$0xff] }
 0x62f   :  { %3816 = vst [vmem:[#allocation2 + $0x1e9] sm:$0xff] %v3674_v4  ;;  %5201 = vmatpush.msrb.mxu0 %v4477_v38  ;;  %v4500_v4 = vld [vmem:[#allocation3 + $0x270] sm:$0xff] }
 0x630   :  { %3817 = vst [vmem:[#allocation2 + $0x1f9] sm:$0xff] %v3675_v11  ;;  %v4470_v11 = vld [vmem:[#allocation3 + $0x180] sm:$0xff]  ;;  %5403 = vmatpush.msrb.mxu1 %v4500_v4 }
 0x631   :  { %3818 = vst [vmem:[#allocation2 + $0x201] sm:$0xff] %v3676_v62  ;;  %5202 = vmatpush.msrb.mxu0 %v4476_v55  ;;  %v3848_v62 = vld [vmem:[#allocation2 + $0x20] sm:$0xff] }
 0x632   :  { %3819 = vst [vmem:[#allocation2 + $0x211] sm:$0xff] %v3677_v22 }
 0x633   :  { %3820 = vst [vmem:[#allocation2 + $0x219] sm:$0xff] %v3678_v6  ;;  %5203 = vmatpush.msrb.mxu0 %v4475_v23 }
 0x634   :  { %3821 = vst [vmem:[#allocation2 + $0x229] sm:$0xff] %v3679_v1  ;;  %v3977_v1 = vld [vmem:[#allocation2 + $0x32] sm:$0xff] }
 0x635   :  { %3822 = vst [vmem:[#allocation2 + $0x231] sm:$0xff] %v3680_v10  ;;  %5204 = vmatpush.msrb.mxu0 %v4474_v7  ;;  %v4499_v10 = vld [vmem:[#allocation3 + $0x268] sm:$0xff] }
 0x636   :  { %3823 = vst [vmem:[#allocation2 + $0x241] sm:$0xff] %v3681_v63  ;;  %v3850_v63 = vld [vmem:[#allocation2 + $0x38] sm:$0xff]  ;;  %5404 = vmatpush.msrb.mxu1 %v4499_v10 }
 0x637   :  { %3824 = vst [vmem:[#allocation2 + $0x249] sm:$0xff] %v3682_v53  ;;  %5205 = vmatpush.msrb.mxu0 %v4473_v25  ;;  %v4496_v25 = vld [vmem:[#allocation3 + $0x250] sm:$0xff] }
 0x638   :  { %3825 = vst [vmem:[#allocation2 + $0x259] sm:$0xff] %v3683_v60 }
 0x639   :  { %3826 = vst [vmem:[#allocation2 + $0x261] sm:$0xff] %v3684_v59  ;;  %5206 = vmatpush.msrb.mxu0 %v4472_v26  ;;  %v3979_v59 = vld [vmem:[#allocation2 + $0x4a] sm:$0xff] }
 0x63a   :  { %3827 = vst [vmem:[#allocation2 + $0x271] sm:$0xff] %v3685_v9  ;;  %v14350_v9 = vmax.f32 %v11232_v0, 0.0  ;;  %v3862_v26 = vld [vmem:[#allocation2 + $0xc8] sm:$0xff] }
 0x63b   :  { %3828 = vst [vmem:[#allocation2 + $0x279] sm:$0xff] %v3686_v15  ;;  %5207 = vmatpush.msrb.mxu0 %v4471_v37  ;;  %v3852_v15 = vld [vmem:[#allocation2 + $0x50] sm:$0xff] }
 0x63c   :  { %3829 = vst [vmem:[#allocation2 + $0x289] sm:$0xff] %v3687_v19 }
 0x63d   :  { %3830 = vst [vmem:[#allocation2 + $0x291] sm:$0xff] %v3688_v18  ;;  %5208 = vmatpush.msrb.mxu0 %v4470_v11  ;;  %v14351_v18 = vmax.f32 %v11236_v39, 0.0 }
 0x63e   :  { %3831 = vst [vmem:[#allocation2 + $0x2a1] sm:$0xff] %v3689_v36 }
 0x63f   :  { %3832 = vst [vmem:[#allocation2 + $0x2a9] sm:$0xff] %v3690_v31  ;;  %v14352_v31 = vmax.f32 %v11327_v2, 0.0  ;;  %v3856_v2 = vld [vmem:[#allocation2 + $0x80] sm:$0xff] }
 0x640   :  { %3833 = vst [vmem:[#allocation2 + $0x2b9] sm:$0xff] %v3691_v61  ;;  %v4498_v61 = vld [vmem:[#allocation3 + $0x260] sm:$0xff] }
 0x641   :  { %3834 = vst [vmem:[#allocation2 + $0x2c1] sm:$0xff] %v3692_v58  ;;  %v3854_v58 = vld [vmem:[#allocation2 + $0x68] sm:$0xff]  ;;  %5405 = vmatpush.msrb.mxu1 %v4498_v61 }
 0x642   :  { %3835 = vst [vmem:[#allocation2 + $0x2d1] sm:$0xff] %v3693_v57  ;;  %v14353_v57 = vmax.f32 %v11332_v34, 0.0  ;;  %v3985_v34 = vld [vmem:[#allocation2 + $0x92] sm:$0xff] }
 0x643   :  { %3836 = vst [vmem:[#allocation2 + $0x2d9] sm:$0xff] %v3694_v42  ;;  %v3983_v42 = vld [vmem:[#allocation2 + $0x7a] sm:$0xff] }
 0x644   :  { %3837 = vst [vmem:[#allocation2 + $0x2e9] sm:$0xff] %v3695_v12  ;;  %v14354_v12 = vmax.f32 %v11339_v16, 0.0 }
 0x645   :  { %3838 = vst [vmem:[#allocation2 + $0x2f1] sm:$0xff] %v3696_v40 }
 0x646   :  { %3839 = vst [vmem:[#allocation2 + $0x301] sm:$0xff] %v3697_v5  ;;  %v14355_v5 = vmax.f32 %v11346_v54, 0.0 }
 0x647   :  { %3840 = vst [vmem:[#allocation2 + $0x309] sm:$0xff] %v3698_v14 }
 0x648   :  { %3841 = vst [vmem:[#allocation2 + $0x319] sm:$0xff] %v3699_v56  ;;  %v14356_v56 = vmax.f32 %v11353_v29, 0.0  ;;  %v3860_v29 = vld [vmem:[#allocation2 + $0xb0] sm:$0xff] }
 0x649   :  { %3842 = vst [vmem:[#allocation2 + $0x321] sm:$0xff] %v3700_v20  ;;  %v4497_v20 = vld [vmem:[#allocation3 + $0x258] sm:$0xff] }
 0x64a   :  { %3843 = vst [vmem:[#allocation2 + $0x331] sm:$0xff] %v3701_v3  ;;  %v3858_v3 = vld [vmem:[#allocation2 + $0x98] sm:$0xff]  ;;  %5406 = vmatpush.msrb.mxu1 %v4497_v20 }
 0x64b   :  { %3703 = vst [vmem:[#allocation2] sm:$0xff] %v14344_v27 }
 0x64c   :  { %3704 = vst [vmem:[#allocation2 + $0x8] sm:$0xff] %v14344_v27  ;;  %5407 = vmatpush.msrb.mxu1 %v4496_v25 }
 0x64d   :  { %3705 = vst [vmem:[#allocation2 + $0x10] sm:$0x3] %v14344_v27 }
 0x64e   :  { %3706 = vst [vmem:[#allocation2 + $0x1b0] sm:$0xff] %v14344_v27 }
 0x64f   :  { %3707 = vst [vmem:[#allocation2 + $0x1b8] sm:$0xff] %v14344_v27 }
 0x650   :  { %3708 = vst [vmem:[#allocation2 + $0x1c0] sm:$0x3] %v14344_v27 }
 0x651   :  { %3710 = vst [vmem:[#allocation2 + $0x198] sm:$0xff] %v14344_v27 }
 0x652   :  { %3711 = vst [vmem:[#allocation2 + $0x1a0] sm:$0xff] %v14344_v27 }
 0x653   :  { %v3909_v43 = vld [vmem:[#allocation2 + $0x1] sm:$0xff]  ;;  %3712 = vst [vmem:[#allocation2 + $0x1a8] sm:$0x3] %v14344_v27 }
 0x654   :  { %4791 = vmatmul.f32.vlgmr.msrb.gmra.mxu2 %v3909_v43  ;;  %3713 = vst [vmem:[#allocation2 + $0x348] sm:$0xff] %v14344_v27  ;;  %v3973_v44 = vld [vmem:[#allocation2 + $0x2] sm:$0xff]  ;;  %v3974_v17 = vld [vmem:[#allocation2 + $0xa] sm:$0xff]  ;;  %v14357_v43 = vmax.f32 %v11360_v30, 0.0 }
 0x655   :  { %3714 = vst [vmem:[#allocation2 + $0x350] sm:$0xff] %v14344_v27  ;;  %5000 = vmatmul.f32.vlgmr.msrb.gmra.mxu3 %v3973_v44  ;;  %v3910_v51 = vld [vmem:[#allocation2 + $0x9] sm:$0xff]  ;;  %v14359_v44 = vmax.f32 %v14358_v24, 0.0 }
 0x656   :  { %3715 = vst [vmem:[#allocation2 + $0x358] sm:$0x3] %v14344_v27 }
 0x657   :  { %3717 = vst [vmem:[#allocation2 + $0x18] sm:$0x1] %v14344_v27 }
 0x658   :  { %3718 = vst [vmem:[#allocation2 + $0x30] sm:$0x1] %v14344_v27 }
 0x659   :  { %3719 = vst [vmem:[#allocation2 + $0x48] sm:$0x1] %v14344_v27 }
 0x65a   :  { %3720 = vst [vmem:[#allocation2 + $0x60] sm:$0x1] %v14344_v27 }
 0x65b   :  { %3721 = vst [vmem:[#allocation2 + $0x78] sm:$0x1] %v14344_v27 }
 0x65c   :  { %3722 = vst [vmem:[#allocation2 + $0x90] sm:$0x1] %v14344_v27  ;;  %4794 = vmatmul.f32.gmra.mxu2 %v3910_v51  ;;  %v14360_v51 = vld [vmem:[#allocation84_spill] sm:$0xff] }
 0x65d   :  { %3723 = vst [vmem:[#allocation2 + $0xa8] sm:$0x1] %v14344_v27  ;;  %5003 = vmatmul.f32.gmra.mxu3 %v3974_v17  ;;  %v14361_v38 = vmax.f32 %v14360_v51, 0.0  ;;  %v3989_v17 = vld [vmem:[#allocation2 + $0xc2] sm:$0xff]  ;;  %v3995_v51 = vld [vmem:[#allocation2 + $0x10a] sm:$0xff] }
 0x65e   :  { %3724 = vst [vmem:[#allocation2 + $0xc0] sm:$0x1] %v14344_v27  ;;  %v3847_v32 = vld [vmem:[#allocation2 + $0x18] sm:$0xff] }
 0x65f   :  { %3725 = vst [vmem:[#allocation2 + $0xd8] sm:$0x1] %v14344_v27  ;;  %4588 = vmatmul.f32.gmra.mxu1 %v3847_v32  ;;  %5209 = vmatmul.f32.vlgmr.msrb.gmra.mxu0 %v3847_v32  ;;  %v3849_v6 = vld [vmem:[#allocation2 + $0x30] sm:$0xff] }
 0x660   :  { %3726 = vst [vmem:[#allocation2 + $0xf0] sm:$0x1] %v14344_v27  ;;  %v3851_v60 = vld [vmem:[#allocation2 + $0x48] sm:$0xff] }
 0x661   :  { %3727 = vst [vmem:[#allocation2 + $0x108] sm:$0x1] %v14344_v27  ;;  %v3853_v36 = vld [vmem:[#allocation2 + $0x60] sm:$0xff] }
 0x662   :  { %3728 = vst [vmem:[#allocation2 + $0x120] sm:$0x1] %v14344_v27  ;;  %v3855_v39 = vld [vmem:[#allocation2 + $0x78] sm:$0xff] }
 0x663   :  { %3729 = vst [vmem:[#allocation2 + $0x138] sm:$0x1] %v14344_v27  ;;  %v3857_v14 = vld [vmem:[#allocation2 + $0x90] sm:$0xff] }
 0x664   :  { %3730 = vst [vmem:[#allocation2 + $0x150] sm:$0x1] %v14344_v27  ;;  %4797 = vmatmul.f32.gmra.mxu2 %v14345_v33  ;;  %v3859_v54 = vld [vmem:[#allocation2 + $0xa8] sm:$0xff] }
 0x665   :  { %3731 = vst [vmem:[#allocation2 + $0x168] sm:$0x1] %v14344_v27  ;;  %5006 = vmatmul.f32.gmra.mxu3 %v3975_v49  ;;  %v3861_v55 = vld [vmem:[#allocation2 + $0xc0] sm:$0xff] }
 0x666   :  { %3732 = vst [vmem:[#allocation2 + $0x180] sm:$0x1] %v14344_v27 }
 0x667   :  { %3733 = vst [vmem:[#allocation2 + $0x1c8] sm:$0x1] %v14344_v27  ;;  %4591 = vmatmul.f32.gmra.mxu1 %v3848_v62  ;;  %5212 = vmatmul.f32.gmra.mxu0 %v3848_v62 }
 0x668   :  { %3734 = vst [vmem:[#allocation2 + $0x1e0] sm:$0x1] %v14344_v27 }
 0x669   :  { %3735 = vst [vmem:[#allocation2 + $0x1f8] sm:$0x1] %v14344_v27 }
 0x66a   :  { %3736 = vst [vmem:[#allocation2 + $0x210] sm:$0x1] %v14344_v27 }
 0x66b   :  { %3737 = vst [vmem:[#allocation2 + $0x228] sm:$0x1] %v14344_v27 }
 0x66c   :  { %3738 = vst [vmem:[#allocation2 + $0x240] sm:$0x1] %v14344_v27  ;;  %4800 = vmatmul.f32.gmra.mxu2 %v14346_v8  ;;  %v14363_v8 = vld [vmem:[#allocation90_spill] sm:$0xff] }
 0x66d   :  { %3739 = vst [vmem:[#allocation2 + $0x258] sm:$0x1] %v14344_v27  ;;  %v14364_v62 = vmax.f32 %v14363_v8, 0.0 }
 0x66e   :  { %3740 = vst [vmem:[#allocation2 + $0x270] sm:$0x1] %v14344_v27 }
 0x66f   :  { %3741 = vst [vmem:[#allocation2 + $0x288] sm:$0x1] %v14344_v27  ;;  %4594 = vmatmul.f32.gmra.mxu1 %v3849_v6  ;;  %5215 = vmatmul.f32.gmra.mxu0 %v3849_v6 }
 0x670   :  { %3742 = vst [vmem:[#allocation2 + $0x2a0] sm:$0x1] %v14344_v27 }
 0x671   :  { %3743 = vst [vmem:[#allocation2 + $0x2b8] sm:$0x1] %v14344_v27 }
 0x672   :  { %3744 = vst [vmem:[#allocation2 + $0x2d0] sm:$0x1] %v14344_v27 }
 0x673   :  { %3745 = vst [vmem:[#allocation2 + $0x2e8] sm:$0x1] %v14344_v27 }
 0x674   :  { %3746 = vst [vmem:[#allocation2 + $0x300] sm:$0x1] %v14344_v27  ;;  %4803 = vmatmul.f32.gmra.mxu2 %v14347_v28 }
 0x675   :  { %3747 = vst [vmem:[#allocation2 + $0x318] sm:$0x1] %v14344_v27 }
 0x676   :  { %3748 = vst [vmem:[#allocation2 + $0x330] sm:$0x1] %v14344_v27 }
 0x677   :  { %3749 = vst [vmem:[#allocation2 + $0x29] sm:$0x1] %v14344_v27  ;;  %4597 = vmatmul.f32.gmra.mxu1 %v3850_v63  ;;  %5218 = vmatmul.f32.gmra.mxu0 %v3850_v63 }
 0x678   :  { %3750 = vst [vmem:[#allocation2 + $0x41] sm:$0x1] %v14344_v27 }
 0x679   :  { %3751 = vst [vmem:[#allocation2 + $0x59] sm:$0x1] %v14344_v27 }
 0x67a   :  { %3752 = vst [vmem:[#allocation2 + $0x71] sm:$0x1] %v14344_v27 }
 0x67b   :  { %3753 = vst [vmem:[#allocation2 + $0x89] sm:$0x1] %v14344_v27 }
 0x67c   :  { %3754 = vst [vmem:[#allocation2 + $0xa1] sm:$0x1] %v14344_v27  ;;  %4806 = vmatmul.f32.gmra.mxu2 %v14348_v35 }
 0x67d   :  { %3755 = vst [vmem:[#allocation2 + $0xb9] sm:$0x1] %v14344_v27 }
 0x67e   :  { %3756 = vst [vmem:[#allocation2 + $0xd1] sm:$0x1] %v14344_v27  ;;  %v3976_v22 = vld [vmem:[#allocation2 + $0x22] sm:$0xff] }
 0x67f   :  { %3757 = vst [vmem:[#allocation2 + $0xe9] sm:$0x1] %v14344_v27  ;;  %5009 = vmatmul.f32.gmra.mxu3 %v3976_v22  ;;  %v3978_v53 = vld [vmem:[#allocation2 + $0x3a] sm:$0xff]  ;;  %4600 = vmatmul.f32.gmra.mxu1 %v3851_v60 }
 0x680   :  { %3758 = vst [vmem:[#allocation2 + $0x101] sm:$0x1] %v14344_v27  ;;  %5221 = vmatmul.f32.gmra.mxu0 %v3851_v60  ;;  %v3980_v19 = vld [vmem:[#allocation2 + $0x52] sm:$0xff]  ;;  %v3864_v60 = vld [vmem:[#allocation2 + $0xe0] sm:$0xff] }
 0x681   :  { %3759 = vst [vmem:[#allocation2 + $0x119] sm:$0x1] %v14344_v27  ;;  %v3982_v0 = vld [vmem:[#allocation2 + $0x6a] sm:$0xff]  ;;  %v3863_v22 = vld [vmem:[#allocation2 + $0xd8] sm:$0xff] }
 0x682   :  { %3760 = vst [vmem:[#allocation2 + $0x131] sm:$0x1] %v14344_v27  ;;  %v3984_v40 = vld [vmem:[#allocation2 + $0x82] sm:$0xff] }
 0x683   :  { %3761 = vst [vmem:[#allocation2 + $0x149] sm:$0x1] %v14344_v27  ;;  %v3986_v16 = vld [vmem:[#allocation2 + $0x9a] sm:$0xff] }
 0x684   :  { %3762 = vst [vmem:[#allocation2 + $0x161] sm:$0x1] %v14344_v27  ;;  %4809 = vmatmul.f32.gmra.mxu2 %v14349_v47  ;;  %v3988_v52 = vld [vmem:[#allocation2 + $0xb2] sm:$0xff] }
 0x685   :  { %3763 = vst [vmem:[#allocation2 + $0x179] sm:$0x1] %v14344_v27  ;;  %v3990_v32 = vld [vmem:[#allocation2 + $0xca] sm:$0xff] }
 0x686   :  { %3764 = vst [vmem:[#allocation2 + $0x191] sm:$0x1] %v14344_v27 }
 0x687   :  { %3765 = vst [vmem:[#allocation2 + $0x1d9] sm:$0x1] %v14344_v27  ;;  %5012 = vmatmul.f32.gmra.mxu3 %v3977_v1  ;;  %4603 = vmatmul.f32.gmra.mxu1 %v3852_v15  ;;  %v3994_v20 = vld [vmem:[#allocation2 + $0xfa] sm:$0xff] }
 0x688   :  { %3766 = vst [vmem:[#allocation2 + $0x1f1] sm:$0x1] %v14344_v27  ;;  %5224 = vmatmul.f32.gmra.mxu0 %v3852_v15 }
 0x689   :  { %3767 = vst [vmem:[#allocation2 + $0x209] sm:$0x1] %v14344_v27 }
 0x68a   :  { %3768 = vst [vmem:[#allocation2 + $0x221] sm:$0x1] %v14344_v27 }
 0x68b   :  { %3769 = vst [vmem:[#allocation2 + $0x239] sm:$0x1] %v14344_v27 }
 0x68c   :  { %3770 = vst [vmem:[#allocation2 + $0x251] sm:$0x1] %v14344_v27  ;;  %4812 = vmatmul.f32.gmra.mxu2 %v14350_v9 }
 0x68d   :  { %3771 = vst [vmem:[#allocation2 + $0x269] sm:$0x1] %v14344_v27 }
 0x68e   :  { %3772 = vst [vmem:[#allocation2 + $0x281] sm:$0x1] %v14344_v27 }
 0x68f   :  { %3773 = vst [vmem:[#allocation2 + $0x299] sm:$0x1] %v14344_v27  ;;  %5015 = vmatmul.f32.gmra.mxu3 %v3978_v53  ;;  %4606 = vmatmul.f32.gmra.mxu1 %v3853_v36  ;;  %v14365_v53 = vld [vmem:[#allocation38_spill] sm:$0xff] }
 0x690   :  { %3774 = vst [vmem:[#allocation2 + $0x2b1] sm:$0x1] %v14344_v27  ;;  %5227 = vmatmul.f32.gmra.mxu0 %v3853_v36  ;;  %v14366_v47 = vmax.f32 %v14365_v53, 0.0 }
 0x691   :  { %3775 = vst [vmem:[#allocation2 + $0x2c9] sm:$0x1] %v14344_v27 }
 0x692   :  { %3776 = vst [vmem:[#allocation2 + $0x2e1] sm:$0x1] %v14344_v27 }
 0x693   :  { %3777 = vst [vmem:[#allocation2 + $0x2f9] sm:$0x1] %v14344_v27 }
 0x694   :  { %3778 = vst [vmem:[#allocation2 + $0x311] sm:$0x1] %v14344_v27  ;;  %4815 = vmatmul.f32.gmra.mxu2 %v14351_v18 }
 0x695   :  { %3779 = vst [vmem:[#allocation2 + $0x329] sm:$0x1] %v14344_v27 }
 0x696   :  { %3780 = vst [vmem:[#allocation2 + $0x341] sm:$0x1] %v14344_v27 }
 0x697   :  { %5018 = vmatmul.f32.gmra.mxu3 %v3979_v59  ;;  %4609 = vmatmul.f32.gmra.mxu1 %v3854_v58  ;;  %v3992_v59 = vld [vmem:[#allocation2 + $0xe2] sm:$0xff] }
 0x698   :  { %5230 = vmatmul.f32.gmra.mxu0 %v3854_v58  ;;  %v11628_v45 = vpop.f32.mrf.mxu1  ;;  %v3865_v58 = vld [vmem:[#allocation2 + $0xf0] sm:$0xff] }
 0x69c   :  { %4818 = vmatmul.f32.gmra.mxu2 %v14352_v31  ;;  %v14367_v31 = vld [vmem:[#allocation81_spill] sm:$0xff] }
 0x69d   :  { %v14368_v61 = vmax.f32 %v14367_v31, 0.0  ;;  %v4494_v31 = vld [vmem:[#allocation3 + $0x240] sm:$0xff] }
 0x69f   :  { %5021 = vmatmul.f32.gmra.mxu3 %v3980_v19  ;;  %4612 = vmatmul.f32.gmra.mxu1 %v3855_v39 }
 0x6a0   :  { %5233 = vmatmul.f32.gmra.mxu0 %v3855_v39 }
 0x6a2   :  { %v4586_v23 = vpop.f32.mrf.mxu1 }
 0x6a4   :  { %4821 = vmatmul.f32.gmra.mxu2 %v14353_v57 }
 0x6a7   :  { %5024 = vmatmul.f32.gmra.mxu3 %v3981_v46  ;;  %4615 = vmatmul.f32.gmra.mxu1 %v3856_v2 }
 0x6a8   :  { %5236 = vmatmul.f32.gmra.mxu0 %v3856_v2 }
 0x6ac   :  { %4824 = vmatmul.f32.gmra.mxu2 %v14354_v12 }
 0x6af   :  { %5027 = vmatmul.f32.gmra.mxu3 %v3982_v0  ;;  %4618 = vmatmul.f32.gmra.mxu1 %v3857_v14  ;;  %v3993_v0 = vld [vmem:[#allocation2 + $0xf2] sm:$0xff] }
 0x6b0   :  { %5239 = vmatmul.f32.gmra.mxu0 %v3857_v14 }
 0x6b4   :  { %4827 = vmatmul.f32.gmra.mxu2 %v14355_v5  ;;  %v14369_v5 = vld [vmem:[#allocation78_spill] sm:$0xff] }
 0x6b5   :  { %v14370_v14 = vmax.f32 %v14369_v5, 0.0 }
 0x6b7   :  { %5030 = vmatmul.f32.gmra.mxu3 %v3983_v42  ;;  %4621 = vmatmul.f32.gmra.mxu1 %v3858_v3 }
 0x6b8   :  { %5242 = vmatmul.f32.gmra.mxu0 %v3858_v3 }
 0x6bc   :  { %4830 = vmatmul.f32.gmra.mxu2 %v14356_v56  ;;  %v3866_v56 = vld [vmem:[#allocation2 + $0xf8] sm:$0xff] }
 0x6bf   :  { %5033 = vmatmul.f32.gmra.mxu3 %v3984_v40  ;;  %4624 = vmatmul.f32.gmra.mxu1 %v3859_v54 }
 0x6c0   :  { %5245 = vmatmul.f32.gmra.mxu0 %v3859_v54 }
 0x6c4   :  { %4833 = vmatmul.f32.gmra.mxu2 %v14357_v43 }
 0x6c7   :  { %5036 = vmatmul.f32.gmra.mxu3 %v3985_v34  ;;  %4627 = vmatmul.f32.gmra.mxu1 %v3860_v29  ;;  %v4495_v34 = vld [vmem:[#allocation3 + $0x248] sm:$0xff] }
 0x6c8   :  { %5248 = vmatmul.f32.gmra.mxu0 %v3860_v29  ;;  %5408 = vmatpush.msrb.mxu1 %v4495_v34  ;;  %v3871_v34 = vld [vmem:[#allocation2 + $0x138] sm:$0xff] }
 0x6ca   :  { %5409 = vmatpush.msrb.mxu1 %v4494_v31  ;;  %v3939_v31 = vld [vmem:[#allocation2 + $0x169] sm:$0xff] }
 0x6cc   :  { %4836 = vmatmul.f32.gmra.mxu2 %v14359_v44  ;;  %v14371_v44 = vld [vmem:[#allocation88_spill] sm:$0xff] }
 0x6cd   :  { %v14372_v29 = vmax.f32 %v14371_v44, 0.0 }
 0x6cf   :  { %5039 = vmatmul.f32.gmra.mxu3 %v3986_v16  ;;  %4630 = vmatmul.f32.gmra.mxu1 %v3861_v55 }
 0x6d0   :  { %5251 = vmatmul.f32.gmra.mxu0 %v3861_v55 }
 0x6d4   :  { %4839 = vmatmul.f32.gmra.mxu2 %v14361_v38 }
 0x6d7   :  { %5042 = vmatmul.f32.gmra.mxu3 %v3987_v41  ;;  %v11632_v30 = vpop.f32.mrf.mxu2  ;;  %4633 = vmatmul.f32.gmra.mxu1 %v3862_v26 }
 0x6d8   :  { %v11634_v7 = vpop.f32.mrf.mxu3  ;;  %5254 = vmatmul.f32.gmra.mxu0 %v3862_v26  ;;  %v14373_v26 = vld [vmem:[#allocation82_spill] sm:$0xff] }
 0x6dc   :  { %4842 = vmatmul.f32.gmra.mxu2 %v14362_v50  ;;  %v4589_v4 = vpop.f32.mrf.mxu1  ;;  %v11642_v1 = vpop.f32.mrf.mxu0 }
 0x6df   :  { %5045 = vmatmul.f32.gmra.mxu3 %v3988_v52  ;;  %v4795_v33 = vpop.f32.mrf.mxu2  ;;  %4636 = vmatmul.f32.gmra.mxu1 %v3863_v22  ;;  %v3867_v52 = vld [vmem:[#allocation2 + $0x108] sm:$0xff] }
 0x6e0   :  { %v4796_v37 = vadd.f32 %v4795_v33, %v4586_v23  ;;  %v5004_v49 = vpop.f32.mrf.mxu3  ;;  %5257 = vmatmul.f32.gmra.mxu0 %v3863_v22  ;;  %v14374_v33 = vmax.f32 %v14373_v26, 0.0  ;;  %v3937_v26 = vld [vmem:[#allocation2 + $0x151] sm:$0xff] }
 0x6e2   :  { %v11638_v11 = vadd.f32 %v5004_v49, %v4796_v37  ;;  %v3996_v37 = vld [vmem:[#allocation2 + $0x112] sm:$0xff] }
 0x6e4   :  { %4845 = vmatmul.f32.gmra.mxu2 %v14364_v62  ;;  %v4592_v10 = vpop.f32.mrf.mxu1  ;;  %v11648_v19 = vpop.f32.mrf.mxu0 }
 0x6e7   :  { %5048 = vmatmul.f32.gmra.mxu3 %v3989_v17  ;;  %v4798_v28 = vpop.f32.mrf.mxu2  ;;  %4639 = vmatmul.f32.gmra.mxu1 %v3864_v60 }
 0x6e8   :  { %v4799_v6 = vadd.f32 %v4798_v28, %v4589_v4  ;;  %v5007_v35 = vpop.f32.mrf.mxu3  ;;  %5260 = vmatmul.f32.gmra.mxu0 %v3864_v60  ;;  %v14375_v28 = vld [vmem:[#allocation91_spill] sm:$0xff] }
 0x6ea   :  { %v11644_v63 = vadd.f32 %v5007_v35, %v4799_v6  ;;  %v14376_v6 = vmax.f32 %v14375_v28, 0.0  ;;  %v3869_v35 = vld [vmem:[#allocation2 + $0x120] sm:$0xff] }
 0x6eb   :  { %v3938_v28 = vld [vmem:[#allocation2 + $0x159] sm:$0xff] }
 0x6ec   :  { %4848 = vmatmul.f32.gmra.mxu2 %v14366_v47  ;;  %v4595_v36 = vpop.f32.mrf.mxu1  ;;  %v11654_v42 = vpop.f32.mrf.mxu0 }
 0x6ef   :  { %5051 = vmatmul.f32.gmra.mxu3 %v3990_v32  ;;  %v4801_v9 = vpop.f32.mrf.mxu2  ;;  %4642 = vmatmul.f32.gmra.mxu1 %v3865_v58  ;;  %v3868_v32 = vld [vmem:[#allocation2 + $0x110] sm:$0xff] }
 0x6f0   :  { %v4802_v15 = vadd.f32 %v4801_v9, %v4592_v10  ;;  %5263 = vmatmul.f32.gmra.mxu0 %v3865_v58  ;;  %v3997_v10 = vld [vmem:[#allocation2 + $0x122] sm:$0xff]  ;;  %v3998_v58 = vld [vmem:[#allocation2 + $0x12a] sm:$0xff] }
 0x6f4   :  { %4851 = vmatmul.f32.gmra.mxu2 %v14368_v61  ;;  %v4598_v2 = vpop.f32.mrf.mxu1  ;;  %v11660_v43 = vpop.f32.mrf.mxu0  ;;  %v3870_v61 = vld [vmem:[#allocation2 + $0x128] sm:$0xff] }
 0x6f7   :  { %5054 = vmatmul.f32.gmra.mxu3 %v3991_v48  ;;  %v4804_v57 = vpop.f32.mrf.mxu2  ;;  %4645 = vmatmul.f32.gmra.mxu1 %v3866_v56 }
 0x6f8   :  { %v4805_v39 = vadd.f32 %v4804_v57, %v4595_v36  ;;  %5266 = vmatmul.f32.gmra.mxu0 %v3866_v56  ;;  %v3999_v56 = vld [vmem:[#allocation2 + $0x13a] sm:$0xff] }
 0x6fc   :  { %4854 = vmatmul.f32.gmra.mxu2 %v14370_v14  ;;  %v4601_v41 = vpop.f32.mrf.mxu1  ;;  %v14379_v14 = vmax.f32 %v11444_v21, 0.0  ;;  %v4000_v21 = vld [vmem:[#allocation2 + $0x142] sm:$0xff] }
 0x6fd   :  { %v11666_v17 = vpop.f32.mrf.mxu0 }
 0x6ff   :  { %5057 = vmatmul.f32.gmra.mxu3 %v3992_v59  ;;  %v4807_v3 = vpop.f32.mrf.mxu2  ;;  %4648 = vmatmul.f32.gmra.mxu1 %v3867_v52 }
 0x700   :  { %v4808_v16 = vadd.f32 %v4807_v3, %v4598_v2  ;;  %5269 = vmatmul.f32.gmra.mxu0 %v3867_v52  ;;  %v3872_v52 = vld [vmem:[#allocation2 + $0x140] sm:$0xff] }
 0x702   :  { %v5010_v18 = vpop.f32.mrf.mxu3 }
 0x703   :  { %v11650_v46 = vadd.f32 %v5010_v18, %v4802_v15  ;;  %v14377_v18 = vld [vmem:[#allocation40_spill] sm:$0xff] }
 0x704   :  { %4857 = vmatmul.f32.gmra.mxu2 %v14372_v29  ;;  %v4604_v50 = vpop.f32.mrf.mxu1  ;;  %v14378_v36 = vmax.f32 %v14377_v18, 0.0  ;;  %v14380_v29 = vmax.f32 %v11451_v13, 0.0 }
 0x705   :  { %v11672_v8 = vpop.f32.mrf.mxu0 }
 0x707   :  { %5060 = vmatmul.f32.gmra.mxu3 %v3993_v0  ;;  %v4810_v38 = vpop.f32.mrf.mxu2  ;;  %4651 = vmatmul.f32.gmra.mxu1 %v3868_v32 }
 0x708   :  { %v4811_v55 = vadd.f32 %v4810_v38, %v4601_v41  ;;  %5272 = vmatmul.f32.gmra.mxu0 %v3868_v32  ;;  %v3873_v32 = vld [vmem:[#allocation2 + $0x150] sm:$0xff] }
 0x70a   :  { %v5013_v12 = vpop.f32.mrf.mxu3 }
 0x70b   :  { %v11656_v40 = vadd.f32 %v5013_v12, %v4805_v39 }
 0x70c   :  { %4860 = vmatmul.f32.gmra.mxu2 %v14374_v33  ;;  %v4607_v22 = vpop.f32.mrf.mxu1 }
 0x70d   :  { %v11678_v60 = vpop.f32.mrf.mxu0 }
 0x70f   :  { %5063 = vmatmul.f32.gmra.mxu3 %v3994_v20  ;;  %v4813_v49 = vpop.f32.mrf.mxu2  ;;  %4654 = vmatmul.f32.gmra.mxu1 %v3869_v35 }
 0x710   :  { %v4814_v4 = vadd.f32 %v4813_v49, %v4604_v50  ;;  %5275 = vmatmul.f32.gmra.mxu0 %v3869_v35  ;;  %v4493_v35 = vld [vmem:[#allocation3 + $0x238] sm:$0xff] }
 0x711   :  { %5410 = vmatpush.msrb.mxu1 %v4493_v35  ;;  %v4492_v35 = vld [vmem:[#allocation3 + $0x230] sm:$0xff] }
 0x712   :  { %v5016_v54 = vpop.f32.mrf.mxu3 }
 0x713   :  { %v11662_v24 = vadd.f32 %v5016_v54, %v4808_v16  ;;  %5411 = vmatpush.msrb.mxu1 %v4492_v35 }
 0x714   :  { %4863 = vmatmul.f32.gmra.mxu2 %v14376_v6  ;;  %v4610_v9 = vpop.f32.mrf.mxu1 }
 0x715   :  { %v11684_v39 = vpop.f32.mrf.mxu0 }
 0x717   :  { %5066 = vmatmul.f32.gmra.mxu3 %v3995_v51  ;;  %v4816_v53 = vpop.f32.mrf.mxu2  ;;  %4657 = vmatmul.f32.gmra.mxu1 %v3870_v61 }
 0x718   :  { %v4817_v47 = vadd.f32 %v4816_v53, %v4607_v22  ;;  %5278 = vmatmul.f32.gmra.mxu0 %v3870_v61  ;;  %v4002_v53 = vld [vmem:[#allocation2 + $0x15a] sm:$0xff] }
 0x71a   :  { %v5019_v23 = vpop.f32.mrf.mxu3 }
 0x71b   :  { %v11668_v25 = vadd.f32 %v5019_v23, %v4811_v55 }
 0x71c   :  { %4866 = vmatmul.f32.gmra.mxu2 %v14378_v36  ;;  %v4613_v2 = vpop.f32.mrf.mxu1 }
 0x71d   :  { %v11690_v16 = vpop.f32.mrf.mxu0 }
 0x71f   :  { %5069 = vmatmul.f32.gmra.mxu3 %v3996_v37  ;;  %v4819_v0 = vpop.f32.mrf.mxu2  ;;  %4660 = vmatmul.f32.gmra.mxu1 %v3871_v34  ;;  %v4001_v37 = vld [vmem:[#allocation2 + $0x152] sm:$0xff] }
 0x720   :  { %v4820_v57 = vadd.f32 %v4819_v0, %v4610_v9  ;;  %5281 = vmatmul.f32.gmra.mxu0 %v3871_v34  ;;  %v4003_v0 = vld [vmem:[#allocation2 + $0x16a] sm:$0xff] }
 0x722   :  { %v5022_v62 = vpop.f32.mrf.mxu3 }
 0x723   :  { %v11674_v48 = vadd.f32 %v5022_v62, %v4814_v4 }
 0x724   :  { %4869 = vmatmul.f32.gmra.mxu2 %v14379_v14  ;;  %v4616_v41 = vpop.f32.mrf.mxu1 }
 0x725   :  { %v11696_v55 = vpop.f32.mrf.mxu0 }
 0x727   :  { %5072 = vmatmul.f32.gmra.mxu3 %v3997_v10  ;;  %v4822_v20 = vpop.f32.mrf.mxu2  ;;  %4663 = vmatmul.f32.gmra.mxu1 %v3872_v52  ;;  %v3874_v10 = vld [vmem:[#allocation2 + $0x158] sm:$0xff] }
 0x728   :  { %v4823_v3 = vadd.f32 %v4822_v20, %v4613_v2  ;;  %5284 = vmatmul.f32.gmra.mxu0 %v3872_v52 }
 0x72a   :  { %v5025_v59 = vpop.f32.mrf.mxu3 }
 0x72b   :  { %v11680_v15 = vadd.f32 %v5025_v59, %v4817_v47 }
 0x72c   :  { %4872 = vmatmul.f32.gmra.mxu2 %v14380_v29  ;;  %v4619_v50 = vpop.f32.mrf.mxu1 }
 0x72d   :  { %v11700_v4 = vpop.f32.mrf.mxu0 }
 0x72f   :  { %5075 = vmatmul.f32.gmra.mxu3 %v3998_v58  ;;  %v4825_v51 = vpop.f32.mrf.mxu2  ;;  %4666 = vmatmul.f32.gmra.mxu1 %v3873_v32  ;;  %v3875_v58 = vld [vmem:[#allocation2 + $0x168] sm:$0xff] }
 0x730   :  { %v4826_v38 = vadd.f32 %v4825_v51, %v4616_v41  ;;  %5287 = vmatmul.f32.gmra.mxu0 %v3873_v32 }
 0x732   :  { %v5028_v12 = vpop.f32.mrf.mxu3 }
 0x733   :  { %v11686_v5 = vadd.f32 %v5028_v12, %v4820_v57 }
 0x734   :  { %4875 = vmatmul.f32.gmra.mxu2 %v3937_v26  ;;  %v4622_v22 = vpop.f32.mrf.mxu1 }
 0x735   :  { %v11704_v9 = vpop.f32.mrf.mxu0 }
 0x737   :  { %5078 = vmatmul.f32.gmra.mxu3 %v3999_v56  ;;  %v4828_v13 = vpop.f32.mrf.mxu2  ;;  %4669 = vmatmul.f32.gmra.mxu1 %v3874_v10  ;;  %v3940_v56 = vld [vmem:[#allocation2 + $0x171] sm:$0xff] }
 0x738   :  { %v4829_v49 = vadd.f32 %v4828_v13, %v4619_v50  ;;  %5290 = vmatmul.f32.gmra.mxu0 %v3874_v10  ;;  %v4005_v50 = vld [vmem:[#allocation2 + $0x1b2] sm:$0xff]  ;;  %v4006_v10 = vld [vmem:[#allocation2 + $0x1ba] sm:$0xff] }
 0x739   :  { %v3942_v13 = vld [vmem:[#allocation2 + $0x1b9] sm:$0xff] }
 0x73a   :  { %v5031_v54 = vpop.f32.mrf.mxu3 }
 0x73b   :  { %v11692_v44 = vadd.f32 %v5031_v54, %v4823_v3  ;;  %v3876_v3 = vld [vmem:[#allocation2 + $0x170] sm:$0xff] }
 0x73c   :  { %4878 = vmatmul.f32.gmra.mxu2 %v3938_v28  ;;  %v4625_v36 = vpop.f32.mrf.mxu1  ;;  %v4004_v54 = vld [vmem:[#allocation2 + $0x172] sm:$0xff] }
 0x73d   :  { %v11708_v2 = vpop.f32.mrf.mxu0 }
 0x73f   :  { %5081 = vmatmul.f32.gmra.mxu3 %v4000_v21  ;;  %v4831_v47 = vpop.f32.mrf.mxu2  ;;  %4672 = vmatmul.f32.gmra.mxu1 %v3875_v58  ;;  %v3941_v21 = vld [vmem:[#allocation2 + $0x1b1] sm:$0xff] }
 0x740   :  { %v4832_v59 = vadd.f32 %v4831_v47, %v4622_v22  ;;  %5293 = vmatmul.f32.gmra.mxu0 %v3875_v58  ;;  %v3943_v58 = vld [vmem:[#allocation2 + $0x1c9] sm:$0xff] }
 0x742   :  { %v5034_v23 = vpop.f32.mrf.mxu3 }
 0x743   :  { %v11698_v33 = vadd.f32 %v5034_v23, %v4826_v38 }
 0x744   :  { %4881 = vmatmul.f32.gmra.mxu2 %v3939_v31  ;;  %v4628_v34 = vpop.f32.mrf.mxu1 }
 0x745   :  { %v11712_v52 = vpop.f32.mrf.mxu0 }
 0x747   :  { %5084 = vmatmul.f32.gmra.mxu3 %v4001_v37  ;;  %v4834_v57 = vpop.f32.mrf.mxu2  ;;  %4675 = vmatmul.f32.gmra.mxu1 %v3876_v3 }
 0x748   :  { %v4835_v12 = vadd.f32 %v4834_v57, %v4625_v36  ;;  %5296 = vmatmul.f32.gmra.mxu0 %v3876_v3  ;;  %v3879_v57 = vld [vmem:[#allocation2 + $0x1c8] sm:$0xff] }
 0x74a   :  { %v5037_v62 = vpop.f32.mrf.mxu3 }
 0x74b   :  { %v11702_v6 = vadd.f32 %v5037_v62, %v4829_v49  ;;  %v4067_v49 = vld [vmem:[#allocation2 + $0x180] sm:$0xff] }
 0x74c   :  { %4884 = vmatmul.f32.gmra.mxu2 %v3940_v56  ;;  %v4631_v38 = vpop.f32.mrf.mxu1 }
 0x74d   :  { %v11717_v37 = vpop.f32.mrf.mxu0 }
 0x74f   :  { %5087 = vmatmul.f32.gmra.mxu3 %v4002_v53  ;;  %v4837_v41 = vpop.f32.mrf.mxu2  ;;  %4678 = vmatmul.f32.gmra.mxu1 %v14344_v27 }
 0x750   :  { %v4838_v29 = vadd.f32 %v4837_v41, %v4628_v34  ;;  %5299 = vmatmul.f32.gmra.mxu0 %v4067_v49 }
 0x752   :  { %v5040_v18 = vpop.f32.mrf.mxu3 }
 0x753   :  { %v11706_v61 = vadd.f32 %v5040_v18, %v4832_v59  ;;  %v4068_v18 = vld [vmem:[#allocation2 + $0x188] sm:$0xff] }
 0x754   :  { %4887 = vmatmul.f32.gmra.mxu2 %v3941_v21  ;;  %v4634_v22 = vpop.f32.mrf.mxu1  ;;  %v4008_v21 = vld [vmem:[#allocation2 + $0x1d2] sm:$0xff] }
 0x755   :  { %v11722_v59 = vpop.f32.mrf.mxu0 }
 0x757   :  { %5090 = vmatmul.f32.gmra.mxu3 %v4003_v0  ;;  %v4840_v26 = vpop.f32.mrf.mxu2  ;;  %4681 = vmatmul.f32.gmra.mxu1 %v14344_v27 }
 0x758   :  { %v4841_v32 = vadd.f32 %v4840_v26, %v4631_v38  ;;  %5302 = vmatmul.f32.gmra.mxu0 %v4068_v18 }
 0x75a   :  { %v5043_v14 = vpop.f32.mrf.mxu3 }
 0x75b   :  { %v11710_v20 = vadd.f32 %v5043_v14, %v4835_v12  ;;  %v4007_v12 = vld [vmem:[#allocation2 + $0x1ca] sm:$0xff] }
 0x75c   :  { %4890 = vmatmul.f32.gmra.mxu2 %v3942_v13  ;;  %v4637_v31 = vpop.f32.mrf.mxu1  ;;  %v3945_v13 = vld [vmem:[#allocation2 + $0x1e1] sm:$0xff] }
 0x75d   :  { %v11726_v27 = vpop.f32.mrf.mxu0 }
 0x75f   :  { %5093 = vmatmul.f32.gmra.mxu3 %v4004_v54  ;;  %v4843_v53 = vpop.f32.mrf.mxu2  ;;  %4684 = vmatmul.f32.gmra.mxu1 %v3879_v57  ;;  %v3944_v54 = vld [vmem:[#allocation2 + $0x1d1] sm:$0xff] }
 0x760   :  { %v4844_v47 = vadd.f32 %v4843_v53, %v4634_v22  ;;  %5305 = vmatmul.f32.gmra.mxu0 %v3879_v57  ;;  %v4009_v22 = vld [vmem:[#allocation2 + $0x1e2] sm:$0xff] }
 0x761   :  { %v3882_v57 = vld [vmem:[#allocation2 + $0x1e8] sm:$0xff] }
 0x762   :  { %v5046_v51 = vpop.f32.mrf.mxu3 }
 0x763   :  { %v11714_v23 = vadd.f32 %v5046_v51, %v4838_v29  ;;  %v3880_v29 = vld [vmem:[#allocation2 + $0x1d0] sm:$0xff] }
 0x764   :  { %4893 = vmatmul.f32.gmra.mxu2 %v3943_v58  ;;  %v4640_v3 = vpop.f32.mrf.mxu1  ;;  %v4491_v58 = vld [vmem:[#allocation3 + $0x228] sm:$0xff] }
 0x765   :  { %5412 = vmatpush.msrb.mxu1 %v4491_v58 }
 0x767   :  { %5096 = vmatmul.f32.gmra.mxu3 %v4005_v50  ;;  %v4846_v14 = vpop.f32.mrf.mxu2  ;;  %4687 = vmatmul.f32.gmra.mxu1 %v3880_v29  ;;  %v11730_v50 = vpop.f32.mrf.mxu0 }
 0x768   :  { %v4847_v34 = vadd.f32 %v4846_v14, %v4637_v31  ;;  %5308 = vmatmul.f32.gmra.mxu0 %v3880_v29  ;;  %v3947_v29 = vld [vmem:[#allocation2 + $0x1f9] sm:$0xff] }
 0x76a   :  { %v5049_v62 = vpop.f32.mrf.mxu3 }
 0x76b   :  { %v11719_v28 = vadd.f32 %v5049_v62, %v4841_v32  ;;  %v3881_v62 = vld [vmem:[#allocation2 + $0x1e0] sm:$0xff] }
 0x76c   :  { %4896 = vmatmul.f32.gmra.mxu2 %v3944_v54  ;;  %v4643_v32 = vpop.f32.mrf.mxu1 }
 0x76f   :  { %5099 = vmatmul.f32.gmra.mxu3 %v4006_v10  ;;  %v4849_v51 = vpop.f32.mrf.mxu2  ;;  %4690 = vmatmul.f32.gmra.mxu1 %v3881_v62  ;;  %v11734_v53 = vpop.f32.mrf.mxu0 }
 0x770   :  { %v4850_v38 = vadd.f32 %v4849_v51, %v4640_v3  ;;  %5311 = vmatmul.f32.gmra.mxu0 %v3881_v62  ;;  %v3883_v51 = vld [vmem:[#allocation2 + $0x1f8] sm:$0xff] }
 0x772   :  { %v5052_v36 = vpop.f32.mrf.mxu3 }
 0x773   :  { %v11724_v0 = vadd.f32 %v5052_v36, %v4844_v47  ;;  %v3946_v36 = vld [vmem:[#allocation2 + $0x1e9] sm:$0xff] }
 0x774   :  { %4899 = vmatmul.f32.gmra.mxu2 %v3945_v13  ;;  %v4646_v18 = vpop.f32.mrf.mxu1 }
 0x777   :  { %5102 = vmatmul.f32.gmra.mxu3 %v4007_v12  ;;  %v4852_v35 = vpop.f32.mrf.mxu2  ;;  %4693 = vmatmul.f32.gmra.mxu1 %v3882_v57  ;;  %v4010_v12 = vld [vmem:[#allocation2 + $0x1ea] sm:$0xff] }
 0x778   :  { %v4853_v10 = vadd.f32 %v4852_v35, %v4643_v32  ;;  %5314 = vmatmul.f32.gmra.mxu0 %v3882_v57  ;;  %v3948_v35 = vld [vmem:[#allocation2 + $0x201] sm:$0xff] }
 0x77a   :  { %v5055_v56 = vpop.f32.mrf.mxu3 }
 0x77b   :  { %v11728_v41 = vadd.f32 %v5055_v56, %v4847_v34  ;;  %v11738_v56 = vpop.f32.mrf.mxu0 }
 0x77c   :  { %4902 = vmatmul.f32.gmra.mxu2 %v3946_v36  ;;  %v4649_v54 = vpop.f32.mrf.mxu1 }
 0x77f   :  { %5105 = vmatmul.f32.gmra.mxu3 %v4008_v21  ;;  %v4855_v14 = vpop.f32.mrf.mxu2  ;;  %4696 = vmatmul.f32.gmra.mxu1 %v3883_v51 }
 0x780   :  { %v4856_v34 = vadd.f32 %v4855_v14, %v4646_v18  ;;  %5317 = vmatmul.f32.gmra.mxu0 %v3883_v51  ;;  %v4012_v18 = vld [vmem:[#allocation2 + $0x202] sm:$0xff] }
 0x782   :  { %v5058_v26 = vpop.f32.mrf.mxu3 }
 0x783   :  { %v11732_v49 = vadd.f32 %v5058_v26, %v4850_v38  ;;  %v4011_v38 = vld [vmem:[#allocation2 + $0x1fa] sm:$0xff]  ;;  %v11742_v13 = vpop.f32.mrf.mxu0 }
 0x784   :  { %4905 = vmatmul.f32.gmra.mxu2 %v3947_v29  ;;  %v4013_v29 = vld [vmem:[#allocation2 + $0x212] sm:$0xff] }
 0x787   :  { %5108 = vmatmul.f32.gmra.mxu3 %v4009_v22  ;;  %v4858_v26 = vpop.f32.mrf.mxu2  ;;  %v4652_v22 = vpop.f32.mrf.mxu1 }
 0x788   :  { %v4859_v32 = vadd.f32 %v4858_v26, %v4649_v54  ;;  %v3885_v54 = vld [vmem:[#allocation2 + $0x210] sm:$0xff] }
 0x78a   :  { %v5061_v47 = vpop.f32.mrf.mxu3 }
 0x78b   :  { %v11736_v31 = vadd.f32 %v5061_v47, %v4853_v10  ;;  %v3884_v47 = vld [vmem:[#allocation2 + $0x200] sm:$0xff]  ;;  %v11746_v57 = vpop.f32.mrf.mxu0 }
 0x78c   :  { %4908 = vmatmul.f32.gmra.mxu2 %v3948_v35  ;;  %4699 = vmatmul.f32.gmra.mxu1 %v3884_v47  ;;  %14382 = vst [vmem:[#allocation85_spill] sm:$0xff] %v11746_v57 }
 0x78d   :  { %5320 = vmatmul.f32.gmra.mxu0 %v3884_v47  ;;  %v3886_v47 = vld [vmem:[#allocation2 + $0x218] sm:$0xff] }
 0x78f   :  { %5111 = vmatmul.f32.gmra.mxu3 %v4010_v12  ;;  %v4861_v36 = vpop.f32.mrf.mxu2  ;;  %v4655_v14 = vpop.f32.mrf.mxu1 }
 0x790   :  { %v4862_v58 = vadd.f32 %v4861_v36, %v4652_v22  ;;  %v3950_v22 = vld [vmem:[#allocation2 + $0x219] sm:$0xff] }
 0x791   :  { %v4014_v36 = vld [vmem:[#allocation2 + $0x21a] sm:$0xff] }
 0x792   :  { %v5064_v3 = vpop.f32.mrf.mxu3 }
 0x793   :  { %v11740_v21 = vadd.f32 %v5064_v3, %v4856_v34  ;;  %v3949_v34 = vld [vmem:[#allocation2 + $0x211] sm:$0xff]  ;;  %v11750_v26 = vpop.f32.mrf.mxu0 }
 0x794   :  { %4911 = vmatmul.f32.gmra.mxu2 %v3949_v34  ;;  %4702 = vmatmul.f32.gmra.mxu1 %v3885_v54  ;;  %14384 = vst [vmem:[#allocation92_spill] sm:$0xff] %v11750_v26  ;;  %v3967_v26 = vld [vmem:[#allocation2 + $0x2e9] sm:$0xff] }
 0x795   :  { %5323 = vmatmul.f32.gmra.mxu0 %v3885_v54  ;;  %v3887_v54 = vld [vmem:[#allocation2 + $0x228] sm:$0xff] }
 0x797   :  { %5114 = vmatmul.f32.gmra.mxu3 %v4011_v38  ;;  %v4864_v51 = vpop.f32.mrf.mxu2 }
 0x798   :  { %v4865_v38 = vadd.f32 %v4864_v51, %v4655_v14  ;;  %v3951_v51 = vld [vmem:[#allocation2 + $0x229] sm:$0xff] }
 0x79a   :  { %v5067_v62 = vpop.f32.mrf.mxu3 }
 0x79b   :  { %v11744_v10 = vadd.f32 %v5067_v62, %v4859_v32  ;;  %v4658_v62 = vpop.f32.mrf.mxu1  ;;  %v11754_v34 = vpop.f32.mrf.mxu0 }
 0x79c   :  { %4914 = vmatmul.f32.gmra.mxu2 %v3950_v22  ;;  %4705 = vmatmul.f32.gmra.mxu1 %v3886_v47  ;;  %14386 = vst [vmem:[#allocation43_spill] sm:$0xff] %v11754_v34  ;;  %v3888_v34 = vld [vmem:[#allocation2 + $0x230] sm:$0xff] }
 0x79d   :  { %14381 = vst [vmem:[#allocation86_spill] sm:$0xff] %v11744_v10  ;;  %5326 = vmatmul.f32.gmra.mxu0 %v3886_v47  ;;  %v4016_v47 = vld [vmem:[#allocation2 + $0x232] sm:$0xff] }
 0x79f   :  { %5117 = vmatmul.f32.gmra.mxu3 %v4012_v18  ;;  %v4490_v18 = vld [vmem:[#allocation3 + $0x220] sm:$0xff] }
 0x7a0   :  { %5413 = vmatpush.msrb.mxu1 %v4490_v18 }
 0x7a2   :  { %v5070_v12 = vpop.f32.mrf.mxu3 }
 0x7a3   :  { %v11748_v3 = vadd.f32 %v5070_v12, %v4862_v58  ;;  %v4867_v58 = vpop.f32.mrf.mxu2  ;;  %v11758_v18 = vpop.f32.mrf.mxu0 }
 0x7a4   :  { %v4868_v12 = vadd.f32 %v4867_v58, %v4658_v62  ;;  %4917 = vmatmul.f32.gmra.mxu2 %v3951_v51  ;;  %4708 = vmatmul.f32.gmra.mxu1 %v3887_v54  ;;  %14388 = vst [vmem:[#allocation46_spill] sm:$0xff] %v11758_v18  ;;  %v3952_v62 = vld [vmem:[#allocation2 + $0x231] sm:$0xff]  ;;  %v3889_v18 = vld [vmem:[#allocation2 + $0x240] sm:$0xff] }
 0x7a5   :  { %14383 = vst [vmem:[#allocation41_spill] sm:$0xff] %v11748_v3  ;;  %5329 = vmatmul.f32.gmra.mxu0 %v3887_v54 }
 0x7a7   :  { %5120 = vmatmul.f32.gmra.mxu3 %v4013_v29  ;;  %v4661_v29 = vpop.f32.mrf.mxu1 }
 0x7aa   :  { %v5073_v32 = vpop.f32.mrf.mxu3 }
 0x7ab   :  { %v11752_v35 = vadd.f32 %v5073_v32, %v4865_v38  ;;  %v4015_v38 = vld [vmem:[#allocation2 + $0x22a] sm:$0xff]  ;;  %v4870_v32 = vpop.f32.mrf.mxu2  ;;  %v11762_v51 = vpop.f32.mrf.mxu0 }
 0x7ac   :  { %v4871_v22 = vadd.f32 %v4870_v32, %v4661_v29  ;;  %4920 = vmatmul.f32.gmra.mxu2 %v3952_v62  ;;  %4711 = vmatmul.f32.gmra.mxu1 %v3888_v34  ;;  %14390 = vst [vmem:[#allocation49_spill] sm:$0xff] %v11762_v51  ;;  %v3953_v29 = vld [vmem:[#allocation2 + $0x241] sm:$0xff]  ;;  %v4489_v51 = vld [vmem:[#allocation3 + $0x218] sm:$0xff] }
 0x7ad   :  { %14385 = vst [vmem:[#allocation89_spill] sm:$0xff] %v11752_v35  ;;  %5332 = vmatmul.f32.gmra.mxu0 %v3888_v34  ;;  %v3890_v34 = vld [vmem:[#allocation2 + $0x248] sm:$0xff]  ;;  %5414 = vmatpush.msrb.mxu1 %v4489_v51 }
 0x7af   :  { %5123 = vmatmul.f32.gmra.mxu3 %v4014_v36  ;;  %v4664_v36 = vpop.f32.mrf.mxu1 }
 0x7b2   :  { %v5076_v14 = vpop.f32.mrf.mxu3 }
 0x7b3   :  { %v11756_v3 = vadd.f32 %v5076_v14, %v4868_v12  ;;  %v4873_v12 = vpop.f32.mrf.mxu2  ;;  %v11766_v62 = vpop.f32.mrf.mxu0 }
 0x7b4   :  { %v4874_v14 = vadd.f32 %v4873_v12, %v4664_v36  ;;  %4923 = vmatmul.f32.gmra.mxu2 %v3953_v29  ;;  %4714 = vmatmul.f32.gmra.mxu1 %v3889_v18  ;;  %14392 = vst [vmem:[#allocation52_spill] sm:$0xff] %v11766_v62  ;;  %v3954_v36 = vld [vmem:[#allocation2 + $0x249] sm:$0xff] }
 0x7b5   :  { %14387 = vst [vmem:[#allocation44_spill] sm:$0xff] %v11756_v3  ;;  %5335 = vmatmul.f32.gmra.mxu0 %v3889_v18  ;;  %v3891_v18 = vld [vmem:[#allocation2 + $0x258] sm:$0xff] }
 0x7b7   :  { %5126 = vmatmul.f32.gmra.mxu3 %v4015_v38  ;;  %v4667_v38 = vpop.f32.mrf.mxu1 }
 0x7ba   :  { %v5079_v35 = vpop.f32.mrf.mxu3 }
 0x7bb   :  { %v11760_v58 = vadd.f32 %v5079_v35, %v4871_v22  ;;  %v4017_v35 = vld [vmem:[#allocation2 + $0x242] sm:$0xff]  ;;  %v4876_v54 = vpop.f32.mrf.mxu2 }
 0x7bc   :  { %v4877_v22 = vadd.f32 %v4876_v54, %v4667_v38  ;;  %4926 = vmatmul.f32.gmra.mxu2 %v3954_v36  ;;  %4717 = vmatmul.f32.gmra.mxu1 %v3890_v34  ;;  %v3955_v54 = vld [vmem:[#allocation2 + $0x259] sm:$0xff] }
 0x7bd   :  { %14389 = vst [vmem:[#allocation47_spill] sm:$0xff] %v11760_v58  ;;  %5338 = vmatmul.f32.gmra.mxu0 %v3890_v34  ;;  %v4020_v34 = vld [vmem:[#allocation2 + $0x262] sm:$0xff] }
 0x7bf   :  { %5129 = vmatmul.f32.gmra.mxu3 %v4016_v47  ;;  %v4670_v47 = vpop.f32.mrf.mxu1 }
 0x7c2   :  { %v5082_v3 = vpop.f32.mrf.mxu3 }
 0x7c3   :  { %v11764_v32 = vadd.f32 %v5082_v3, %v4874_v14  ;;  %v4018_v3 = vld [vmem:[#allocation2 + $0x24a] sm:$0xff]  ;;  %v4879_v14 = vpop.f32.mrf.mxu2 }
 0x7c4   :  { %v4880_v29 = vadd.f32 %v4879_v14, %v4670_v47  ;;  %4929 = vmatmul.f32.gmra.mxu2 %v3955_v54  ;;  %4720 = vmatmul.f32.gmra.mxu1 %v3891_v18  ;;  %v3956_v47 = vld [vmem:[#allocation2 + $0x261] sm:$0xff] }
 0x7c5   :  { %14391 = vst [vmem:[#allocation50_spill] sm:$0xff] %v11764_v32  ;;  %v11770_v32 = vpop.f32.mrf.mxu0  ;;  %5341 = vmatmul.f32.gmra.mxu0 %v3891_v18 }
 0x7c6   :  { %14394 = vst [vmem:[#allocation55_spill] sm:$0xff] %v11770_v32  ;;  %v3892_v32 = vld [vmem:[#allocation2 + $0x260] sm:$0xff] }
 0x7c7   :  { %5132 = vmatmul.f32.gmra.mxu3 %v4017_v35  ;;  %v4673_v35 = vpop.f32.mrf.mxu1 }
 0x7ca   :  { %v5085_v58 = vpop.f32.mrf.mxu3 }
 0x7cb   :  { %v11768_v12 = vadd.f32 %v5085_v58, %v4877_v22  ;;  %v4019_v58 = vld [vmem:[#allocation2 + $0x25a] sm:$0xff]  ;;  %v4882_v22 = vpop.f32.mrf.mxu2 }
 0x7cc   :  { %v4883_v51 = vadd.f32 %v4882_v22, %v4673_v35  ;;  %4932 = vmatmul.f32.gmra.mxu2 %v3956_v47  ;;  %4723 = vmatmul.f32.gmra.mxu1 %v3892_v32  ;;  %v3957_v35 = vld [vmem:[#allocation2 + $0x271] sm:$0xff] }
 0x7cd   :  { %14393 = vst [vmem:[#allocation53_spill] sm:$0xff] %v11768_v12  ;;  %v11774_v36 = vpop.f32.mrf.mxu0  ;;  %5344 = vmatmul.f32.gmra.mxu0 %v3892_v32  ;;  %v3894_v32 = vld [vmem:[#allocation2 + $0x278] sm:$0xff] }
 0x7ce   :  { %14396 = vst [vmem:[#allocation93_spill] sm:$0xff] %v11774_v36  ;;  %v3893_v36 = vld [vmem:[#allocation2 + $0x270] sm:$0xff] }
 0x7cf   :  { %5135 = vmatmul.f32.gmra.mxu3 %v4018_v3  ;;  %v4676_v3 = vpop.f32.mrf.mxu1 }
 0x7d2   :  { %v5088_v38 = vpop.f32.mrf.mxu3 }
 0x7d3   :  { %v11772_v62 = vadd.f32 %v5088_v38, %v4880_v29  ;;  %v4885_v29 = vpop.f32.mrf.mxu2 }
 0x7d4   :  { %v4886_v38 = vadd.f32 %v4885_v29, %v4676_v3  ;;  %4935 = vmatmul.f32.gmra.mxu2 %v3957_v35  ;;  %4726 = vmatmul.f32.gmra.mxu1 %v3893_v36  ;;  %v3958_v3 = vld [vmem:[#allocation2 + $0x279] sm:$0xff] }
 0x7d5   :  { %14395 = vst [vmem:[#allocation67_spill] sm:$0xff] %v11772_v62  ;;  %v11778_v54 = vpop.f32.mrf.mxu0  ;;  %5347 = vmatmul.f32.gmra.mxu0 %v3893_v36  ;;  %v3895_v36 = vld [vmem:[#allocation2 + $0x288] sm:$0xff] }
 0x7d6   :  { %14398 = vst [vmem:[#allocation32_spill] sm:$0xff] %v11778_v54  ;;  %v4488_v54 = vld [vmem:[#allocation3 + $0x210] sm:$0xff] }
 0x7d7   :  { %5138 = vmatmul.f32.gmra.mxu3 %v4019_v58  ;;  %v4679_v58 = vpop.f32.mrf.mxu1  ;;  %5415 = vmatpush.msrb.mxu1 %v4488_v54 }
 0x7da   :  { %v5091_v12 = vpop.f32.mrf.mxu3 }
 0x7db   :  { %v11776_v14 = vadd.f32 %v5091_v12, %v4883_v51  ;;  %v4021_v12 = vld [vmem:[#allocation2 + $0x272] sm:$0xff]  ;;  %v4888_v18 = vpop.f32.mrf.mxu2 }
 0x7dc   :  { %v4889_v51 = vadd.f32 %v4888_v18, %v4679_v58  ;;  %4938 = vmatmul.f32.gmra.mxu2 %v3958_v3  ;;  %4729 = vmatmul.f32.gmra.mxu1 %v3894_v32  ;;  %v3959_v18 = vld [vmem:[#allocation2 + $0x289] sm:$0xff] }
 0x7dd   :  { %14397 = vst [vmem:[#allocation56_spill] sm:$0xff] %v11776_v14  ;;  %v11782_v47 = vpop.f32.mrf.mxu0  ;;  %5350 = vmatmul.f32.gmra.mxu0 %v3894_v32  ;;  %v4024_v32 = vld [vmem:[#allocation2 + $0x292] sm:$0xff] }
 0x7de   :  { %14400 = vst [vmem:[#allocation10_spill] sm:$0xff] %v11782_v47 }
 0x7df   :  { %5141 = vmatmul.f32.gmra.mxu3 %v4020_v34  ;;  %v4682_v34 = vpop.f32.mrf.mxu1 }
 0x7e2   :  { %v5094_v62 = vpop.f32.mrf.mxu3 }
 0x7e3   :  { %v11780_v22 = vadd.f32 %v5094_v62, %v4886_v38  ;;  %v4022_v62 = vld [vmem:[#allocation2 + $0x27a] sm:$0xff]  ;;  %v4891_v38 = vpop.f32.mrf.mxu2 }
 0x7e4   :  { %v4892_v35 = vadd.f32 %v4891_v38, %v4682_v34  ;;  %4941 = vmatmul.f32.gmra.mxu2 %v3959_v18  ;;  %4732 = vmatmul.f32.gmra.mxu1 %v3895_v36  ;;  %v3960_v34 = vld [vmem:[#allocation2 + $0x291] sm:$0xff] }
 0x7e5   :  { %14399 = vst [vmem:[#allocation9_spill] sm:$0xff] %v11780_v22  ;;  %v11786_v22 = vpop.f32.mrf.mxu0  ;;  %5353 = vmatmul.f32.gmra.mxu0 %v3895_v36 }
 0x7e6   :  { %14402 = vst [vmem:[#allocation12_spill] sm:$0xff] %v11786_v22  ;;  %v3896_v22 = vld [vmem:[#allocation2 + $0x290] sm:$0xff] }
 0x7e7   :  { %5144 = vmatmul.f32.gmra.mxu3 %v4021_v12  ;;  %v4685_v12 = vpop.f32.mrf.mxu1 }
 0x7ea   :  { %v5097_v14 = vpop.f32.mrf.mxu3 }
 0x7eb   :  { %v11784_v29 = vadd.f32 %v5097_v14, %v4889_v51  ;;  %v4023_v14 = vld [vmem:[#allocation2 + $0x28a] sm:$0xff]  ;;  %v4894_v51 = vpop.f32.mrf.mxu2 }
 0x7ec   :  { %v4895_v54 = vadd.f32 %v4894_v51, %v4685_v12  ;;  %4944 = vmatmul.f32.gmra.mxu2 %v3960_v34  ;;  %4735 = vmatmul.f32.gmra.mxu1 %v3896_v22  ;;  %v3961_v12 = vld [vmem:[#allocation2 + $0x2a1] sm:$0xff] }
 0x7ed   :  { %14401 = vst [vmem:[#allocation11_spill] sm:$0xff] %v11784_v29  ;;  %v11790_v3 = vpop.f32.mrf.mxu0  ;;  %5356 = vmatmul.f32.gmra.mxu0 %v3896_v22  ;;  %v3898_v22 = vld [vmem:[#allocation2 + $0x2a8] sm:$0xff] }
 0x7ee   :  { %14404 = vst [vmem:[#allocation14_spill] sm:$0xff] %v11790_v3  ;;  %v3897_v3 = vld [vmem:[#allocation2 + $0x2a0] sm:$0xff] }
 0x7ef   :  { %5147 = vmatmul.f32.gmra.mxu3 %v4022_v62  ;;  %v4688_v62 = vpop.f32.mrf.mxu1 }
 0x7f2   :  { %v5100_v58 = vpop.f32.mrf.mxu3 }
 0x7f3   :  { %v11788_v47 = vadd.f32 %v5100_v58, %v4892_v35  ;;  %v4897_v35 = vpop.f32.mrf.mxu2 }
 0x7f4   :  { %v4898_v58 = vadd.f32 %v4897_v35, %v4688_v62  ;;  %4947 = vmatmul.f32.gmra.mxu2 %v3961_v12  ;;  %4738 = vmatmul.f32.gmra.mxu1 %v3897_v3  ;;  %v3962_v62 = vld [vmem:[#allocation2 + $0x2a9] sm:$0xff] }
 0x7f5   :  { %14403 = vst [vmem:[#allocation13_spill] sm:$0xff] %v11788_v47  ;;  %v11794_v18 = vpop.f32.mrf.mxu0  ;;  %5359 = vmatmul.f32.gmra.mxu0 %v3897_v3  ;;  %v3899_v3 = vld [vmem:[#allocation2 + $0x2b8] sm:$0xff] }
 0x7f6   :  { %14406 = vst [vmem:[#allocation16_spill] sm:$0xff] %v11794_v18  ;;  %v4487_v18 = vld [vmem:[#allocation3 + $0x208] sm:$0xff] }
 0x7f7   :  { %5150 = vmatmul.f32.gmra.mxu3 %v4023_v14  ;;  %v4691_v14 = vpop.f32.mrf.mxu1  ;;  %5416 = vmatpush.msrb.mxu1 %v4487_v18 }
 0x7fa   :  { %v5103_v29 = vpop.f32.mrf.mxu3 }
 0x7fb   :  { %v11792_v38 = vadd.f32 %v5103_v29, %v4895_v54  ;;  %v4025_v29 = vld [vmem:[#allocation2 + $0x2a2] sm:$0xff]  ;;  %v4900_v36 = vpop.f32.mrf.mxu2 }
 0x7fc   :  { %v4901_v54 = vadd.f32 %v4900_v36, %v4691_v14  ;;  %4950 = vmatmul.f32.gmra.mxu2 %v3962_v62  ;;  %4741 = vmatmul.f32.gmra.mxu1 %v3898_v22  ;;  %v3963_v36 = vld [vmem:[#allocation2 + $0x2b9] sm:$0xff] }
 0x7fd   :  { %14405 = vst [vmem:[#allocation15_spill] sm:$0xff] %v11792_v38  ;;  %v11798_v34 = vpop.f32.mrf.mxu0  ;;  %5362 = vmatmul.f32.gmra.mxu0 %v3898_v22  ;;  %v4028_v22 = vld [vmem:[#allocation2 + $0x2c2] sm:$0xff] }
 0x7fe   :  { %14408 = vst [vmem:[#allocation18_spill] sm:$0xff] %v11798_v34 }
 0x7ff   :  { %5153 = vmatmul.f32.gmra.mxu3 %v4024_v32  ;;  %v4694_v32 = vpop.f32.mrf.mxu1 }
 0x802   :  { %v5106_v47 = vpop.f32.mrf.mxu3 }
 0x803   :  { %v11796_v51 = vadd.f32 %v5106_v47, %v4898_v58  ;;  %v4026_v47 = vld [vmem:[#allocation2 + $0x2aa] sm:$0xff]  ;;  %v4903_v58 = vpop.f32.mrf.mxu2 }
 0x804   :  { %v4904_v12 = vadd.f32 %v4903_v58, %v4694_v32  ;;  %4953 = vmatmul.f32.gmra.mxu2 %v3963_v36  ;;  %4744 = vmatmul.f32.gmra.mxu1 %v3899_v3  ;;  %v3964_v32 = vld [vmem:[#allocation2 + $0x2c1] sm:$0xff] }
 0x805   :  { %14407 = vst [vmem:[#allocation17_spill] sm:$0xff] %v11796_v51  ;;  %v11802_v51 = vpop.f32.mrf.mxu0  ;;  %5365 = vmatmul.f32.gmra.mxu0 %v3899_v3 }
 0x806   :  { %14410 = vst [vmem:[#allocation20_spill] sm:$0xff] %v11802_v51  ;;  %v3900_v51 = vld [vmem:[#allocation2 + $0x2c0] sm:$0xff] }
 0x807   :  { %5156 = vmatmul.f32.gmra.mxu3 %v4025_v29  ;;  %v4697_v29 = vpop.f32.mrf.mxu1 }
 0x80a   :  { %v5109_v38 = vpop.f32.mrf.mxu3 }
 0x80b   :  { %v11800_v35 = vadd.f32 %v5109_v38, %v4901_v54  ;;  %v4027_v38 = vld [vmem:[#allocation2 + $0x2ba] sm:$0xff]  ;;  %v4906_v54 = vpop.f32.mrf.mxu2 }
 0x80c   :  { %v4907_v18 = vadd.f32 %v4906_v54, %v4697_v29  ;;  %4956 = vmatmul.f32.gmra.mxu2 %v3964_v32  ;;  %4747 = vmatmul.f32.gmra.mxu1 %v3900_v51  ;;  %v3965_v29 = vld [vmem:[#allocation2 + $0x2d1] sm:$0xff] }
 0x80d   :  { %14409 = vst [vmem:[#allocation19_spill] sm:$0xff] %v11800_v35  ;;  %v11806_v62 = vpop.f32.mrf.mxu0  ;;  %5368 = vmatmul.f32.gmra.mxu0 %v3900_v51  ;;  %v4517_v51 = vld [vmem:[#allocation3 + $0x2f8] sm:$0xff] }
 0x80e   :  { %14412 = vst [vmem:[#allocation22_spill] sm:$0xff] %v11806_v62  ;;  %v3901_v62 = vld [vmem:[#allocation2 + $0x2d0] sm:$0xff]  ;;  %5611 = vmatpush.msra.mxu2 %v4517_v51 }
 0x80f   :  { %5159 = vmatmul.f32.gmra.mxu3 %v4026_v47  ;;  %v4700_v47 = vpop.f32.mrf.mxu1 }
 0x812   :  { %v5112_v14 = vpop.f32.mrf.mxu3 }
 0x813   :  { %v11804_v34 = vadd.f32 %v5112_v14, %v4904_v12  ;;  %v4909_v12 = vpop.f32.mrf.mxu2 }
 0x814   :  { %v4910_v14 = vadd.f32 %v4909_v12, %v4700_v47  ;;  %4959 = vmatmul.f32.gmra.mxu2 %v3965_v29  ;;  %4750 = vmatmul.f32.gmra.mxu1 %v3901_v62  ;;  %v3966_v47 = vld [vmem:[#allocation2 + $0x2d9] sm:$0xff]  ;;  %v4516_v29 = vld [vmem:[#allocation3 + $0x2f0] sm:$0xff] }
 0x815   :  { %14411 = vst [vmem:[#allocation21_spill] sm:$0xff] %v11804_v34  ;;  %v11810_v36 = vpop.f32.mrf.mxu0  ;;  %5371 = vmatmul.f32.gmra.mxu0 %v3901_v62  ;;  %5612 = vmatpush.msra.mxu2 %v4516_v29  ;;  %v4515_v62 = vld [vmem:[#allocation3 + $0x2e8] sm:$0xff]  ;;  %v4529_v29 = vld [vmem:[#allocation3 + $0x358] sm:$0xff] }
 0x816   :  { %14414 = vst [vmem:[#allocation24_spill] sm:$0xff] %v11810_v36  ;;  %v4486_v36 = vld [vmem:[#allocation3 + $0x200] sm:$0xff] }
 0x817   :  { %5162 = vmatmul.f32.gmra.mxu3 %v4027_v38  ;;  %v4703_v38 = vpop.f32.mrf.mxu1  ;;  %5417 = vmatpush.msrb.mxu1 %v4486_v36  ;;  %v4530_v36 = vld [vmem:[#allocation3 + $0x360] sm:$0xff] }
 0x818   :  { %5613 = vmatpush.msra.mxu2 %v4515_v62 }
 0x81a   :  { %v5115_v35 = vpop.f32.mrf.mxu3 }
 0x81b   :  { %v11808_v58 = vadd.f32 %v5115_v35, %v4907_v18  ;;  %v4029_v35 = vld [vmem:[#allocation2 + $0x2d2] sm:$0xff]  ;;  %v4912_v3 = vpop.f32.mrf.mxu2 }
 0x81c   :  { %v4913_v18 = vadd.f32 %v4912_v3, %v4703_v38  ;;  %4962 = vmatmul.f32.gmra.mxu2 %v3966_v47  ;;  %v4030_v38 = vld [vmem:[#allocation2 + $0x2da] sm:$0xff] }
 0x81d   :  { %14413 = vst [vmem:[#allocation23_spill] sm:$0xff] %v11808_v58  ;;  %v11814_v32 = vpop.f32.mrf.mxu0 }
 0x81e   :  { %14416 = vst [vmem:[#allocation26_spill] sm:$0xff] %v11814_v32 }
 0x81f   :  { %5165 = vmatmul.f32.gmra.mxu3 %v4028_v22  ;;  %v4706_v22 = vpop.f32.mrf.mxu1 }
 0x822   :  { %v5118_v34 = vpop.f32.mrf.mxu3 }
 0x823   :  { %v11812_v54 = vadd.f32 %v5118_v34, %v4910_v14  ;;  %v4533_v34 = vld [vmem:[#allocation3 + $0x378] sm:$0xff]  ;;  %v4915_v3 = vpop.f32.mrf.mxu2 }
 0x824   :  { %v3902_v14 = vld [vmem:[#allocation2 + $0x2d8] sm:$0xff]  ;;  %5820 = vmatpush.msra.mxu3 %v4533_v34  ;;  %4965 = vmatmul.f32.gmra.mxu2 %v3967_v26  ;;  %v4527_v26 = vld [vmem:[#allocation3 + $0x348] sm:$0xff] }
 0x825   :  { %14415 = vst [vmem:[#allocation25_spill] sm:$0xff] %v11812_v54  ;;  %4753 = vmatmul.f32.gmra.mxu1 %v3902_v14  ;;  %v4916_v54 = vadd.f32 %v4915_v3, %v4706_v22  ;;  %v11818_v32 = vpop.f32.mrf.mxu0  ;;  %5374 = vmatmul.f32.gmra.mxu0 %v3902_v14  ;;  %v4513_v34 = vld [vmem:[#allocation3 + $0x2d8] sm:$0xff]  ;;  %v4512_v22 = vld [vmem:[#allocation3 + $0x2d0] sm:$0xff]  ;;  %v4510_v14 = vld [vmem:[#allocation3 + $0x2c0] sm:$0xff] }
 0x826   :  { %14418 = vst [vmem:[#allocation28_spill] sm:$0xff] %v11818_v32  ;;  %v4031_v3 = vld [vmem:[#allocation2 + $0x2ea] sm:$0xff] }
 0x827   :  { %5168 = vmatmul.f32.gmra.mxu3 %v4029_v35  ;;  %v4532_v35 = vld [vmem:[#allocation3 + $0x370] sm:$0xff] }
 0x828   :  { %5821 = vmatpush.msra.mxu3 %v4532_v35  ;;  %v4528_v35 = vld [vmem:[#allocation3 + $0x350] sm:$0xff] }
 0x82a   :  { %v5121_v58 = vpop.f32.mrf.mxu3 }
 0x82b   :  { %v11816_v12 = vadd.f32 %v5121_v58, %v4913_v18  ;;  %v4531_v58 = vld [vmem:[#allocation3 + $0x368] sm:$0xff]  ;;  %v4514_v18 = vld [vmem:[#allocation3 + $0x2e0] sm:$0xff]  ;;  %v4918_v32 = vpop.f32.mrf.mxu2 }
 0x82c   :  { %5822 = vmatpush.msra.mxu3 %v4531_v58  ;;  %5614 = vmatpush.msra.mxu2 %v4514_v18  ;;  %v3968_v18 = vld [vmem:[#allocation2 + $0x2f1] sm:$0xff] }
 0x82d   :  { %14417 = vst [vmem:[#allocation27_spill] sm:$0xff] %v11816_v12  ;;  %v4709_v12 = vpop.f32.mrf.mxu1  ;;  %v11822_v58 = vpop.f32.mrf.mxu0  ;;  %4968 = vmatmul.f32.gmra.mxu2 %v3968_v18 }
 0x82e   :  { %5823 = vmatpush.msra.mxu3 %v4530_v36  ;;  %5615 = vmatpush.msra.mxu2 %v4513_v34  ;;  %v4919_v62 = vadd.f32 %v4918_v32, %v4709_v12  ;;  %14420 = vst [vmem:[#allocation30_spill] sm:$0xff] %v11822_v58  ;;  %v4526_v36 = vld [vmem:[#allocation3 + $0x340] sm:$0xff]  ;;  %v4509_v34 = vld [vmem:[#allocation3 + $0x2b8] sm:$0xff]  ;;  %v3904_v12 = vld [vmem:[#allocation2 + $0x2f0] sm:$0xff] }
 0x82f   :  { %5171 = vmatmul.f32.gmra.mxu3 %v4030_v38  ;;  %v3903_v38 = vld [vmem:[#allocation2 + $0x2e8] sm:$0xff]  ;;  %v4549_v32 = vld [vmem:[#allocation3 + $0x3f8] sm:$0xff] }
 0x830   :  { %4756 = vmatmul.f32.gmra.mxu1 %v3903_v38  ;;  %5824 = vmatpush.msra.mxu3 %v4529_v29  ;;  %v4525_v29 = vld [vmem:[#allocation3 + $0x338] sm:$0xff] }
 0x831   :  { %5616 = vmatpush.msra.mxu2 %v4512_v22  ;;  %5377 = vmatmul.f32.gmra.mxu0 %v3903_v38  ;;  %v4548_v22 = vld [vmem:[#allocation3 + $0x3f0] sm:$0xff] }
 0x832   :  { %v5124_v47 = vpop.f32.mrf.mxu3  ;;  %5825 = vmatpush.msra.mxu3 %v4528_v35  ;;  %6029 = vmatpush.msra.mxu0 %v4549_v32  ;;  %v4508_v35 = vld [vmem:[#allocation3 + $0x2b0] sm:$0xff]  ;;  %v4506_v32 = vld [vmem:[#allocation3 + $0x2a0] sm:$0xff] }
 0x833   :  { %v11820_v51 = vadd.f32 %v5124_v47, %v4916_v54  ;;  %v4511_v54 = vld [vmem:[#allocation3 + $0x2c8] sm:$0xff]  ;;  %v4032_v58 = vld [vmem:[#allocation2 + $0x2f2] sm:$0xff]  ;;  %v4921_v57 = vpop.f32.mrf.mxu2 }
 0x834   :  { %5617 = vmatpush.msra.mxu2 %v4511_v54  ;;  %5826 = vmatpush.msra.mxu3 %v4527_v26  ;;  %v4507_v54 = vld [vmem:[#allocation3 + $0x2a8] sm:$0xff] }
 0x835   :  { %14419 = vst [vmem:[#allocation29_spill] sm:$0xff] %v11820_v51  ;;  %v4712_v51 = vpop.f32.mrf.mxu1  ;;  %6030 = vmatpush.msra.mxu0 %v4548_v22  ;;  %v4523_v26 = vld [vmem:[#allocation3 + $0x328] sm:$0xff]  ;;  %v4545_v22 = vld [vmem:[#allocation3 + $0x3d8] sm:$0xff] }
 0x836   :  { %5618 = vmatpush.msra.mxu2 %v4510_v14  ;;  %5827 = vmatpush.msra.mxu3 %v4526_v36  ;;  %v4922_v38 = vadd.f32 %v4921_v57, %v4712_v51  ;;  %v4547_v14 = vld [vmem:[#allocation3 + $0x3e8] sm:$0xff]  ;;  %v4546_v57 = vld [vmem:[#allocation3 + $0x3e0] sm:$0xff]  ;;  %v4505_v51 = vld [vmem:[#allocation3 + $0x298] sm:$0xff] }
 0x837   :  { %5174 = vmatmul.f32.gmra.mxu3 %v4031_v3  ;;  %v4524_v3 = vld [vmem:[#allocation3 + $0x330] sm:$0xff]  ;;  %v3969_v36 = vld [vmem:[#allocation2 + $0x301] sm:$0xff]  ;;  %6031 = vmatpush.msra.mxu0 %v4547_v14 }
 0x838   :  { %4759 = vmatmul.f32.gmra.mxu1 %v3904_v12  ;;  %5619 = vmatpush.msra.mxu2 %v4509_v34  ;;  %v4503_v14 = vld [vmem:[#allocation3 + $0x288] sm:$0xff] }
 0x839   :  { %5828 = vmatpush.msra.mxu3 %v4525_v29  ;;  %5380 = vmatmul.f32.gmra.mxu0 %v3904_v12  ;;  %v4521_v29 = vld [vmem:[#allocation3 + $0x318] sm:$0xff]  ;;  %v4520_v12 = vld [vmem:[#allocation3 + $0x310] sm:$0xff] }
 0x83a   :  { %v5127_v47 = vpop.f32.mrf.mxu3  ;;  %5620 = vmatpush.msra.mxu2 %v4508_v35  ;;  %v4033_v35 = vld [vmem:[#allocation2 + $0x302] sm:$0xff]  ;;  %6032 = vmatpush.msra.mxu0 %v4546_v57 }
 0x83b   :  { %v11824_v10 = vadd.f32 %v5127_v47, %v4919_v62  ;;  %v11826_v62 = vpop.f32.mrf.mxu0  ;;  %5829 = vmatpush.msra.mxu3 %v4524_v3  ;;  %4971 = vmatmul.f32.gmra.mxu2 %v3969_v36  ;;  %v4924_v3 = vpop.f32.mrf.mxu2  ;;  %v4519_v36 = vld [vmem:[#allocation3 + $0x308] sm:$0xff] }
 0x83c   :  { %14422 = vst [vmem:[#allocation33_spill] sm:$0xff] %v11826_v62  ;;  %5621 = vmatpush.msra.mxu2 %v4507_v54  ;;  %v4504_v54 = vld [vmem:[#allocation3 + $0x290] sm:$0xff]  ;;  %6033 = vmatpush.msra.mxu0 %v4545_v22  ;;  %v4543_v62 = vld [vmem:[#allocation3 + $0x3c8] sm:$0xff]  ;;  %v4565_v22 = vld [vmem:[#allocation3 + $0x478] sm:$0xff] }
 0x83d   :  { %14421 = vst [vmem:[#allocation31_spill] sm:$0xff] %v11824_v10  ;;  %v4715_v18 = vpop.f32.mrf.mxu1  ;;  %5830 = vmatpush.msra.mxu3 %v4523_v26  ;;  %v4522_v10 = vld [vmem:[#allocation3 + $0x320] sm:$0xff]  ;;  %6238 = vmatpush.msra.mxu1 %v4565_v22  ;;  %v4537_v22 = vld [vmem:[#allocation3 + $0x398] sm:$0xff] }
 0x83e   :  { %5622 = vmatpush.msra.mxu2 %v4506_v32  ;;  %v4925_v26 = vadd.f32 %v4924_v3, %v4715_v18  ;;  %v4502_v18 = vld [vmem:[#allocation3 + $0x280] sm:$0xff]  ;;  %v4034_v3 = vld [vmem:[#allocation2 + $0x30a] sm:$0xff] }
 0x83f   :  { %5177 = vmatmul.f32.gmra.mxu3 %v4032_v58  ;;  %v3905_v58 = vld [vmem:[#allocation2 + $0x300] sm:$0xff] }
 0x840   :  { %4762 = vmatmul.f32.gmra.mxu1 %v3905_v58  ;;  %5831 = vmatpush.msra.mxu3 %v4522_v10 }
 0x841   :  { %5623 = vmatpush.msra.mxu2 %v4505_v51  ;;  %5383 = vmatmul.f32.gmra.mxu0 %v3905_v58  ;;  %v4518_v51 = vld [vmem:[#allocation3 + $0x300] sm:$0xff] }
 0x842   :  { %v5130_v47 = vpop.f32.mrf.mxu3  ;;  %5832 = vmatpush.msra.mxu3 %v4521_v29  ;;  %v4542_v29 = vld [vmem:[#allocation3 + $0x3c0] sm:$0xff] }
 0x843   :  { %v11828_v34 = vadd.f32 %v5130_v47, %v4922_v38  ;;  %v4544_v38 = vld [vmem:[#allocation3 + $0x3d0] sm:$0xff]  ;;  %v11830_v47 = vpop.f32.mrf.mxu0  ;;  %5624 = vmatpush.msra.mxu2 %v4504_v54  ;;  %v4927_v54 = vpop.f32.mrf.mxu2 }
 0x844   :  { %5833 = vmatpush.msra.mxu3 %v4520_v12  ;;  %6034 = vmatpush.msra.mxu0 %v4544_v38  ;;  %v4541_v12 = vld [vmem:[#allocation3 + $0x3b8] sm:$0xff] }
 0x845   :  { %14423 = vst [vmem:[#allocation36_spill] sm:$0xff] %v11828_v34  ;;  %v4718_v10 = vpop.f32.mrf.mxu1  ;;  %v3970_v34 = vld [vmem:[#allocation2 + $0x309] sm:$0xff]  ;;  %5625 = vmatpush.msra.mxu2 %v4503_v14 }
 0x846   :  { %4974 = vmatmul.f32.gmra.mxu2 %v3970_v34  ;;  %5834 = vmatpush.msra.mxu3 %v4519_v36  ;;  %v4928_v38 = vadd.f32 %v4927_v54, %v4718_v10  ;;  %v4540_v34 = vld [vmem:[#allocation3 + $0x3b0] sm:$0xff]  ;;  %v3971_v36 = vld [vmem:[#allocation2 + $0x319] sm:$0xff] }
 0x847   :  { %5180 = vmatmul.f32.gmra.mxu3 %v4033_v35  ;;  %v3906_v35 = vld [vmem:[#allocation2 + $0x308] sm:$0xff]  ;;  %6035 = vmatpush.msra.mxu0 %v4543_v62  ;;  %v4536_v54 = vld [vmem:[#allocation3 + $0x390] sm:$0xff] }
 0x848   :  { %4765 = vmatmul.f32.gmra.mxu1 %v3906_v35  ;;  %5626 = vmatpush.msra.mxu2 %v4502_v18  ;;  %v4539_v62 = vld [vmem:[#allocation3 + $0x3a8] sm:$0xff]  ;;  %v4538_v18 = vld [vmem:[#allocation3 + $0x3a0] sm:$0xff] }
 0x849   :  { %5835 = vmatpush.msra.mxu3 %v4518_v51  ;;  %6036 = vmatpush.msra.mxu0 %v4542_v29  ;;  %v4035_v51 = vld [vmem:[#allocation2 + $0x31a] sm:$0xff] }
 0x84a   :  { %v5133_v32 = vpop.f32.mrf.mxu3  ;;  %5386 = vmatmul.f32.gmra.mxu0 %v3906_v35 }
 0x84b   :  { %v11832_v57 = vadd.f32 %v5133_v32, %v4925_v26  ;;  %v11834_v58 = vpop.f32.mrf.mxu0  ;;  %6037 = vmatpush.msra.mxu0 %v4541_v12  ;;  %v4930_v10 = vpop.f32.mrf.mxu2 }
 0x84d   :  { %14424 = vst [vmem:[#allocation39_spill] sm:$0xff] %v11832_v57  ;;  %v4721_v14 = vpop.f32.mrf.mxu1  ;;  %v3907_v57 = vld [vmem:[#allocation2 + $0x318] sm:$0xff]  ;;  %6038 = vmatpush.msra.mxu0 %v4540_v34  ;;  %v4535_v34 = vld [vmem:[#allocation3 + $0x388] sm:$0xff] }
 0x84e   :  { %4977 = vmatmul.f32.gmra.mxu2 %v3971_v36  ;;  %v4931_v29 = vadd.f32 %v4930_v10, %v4721_v14  ;;  %v3908_v36 = vld [vmem:[#allocation2 + $0x320] sm:$0xff] }
 0x84f   :  { %5183 = vmatmul.f32.gmra.mxu3 %v4034_v3  ;;  %6039 = vmatpush.msra.mxu0 %v4539_v62  ;;  %v4534_v62 = vld [vmem:[#allocation3 + $0x380] sm:$0xff] }
 0x850   :  { %4768 = vmatmul.f32.gmra.mxu1 %v3907_v57 }
 0x851   :  { %6040 = vmatpush.msra.mxu0 %v4538_v18 }
 0x852   :  { %v5136_v26 = vpop.f32.mrf.mxu3  ;;  %5389 = vmatmul.f32.gmra.mxu0 %v3907_v57 }
 0x853   :  { %v11836_v32 = vadd.f32 %v5136_v26, %v4928_v38  ;;  %v11838_v3 = vpop.f32.mrf.mxu0  ;;  %v3972_v38 = vld [vmem:[#allocation2 + $0x321] sm:$0xff]  ;;  %6041 = vmatpush.msra.mxu0 %v4537_v22  ;;  %v4933_v14 = vpop.f32.mrf.mxu2 }
 0x854   :  { %14426 = vst [vmem:[#allocation58_spill] sm:$0xff] %v11838_v3  ;;  %v4165_v22 = vld [vmem:[#allocation2 + $0x1a] sm:$0xff] }
 0x855   :  { %14425 = vst [vmem:[#allocation42_spill] sm:$0xff] %v11836_v32  ;;  %v4724_v35 = vpop.f32.mrf.mxu1  ;;  %6042 = vmatpush.msra.mxu0 %v4536_v54  ;;  %v4230_v54 = vld [vmem:[#allocation2 + $0x30] sm:$0xff] }
 0x856   :  { %4980 = vmatmul.f32.gmra.mxu2 %v3972_v38  ;;  %v4934_v10 = vadd.f32 %v4933_v14, %v4724_v35  ;;  %v4166_v14 = vld [vmem:[#allocation2 + $0x22] sm:$0xff] }
 0x857   :  { %5186 = vmatmul.f32.gmra.mxu3 %v4035_v51  ;;  %v4036_v51 = vld [vmem:[#allocation2 + $0x322] sm:$0xff]  ;;  %6043 = vmatpush.msra.mxu0 %v4535_v34  ;;  %v4099_v34 = vld [vmem:[#allocation2 + $0x330] sm:$0xff] }
 0x858   :  { %4771 = vmatmul.f32.gmra.mxu1 %v3908_v36 }
 0x859   :  { %6044 = vmatpush.msra.mxu0 %v4534_v62 }
 0x85a   :  { %v5139_v12 = vpop.f32.mrf.mxu3  ;;  %5392 = vmatmul.f32.gmra.mxu0 %v3908_v36  ;;  %v4564_v36 = vld [vmem:[#allocation3 + $0x470] sm:$0xff] }
 0x85b   :  { %v11840_v26 = vadd.f32 %v5139_v12, %v4931_v29  ;;  %v11842_v18 = vpop.f32.mrf.mxu0  ;;  %v4101_v29 = vld [vmem:[#allocation2 + $0x19] sm:$0xff]  ;;  %v4936_v12 = vpop.f32.mrf.mxu2  ;;  %6239 = vmatpush.msra.mxu1 %v4564_v36 }
 0x85c   :  { %14428 = vst [vmem:[#allocation63_spill] sm:$0xff] %v11842_v18 }
 0x85d   :  { %14427 = vst [vmem:[#allocation62_spill] sm:$0xff] %v11840_v26  ;;  %v4727_v3 = vpop.f32.mrf.mxu1 }
 0x85e   :  { %5627 = vmatmul.f32.vlgmr.msra.gmra.mxu2 %v4165_v22  ;;  %v4937_v38 = vadd.f32 %v4936_v12, %v4727_v3  ;;  %v4100_v3 = vld [vmem:[#allocation2 + $0x338] sm:$0xff] }
 0x85f   :  { %5189 = vmatmul.f32.gmra.mxu3 %v4036_v51 }
 0x860   :  { %5418 = vmatmul.f32.vlgmr.msrb.gmra.mxu1 %v4101_v29 }
 0x862   :  { %v5142_v32 = vpop.f32.mrf.mxu3  ;;  %5395 = vmatmul.f32.gmra.mxu0 %v4099_v34  ;;  %v4232_v34 = vld [vmem:[#allocation2 + $0x48] sm:$0xff] }
 0x863   :  { %v11844_v57 = vadd.f32 %v5142_v32, %v4934_v10  ;;  %v11846_v26 = vpop.f32.mrf.mxu0  ;;  %v4102_v32 = vld [vmem:[#allocation2 + $0x21] sm:$0xff]  ;;  %v4231_v10 = vld [vmem:[#allocation2 + $0x38] sm:$0xff]  ;;  %v4939_v22 = vpop.f32.mrf.mxu2 }
 0x864   :  { %14430 = vst [vmem:[#allocation66_spill] sm:$0xff] %v11846_v26  ;;  %v4167_v26 = vld [vmem:[#allocation2 + $0x32] sm:$0xff] }
 0x865   :  { %14429 = vst [vmem:[#allocation64_spill] sm:$0xff] %v11844_v57  ;;  %v4730_v51 = vpop.f32.mrf.mxu1 }
 0x866   :  { %5630 = vmatmul.f32.gmra.mxu2 %v4166_v14  ;;  %v4940_v29 = vadd.f32 %v4939_v22, %v4730_v51 }
 0x867   :  { %5836 = vmatmul.f32.vlgmr.msra.gmra.mxu3 %v4230_v54 }
 0x868   :  { %5421 = vmatmul.f32.gmra.mxu1 %v4102_v32 }
 0x86a   :  { %v5145_v35 = vpop.f32.mrf.mxu3  ;;  %5398 = vmatmul.f32.gmra.mxu0 %v4100_v3 }
 0x86b   :  { %v11848_v62 = vadd.f32 %v5145_v35, %v4937_v38  ;;  %v11850_v54 = vpop.f32.mrf.mxu0  ;;  %v4103_v38 = vld [vmem:[#allocation2 + $0x31] sm:$0xff]  ;;  %v4942_v35 = vpop.f32.mrf.mxu2 }
 0x86c   :  { %14432 = vst [vmem:[#allocation45_spill] sm:$0xff] %v11850_v54  ;;  %v4181_v54 = vld [vmem:[#allocation2 + $0xda] sm:$0xff] }
 0x86d   :  { %14431 = vst [vmem:[#allocation68_spill] sm:$0xff] %v11848_v62  ;;  %v4733_v57 = vpop.f32.mrf.mxu1  ;;  %v4104_v62 = vld [vmem:[#allocation2 + $0x39] sm:$0xff] }
 0x86e   :  { %5633 = vmatmul.f32.gmra.mxu2 %v4167_v26  ;;  %v4943_v14 = vadd.f32 %v4942_v35, %v4733_v57  ;;  %v4169_v57 = vld [vmem:[#allocation2 + $0x4a] sm:$0xff] }
 0x86f   :  { %5839 = vmatmul.f32.gmra.mxu3 %v4231_v10  ;;  %v4168_v10 = vld [vmem:[#allocation2 + $0x3a] sm:$0xff] }
 0x870   :  { %5424 = vmatmul.f32.gmra.mxu1 %v4103_v38 }
 0x872   :  { %v5148_v12 = vpop.f32.mrf.mxu3  ;;  %6045 = vmatmul.f32.vlgmr.msra.gmra.mxu0 %v4103_v38  ;;  %v4234_v38 = vld [vmem:[#allocation2 + $0x60] sm:$0xff] }
 0x873   :  { %v11852_v18 = vadd.f32 %v5148_v12, %v4940_v29  ;;  %v11854_v36 = vpop.f32.mrf.mxu0  ;;  %v4233_v29 = vld [vmem:[#allocation2 + $0x50] sm:$0xff]  ;;  %v4945_v3 = vpop.f32.mrf.mxu2 }
 0x874   :  { %14434 = vst [vmem:[#allocation51_spill] sm:$0xff] %v11854_v36  ;;  %v4105_v36 = vld [vmem:[#allocation2 + $0x49] sm:$0xff] }
 0x875   :  { %14433 = vst [vmem:[#allocation48_spill] sm:$0xff] %v11852_v18  ;;  %v4736_v51 = vpop.f32.mrf.mxu1 }
 0x876   :  { %5636 = vmatmul.f32.gmra.mxu2 %v4168_v10  ;;  %v4946_v26 = vadd.f32 %v4945_v3, %v4736_v51  ;;  %v4170_v51 = vld [vmem:[#allocation2 + $0x52] sm:$0xff] }
 0x877   :  { %5842 = vmatmul.f32.gmra.mxu3 %v4232_v34 }
 0x878   :  { %5427 = vmatmul.f32.gmra.mxu1 %v4104_v62 }
 0x87a   :  { %v5151_v32 = vpop.f32.mrf.mxu3  ;;  %6048 = vmatmul.f32.gmra.mxu0 %v4104_v62  ;;  %v4106_v62 = vld [vmem:[#allocation2 + $0x51] sm:$0xff] }
 0x87b   :  { %v11856_v22 = vadd.f32 %v5151_v32, %v4943_v14  ;;  %v11858_v12 = vpop.f32.mrf.mxu0  ;;  %v4948_v14 = vpop.f32.mrf.mxu2 }
 0x87c   :  { %14436 = vst [vmem:[#allocation57_spill] sm:$0xff] %v11858_v12  ;;  %v4563_v12 = vld [vmem:[#allocation3 + $0x468] sm:$0xff] }
 0x87d   :  { %14435 = vst [vmem:[#allocation54_spill] sm:$0xff] %v11856_v22  ;;  %v4739_v34 = vpop.f32.mrf.mxu1  ;;  %6240 = vmatpush.msra.mxu1 %v4563_v12 }
 0x87e   :  { %5639 = vmatmul.f32.gmra.mxu2 %v4169_v57  ;;  %v4949_v32 = vadd.f32 %v4948_v14, %v4739_v34  ;;  %v4171_v14 = vld [vmem:[#allocation2 + $0x62] sm:$0xff] }
 0x87f   :  { %5845 = vmatmul.f32.gmra.mxu3 %v4233_v29 }
 0x880   :  { %5430 = vmatmul.f32.gmra.mxu1 %v4105_v36 }
 0x882   :  { %v5154_v18 = vpop.f32.mrf.mxu3  ;;  %6051 = vmatmul.f32.gmra.mxu0 %v4105_v36  ;;  %v4107_v36 = vld [vmem:[#allocation2 + $0x61] sm:$0xff] }
 0x883   :  { %v11860_v35 = vadd.f32 %v5154_v18, %v4946_v26  ;;  %v11862_v10 = vpop.f32.mrf.mxu0  ;;  %v4235_v18 = vld [vmem:[#allocation2 + $0x68] sm:$0xff]  ;;  %v4951_v26 = vpop.f32.mrf.mxu2 }
 0x884   :  { %14438 = vst [vmem:[#allocation60_spill] sm:$0xff] %v11862_v10 }
 0x885   :  { %14437 = vst [vmem:[#allocation59_spill] sm:$0xff] %v11860_v35  ;;  %v4742_v29 = vpop.f32.mrf.mxu1 }
 0x886   :  { %5642 = vmatmul.f32.gmra.mxu2 %v4170_v51  ;;  %v4952_v57 = vadd.f32 %v4951_v26, %v4742_v29  ;;  %v4172_v29 = vld [vmem:[#allocation2 + $0x6a] sm:$0xff] }
 0x887   :  { %5848 = vmatmul.f32.gmra.mxu3 %v4234_v38 }
 0x888   :  { %5433 = vmatmul.f32.gmra.mxu1 %v4106_v62 }
 0x88a   :  { %v5157_v22 = vpop.f32.mrf.mxu3  ;;  %6054 = vmatmul.f32.gmra.mxu0 %v4106_v62  ;;  %v4237_v62 = vld [vmem:[#allocation2 + $0x80] sm:$0xff] }
 0x88b   :  { %v11864_v3 = vadd.f32 %v5157_v22, %v4949_v32  ;;  %v11866_v35 = vpop.f32.mrf.mxu0  ;;  %v4236_v22 = vld [vmem:[#allocation2 + $0x78] sm:$0xff]  ;;  %v4954_v32 = vpop.f32.mrf.mxu2 }
 0x88c   :  { %14440 = vst [vmem:[#allocation65_spill] sm:$0xff] %v11866_v35  ;;  %v4108_v35 = vld [vmem:[#allocation2 + $0x69] sm:$0xff] }
 0x88d   :  { %14439 = vst [vmem:[#allocation61_spill] sm:$0xff] %v11864_v3  ;;  %v4745_v38 = vpop.f32.mrf.mxu1 }
 0x88e   :  { %5645 = vmatmul.f32.gmra.mxu2 %v4171_v14  ;;  %v4955_v12 = vadd.f32 %v4954_v32, %v4745_v38  ;;  %v4173_v38 = vld [vmem:[#allocation2 + $0x7a] sm:$0xff] }
 0x88f   :  { %5851 = vmatmul.f32.gmra.mxu3 %v4235_v18 }
 0x890   :  { %5436 = vmatmul.f32.gmra.mxu1 %v4107_v36 }
 0x892   :  { %v5160_v34 = vpop.f32.mrf.mxu3  ;;  %6057 = vmatmul.f32.gmra.mxu0 %v4107_v36 }
 0x893   :  { %v11868_v10 = vadd.f32 %v5160_v34, %v4952_v57  ;;  %v11870_v51 = vpop.f32.mrf.mxu0  ;;  %v4957_v57 = vpop.f32.mrf.mxu2 }
 0x894   :  { %14442 = vst [vmem:[#allocation79_spill] sm:$0xff] %v11870_v51  ;;  %v4109_v51 = vld [vmem:[#allocation2 + $0x79] sm:$0xff] }
 0x895   :  { %14441 = vst [vmem:[#allocation73_spill] sm:$0xff] %v11868_v10  ;;  %v4748_v18 = vpop.f32.mrf.mxu1 }
 0x896   :  { %5648 = vmatmul.f32.gmra.mxu2 %v4172_v29  ;;  %v4958_v34 = vadd.f32 %v4957_v57, %v4748_v18  ;;  %v4174_v18 = vld [vmem:[#allocation2 + $0x82] sm:$0xff] }
 0x897   :  { %5854 = vmatmul.f32.gmra.mxu3 %v4236_v22 }
 0x898   :  { %5439 = vmatmul.f32.gmra.mxu1 %v4108_v35 }
 0x89a   :  { %v5163_v3 = vpop.f32.mrf.mxu3  ;;  %6060 = vmatmul.f32.gmra.mxu0 %v4108_v35  ;;  %v4110_v35 = vld [vmem:[#allocation2 + $0x81] sm:$0xff] }
 0x89b   :  { %v11872_v26 = vadd.f32 %v5163_v3, %v4955_v12  ;;  %v11874_v14 = vpop.f32.mrf.mxu0  ;;  %v4238_v3 = vld [vmem:[#allocation2 + $0x90] sm:$0xff]  ;;  %v4960_v36 = vpop.f32.mrf.mxu2 }
 0x89c   :  { %14444 = vst [vmem:[#allocation34_spill] sm:$0xff] %v11874_v14  ;;  %v4562_v14 = vld [vmem:[#allocation3 + $0x460] sm:$0xff] }
 0x89d   :  { %14443 = vst [vmem:[#allocation70_spill] sm:$0xff] %v11872_v26  ;;  %v4751_v22 = vpop.f32.mrf.mxu1  ;;  %6241 = vmatpush.msra.mxu1 %v4562_v14 }
 0x89e   :  { %5651 = vmatmul.f32.gmra.mxu2 %v4173_v38  ;;  %v4961_v12 = vadd.f32 %v4960_v36, %v4751_v22  ;;  %v4175_v36 = vld [vmem:[#allocation2 + $0x92] sm:$0xff] }
 0x89f   :  { %5857 = vmatmul.f32.gmra.mxu3 %v4237_v62 }
 0x8a0   :  { %5442 = vmatmul.f32.gmra.mxu1 %v4109_v51 }
 0x8a2   :  { %v5166_v10 = vpop.f32.mrf.mxu3  ;;  %6063 = vmatmul.f32.gmra.mxu0 %v4109_v51  ;;  %v4111_v51 = vld [vmem:[#allocation2 + $0x91] sm:$0xff] }
 0x8a3   :  { %v11876_v32 = vadd.f32 %v5166_v10, %v4958_v34  ;;  %v11878_v29 = vpop.f32.mrf.mxu0  ;;  %v4239_v10 = vld [vmem:[#allocation2 + $0x98] sm:$0xff]  ;;  %v4963_v34 = vpop.f32.mrf.mxu2 }
 0x8a4   :  { %14446 = vst [vmem:[#allocation76_spill] sm:$0xff] %v11878_v29 }
 0x8a5   :  { %14445 = vst [vmem:[#allocation71_spill] sm:$0xff] %v11876_v32  ;;  %v4754_v62 = vpop.f32.mrf.mxu1 }
 0x8a6   :  { %5654 = vmatmul.f32.gmra.mxu2 %v4174_v18  ;;  %v4964_v38 = vadd.f32 %v4963_v34, %v4754_v62  ;;  %v4176_v62 = vld [vmem:[#allocation2 + $0x9a] sm:$0xff] }
 0x8a7   :  { %5860 = vmatmul.f32.gmra.mxu3 %v4238_v3 }
 0x8a8   :  { %5445 = vmatmul.f32.gmra.mxu1 %v4110_v35 }
 0x8aa   :  { %v5169_v26 = vpop.f32.mrf.mxu3  ;;  %6066 = vmatmul.f32.gmra.mxu0 %v4110_v35  ;;  %v4241_v35 = vld [vmem:[#allocation2 + $0xb0] sm:$0xff] }
 0x8ab   :  { %v11880_v57 = vadd.f32 %v5169_v26, %v4961_v12  ;;  %v11882_v32 = vpop.f32.mrf.mxu0  ;;  %v4240_v26 = vld [vmem:[#allocation2 + $0xa8] sm:$0xff]  ;;  %v4966_v12 = vpop.f32.mrf.mxu2 }
 0x8ac   :  { %14448 = vst [vmem:[#allocation69_spill] sm:$0xff] %v11882_v32  ;;  %v4112_v32 = vld [vmem:[#allocation2 + $0x99] sm:$0xff] }
 0x8ad   :  { %14447 = vst [vmem:[#allocation83_spill] sm:$0xff] %v11880_v57  ;;  %v4757_v3 = vpop.f32.mrf.mxu1 }
 0x8ae   :  { %5657 = vmatmul.f32.gmra.mxu2 %v4175_v36  ;;  %v4967_v14 = vadd.f32 %v4966_v12, %v4757_v3  ;;  %v4177_v3 = vld [vmem:[#allocation2 + $0xaa] sm:$0xff] }
 0x8af   :  { %5863 = vmatmul.f32.gmra.mxu3 %v4239_v10 }
 0x8b0   :  { %5448 = vmatmul.f32.gmra.mxu1 %v4111_v51 }
 0x8b2   :  { %v5172_v22 = vpop.f32.mrf.mxu3  ;;  %6069 = vmatmul.f32.gmra.mxu0 %v4111_v51 }
 0x8b3   :  { %v11884_v29 = vadd.f32 %v5172_v22, %v4964_v38  ;;  %v11886_v18 = vpop.f32.mrf.mxu0  ;;  %v4969_v38 = vpop.f32.mrf.mxu2 }
 0x8b4   :  { %14450 = vst [vmem:[#allocation74_spill] sm:$0xff] %v11886_v18  ;;  %v4113_v18 = vld [vmem:[#allocation2 + $0xa9] sm:$0xff] }
 0x8b5   :  { %14449 = vst [vmem:[#allocation35_spill] sm:$0xff] %v11884_v29  ;;  %v4760_v10 = vpop.f32.mrf.mxu1 }
 0x8b6   :  { %5660 = vmatmul.f32.gmra.mxu2 %v4176_v62  ;;  %v4970_v22 = vadd.f32 %v4969_v38, %v4760_v10  ;;  %v4178_v10 = vld [vmem:[#allocation2 + $0xb2] sm:$0xff] }
 0x8b7   :  { %5866 = vmatmul.f32.gmra.mxu3 %v4240_v26 }
 0x8b8   :  { %5451 = vmatmul.f32.gmra.mxu1 %v4112_v32 }
 0x8ba   :  { %v5175_v57 = vpop.f32.mrf.mxu3  ;;  %6072 = vmatmul.f32.gmra.mxu0 %v4112_v32  ;;  %v4114_v32 = vld [vmem:[#allocation2 + $0xb1] sm:$0xff] }
 0x8bb   :  { %v11888_v34 = vadd.f32 %v5175_v57, %v4967_v14  ;;  %v11890_v36 = vpop.f32.mrf.mxu0  ;;  %v4242_v57 = vld [vmem:[#allocation2 + $0xc0] sm:$0xff] }
 0x8bc   :  { %14452 = vst [vmem:[#allocation80_spill] sm:$0xff] %v11890_v36  ;;  %v4561_v36 = vld [vmem:[#allocation3 + $0x458] sm:$0xff] }
 0x8bd   :  { %14451 = vst [vmem:[#allocation72_spill] sm:$0xff] %v11888_v34  ;;  %v4763_v26 = vpop.f32.mrf.mxu1  ;;  %6242 = vmatpush.msra.mxu1 %v4561_v36 }
 0x8be   :  { %5663 = vmatmul.f32.gmra.mxu2 %v4177_v3  ;;  %v4972_v51 = vpop.f32.mrf.mxu2 }
 0x8bf   :  { %5869 = vmatmul.f32.gmra.mxu3 %v4241_v35  ;;  %v4973_v14 = vadd.f32 %v4972_v51, %v4763_v26  ;;  %v4179_v51 = vld [vmem:[#allocation2 + $0xc2] sm:$0xff] }
 0x8c0   :  { %5454 = vmatmul.f32.gmra.mxu1 %v4113_v18 }
 0x8c2   :  { %v5178_v29 = vpop.f32.mrf.mxu3  ;;  %6075 = vmatmul.f32.gmra.mxu0 %v4113_v18  ;;  %v4115_v18 = vld [vmem:[#allocation2 + $0xc1] sm:$0xff] }
 0x8c3   :  { %v11892_v12 = vadd.f32 %v5178_v29, %v4970_v22  ;;  %v11894_v62 = vpop.f32.mrf.mxu0  ;;  %v4243_v29 = vld [vmem:[#allocation2 + $0xc8] sm:$0xff] }
 0x8c4   :  { %14454 = vst [vmem:[#allocation37_spill] sm:$0xff] %v11894_v62 }
 0x8c5   :  { %14453 = vst [vmem:[#allocation87_spill] sm:$0xff] %v11892_v12  ;;  %v4766_v35 = vpop.f32.mrf.mxu1 }
 0x8c6   :  { %5666 = vmatmul.f32.gmra.mxu2 %v4178_v10 }
 0x8c7   :  { %5872 = vmatmul.f32.gmra.mxu3 %v4242_v57 }
 0x8c8   :  { %5457 = vmatmul.f32.gmra.mxu1 %v4114_v32 }
 0x8c9   :  { %v4975_v22 = vpop.f32.mrf.mxu2 }
 0x8ca   :  { %v5181_v34 = vpop.f32.mrf.mxu3  ;;  %v4976_v3 = vadd.f32 %v4975_v22, %v4766_v35  ;;  %6078 = vmatmul.f32.gmra.mxu0 %v4114_v32  ;;  %v4180_v35 = vld [vmem:[#allocation2 + $0xca] sm:$0xff]  ;;  %v4793_v22 = vadd.f32 %v11632_v30, %v11628_v45 }
 0x8cb   :  { %v11896_v38 = vadd.f32 %v5181_v34, %v4973_v14  ;;  %v11898_v12 = vpop.f32.mrf.mxu0  ;;  %v4244_v34 = vld [vmem:[#allocation2 + $0xd8] sm:$0xff]  ;;  %v4116_v32 = vld [vmem:[#allocation2 + $0xc9] sm:$0xff] }
 0x8cc   :  { %14456 = vst [vmem:[#allocation75_spill] sm:$0xff] %v11898_v12 }
 0x8cd   :  { %14455 = vst [vmem:[#allocation77_spill] sm:$0xff] %v11896_v38  ;;  %v4769_v57 = vpop.f32.mrf.mxu1 }
 0x8ce   :  { %5669 = vmatmul.f32.gmra.mxu2 %v4179_v51  ;;  %v5002_v51 = vadd.f32 %v11634_v7, %v4793_v22 }
 0x8cf   :  { %5875 = vmatmul.f32.gmra.mxu3 %v4243_v29 }
 0x8d0   :  { %5460 = vmatmul.f32.gmra.mxu1 %v4115_v18 }
 0x8d1   :  { %v4978_v14 = vpop.f32.mrf.mxu2 }
 0x8d2   :  { %v5184_v26 = vpop.f32.mrf.mxu3  ;;  %v4979_v36 = vadd.f32 %v4978_v14, %v4769_v57  ;;  %6081 = vmatmul.f32.gmra.mxu0 %v4115_v18  ;;  %v5211_v14 = vadd.f32 %v11642_v1, %v5002_v51  ;;  %v4246_v18 = vld [vmem:[#allocation2 + $0xf0] sm:$0xff] }
 0x8d3   :  { %v11900_v62 = vadd.f32 %v5184_v26, %v4976_v3  ;;  %v11902_v10 = vpop.f32.mrf.mxu0  ;;  %v4245_v3 = vld [vmem:[#allocation2 + $0xe0] sm:$0xff] }
 0x8d4   :  { %14458 = vst [vmem:[#allocation90_spill] sm:$0xff] %v11902_v10 }
 0x8d5   :  { %14457 = vst [vmem:[#allocation84_spill] sm:$0xff] %v11900_v62  ;;  %v4772_v29 = vpop.f32.mrf.mxu1 }
 0x8d6   :  { %5672 = vmatmul.f32.gmra.mxu2 %v4180_v35 }
 0x8d7   :  { %5878 = vmatmul.f32.gmra.mxu3 %v4244_v34 }
 0x8d8   :  { %5463 = vmatmul.f32.gmra.mxu1 %v4116_v32 }
 0x8d9   :  { %v4981_v26 = vpop.f32.mrf.mxu2 }
 0x8da   :  { %v5187_v38 = vpop.f32.mrf.mxu3  ;;  %v4982_v57 = vadd.f32 %v4981_v26, %v4772_v29  ;;  %6084 = vmatmul.f32.gmra.mxu0 %v4116_v32  ;;  %v5214_v29 = vadd.f32 %v11648_v19, %v11638_v11  ;;  %v4247_v26 = vld [vmem:[#allocation2 + $0xf8] sm:$0xff]  ;;  %v5217_v11 = vadd.f32 %v11654_v42, %v11644_v63 }
 0x8db   :  { %v11906_v12 = vadd.f32 %v5187_v38, %v4979_v36  ;;  %v11909_v34 = vpop.f32.mrf.mxu0  ;;  %v4117_v38 = vld [vmem:[#allocation2 + $0xd9] sm:$0xff] }
 0x8dc   :  { %14460 = vst [vmem:[#allocation81_spill] sm:$0xff] %v11909_v34 }
 0x8dd   :  { %14459 = vst [vmem:[#allocation38_spill] sm:$0xff] %v11906_v12  ;;  %v5419_v10 = vpop.f32.mrf.mxu1  ;;  %v4204_v12 = vld [vmem:[#allocation2 + $0x21a] sm:$0xff] }
 0x8de   :  { %v5420_v30 = vadd.f32 %v5419_v10, %v5211_v14  ;;  %5675 = vmatmul.f32.gmra.mxu2 %v4181_v54  ;;  %v4560_v54 = vld [vmem:[#allocation3 + $0x450] sm:$0xff]  ;;  %v4118_v10 = vld [vmem:[#allocation2 + $0xe1] sm:$0xff] }
 0x8df   :  { %5881 = vmatmul.f32.gmra.mxu3 %v4245_v3  ;;  %v4182_v3 = vld [vmem:[#allocation2 + $0xe2] sm:$0xff]  ;;  %6243 = vmatpush.msra.mxu1 %v4560_v54  ;;  %v4184_v54 = vld [vmem:[#allocation2 + $0xfa] sm:$0xff] }
 0x8e0   :  { %5466 = vmatmul.f32.gmra.mxu1 %v4117_v38 }
 0x8e1   :  { %v5628_v36 = vpop.f32.mrf.mxu2 }
 0x8e2   :  { %v5190_v62 = vpop.f32.mrf.mxu3  ;;  %v5629_v7 = vadd.f32 %v5628_v36, %v5420_v30  ;;  %6087 = vmatmul.f32.gmra.mxu0 %v4117_v38  ;;  %v4183_v38 = vld [vmem:[#allocation2 + $0xf2] sm:$0xff] }
 0x8e3   :  { %v11912_v45 = vadd.f32 %v5190_v62, %v4982_v57  ;;  %v11914_v35 = vpop.f32.mrf.mxu0 }
 0x8e4   :  { %14462 = vst [vmem:[#allocation88_spill] sm:$0xff] %v11914_v35 }
 0x8e5   :  { %14461 = vst [vmem:[#allocation78_spill] sm:$0xff] %v11912_v45  ;;  %v5422_v22 = vpop.f32.mrf.mxu1 }
 0x8e6   :  { %v5423_v62 = vadd.f32 %v5422_v22, %v5214_v29  ;;  %5678 = vmatmul.f32.gmra.mxu2 %v4182_v3  ;;  %v4248_v29 = vld [vmem:[#allocation2 + $0x108] sm:$0xff] }
 0x8e7   :  { %5884 = vmatmul.f32.gmra.mxu3 %v4246_v18 }
 0x8e8   :  { %5469 = vmatmul.f32.gmra.mxu1 %v4118_v10 }
 0x8e9   :  { %v5631_v51 = vpop.f32.mrf.mxu2 }
 0x8ea   :  { %v5837_v1 = vpop.f32.mrf.mxu3  ;;  %v5632_v57 = vadd.f32 %v5631_v51, %v5423_v62  ;;  %6090 = vmatmul.f32.gmra.mxu0 %v4118_v10  ;;  %v5220_v62 = vadd.f32 %v11660_v43, %v11650_v46  ;;  %v4120_v51 = vld [vmem:[#allocation2 + $0xf9] sm:$0xff] }
 0x8eb   :  { %v11918_v32 = vadd.f32 %v5837_v1, %v5629_v7  ;;  %v11920_v14 = vpop.f32.mrf.mxu0  ;;  %v4119_v7 = vld [vmem:[#allocation2 + $0xf1] sm:$0xff] }
 0x8ec   :  { %14463 = vst [vmem:[#allocation82_spill] sm:$0xff] %v11920_v14 }
 0x8ed   :  { %v5425_v30 = vpop.f32.mrf.mxu1 }
 0x8ee   :  { %v5426_v36 = vadd.f32 %v5425_v30, %v5217_v11  ;;  %5681 = vmatmul.f32.gmra.mxu2 %v4183_v38  ;;  %v5223_v38 = vadd.f32 %v11666_v17, %v11656_v40 }
 0x8ef   :  { %5887 = vmatmul.f32.gmra.mxu3 %v4247_v26 }
 0x8f0   :  { %5472 = vmatmul.f32.gmra.mxu1 %v4119_v7 }
 0x8f1   :  { %v5634_v1 = vpop.f32.mrf.mxu2 }
 0x8f2   :  { %v5840_v19 = vpop.f32.mrf.mxu3  ;;  %v5635_v22 = vadd.f32 %v5634_v1, %v5426_v36  ;;  %6093 = vmatmul.f32.gmra.mxu0 %v4119_v7  ;;  %v4185_v36 = vld [vmem:[#allocation2 + $0x10a] sm:$0xff] }
 0x8f3   :  { %v11924_v18 = vadd.f32 %v5840_v19, %v5632_v57  ;;  %v11926_v3 = vpop.f32.mrf.mxu0  ;;  %v4249_v57 = vld [vmem:[#allocation2 + $0x110] sm:$0xff] }
 0x8f4   :  { %v4121_v1 = vld [vmem:[#allocation2 + $0x109] sm:$0xff] }
 0x8f5   :  { %v5428_v42 = vpop.f32.mrf.mxu1 }
 0x8f6   :  { %v5429_v26 = vadd.f32 %v5428_v42, %v5220_v62  ;;  %5684 = vmatmul.f32.gmra.mxu2 %v4184_v54  ;;  %v5226_v54 = vadd.f32 %v11672_v8, %v11662_v24  ;;  %v5229_v24 = vadd.f32 %v11678_v60, %v11668_v25 }
 0x8f7   :  { %5890 = vmatmul.f32.gmra.mxu3 %v4248_v29 }
 0x8f8   :  { %5475 = vmatmul.f32.gmra.mxu1 %v4120_v51 }
 0x8f9   :  { %v5637_v11 = vpop.f32.mrf.mxu2 }
 0x8fa   :  { %v5843_v63 = vpop.f32.mrf.mxu3  ;;  %v5638_v19 = vadd.f32 %v5637_v11, %v5429_v26  ;;  %6096 = vmatmul.f32.gmra.mxu0 %v4120_v51  ;;  %v4186_v26 = vld [vmem:[#allocation2 + $0x112] sm:$0xff]  ;;  %v4559_v11 = vld [vmem:[#allocation3 + $0x448] sm:$0xff] }
 0x8fb   :  { %v11930_v10 = vadd.f32 %v5843_v63, %v5635_v22  ;;  %v11932_v30 = vpop.f32.mrf.mxu0  ;;  %v4250_v22 = vld [vmem:[#allocation2 + $0x120] sm:$0xff]  ;;  %6244 = vmatpush.msra.mxu1 %v4559_v11  ;;  %v4188_v11 = vld [vmem:[#allocation2 + $0x12a] sm:$0xff] }
 0x8fd   :  { %v5431_v43 = vpop.f32.mrf.mxu1 }
 0x8fe   :  { %v5432_v29 = vadd.f32 %v5431_v43, %v5223_v38  ;;  %5687 = vmatmul.f32.gmra.mxu2 %v4185_v36  ;;  %v4251_v38 = vld [vmem:[#allocation2 + $0x128] sm:$0xff] }
 0x8ff   :  { %5893 = vmatmul.f32.gmra.mxu3 %v4249_v57 }
 0x900   :  { %5478 = vmatmul.f32.gmra.mxu1 %v4121_v1 }
 0x901   :  { %v5640_v62 = vpop.f32.mrf.mxu2 }
 0x902   :  { %v5846_v46 = vpop.f32.mrf.mxu3  ;;  %v5641_v63 = vadd.f32 %v5640_v62, %v5432_v29  ;;  %6099 = vmatmul.f32.gmra.mxu0 %v4121_v1  ;;  %v4187_v1 = vld [vmem:[#allocation2 + $0x122] sm:$0xff] }
 0x903   :  { %v11936_v7 = vadd.f32 %v5846_v46, %v5638_v19  ;;  %v11938_v42 = vpop.f32.mrf.mxu0  ;;  %v4122_v19 = vld [vmem:[#allocation2 + $0x111] sm:$0xff] }
 0x905   :  { %v5434_v17 = vpop.f32.mrf.mxu1 }
 0x906   :  { %v5435_v57 = vadd.f32 %v5434_v17, %v5226_v54  ;;  %5690 = vmatmul.f32.gmra.mxu2 %v4186_v26  ;;  %v4252_v54 = vld [vmem:[#allocation2 + $0x138] sm:$0xff] }
 0x907   :  { %5896 = vmatmul.f32.gmra.mxu3 %v4250_v22 }
 0x908   :  { %5481 = vmatmul.f32.gmra.mxu1 %v4122_v19 }
 0x909   :  { %v5643_v46 = vpop.f32.mrf.mxu2 }
 0x90a   :  { %v5849_v40 = vpop.f32.mrf.mxu3  ;;  %v5644_v43 = vadd.f32 %v5643_v46, %v5435_v57  ;;  %6102 = vmatmul.f32.gmra.mxu0 %v4122_v19  ;;  %v5232_v57 = vadd.f32 %v11684_v39, %v11674_v48  ;;  %v4124_v46 = vld [vmem:[#allocation2 + $0x129] sm:$0xff] }
 0x90b   :  { %v11942_v51 = vadd.f32 %v5849_v40, %v5641_v63  ;;  %v11944_v36 = vpop.f32.mrf.mxu0  ;;  %v4123_v63 = vld [vmem:[#allocation2 + $0x121] sm:$0xff] }
 0x90d   :  { %v5437_v29 = vpop.f32.mrf.mxu1 }
 0x90e   :  { %v5438_v62 = vadd.f32 %v5437_v29, %v5229_v24  ;;  %5693 = vmatmul.f32.gmra.mxu2 %v4187_v1  ;;  %v5235_v1 = vadd.f32 %v11690_v16, %v11680_v15 }
 0x90f   :  { %5899 = vmatmul.f32.gmra.mxu3 %v4251_v38 }
 0x910   :  { %5484 = vmatmul.f32.gmra.mxu1 %v4123_v63 }
 0x911   :  { %v5646_v40 = vpop.f32.mrf.mxu2 }
 0x912   :  { %v5852_v8 = vpop.f32.mrf.mxu3  ;;  %v5647_v17 = vadd.f32 %v5646_v40, %v5438_v62  ;;  %6105 = vmatmul.f32.gmra.mxu0 %v4123_v63  ;;  %v4189_v62 = vld [vmem:[#allocation2 + $0x13a] sm:$0xff] }
 0x913   :  { %v11948_v22 = vadd.f32 %v5852_v8, %v5644_v43  ;;  %v11950_v26 = vpop.f32.mrf.mxu0  ;;  %v4253_v43 = vld [vmem:[#allocation2 + $0x140] sm:$0xff] }
 0x914   :  { %v4125_v40 = vld [vmem:[#allocation2 + $0x139] sm:$0xff] }
 0x915   :  { %v5440_v60 = vpop.f32.mrf.mxu1 }
 0x916   :  { %v5441_v38 = vadd.f32 %v5440_v60, %v5232_v57  ;;  %5696 = vmatmul.f32.gmra.mxu2 %v4188_v11  ;;  %v5238_v11 = vadd.f32 %v11696_v55, %v11686_v5  ;;  %v5241_v5 = vadd.f32 %v11700_v4, %v11692_v44 }
 0x917   :  { %5902 = vmatmul.f32.gmra.mxu3 %v4252_v54 }
 0x918   :  { %5487 = vmatmul.f32.gmra.mxu1 %v4124_v46 }
 0x919   :  { %v5649_v24 = vpop.f32.mrf.mxu2 }
 0x91a   :  { %v5855_v25 = vpop.f32.mrf.mxu3  ;;  %v5650_v8 = vadd.f32 %v5649_v24, %v5441_v38  ;;  %6108 = vmatmul.f32.gmra.mxu0 %v4124_v46  ;;  %v4190_v38 = vld [vmem:[#allocation2 + $0x142] sm:$0xff] }
 0x91b   :  { %v11954_v19 = vadd.f32 %v5855_v25, %v5647_v17  ;;  %v11956_v29 = vpop.f32.mrf.mxu0  ;;  %v4254_v17 = vld [vmem:[#allocation2 + $0x150] sm:$0xff]  ;;  %v4558_v24 = vld [vmem:[#allocation3 + $0x440] sm:$0xff] }
 0x91c   :  { %6245 = vmatpush.msra.mxu1 %v4558_v24  ;;  %v4192_v24 = vld [vmem:[#allocation2 + $0x15a] sm:$0xff] }
 0x91d   :  { %v5443_v39 = vpop.f32.mrf.mxu1 }
 0x91e   :  { %v5444_v54 = vadd.f32 %v5443_v39, %v5235_v1  ;;  %5699 = vmatmul.f32.gmra.mxu2 %v4189_v62  ;;  %v4255_v1 = vld [vmem:[#allocation2 + $0x158] sm:$0xff] }
 0x91f   :  { %5905 = vmatmul.f32.gmra.mxu3 %v4253_v43 }
 0x920   :  { %5490 = vmatmul.f32.gmra.mxu1 %v4125_v40 }
 0x921   :  { %v5652_v57 = vpop.f32.mrf.mxu2 }
 0x922   :  { %v5858_v48 = vpop.f32.mrf.mxu3  ;;  %v5653_v25 = vadd.f32 %v5652_v57, %v5444_v54  ;;  %6111 = vmatmul.f32.gmra.mxu0 %v4125_v40  ;;  %v4191_v40 = vld [vmem:[#allocation2 + $0x152] sm:$0xff] }
 0x923   :  { %v11960_v63 = vadd.f32 %v5858_v48, %v5650_v8  ;;  %v11962_v60 = vpop.f32.mrf.mxu0  ;;  %v4126_v8 = vld [vmem:[#allocation2 + $0x141] sm:$0xff] }
 0x925   :  { %v5446_v16 = vpop.f32.mrf.mxu1 }
 0x926   :  { %v5447_v43 = vadd.f32 %v5446_v16, %v5238_v11  ;;  %5702 = vmatmul.f32.gmra.mxu2 %v4190_v38  ;;  %v4256_v11 = vld [vmem:[#allocation2 + $0x168] sm:$0xff] }
 0x927   :  { %5908 = vmatmul.f32.gmra.mxu3 %v4254_v17 }
 0x928   :  { %5493 = vmatmul.f32.gmra.mxu1 %v4126_v8 }
 0x929   :  { %v5655_v48 = vpop.f32.mrf.mxu2 }
 0x92a   :  { %v5861_v15 = vpop.f32.mrf.mxu3  ;;  %v5656_v39 = vadd.f32 %v5655_v48, %v5447_v43  ;;  %6114 = vmatmul.f32.gmra.mxu0 %v4126_v8  ;;  %v5244_v43 = vadd.f32 %v11704_v9, %v11698_v33  ;;  %v4128_v48 = vld [vmem:[#allocation2 + $0x159] sm:$0xff] }
 0x92b   :  { %v11966_v46 = vadd.f32 %v5861_v15, %v5653_v25  ;;  %v11968_v62 = vpop.f32.mrf.mxu0  ;;  %v4127_v25 = vld [vmem:[#allocation2 + $0x151] sm:$0xff] }
 0x92d   :  { %v5449_v54 = vpop.f32.mrf.mxu1 }
 0x92e   :  { %v5450_v57 = vadd.f32 %v5449_v54, %v5241_v5  ;;  %5705 = vmatmul.f32.gmra.mxu2 %v4191_v40  ;;  %v5247_v40 = vadd.f32 %v11708_v2, %v11702_v6 }
 0x92f   :  { %5911 = vmatmul.f32.gmra.mxu3 %v4255_v1 }
 0x930   :  { %5496 = vmatmul.f32.gmra.mxu1 %v4127_v25 }
 0x931   :  { %v5658_v15 = vpop.f32.mrf.mxu2 }
 0x932   :  { %v5864_v55 = vpop.f32.mrf.mxu3  ;;  %v5659_v16 = vadd.f32 %v5658_v15, %v5450_v57  ;;  %6117 = vmatmul.f32.gmra.mxu0 %v4127_v25  ;;  %v4193_v57 = vld [vmem:[#allocation2 + $0x16a] sm:$0xff] }
 0x933   :  { %v11972_v17 = vadd.f32 %v5864_v55, %v5656_v39  ;;  %v11974_v38 = vpop.f32.mrf.mxu0  ;;  %v4257_v39 = vld [vmem:[#allocation2 + $0x170] sm:$0xff] }
 0x934   :  { %v4129_v15 = vld [vmem:[#allocation2 + $0x169] sm:$0xff] }
 0x935   :  { %v5452_v4 = vpop.f32.mrf.mxu1 }
 0x936   :  { %v5453_v1 = vadd.f32 %v5452_v4, %v5244_v43  ;;  %5708 = vmatmul.f32.gmra.mxu2 %v4192_v24  ;;  %v5250_v24 = vadd.f32 %v11712_v52, %v11706_v61  ;;  %v5253_v61 = vadd.f32 %v11717_v37, %v11710_v20  ;;  %v5256_v20 = vadd.f32 %v11722_v59, %v11714_v23 }
 0x937   :  { %5914 = vmatmul.f32.gmra.mxu3 %v4256_v11 }
 0x938   :  { %5499 = vmatmul.f32.gmra.mxu1 %v4128_v48 }
 0x939   :  { %v5661_v5 = vpop.f32.mrf.mxu2 }
 0x93a   :  { %v5867_v44 = vpop.f32.mrf.mxu3  ;;  %v5662_v55 = vadd.f32 %v5661_v5, %v5453_v1  ;;  %6120 = vmatmul.f32.gmra.mxu0 %v4128_v48  ;;  %v4194_v1 = vld [vmem:[#allocation2 + $0x172] sm:$0xff] }
 0x93b   :  { %v11978_v8 = vadd.f32 %v5867_v44, %v5659_v16  ;;  %v11980_v54 = vpop.f32.mrf.mxu0  ;;  %v4258_v16 = vld [vmem:[#allocation2 + $0x180] sm:$0xff]  ;;  %v4557_v5 = vld [vmem:[#allocation3 + $0x438] sm:$0xff] }
 0x93c   :  { %6246 = vmatpush.msra.mxu1 %v4557_v5  ;;  %v4196_v5 = vld [vmem:[#allocation2 + $0x18a] sm:$0xff] }
 0x93d   :  { %v5455_v9 = vpop.f32.mrf.mxu1 }
 0x93e   :  { %v5456_v11 = vadd.f32 %v5455_v9, %v5247_v40  ;;  %5711 = vmatmul.f32.gmra.mxu2 %v4193_v57  ;;  %v4259_v40 = vld [vmem:[#allocation2 + $0x188] sm:$0xff] }
 0x93f   :  { %5917 = vmatmul.f32.gmra.mxu3 %v4257_v39 }
 0x940   :  { %5502 = vmatmul.f32.gmra.mxu1 %v4129_v15 }
 0x941   :  { %v5664_v43 = vpop.f32.mrf.mxu2 }
 0x942   :  { %v5870_v33 = vpop.f32.mrf.mxu3  ;;  %v5665_v44 = vadd.f32 %v5664_v43, %v5456_v11  ;;  %6123 = vmatmul.f32.gmra.mxu0 %v4129_v15  ;;  %v4195_v15 = vld [vmem:[#allocation2 + $0x182] sm:$0xff] }
 0x943   :  { %v11984_v25 = vadd.f32 %v5870_v33, %v5662_v55  ;;  %v11986_v4 = vpop.f32.mrf.mxu0  ;;  %v4130_v55 = vld [vmem:[#allocation2 + $0x171] sm:$0xff] }
 0x945   :  { %v5458_v2 = vpop.f32.mrf.mxu1 }
 0x946   :  { %v5459_v39 = vadd.f32 %v5458_v2, %v5250_v24  ;;  %5714 = vmatmul.f32.gmra.mxu2 %v4194_v1 }
 0x947   :  { %5920 = vmatmul.f32.gmra.mxu3 %v4258_v16 }
 0x948   :  { %5505 = vmatmul.f32.gmra.mxu1 %v4130_v55 }
 0x949   :  { %v5667_v33 = vpop.f32.mrf.mxu2 }
 0x94a   :  { %v5873_v6 = vpop.f32.mrf.mxu3  ;;  %v5668_v9 = vadd.f32 %v5667_v33, %v5459_v39  ;;  %6126 = vmatmul.f32.gmra.mxu0 %v4130_v55  ;;  %v4132_v33 = vld [vmem:[#allocation2 + $0x189] sm:$0xff] }
 0x94b   :  { %v11990_v48 = vadd.f32 %v5873_v6, %v5665_v44  ;;  %v11992_v57 = vpop.f32.mrf.mxu0  ;;  %v4131_v44 = vld [vmem:[#allocation2 + $0x181] sm:$0xff] }
 0x94c   :  { %v11998_v6 = vld [vmem:[#allocation2] sm:$0xff] }
 0x94d   :  { %v5461_v11 = vpop.f32.mrf.mxu1 }
 0x94e   :  { %v5462_v43 = vadd.f32 %v5461_v11, %v5253_v61  ;;  %5717 = vmatmul.f32.gmra.mxu2 %v4195_v15  ;;  %v5259_v11 = vadd.f32 %v11726_v27, %v11719_v28  ;;  %v4197_v15 = vld [vmem:[#allocation2 + $0x1ca] sm:$0xff]  ;;  %v5262_v28 = vadd.f32 %v11730_v50, %v11724_v0  ;;  %v5265_v0 = vadd.f32 %v11734_v53, %v11728_v41 }
 0x94f   :  { %5923 = vmatmul.f32.gmra.mxu3 %v4259_v40 }
 0x950   :  { %5508 = vmatmul.f32.gmra.mxu1 %v4131_v44 }
 0x951   :  { %v5670_v24 = vpop.f32.mrf.mxu2 }
 0x952   :  { %v5876_v52 = vpop.f32.mrf.mxu3  ;;  %v5671_v2 = vadd.f32 %v5670_v24, %v5462_v43  ;;  %6129 = vmatmul.f32.gmra.mxu0 %v4131_v44  ;;  %v4133_v24 = vld [vmem:[#allocation2 + $0x1c9] sm:$0xff] }
 0x953   :  { %v11996_v16 = vadd.f32 %v5876_v52, %v5668_v9  ;;  %v12001_v1 = vpop.f32.mrf.mxu0 }
 0x955   :  { %v5464_v39 = vpop.f32.mrf.mxu1 }
 0x956   :  { %v5465_v40 = vadd.f32 %v5464_v39, %v5256_v20  ;;  %5720 = vmatmul.f32.gmra.mxu2 %v4196_v5  ;;  %v4324_v5 = vld [vmem:[#allocation2 + $0x199] sm:$0xff] }
 0x957   :  { %5926 = vmatmul.f32.gmra.mxu3 %v11998_v6 }
 0x958   :  { %5511 = vmatmul.f32.gmra.mxu1 %v4132_v33 }
 0x959   :  { %v5673_v9 = vpop.f32.mrf.mxu2 }
 0x95a   :  { %v5879_v37 = vpop.f32.mrf.mxu3  ;;  %v5674_v61 = vadd.f32 %v5673_v9, %v5465_v40  ;;  %6132 = vmatmul.f32.gmra.mxu0 %v4132_v33  ;;  %v4198_v9 = vld [vmem:[#allocation2 + $0x1d2] sm:$0xff] }
 0x95b   :  { %v12005_v55 = vadd.f32 %v5879_v37, %v5671_v2  ;;  %v12008_v52 = vpop.f32.mrf.mxu0  ;;  %v4262_v2 = vld [vmem:[#allocation2 + $0x1e0] sm:$0xff] }
 0x95d   :  { %v5467_v59 = vpop.f32.mrf.mxu1 }
 0x95e   :  { %v5468_v44 = vadd.f32 %v5467_v59, %v5259_v11  ;;  %5723 = vmatmul.f32.gmra.mxu2 %v4197_v15  ;;  %v4556_v11 = vld [vmem:[#allocation3 + $0x430] sm:$0xff]  ;;  %v4263_v59 = vld [vmem:[#allocation2 + $0x1e8] sm:$0xff] }
 0x95f   :  { %5929 = vmatmul.f32.gmra.mxu3 %v11998_v6  ;;  %6247 = vmatpush.msra.mxu1 %v4556_v11 }
 0x960   :  { %5514 = vmatmul.f32.gmra.mxu1 %v4133_v24 }
 0x961   :  { %v5676_v20 = vpop.f32.mrf.mxu2 }
 0x962   :  { %v5882_v23 = vpop.f32.mrf.mxu3  ;;  %v5677_v37 = vadd.f32 %v5676_v20, %v5468_v44  ;;  %6135 = vmatmul.f32.gmra.mxu0 %v4324_v5 }
 0x963   :  { %v12012_v43 = vadd.f32 %v5882_v23, %v5674_v61  ;;  %v12014_v39 = vpop.f32.mrf.mxu0  ;;  %v4134_v23 = vld [vmem:[#allocation2 + $0x1d1] sm:$0xff] }
 0x965   :  { %14464 = vst [vmem:[#allocation91_spill] sm:$0xff] %v12012_v43  ;;  %v5470_v40 = vpop.f32.mrf.mxu1  ;;  %v4392_v43 = vld [vmem:[#allocation2 + $0x1fa] sm:$0xff] }
 0x966   :  { %v5471_v61 = vadd.f32 %v5470_v40, %v5262_v28  ;;  %5726 = vmatmul.f32.gmra.mxu2 %v4198_v9  ;;  %v4264_v40 = vld [vmem:[#allocation2 + $0x1f8] sm:$0xff] }
 0x967   :  { %5932 = vmatmul.f32.gmra.mxu3 %v4262_v2  ;;  %v4325_v2 = vld [vmem:[#allocation2 + $0x1a1] sm:$0xff] }
 0x968   :  { %5517 = vmatmul.f32.gmra.mxu1 %v4134_v23  ;;  %v5268_v23 = vadd.f32 %v11738_v56, %v11732_v49 }
 0x969   :  { %v5679_v15 = vpop.f32.mrf.mxu2 }
 0x96a   :  { %v5885_v27 = vpop.f32.mrf.mxu3  ;;  %v5680_v44 = vadd.f32 %v5679_v15, %v5471_v61  ;;  %6138 = vmatmul.f32.gmra.mxu0 %v4325_v2  ;;  %v4136_v2 = vld [vmem:[#allocation2 + $0x1e9] sm:$0xff] }
 0x96b   :  { %v12018_v33 = vadd.f32 %v5885_v27, %v5677_v37  ;;  %v12020_v24 = vpop.f32.mrf.mxu0  ;;  %v4199_v37 = vld [vmem:[#allocation2 + $0x1e2] sm:$0xff] }
 0x96c   :  { %14466 = vst [vmem:[#allocation94_spill] sm:$0xff] %v12020_v24  ;;  %v4135_v27 = vld [vmem:[#allocation2 + $0x1e1] sm:$0xff]  ;;  %v4391_v24 = vld [vmem:[#allocation2 + $0x1ea] sm:$0xff] }
 0x96d   :  { %14465 = vst [vmem:[#allocation40_spill] sm:$0xff] %v12018_v33  ;;  %v5473_v20 = vpop.f32.mrf.mxu1  ;;  %v4390_v33 = vld [vmem:[#allocation2 + $0x1e2] sm:$0xff] }
 0x96e   :  { %v5474_v28 = vadd.f32 %v5473_v20, %v5265_v0  ;;  %5729 = vmatmul.f32.gmra.mxu2 %v4199_v37  ;;  %v4265_v0 = vld [vmem:[#allocation2 + $0x200] sm:$0xff] }
 0x96f   :  { %5935 = vmatmul.f32.gmra.mxu3 %v4263_v59  ;;  %v4200_v59 = vld [vmem:[#allocation2 + $0x1ea] sm:$0xff] }
 0x970   :  { %5520 = vmatmul.f32.gmra.mxu1 %v4135_v27 }
 0x971   :  { %v5682_v9 = vpop.f32.mrf.mxu2 }
 0x972   :  { %v5888_v50 = vpop.f32.mrf.mxu3  ;;  %v5683_v61 = vadd.f32 %v5682_v9, %v5474_v28  ;;  %6141 = vmatmul.f32.gmra.mxu0 %v4135_v27  ;;  %v5271_v28 = vadd.f32 %v11742_v13, %v11736_v31 }
 0x973   :  { %v12024_v5 = vadd.f32 %v5888_v50, %v5680_v44  ;;  %v12026_v11 = vpop.f32.mrf.mxu0 }
 0x974   :  { %14468 = vst [vmem:[#allocation96_spill] sm:$0xff] %v12026_v11 }
 0x975   :  { %14467 = vst [vmem:[#allocation95_spill] sm:$0xff] %v12024_v5  ;;  %v5476_v53 = vpop.f32.mrf.mxu1 }
 0x976   :  { %v5477_v44 = vadd.f32 %v5476_v53, %v5268_v23  ;;  %5732 = vmatmul.f32.gmra.mxu2 %v4200_v59  ;;  %v4266_v23 = vld [vmem:[#allocation2 + $0x210] sm:$0xff] }
 0x977   :  { %5938 = vmatmul.f32.gmra.mxu3 %v4264_v40  ;;  %v4201_v40 = vld [vmem:[#allocation2 + $0x1fa] sm:$0xff] }
 0x978   :  { %5523 = vmatmul.f32.gmra.mxu1 %v4136_v2 }
 0x979   :  { %v5685_v50 = vpop.f32.mrf.mxu2 }
 0x97a   :  { %v5891_v41 = vpop.f32.mrf.mxu3  ;;  %v5686_v20 = vadd.f32 %v5685_v50, %v5477_v44  ;;  %6144 = vmatmul.f32.gmra.mxu0 %v4136_v2  ;;  %v14473_v44 = vld [vmem:[#allocation85_spill] sm:$0xff] }
 0x97b   :  { %v12030_v15 = vadd.f32 %v5891_v41, %v5683_v61  ;;  %v12032_v37 = vpop.f32.mrf.mxu0  ;;  %v4137_v61 = vld [vmem:[#allocation2 + $0x1f9] sm:$0xff]  ;;  %v4202_v50 = vld [vmem:[#allocation2 + $0x202] sm:$0xff] }
 0x97c   :  { %14470 = vst [vmem:[#allocation98_spill] sm:$0xff] %v12032_v37 }
 0x97d   :  { %14469 = vst [vmem:[#allocation97_spill] sm:$0xff] %v12030_v15  ;;  %v5479_v56 = vpop.f32.mrf.mxu1 }
 0x97e   :  { %v5480_v9 = vadd.f32 %v5479_v56, %v5271_v28  ;;  %5735 = vmatmul.f32.gmra.mxu2 %v4201_v40  ;;  %v4555_v28 = vld [vmem:[#allocation3 + $0x428] sm:$0xff]  ;;  %v4267_v56 = vld [vmem:[#allocation2 + $0x218] sm:$0xff] }
 0x97f   :  { %5941 = vmatmul.f32.gmra.mxu3 %v4265_v0  ;;  %v5274_v0 = vadd.f32 %v14473_v44, %v11740_v21  ;;  %6248 = vmatpush.msra.mxu1 %v4555_v28  ;;  %v14477_v21 = vld [vmem:[#allocation92_spill] sm:$0xff] }
 0x980   :  { %5526 = vmatmul.f32.gmra.mxu1 %v4137_v61 }
 0x981   :  { %v5688_v41 = vpop.f32.mrf.mxu2 }
 0x982   :  { %v5894_v49 = vpop.f32.mrf.mxu3  ;;  %v5689_v53 = vadd.f32 %v5688_v41, %v5480_v9  ;;  %6147 = vmatmul.f32.gmra.mxu0 %v4137_v61  ;;  %v14476_v41 = vld [vmem:[#allocation86_spill] sm:$0xff]  ;;  %v4203_v61 = vld [vmem:[#allocation2 + $0x212] sm:$0xff] }
 0x983   :  { %v12036_v27 = vadd.f32 %v5894_v49, %v5686_v20  ;;  %v12038_v59 = vpop.f32.mrf.mxu0  ;;  %v4138_v49 = vld [vmem:[#allocation2 + $0x201] sm:$0xff]  ;;  %v5277_v44 = vadd.f32 %v14477_v21, %v14476_v41 }
 0x984   :  { %14472 = vst [vmem:[#allocation100_spill] sm:$0xff] %v12038_v59  ;;  %v14567_v59 = vld [vmem:[#allocation48_spill] sm:$0xff] }
 0x985   :  { %14471 = vst [vmem:[#allocation99_spill] sm:$0xff] %v12036_v27  ;;  %v5482_v13 = vpop.f32.mrf.mxu1 }
 0x986   :  { %v5483_v20 = vadd.f32 %v5482_v13, %v5274_v0  ;;  %5738 = vmatmul.f32.gmra.mxu2 %v4202_v50  ;;  %v4268_v13 = vld [vmem:[#allocation2 + $0x228] sm:$0xff] }
 0x987   :  { %5944 = vmatmul.f32.gmra.mxu3 %v4266_v23 }
 0x988   :  { %5529 = vmatmul.f32.gmra.mxu1 %v4138_v49 }
 0x989   :  { %v5691_v40 = vpop.f32.mrf.mxu2 }
 0x98a   :  { %v5897_v31 = vpop.f32.mrf.mxu3  ;;  %v5692_v9 = vadd.f32 %v5691_v40, %v5483_v20  ;;  %6150 = vmatmul.f32.gmra.mxu0 %v4138_v49  ;;  %v14481_v40 = vld [vmem:[#allocation43_spill] sm:$0xff] }
 0x98b   :  { %v12042_v2 = vadd.f32 %v5897_v31, %v5689_v53  ;;  %v12044_v23 = vpop.f32.mrf.mxu0  ;;  %v4139_v31 = vld [vmem:[#allocation2 + $0x211] sm:$0xff] }
 0x98c   :  { %14475 = vst [vmem:[#allocation101_spill] sm:$0xff] %v12044_v23 }
 0x98d   :  { %14474 = vst [vmem:[#allocation85_spill] sm:$0xff] %v12042_v2  ;;  %v5485_v45 = vpop.f32.mrf.mxu1 }
 0x98e   :  { %v5486_v0 = vadd.f32 %v5485_v45, %v5277_v44  ;;  %5741 = vmatmul.f32.gmra.mxu2 %v4203_v61  ;;  %v4140_v45 = vld [vmem:[#allocation2 + $0x219] sm:$0xff] }
 0x98f   :  { %5947 = vmatmul.f32.gmra.mxu3 %v4267_v56  ;;  %v14480_v56 = vld [vmem:[#allocation41_spill] sm:$0xff] }
 0x990   :  { %5532 = vmatmul.f32.gmra.mxu1 %v4139_v31  ;;  %v5280_v35 = vadd.f32 %v14481_v40, %v14480_v56 }
 0x991   :  { %v5694_v50 = vpop.f32.mrf.mxu2 }
 0x992   :  { %v5900_v14 = vpop.f32.mrf.mxu3  ;;  %v5695_v28 = vadd.f32 %v5694_v50, %v5486_v0  ;;  %6153 = vmatmul.f32.gmra.mxu0 %v4139_v31  ;;  %v14485_v50 = vld [vmem:[#allocation46_spill] sm:$0xff] }
 0x993   :  { %v12048_v53 = vadd.f32 %v5900_v14, %v5692_v9  ;;  %v12050_v20 = vpop.f32.mrf.mxu0  ;;  %v4269_v9 = vld [vmem:[#allocation2 + $0x230] sm:$0xff] }
 0x994   :  { %14479 = vst [vmem:[#allocation92_spill] sm:$0xff] %v12050_v20 }
 0x995   :  { %14478 = vst [vmem:[#allocation86_spill] sm:$0xff] %v12048_v53  ;;  %v5488_v21 = vpop.f32.mrf.mxu1  ;;  %v4205_v53 = vld [vmem:[#allocation2 + $0x22a] sm:$0xff] }
 0x996   :  { %v5489_v14 = vadd.f32 %v5488_v21, %v5280_v35  ;;  %5744 = vmatmul.f32.gmra.mxu2 %v4204_v12  ;;  %v4141_v12 = vld [vmem:[#allocation2 + $0x229] sm:$0xff]  ;;  %v4270_v35 = vld [vmem:[#allocation2 + $0x240] sm:$0xff] }
 0x997   :  { %5950 = vmatmul.f32.gmra.mxu3 %v4268_v13  ;;  %v14484_v13 = vld [vmem:[#allocation89_spill] sm:$0xff] }
 0x998   :  { %5535 = vmatmul.f32.gmra.mxu1 %v4140_v45  ;;  %v5283_v34 = vadd.f32 %v14485_v50, %v14484_v13 }
 0x999   :  { %v5697_v44 = vpop.f32.mrf.mxu2 }
 0x99a   :  { %v5903_v41 = vpop.f32.mrf.mxu3  ;;  %v5698_v61 = vadd.f32 %v5697_v44, %v5489_v14  ;;  %6156 = vmatmul.f32.gmra.mxu0 %v4140_v45  ;;  %v14489_v44 = vld [vmem:[#allocation49_spill] sm:$0xff] }
 0x99b   :  { %v12054_v49 = vadd.f32 %v5903_v41, %v5695_v28  ;;  %v12056_v0 = vpop.f32.mrf.mxu0 }
 0x99c   :  { %14483 = vst [vmem:[#allocation43_spill] sm:$0xff] %v12056_v0  ;;  %v4206_v0 = vld [vmem:[#allocation2 + $0x232] sm:$0xff] }
 0x99d   :  { %14482 = vst [vmem:[#allocation41_spill] sm:$0xff] %v12054_v49  ;;  %v5491_v40 = vpop.f32.mrf.mxu1 }
 0x99e   :  { %v5492_v28 = vadd.f32 %v5491_v40, %v5283_v34  ;;  %5747 = vmatmul.f32.gmra.mxu2 %v4205_v53  ;;  %v4554_v34 = vld [vmem:[#allocation3 + $0x420] sm:$0xff]  ;;  %v4142_v53 = vld [vmem:[#allocation2 + $0x231] sm:$0xff] }
 0x99f   :  { %5953 = vmatmul.f32.gmra.mxu3 %v4269_v9  ;;  %v14488_v9 = vld [vmem:[#allocation44_spill] sm:$0xff]  ;;  %6249 = vmatpush.msra.mxu1 %v4554_v34 }
 0x9a0   :  { %5538 = vmatmul.f32.gmra.mxu1 %v4141_v12  ;;  %v5286_v49 = vadd.f32 %v14489_v44, %v14488_v9  ;;  %v14493_v9 = vld [vmem:[#allocation52_spill] sm:$0xff] }
 0x9a1   :  { %v5700_v41 = vpop.f32.mrf.mxu2 }
 0x9a2   :  { %v5906_v56 = vpop.f32.mrf.mxu3  ;;  %v5701_v21 = vadd.f32 %v5700_v41, %v5492_v28  ;;  %6159 = vmatmul.f32.gmra.mxu0 %v4141_v12  ;;  %v14492_v41 = vld [vmem:[#allocation47_spill] sm:$0xff]  ;;  %v4207_v12 = vld [vmem:[#allocation2 + $0x242] sm:$0xff] }
 0x9a3   :  { %v12060_v31 = vadd.f32 %v5906_v56, %v5698_v61  ;;  %v12062_v14 = vpop.f32.mrf.mxu0  ;;  %v4271_v56 = vld [vmem:[#allocation2 + $0x248] sm:$0xff]  ;;  %v5289_v44 = vadd.f32 %v14493_v9, %v14492_v41 }
 0x9a4   :  { %14487 = vst [vmem:[#allocation46_spill] sm:$0xff] %v12062_v14 }
 0x9a5   :  { %14486 = vst [vmem:[#allocation89_spill] sm:$0xff] %v12060_v31  ;;  %v5494_v50 = vpop.f32.mrf.mxu1 }
 0x9a6   :  { %v5495_v61 = vadd.f32 %v5494_v50, %v5286_v49  ;;  %5750 = vmatmul.f32.gmra.mxu2 %v4206_v0  ;;  %v4143_v0 = vld [vmem:[#allocation2 + $0x241] sm:$0xff] }
 0x9a7   :  { %5956 = vmatmul.f32.gmra.mxu3 %v4270_v35 }
 0x9a8   :  { %5541 = vmatmul.f32.gmra.mxu1 %v4142_v53 }
 0x9a9   :  { %v5703_v40 = vpop.f32.mrf.mxu2 }
 0x9aa   :  { %v5909_v13 = vpop.f32.mrf.mxu3  ;;  %v5704_v28 = vadd.f32 %v5703_v40, %v5495_v61  ;;  %6162 = vmatmul.f32.gmra.mxu0 %v4142_v53  ;;  %v14497_v40 = vld [vmem:[#allocation55_spill] sm:$0xff] }
 0x9ab   :  { %v12066_v45 = vadd.f32 %v5909_v13, %v5701_v21  ;;  %v12068_v35 = vpop.f32.mrf.mxu0  ;;  %v4272_v13 = vld [vmem:[#allocation2 + $0x258] sm:$0xff] }
 0x9ac   :  { %14491 = vst [vmem:[#allocation49_spill] sm:$0xff] %v12068_v35  ;;  %v4208_v35 = vld [vmem:[#allocation2 + $0x24a] sm:$0xff] }
 0x9ad   :  { %14490 = vst [vmem:[#allocation44_spill] sm:$0xff] %v12066_v45  ;;  %v5497_v14 = vpop.f32.mrf.mxu1 }
 0x9ae   :  { %v5498_v49 = vadd.f32 %v5497_v14, %v5289_v44  ;;  %5753 = vmatmul.f32.gmra.mxu2 %v4207_v12  ;;  %v4144_v14 = vld [vmem:[#allocation2 + $0x249] sm:$0xff] }
 0x9af   :  { %5959 = vmatmul.f32.gmra.mxu3 %v4271_v56  ;;  %v14496_v56 = vld [vmem:[#allocation50_spill] sm:$0xff] }
 0x9b0   :  { %5544 = vmatmul.f32.gmra.mxu1 %v4143_v0  ;;  %v5292_v45 = vadd.f32 %v14497_v40, %v14496_v56 }
 0x9b1   :  { %v5706_v50 = vpop.f32.mrf.mxu2 }
 0x9b2   :  { %v5912_v31 = vpop.f32.mrf.mxu3  ;;  %v5707_v34 = vadd.f32 %v5706_v50, %v5498_v49  ;;  %6165 = vmatmul.f32.gmra.mxu0 %v4143_v0  ;;  %v14501_v50 = vld [vmem:[#allocation93_spill] sm:$0xff] }
 0x9b3   :  { %v12072_v21 = vadd.f32 %v5912_v31, %v5704_v28  ;;  %v12074_v61 = vpop.f32.mrf.mxu0  ;;  %v4273_v28 = vld [vmem:[#allocation2 + $0x260] sm:$0xff] }
 0x9b4   :  { %14495 = vst [vmem:[#allocation52_spill] sm:$0xff] %v12074_v61  ;;  %v4209_v61 = vld [vmem:[#allocation2 + $0x25a] sm:$0xff] }
 0x9b5   :  { %14494 = vst [vmem:[#allocation47_spill] sm:$0xff] %v12072_v21  ;;  %v5500_v9 = vpop.f32.mrf.mxu1 }
 0x9b6   :  { %v5501_v31 = vadd.f32 %v5500_v9, %v5292_v45  ;;  %5756 = vmatmul.f32.gmra.mxu2 %v4208_v35  ;;  %v4145_v45 = vld [vmem:[#allocation2 + $0x259] sm:$0xff]  ;;  %v4274_v35 = vld [vmem:[#allocation2 + $0x270] sm:$0xff] }
 0x9b7   :  { %5962 = vmatmul.f32.gmra.mxu3 %v4272_v13  ;;  %v14500_v13 = vld [vmem:[#allocation53_spill] sm:$0xff] }
 0x9b8   :  { %5547 = vmatmul.f32.gmra.mxu1 %v4144_v14  ;;  %v5295_v21 = vadd.f32 %v14501_v50, %v14500_v13 }
 0x9b9   :  { %v5709_v44 = vpop.f32.mrf.mxu2 }
 0x9ba   :  { %v5915_v41 = vpop.f32.mrf.mxu3  ;;  %v5710_v12 = vadd.f32 %v5709_v44, %v5501_v31  ;;  %6168 = vmatmul.f32.gmra.mxu0 %v4144_v14  ;;  %v14505_v44 = vld [vmem:[#allocation32_spill] sm:$0xff] }
 0x9bb   :  { %v12078_v53 = vadd.f32 %v5915_v41, %v5707_v34  ;;  %v12080_v49 = vpop.f32.mrf.mxu0 }
 0x9bc   :  { %14499 = vst [vmem:[#allocation55_spill] sm:$0xff] %v12080_v49  ;;  %v4210_v49 = vld [vmem:[#allocation2 + $0x262] sm:$0xff] }
 0x9bd   :  { %14498 = vst [vmem:[#allocation50_spill] sm:$0xff] %v12078_v53  ;;  %v5503_v40 = vpop.f32.mrf.mxu1 }
 0x9be   :  { %v5504_v34 = vadd.f32 %v5503_v40, %v5295_v21  ;;  %5759 = vmatmul.f32.gmra.mxu2 %v4209_v61  ;;  %v4553_v21 = vld [vmem:[#allocation3 + $0x418] sm:$0xff]  ;;  %v4146_v61 = vld [vmem:[#allocation2 + $0x261] sm:$0xff] }
 0x9bf   :  { %5965 = vmatmul.f32.gmra.mxu3 %v4273_v28  ;;  %v14504_v28 = vld [vmem:[#allocation67_spill] sm:$0xff]  ;;  %6250 = vmatpush.msra.mxu1 %v4553_v21 }
 0x9c0   :  { %5550 = vmatmul.f32.gmra.mxu1 %v4145_v45  ;;  %v5298_v53 = vadd.f32 %v14505_v44, %v14504_v28  ;;  %v14509_v28 = vld [vmem:[#allocation10_spill] sm:$0xff] }
 0x9c1   :  { %v5712_v41 = vpop.f32.mrf.mxu2 }
 0x9c2   :  { %v5918_v56 = vpop.f32.mrf.mxu3  ;;  %v5713_v9 = vadd.f32 %v5712_v41, %v5504_v34  ;;  %6171 = vmatmul.f32.gmra.mxu0 %v4145_v45  ;;  %v14508_v41 = vld [vmem:[#allocation56_spill] sm:$0xff] }
 0x9c3   :  { %v12084_v0 = vadd.f32 %v5918_v56, %v5710_v12  ;;  %v12086_v31 = vpop.f32.mrf.mxu0  ;;  %v4275_v56 = vld [vmem:[#allocation2 + $0x278] sm:$0xff]  ;;  %v5301_v44 = vadd.f32 %v14509_v28, %v14508_v41 }
 0x9c4   :  { %14503 = vst [vmem:[#allocation93_spill] sm:$0xff] %v12086_v31  ;;  %v4211_v45 = vld [vmem:[#allocation2 + $0x272] sm:$0xff] }
 0x9c5   :  { %14502 = vst [vmem:[#allocation53_spill] sm:$0xff] %v12084_v0  ;;  %v5506_v50 = vpop.f32.mrf.mxu1 }
 0x9c6   :  { %v5507_v12 = vadd.f32 %v5506_v50, %v5298_v53  ;;  %5762 = vmatmul.f32.gmra.mxu2 %v4210_v49  ;;  %v4147_v49 = vld [vmem:[#allocation2 + $0x271] sm:$0xff] }
 0x9c7   :  { %5968 = vmatmul.f32.gmra.mxu3 %v4274_v35 }
 0x9c8   :  { %5553 = vmatmul.f32.gmra.mxu1 %v4146_v61 }
 0x9c9   :  { %v5715_v40 = vpop.f32.mrf.mxu2 }
 0x9ca   :  { %v5921_v13 = vpop.f32.mrf.mxu3  ;;  %v5716_v34 = vadd.f32 %v5715_v40, %v5507_v12  ;;  %6174 = vmatmul.f32.gmra.mxu0 %v4146_v61  ;;  %v14513_v40 = vld [vmem:[#allocation12_spill] sm:$0xff] }
 0x9cb   :  { %v12090_v14 = vadd.f32 %v5921_v13, %v5713_v9  ;;  %v12092_v35 = vpop.f32.mrf.mxu0  ;;  %v4276_v13 = vld [vmem:[#allocation2 + $0x288] sm:$0xff] }
 0x9cc   :  { %14507 = vst [vmem:[#allocation32_spill] sm:$0xff] %v12092_v35  ;;  %v4212_v35 = vld [vmem:[#allocation2 + $0x27a] sm:$0xff] }
 0x9cd   :  { %14506 = vst [vmem:[#allocation67_spill] sm:$0xff] %v12090_v14  ;;  %v5509_v31 = vpop.f32.mrf.mxu1 }
 0x9ce   :  { %v5510_v53 = vadd.f32 %v5509_v31, %v5301_v44  ;;  %5765 = vmatmul.f32.gmra.mxu2 %v4211_v45  ;;  %v4148_v31 = vld [vmem:[#allocation2 + $0x279] sm:$0xff] }
 0x9cf   :  { %5971 = vmatmul.f32.gmra.mxu3 %v4275_v56  ;;  %v14512_v56 = vld [vmem:[#allocation9_spill] sm:$0xff] }
 0x9d0   :  { %5556 = vmatmul.f32.gmra.mxu1 %v4147_v49  ;;  %v5304_v14 = vadd.f32 %v14513_v40, %v14512_v56 }
 0x9d1   :  { %v5718_v50 = vpop.f32.mrf.mxu2 }
 0x9d2   :  { %v5924_v0 = vpop.f32.mrf.mxu3  ;;  %v5719_v21 = vadd.f32 %v5718_v50, %v5510_v53  ;;  %6177 = vmatmul.f32.gmra.mxu0 %v4147_v49  ;;  %v14517_v50 = vld [vmem:[#allocation14_spill] sm:$0xff] }
 0x9d3   :  { %v12096_v9 = vadd.f32 %v5924_v0, %v5716_v34  ;;  %v12098_v12 = vpop.f32.mrf.mxu0  ;;  %v4277_v34 = vld [vmem:[#allocation2 + $0x290] sm:$0xff] }
 0x9d4   :  { %14511 = vst [vmem:[#allocation10_spill] sm:$0xff] %v12098_v12  ;;  %v4213_v12 = vld [vmem:[#allocation2 + $0x28a] sm:$0xff] }
 0x9d5   :  { %14510 = vst [vmem:[#allocation56_spill] sm:$0xff] %v12096_v9  ;;  %v5512_v28 = vpop.f32.mrf.mxu1 }
 0x9d6   :  { %v5513_v0 = vadd.f32 %v5512_v28, %v5304_v14  ;;  %5768 = vmatmul.f32.gmra.mxu2 %v4212_v35  ;;  %v4149_v14 = vld [vmem:[#allocation2 + $0x289] sm:$0xff]  ;;  %v4278_v35 = vld [vmem:[#allocation2 + $0x2a0] sm:$0xff] }
 0x9d7   :  { %5974 = vmatmul.f32.gmra.mxu3 %v4276_v13  ;;  %v14516_v13 = vld [vmem:[#allocation11_spill] sm:$0xff] }
 0x9d8   :  { %5559 = vmatmul.f32.gmra.mxu1 %v4148_v31  ;;  %v5307_v9 = vadd.f32 %v14517_v50, %v14516_v13 }
 0x9d9   :  { %v5721_v44 = vpop.f32.mrf.mxu2 }
 0x9da   :  { %v5927_v41 = vpop.f32.mrf.mxu3  ;;  %v5722_v45 = vadd.f32 %v5721_v44, %v5513_v0  ;;  %6180 = vmatmul.f32.gmra.mxu0 %v4148_v31  ;;  %v14521_v44 = vld [vmem:[#allocation16_spill] sm:$0xff] }
 0x9db   :  { %v12102_v61 = vadd.f32 %v5927_v41, %v5719_v21  ;;  %v12104_v53 = vpop.f32.mrf.mxu0 }
 0x9dc   :  { %14515 = vst [vmem:[#allocation12_spill] sm:$0xff] %v12104_v53  ;;  %v4214_v53 = vld [vmem:[#allocation2 + $0x292] sm:$0xff] }
 0x9dd   :  { %14514 = vst [vmem:[#allocation9_spill] sm:$0xff] %v12102_v61  ;;  %v5515_v40 = vpop.f32.mrf.mxu1 }
 0x9de   :  { %v5516_v21 = vadd.f32 %v5515_v40, %v5307_v9  ;;  %5771 = vmatmul.f32.gmra.mxu2 %v4213_v12  ;;  %v4552_v9 = vld [vmem:[#allocation3 + $0x410] sm:$0xff] }
 0x9df   :  { %5977 = vmatmul.f32.gmra.mxu3 %v4277_v34  ;;  %v14520_v34 = vld [vmem:[#allocation13_spill] sm:$0xff]  ;;  %v4150_v12 = vld [vmem:[#allocation2 + $0x291] sm:$0xff]  ;;  %6251 = vmatpush.msra.mxu1 %v4552_v9 }
 0x9e0   :  { %5562 = vmatmul.f32.gmra.mxu1 %v4149_v14  ;;  %v5310_v61 = vadd.f32 %v14521_v44, %v14520_v34  ;;  %v14525_v34 = vld [vmem:[#allocation18_spill] sm:$0xff] }
 0x9e1   :  { %v5724_v41 = vpop.f32.mrf.mxu2 }
 0x9e2   :  { %v5930_v56 = vpop.f32.mrf.mxu3  ;;  %v5725_v28 = vadd.f32 %v5724_v41, %v5516_v21  ;;  %6183 = vmatmul.f32.gmra.mxu0 %v4149_v14  ;;  %v14524_v41 = vld [vmem:[#allocation15_spill] sm:$0xff]  ;;  %v4215_v14 = vld [vmem:[#allocation2 + $0x2a2] sm:$0xff] }
 0x9e3   :  { %v12108_v49 = vadd.f32 %v5930_v56, %v5722_v45  ;;  %v12110_v0 = vpop.f32.mrf.mxu0  ;;  %v4279_v56 = vld [vmem:[#allocation2 + $0x2a8] sm:$0xff]  ;;  %v5313_v44 = vadd.f32 %v14525_v34, %v14524_v41 }
 0x9e4   :  { %14519 = vst [vmem:[#allocation14_spill] sm:$0xff] %v12110_v0 }
 0x9e5   :  { %14518 = vst [vmem:[#allocation11_spill] sm:$0xff] %v12108_v49  ;;  %v5518_v50 = vpop.f32.mrf.mxu1 }
 0x9e6   :  { %v5519_v45 = vadd.f32 %v5518_v50, %v5310_v61  ;;  %5774 = vmatmul.f32.gmra.mxu2 %v4214_v53  ;;  %v4151_v53 = vld [vmem:[#allocation2 + $0x2a1] sm:$0xff] }
 0x9e7   :  { %5980 = vmatmul.f32.gmra.mxu3 %v4278_v35 }
 0x9e8   :  { %5565 = vmatmul.f32.gmra.mxu1 %v4150_v12 }
 0x9e9   :  { %v5727_v40 = vpop.f32.mrf.mxu2 }
 0x9ea   :  { %v5933_v13 = vpop.f32.mrf.mxu3  ;;  %v5728_v21 = vadd.f32 %v5727_v40, %v5519_v45  ;;  %6186 = vmatmul.f32.gmra.mxu0 %v4150_v12  ;;  %v14529_v40 = vld [vmem:[#allocation20_spill] sm:$0xff] }
 0x9eb   :  { %v12114_v31 = vadd.f32 %v5933_v13, %v5725_v28  ;;  %v12116_v35 = vpop.f32.mrf.mxu0  ;;  %v4280_v13 = vld [vmem:[#allocation2 + $0x2b8] sm:$0xff] }
 0x9ec   :  { %14523 = vst [vmem:[#allocation16_spill] sm:$0xff] %v12116_v35  ;;  %v4216_v35 = vld [vmem:[#allocation2 + $0x2aa] sm:$0xff] }
 0x9ed   :  { %14522 = vst [vmem:[#allocation13_spill] sm:$0xff] %v12114_v31  ;;  %v5521_v0 = vpop.f32.mrf.mxu1 }
 0x9ee   :  { %v5522_v61 = vadd.f32 %v5521_v0, %v5313_v44  ;;  %5777 = vmatmul.f32.gmra.mxu2 %v4215_v14  ;;  %v4152_v0 = vld [vmem:[#allocation2 + $0x2a9] sm:$0xff] }
 0x9ef   :  { %5983 = vmatmul.f32.gmra.mxu3 %v4279_v56  ;;  %v14528_v56 = vld [vmem:[#allocation17_spill] sm:$0xff] }
 0x9f0   :  { %5568 = vmatmul.f32.gmra.mxu1 %v4151_v53  ;;  %v5316_v31 = vadd.f32 %v14529_v40, %v14528_v56 }
 0x9f1   :  { %v5730_v50 = vpop.f32.mrf.mxu2 }
 0x9f2   :  { %v5936_v49 = vpop.f32.mrf.mxu3  ;;  %v5731_v9 = vadd.f32 %v5730_v50, %v5522_v61  ;;  %6189 = vmatmul.f32.gmra.mxu0 %v4151_v53  ;;  %v14533_v50 = vld [vmem:[#allocation22_spill] sm:$0xff] }
 0x9f3   :  { %v12120_v28 = vadd.f32 %v5936_v49, %v5728_v21  ;;  %v12122_v45 = vpop.f32.mrf.mxu0  ;;  %v4281_v21 = vld [vmem:[#allocation2 + $0x2c0] sm:$0xff] }
 0x9f4   :  { %14527 = vst [vmem:[#allocation18_spill] sm:$0xff] %v12122_v45  ;;  %v4217_v45 = vld [vmem:[#allocation2 + $0x2ba] sm:$0xff] }
 0x9f5   :  { %14526 = vst [vmem:[#allocation15_spill] sm:$0xff] %v12120_v28  ;;  %v5524_v34 = vpop.f32.mrf.mxu1 }
 0x9f6   :  { %v5525_v49 = vadd.f32 %v5524_v34, %v5316_v31  ;;  %5780 = vmatmul.f32.gmra.mxu2 %v4216_v35  ;;  %v4153_v31 = vld [vmem:[#allocation2 + $0x2b9] sm:$0xff]  ;;  %v4282_v35 = vld [vmem:[#allocation2 + $0x2d0] sm:$0xff] }
 0x9f7   :  { %5986 = vmatmul.f32.gmra.mxu3 %v4280_v13  ;;  %v14532_v13 = vld [vmem:[#allocation19_spill] sm:$0xff] }
 0x9f8   :  { %5571 = vmatmul.f32.gmra.mxu1 %v4152_v0  ;;  %v5319_v28 = vadd.f32 %v14533_v50, %v14532_v13 }
 0x9f9   :  { %v5733_v44 = vpop.f32.mrf.mxu2 }
 0x9fa   :  { %v5939_v41 = vpop.f32.mrf.mxu3  ;;  %v5734_v14 = vadd.f32 %v5733_v44, %v5525_v49  ;;  %6192 = vmatmul.f32.gmra.mxu0 %v4152_v0  ;;  %v14537_v44 = vld [vmem:[#allocation24_spill] sm:$0xff] }
 0x9fb   :  { %v12126_v12 = vadd.f32 %v5939_v41, %v5731_v9  ;;  %v12128_v61 = vpop.f32.mrf.mxu0 }
 0x9fc   :  { %14531 = vst [vmem:[#allocation20_spill] sm:$0xff] %v12128_v61  ;;  %v4218_v61 = vld [vmem:[#allocation2 + $0x2c2] sm:$0xff] }
 0x9fd   :  { %14530 = vst [vmem:[#allocation17_spill] sm:$0xff] %v12126_v12  ;;  %v5527_v40 = vpop.f32.mrf.mxu1 }
 0x9fe   :  { %v5528_v9 = vadd.f32 %v5527_v40, %v5319_v28  ;;  %5783 = vmatmul.f32.gmra.mxu2 %v4217_v45  ;;  %v4551_v28 = vld [vmem:[#allocation3 + $0x408] sm:$0xff] }
 0x9ff   :  { %5989 = vmatmul.f32.gmra.mxu3 %v4281_v21  ;;  %v14536_v21 = vld [vmem:[#allocation21_spill] sm:$0xff]  ;;  %6252 = vmatpush.msra.mxu1 %v4551_v28 }
 0xa00   :  { %5574 = vmatmul.f32.gmra.mxu1 %v4153_v31  ;;  %v5322_v12 = vadd.f32 %v14537_v44, %v14536_v21  ;;  %v4154_v45 = vld [vmem:[#allocation2 + $0x2c1] sm:$0xff] }
 0xa01   :  { %v5736_v41 = vpop.f32.mrf.mxu2  ;;  %v14541_v21 = vld [vmem:[#allocation26_spill] sm:$0xff] }
 0xa02   :  { %v5942_v56 = vpop.f32.mrf.mxu3  ;;  %v5737_v34 = vadd.f32 %v5736_v41, %v5528_v9  ;;  %6195 = vmatmul.f32.gmra.mxu0 %v4153_v31  ;;  %v14540_v41 = vld [vmem:[#allocation23_spill] sm:$0xff] }
 0xa03   :  { %v12132_v53 = vadd.f32 %v5942_v56, %v5734_v14  ;;  %v12134_v49 = vpop.f32.mrf.mxu0  ;;  %v4283_v56 = vld [vmem:[#allocation2 + $0x2d8] sm:$0xff]  ;;  %v5325_v44 = vadd.f32 %v14541_v21, %v14540_v41 }
 0xa04   :  { %14535 = vst [vmem:[#allocation22_spill] sm:$0xff] %v12134_v49  ;;  %v4219_v31 = vld [vmem:[#allocation2 + $0x2d2] sm:$0xff] }
 0xa05   :  { %14534 = vst [vmem:[#allocation19_spill] sm:$0xff] %v12132_v53  ;;  %v5530_v50 = vpop.f32.mrf.mxu1 }
 0xa06   :  { %v5531_v14 = vadd.f32 %v5530_v50, %v5322_v12  ;;  %5786 = vmatmul.f32.gmra.mxu2 %v4218_v61  ;;  %v4155_v61 = vld [vmem:[#allocation2 + $0x2d1] sm:$0xff] }
 0xa07   :  { %5992 = vmatmul.f32.gmra.mxu3 %v4282_v35 }
 0xa08   :  { %5577 = vmatmul.f32.gmra.mxu1 %v4154_v45 }
 0xa09   :  { %v5739_v40 = vpop.f32.mrf.mxu2 }
 0xa0a   :  { %v5945_v13 = vpop.f32.mrf.mxu3  ;;  %v5740_v9 = vadd.f32 %v5739_v40, %v5531_v14  ;;  %6198 = vmatmul.f32.gmra.mxu0 %v4154_v45  ;;  %v14545_v40 = vld [vmem:[#allocation28_spill] sm:$0xff] }
 0xa0b   :  { %v12138_v0 = vadd.f32 %v5945_v13, %v5737_v34  ;;  %v12140_v35 = vpop.f32.mrf.mxu0  ;;  %v4284_v13 = vld [vmem:[#allocation2 + $0x2e8] sm:$0xff] }
 0xa0c   :  { %14539 = vst [vmem:[#allocation24_spill] sm:$0xff] %v12140_v35  ;;  %v4220_v35 = vld [vmem:[#allocation2 + $0x2da] sm:$0xff] }
 0xa0d   :  { %14538 = vst [vmem:[#allocation21_spill] sm:$0xff] %v12138_v0  ;;  %v5533_v49 = vpop.f32.mrf.mxu1 }
 0xa0e   :  { %v5534_v12 = vadd.f32 %v5533_v49, %v5325_v44  ;;  %5789 = vmatmul.f32.gmra.mxu2 %v4219_v31  ;;  %v4156_v49 = vld [vmem:[#allocation2 + $0x2d9] sm:$0xff] }
 0xa0f   :  { %5995 = vmatmul.f32.gmra.mxu3 %v4283_v56  ;;  %v14544_v56 = vld [vmem:[#allocation25_spill] sm:$0xff] }
 0xa10   :  { %5580 = vmatmul.f32.gmra.mxu1 %v4155_v61  ;;  %v5328_v0 = vadd.f32 %v14545_v40, %v14544_v56 }
 0xa11   :  { %v5742_v50 = vpop.f32.mrf.mxu2 }
 0xa12   :  { %v5948_v53 = vpop.f32.mrf.mxu3  ;;  %v5743_v28 = vadd.f32 %v5742_v50, %v5534_v12  ;;  %6201 = vmatmul.f32.gmra.mxu0 %v4155_v61  ;;  %v14549_v50 = vld [vmem:[#allocation30_spill] sm:$0xff] }
 0xa13   :  { %v12144_v34 = vadd.f32 %v5948_v53, %v5740_v9  ;;  %v12146_v14 = vpop.f32.mrf.mxu0  ;;  %v4285_v9 = vld [vmem:[#allocation2 + $0x2f0] sm:$0xff] }
 0xa14   :  { %14543 = vst [vmem:[#allocation26_spill] sm:$0xff] %v12146_v14  ;;  %v4221_v14 = vld [vmem:[#allocation2 + $0x2ea] sm:$0xff] }
 0xa15   :  { %14542 = vst [vmem:[#allocation23_spill] sm:$0xff] %v12144_v34  ;;  %v5536_v21 = vpop.f32.mrf.mxu1 }
 0xa16   :  { %v5537_v53 = vadd.f32 %v5536_v21, %v5328_v0  ;;  %5792 = vmatmul.f32.gmra.mxu2 %v4220_v35  ;;  %v4157_v0 = vld [vmem:[#allocation2 + $0x2e9] sm:$0xff]  ;;  %v4286_v35 = vld [vmem:[#allocation2 + $0x300] sm:$0xff] }
 0xa17   :  { %5998 = vmatmul.f32.gmra.mxu3 %v4284_v13  ;;  %v14548_v13 = vld [vmem:[#allocation27_spill] sm:$0xff] }
 0xa18   :  { %5583 = vmatmul.f32.gmra.mxu1 %v4156_v49  ;;  %v5331_v34 = vadd.f32 %v14549_v50, %v14548_v13 }
 0xa19   :  { %v5745_v44 = vpop.f32.mrf.mxu2 }
 0xa1a   :  { %v5951_v41 = vpop.f32.mrf.mxu3  ;;  %v5746_v31 = vadd.f32 %v5745_v44, %v5537_v53  ;;  %6204 = vmatmul.f32.gmra.mxu0 %v4156_v49  ;;  %v14553_v44 = vld [vmem:[#allocation33_spill] sm:$0xff] }
 0xa1b   :  { %v12150_v45 = vadd.f32 %v5951_v41, %v5743_v28  ;;  %v12152_v12 = vpop.f32.mrf.mxu0 }
 0xa1c   :  { %14547 = vst [vmem:[#allocation28_spill] sm:$0xff] %v12152_v12  ;;  %v4222_v12 = vld [vmem:[#allocation2 + $0x2f2] sm:$0xff] }
 0xa1d   :  { %14546 = vst [vmem:[#allocation25_spill] sm:$0xff] %v12150_v45  ;;  %v5539_v40 = vpop.f32.mrf.mxu1 }
 0xa1e   :  { %v5540_v28 = vadd.f32 %v5539_v40, %v5331_v34  ;;  %5795 = vmatmul.f32.gmra.mxu2 %v4221_v14  ;;  %v4550_v34 = vld [vmem:[#allocation3 + $0x400] sm:$0xff]  ;;  %v4158_v14 = vld [vmem:[#allocation2 + $0x2f1] sm:$0xff] }
 0xa1f   :  { %6001 = vmatmul.f32.gmra.mxu3 %v4285_v9  ;;  %v14552_v9 = vld [vmem:[#allocation29_spill] sm:$0xff]  ;;  %6253 = vmatpush.msra.mxu1 %v4550_v34 }
 0xa20   :  { %5586 = vmatmul.f32.gmra.mxu1 %v4157_v0  ;;  %v5334_v45 = vadd.f32 %v14553_v44, %v14552_v9 }
 0xa21   :  { %v5748_v41 = vpop.f32.mrf.mxu2 }
 0xa22   :  { %v5954_v56 = vpop.f32.mrf.mxu3  ;;  %v5749_v21 = vadd.f32 %v5748_v41, %v5540_v28  ;;  %6207 = vmatmul.f32.gmra.mxu0 %v4157_v0  ;;  %v14555_v41 = vld [vmem:[#allocation31_spill] sm:$0xff] }
 0xa23   :  { %v12156_v61 = vadd.f32 %v5954_v56, %v5746_v31  ;;  %v12158_v53 = vpop.f32.mrf.mxu0  ;;  %v4287_v56 = vld [vmem:[#allocation2 + $0x308] sm:$0xff]  ;;  %v5337_v9 = vadd.f32 %v11830_v47, %v14555_v41 }
 0xa24   :  { %14551 = vst [vmem:[#allocation30_spill] sm:$0xff] %v12158_v53  ;;  %v4223_v53 = vld [vmem:[#allocation2 + $0x302] sm:$0xff] }
 0xa25   :  { %14550 = vst [vmem:[#allocation27_spill] sm:$0xff] %v12156_v61  ;;  %v5542_v50 = vpop.f32.mrf.mxu1 }
 0xa26   :  { %v5543_v31 = vadd.f32 %v5542_v50, %v5334_v45  ;;  %5798 = vmatmul.f32.gmra.mxu2 %v4222_v12  ;;  %v4159_v12 = vld [vmem:[#allocation2 + $0x301] sm:$0xff] }
 0xa27   :  { %6004 = vmatmul.f32.gmra.mxu3 %v4286_v35 }
 0xa28   :  { %5589 = vmatmul.f32.gmra.mxu1 %v4158_v14 }
 0xa29   :  { %v5751_v40 = vpop.f32.mrf.mxu2 }
 0xa2a   :  { %v5957_v13 = vpop.f32.mrf.mxu3  ;;  %v5752_v28 = vadd.f32 %v5751_v40, %v5543_v31  ;;  %6210 = vmatmul.f32.gmra.mxu0 %v4158_v14  ;;  %v14556_v31 = vld [vmem:[#allocation36_spill] sm:$0xff] }
 0xa2b   :  { %v5958_v49 = vadd.f32 %v5957_v13, %v5749_v21  ;;  %v12162_v35 = vpop.f32.mrf.mxu0  ;;  %v4288_v21 = vld [vmem:[#allocation2 + $0x318] sm:$0xff] }
 0xa2c   :  { %14554 = vst [vmem:[#allocation29_spill] sm:$0xff] %v12162_v35  ;;  %v4224_v35 = vld [vmem:[#allocation2 + $0x30a] sm:$0xff] }
 0xa2d   :  { %v5545_v61 = vpop.f32.mrf.mxu1 }
 0xa2e   :  { %v5546_v45 = vadd.f32 %v5545_v61, %v5337_v9  ;;  %5801 = vmatmul.f32.gmra.mxu2 %v4223_v53  ;;  %v4160_v61 = vld [vmem:[#allocation2 + $0x309] sm:$0xff]  ;;  %v4289_v53 = vld [vmem:[#allocation2 + $0x320] sm:$0xff] }
 0xa2f   :  { %6007 = vmatmul.f32.gmra.mxu3 %v4287_v56  ;;  %v5340_v56 = vadd.f32 %v11834_v58, %v14556_v31  ;;  %v4225_v31 = vld [vmem:[#allocation2 + $0x31a] sm:$0xff] }
 0xa30   :  { %5592 = vmatmul.f32.gmra.mxu1 %v4159_v12 }
 0xa31   :  { %v5754_v13 = vpop.f32.mrf.mxu2 }
 0xa32   :  { %v5960_v44 = vpop.f32.mrf.mxu3  ;;  %v5755_v50 = vadd.f32 %v5754_v13, %v5546_v45  ;;  %6213 = vmatmul.f32.gmra.mxu0 %v4159_v12  ;;  %v14558_v13 = vld [vmem:[#allocation58_spill] sm:$0xff] }
 0xa33   :  { %v5961_v0 = vadd.f32 %v5960_v44, %v5752_v28  ;;  %v6166_v34 = vpop.f32.mrf.mxu0 }
 0xa34   :  { %v12168_v40 = vadd.f32 %v6166_v34, %v5958_v49 }
 0xa35   :  { %v5548_v41 = vpop.f32.mrf.mxu1 }
 0xa36   :  { %v5549_v28 = vadd.f32 %v5548_v41, %v5340_v56  ;;  %5804 = vmatmul.f32.gmra.mxu2 %v4224_v35  ;;  %v4161_v35 = vld [vmem:[#allocation2 + $0x319] sm:$0xff]  ;;  %v4290_v56 = vld [vmem:[#allocation2 + $0x330] sm:$0xff] }
 0xa37   :  { %6010 = vmatmul.f32.gmra.mxu3 %v4288_v21  ;;  %v14557_v21 = vld [vmem:[#allocation39_spill] sm:$0xff] }
 0xa38   :  { %5595 = vmatmul.f32.gmra.mxu1 %v4160_v61  ;;  %v5343_v20 = vadd.f32 %v14558_v13, %v14557_v21  ;;  %v4226_v13 = vld [vmem:[#allocation2 + $0x322] sm:$0xff] }
 0xa39   :  { %v5757_v9 = vpop.f32.mrf.mxu2 }
 0xa3a   :  { %v5963_v47 = vpop.f32.mrf.mxu3  ;;  %v5758_v44 = vadd.f32 %v5757_v9, %v5549_v28  ;;  %6216 = vmatmul.f32.gmra.mxu0 %v4160_v61  ;;  %v14560_v9 = vld [vmem:[#allocation63_spill] sm:$0xff] }
 0xa3b   :  { %v5964_v14 = vadd.f32 %v5963_v47, %v5755_v50  ;;  %v6169_v45 = vpop.f32.mrf.mxu0 }
 0xa3c   :  { %v12172_v58 = vadd.f32 %v6169_v45, %v5961_v0 }
 0xa3d   :  { %v5551_v34 = vpop.f32.mrf.mxu1 }
 0xa3e   :  { %v5552_v50 = vadd.f32 %v5551_v34, %v5343_v20  ;;  %5807 = vmatmul.f32.gmra.mxu2 %v4225_v31  ;;  %v4162_v20 = vld [vmem:[#allocation2 + $0x321] sm:$0xff] }
 0xa3f   :  { %6013 = vmatmul.f32.gmra.mxu3 %v4289_v53  ;;  %v14559_v53 = vld [vmem:[#allocation42_spill] sm:$0xff] }
 0xa40   :  { %5598 = vmatmul.f32.gmra.mxu1 %v4161_v35  ;;  %v5346_v2 = vadd.f32 %v14560_v9, %v14559_v53  ;;  %v4227_v9 = vld [vmem:[#allocation2 + $0x332] sm:$0xff] }
 0xa41   :  { %v5760_v47 = vpop.f32.mrf.mxu2 }
 0xa42   :  { %v5966_v49 = vpop.f32.mrf.mxu3  ;;  %v5761_v41 = vadd.f32 %v5760_v47, %v5552_v50  ;;  %6219 = vmatmul.f32.gmra.mxu0 %v4161_v35  ;;  %v14562_v47 = vld [vmem:[#allocation66_spill] sm:$0xff] }
 0xa43   :  { %v5967_v12 = vadd.f32 %v5966_v49, %v5758_v44  ;;  %v6172_v28 = vpop.f32.mrf.mxu0  ;;  %v4291_v49 = vld [vmem:[#allocation2 + $0x338] sm:$0xff] }
 0xa44   :  { %v12176_v21 = vadd.f32 %v6172_v28, %v5964_v14 }
 0xa45   :  { %v5554_v45 = vpop.f32.mrf.mxu1 }
 0xa46   :  { %v5555_v44 = vadd.f32 %v5554_v45, %v5346_v2  ;;  %5810 = vmatmul.f32.gmra.mxu2 %v4226_v13  ;;  %v4163_v2 = vld [vmem:[#allocation2 + $0x331] sm:$0xff] }
 0xa47   :  { %6016 = vmatmul.f32.gmra.mxu3 %v4290_v56  ;;  %v14561_v56 = vld [vmem:[#allocation62_spill] sm:$0xff] }
 0xa48   :  { %5601 = vmatmul.f32.gmra.mxu1 %v4162_v20  ;;  %v5349_v23 = vadd.f32 %v14562_v47, %v14561_v56  ;;  %v4228_v47 = vld [vmem:[#allocation2 + $0x33a] sm:$0xff] }
 0xa49   :  { %v5763_v34 = vpop.f32.mrf.mxu2 }
 0xa4a   :  { %v5969_v0 = vpop.f32.mrf.mxu3  ;;  %v5764_v31 = vadd.f32 %v5763_v34, %v5555_v44  ;;  %6222 = vmatmul.f32.gmra.mxu0 %v4162_v20  ;;  %v14563_v44 = vld [vmem:[#allocation64_spill] sm:$0xff] }
 0xa4b   :  { %v5970_v61 = vadd.f32 %v5969_v0, %v5761_v41  ;;  %v6175_v50 = vpop.f32.mrf.mxu0 }
 0xa4c   :  { %v12180_v53 = vadd.f32 %v6175_v50, %v5967_v12 }
 0xa4d   :  { %v5557_v28 = vpop.f32.mrf.mxu1 }
 0xa4e   :  { %v5558_v41 = vadd.f32 %v5557_v28, %v5349_v23  ;;  %5813 = vmatmul.f32.gmra.mxu2 %v4227_v9  ;;  %v4164_v23 = vld [vmem:[#allocation2 + $0x339] sm:$0xff] }
 0xa4f   :  { %6019 = vmatmul.f32.gmra.mxu3 %v4291_v49  ;;  %v14564_v49 = vld [vmem:[#allocation45_spill] sm:$0xff] }
 0xa50   :  { %5604 = vmatmul.f32.gmra.mxu1 %v4163_v2  ;;  %v5352_v34 = vadd.f32 %v14564_v49, %v14563_v44  ;;  %v7631_v28 = vld [vmem:[#allocation2] sm:$0xff] }
 0xa51   :  { %v5766_v0 = vpop.f32.mrf.mxu2 }
 0xa52   :  { %v5972_v14 = vpop.f32.mrf.mxu3  ;;  %v5767_v45 = vadd.f32 %v5766_v0, %v5558_v41  ;;  %6225 = vmatmul.f32.gmra.mxu0 %v4163_v2  ;;  %v14565_v41 = vld [vmem:[#allocation68_spill] sm:$0xff]  ;;  %v14566_v0 = vld [vmem:[#allocation51_spill] sm:$0xff] }
 0xa53   :  { %v5973_v35 = vadd.f32 %v5972_v14, %v5764_v31  ;;  %v6178_v13 = vpop.f32.mrf.mxu0  ;;  %v5355_v27 = vadd.f32 %v14566_v0, %v14565_v41  ;;  %v4359_v0 = vld [vmem:[#allocation2 + $0x3a] sm:$0xff] }
 0xa54   :  { %v12185_v56 = vadd.f32 %v6178_v13, %v5970_v61 }
 0xa55   :  { %v5560_v50 = vpop.f32.mrf.mxu1 }
 0xa56   :  { %v5561_v31 = vadd.f32 %v5560_v50, %v5352_v34  ;;  %5816 = vmatmul.f32.gmra.mxu2 %v4228_v47  ;;  %v4356_v47 = vld [vmem:[#allocation2 + $0x349] sm:$0xff] }
 0xa57   :  { %6022 = vmatmul.f32.gmra.mxu3 %v11998_v6 }
 0xa58   :  { %5607 = vmatmul.f32.gmra.mxu1 %v4164_v23 }
 0xa59   :  { %v5769_v14 = vpop.f32.mrf.mxu2 }
 0xa5a   :  { %v5975_v12 = vpop.f32.mrf.mxu3  ;;  %v5770_v6 = vadd.f32 %v5769_v14, %v5561_v31  ;;  %6228 = vmatmul.f32.gmra.mxu0 %v4164_v23 }
 0xa5b   :  { %v5976_v20 = vadd.f32 %v5975_v12, %v5767_v45  ;;  %v6181_v9 = vpop.f32.mrf.mxu0  ;;  %v4358_v45 = vld [vmem:[#allocation2 + $0x32] sm:$0xff] }
 0xa5c   :  { %v12189_v44 = vadd.f32 %v6181_v9, %v5973_v35 }
 0xa5d   :  { %v5563_v13 = vpop.f32.mrf.mxu1 }
 0xa5e   :  { %v5564_v2 = vadd.f32 %v5563_v13, %v5355_v27  ;;  %v14569_v13 = vld [vmem:[#allocation54_spill] sm:$0xff] }
 0xa5f   :  { %6025 = vmatmul.f32.gmra.mxu3 %v7631_v28  ;;  %v14568_v28 = vld [vmem:[#allocation57_spill] sm:$0xff] }
 0xa60   :  { %6254 = vmatmul.f32.vlgmr.msra.gmra.mxu1 %v4358_v45  ;;  %v5358_v31 = vadd.f32 %v14568_v28, %v14567_v59  ;;  %v4360_v28 = vld [vmem:[#allocation2 + $0x4a] sm:$0xff] }
 0xa61   :  { %v5772_v34 = vpop.f32.mrf.mxu2 }
 0xa62   :  { %v5978_v61 = vpop.f32.mrf.mxu3  ;;  %v5773_v12 = vadd.f32 %v5772_v34, %v5564_v2  ;;  %6231 = vmatmul.f32.gmra.mxu0 %v4356_v47  ;;  %v14570_v2 = vld [vmem:[#allocation60_spill] sm:$0xff] }
 0xa63   :  { %v5979_v49 = vadd.f32 %v5978_v61, %v5770_v6  ;;  %v6184_v50 = vpop.f32.mrf.mxu0  ;;  %v4357_v61 = vld [vmem:[#allocation2 + $0x351] sm:$0xff]  ;;  %v5361_v45 = vadd.f32 %v14570_v2, %v14569_v13 }
 0xa64   :  { %v12193_v14 = vadd.f32 %v6184_v50, %v5976_v20 }
 0xa65   :  { %v5566_v41 = vpop.f32.mrf.mxu1 }
 0xa66   :  { %v5567_v9 = vadd.f32 %v5566_v41, %v5358_v31  ;;  %v14571_v31 = vld [vmem:[#allocation59_spill] sm:$0xff]  ;;  %v14572_v41 = vld [vmem:[#allocation65_spill] sm:$0xff] }
 0xa68   :  { %6257 = vmatmul.f32.gmra.mxu1 %v4359_v0 }
 0xa69   :  { %v5775_v23 = vpop.f32.mrf.mxu2 }
 0xa6a   :  { %v5981_v15 = vpop.f32.mrf.mxu3  ;;  %v5776_v27 = vadd.f32 %v5775_v23, %v5567_v9  ;;  %6234 = vmatmul.f32.gmra.mxu0 %v4357_v61  ;;  %v5364_v9 = vadd.f32 %v14572_v41, %v14571_v31 }
 0xa6b   :  { %v5982_v35 = vadd.f32 %v5981_v15, %v5773_v12  ;;  %v6187_v6 = vpop.f32.mrf.mxu0 }
 0xa6c   :  { %v12197_v34 = vadd.f32 %v6187_v6, %v5979_v49  ;;  %v4361_v6 = vld [vmem:[#allocation2 + $0x52] sm:$0xff] }
 0xa6d   :  { %v5569_v59 = vpop.f32.mrf.mxu1 }
 0xa6e   :  { %v5570_v50 = vadd.f32 %v5569_v59, %v5361_v45  ;;  %v14574_v45 = vld [vmem:[#allocation79_spill] sm:$0xff] }
 0xa70   :  { %6260 = vmatmul.f32.gmra.mxu1 %v4360_v28 }
 0xa71   :  { %v5778_v15 = vpop.f32.mrf.mxu2 }
 0xa72   :  { %v5984_v37 = vpop.f32.mrf.mxu3  ;;  %v5779_v12 = vadd.f32 %v5778_v15, %v5570_v50 }
 0xa73   :  { %v5985_v20 = vadd.f32 %v5984_v37, %v5776_v27  ;;  %v6190_v47 = vpop.f32.mrf.mxu0  ;;  %v14573_v27 = vld [vmem:[#allocation61_spill] sm:$0xff] }
 0xa74   :  { %v12201_v0 = vadd.f32 %v6190_v47, %v5982_v35  ;;  %v5367_v59 = vadd.f32 %v14574_v45, %v14573_v27  ;;  %v4362_v35 = vld [vmem:[#allocation2 + $0x62] sm:$0xff] }
 0xa75   :  { %v5572_v5 = vpop.f32.mrf.mxu1 }
 0xa76   :  { %v5573_v49 = vadd.f32 %v5572_v5, %v5364_v9 }
 0xa78   :  { %6263 = vmatmul.f32.gmra.mxu1 %v4361_v6  ;;  %v4363_v6 = vld [vmem:[#allocation2 + $0x6a] sm:$0xff] }
 0xa79   :  { %v5781_v2 = vpop.f32.mrf.mxu2 }
 0xa7a   :  { %v5987_v23 = vpop.f32.mrf.mxu3  ;;  %v5782_v61 = vadd.f32 %v5781_v2, %v5573_v49 }
 0xa7b   :  { %v5988_v13 = vadd.f32 %v5987_v23, %v5779_v12  ;;  %v6193_v37 = vpop.f32.mrf.mxu0 }
 0xa7c   :  { %v12205_v28 = vadd.f32 %v6193_v37, %v5985_v20 }
 0xa7d   :  { %v5575_v15 = vpop.f32.mrf.mxu1 }
 0xa7e   :  { %14575 = vst [vmem:[#allocation33_spill] sm:$0xff] %v12205_v28  ;;  %v5576_v31 = vadd.f32 %v5575_v15, %v5367_v59  ;;  %v4366_v15 = vld [vmem:[#allocation2 + $0x92] sm:$0xff]  ;;  %v4389_v28 = vld [vmem:[#allocation2 + $0x1a2] sm:$0xff] }
 0xa80   :  { %6266 = vmatmul.f32.gmra.mxu1 %v4362_v35  ;;  %v4367_v35 = vld [vmem:[#allocation2 + $0x9a] sm:$0xff] }
 0xa81   :  { %v5784_v47 = vpop.f32.mrf.mxu2 }
 0xa82   :  { %v5990_v50 = vpop.f32.mrf.mxu3  ;;  %v5785_v41 = vadd.f32 %v5784_v47, %v5576_v31  ;;  %v4368_v47 = vld [vmem:[#allocation2 + $0xaa] sm:$0xff] }
 0xa83   :  { %v5991_v11 = vadd.f32 %v5990_v50, %v5782_v61  ;;  %v6196_v12 = vpop.f32.mrf.mxu0  ;;  %v4364_v61 = vld [vmem:[#allocation2 + $0x7a] sm:$0xff] }
 0xa84   :  { %v12207_v5 = vadd.f32 %v6196_v12, %v5988_v13  ;;  %v4365_v13 = vld [vmem:[#allocation2 + $0x82] sm:$0xff]  ;;  %v4369_v12 = vld [vmem:[#allocation2 + $0xb2] sm:$0xff] }
 0xa85   :  { %v12209_v23 = vpop.f32.mrf.mxu1 }
 0xa86   :  { %14576 = vst [vmem:[#allocation31_spill] sm:$0xff] %v12207_v5  ;;  %v4388_v5 = vld [vmem:[#allocation2 + $0x19a] sm:$0xff] }
 0xa87   :  { %14577 = vst [vmem:[#allocation36_spill] sm:$0xff] %v12209_v23  ;;  %v4385_v23 = vld [vmem:[#allocation2 + $0x172] sm:$0xff] }
 0xa88   :  { %6269 = vmatmul.f32.gmra.mxu1 %v4363_v6 }
 0xa8a   :  { %v5993_v9 = vpop.f32.mrf.mxu3 }
 0xa8b   :  { %v5994_v49 = vadd.f32 %v5993_v9, %v5785_v41  ;;  %v6199_v2 = vpop.f32.mrf.mxu0 }
 0xa8c   :  { %v12211_v20 = vadd.f32 %v6199_v2, %v5991_v11  ;;  %v4371_v2 = vld [vmem:[#allocation2 + $0xca] sm:$0xff] }
 0xa8d   :  { %v12213_v37 = vpop.f32.mrf.mxu1 }
 0xa8e   :  { %14578 = vst [vmem:[#allocation39_spill] sm:$0xff] %v12211_v20  ;;  %v4387_v20 = vld [vmem:[#allocation2 + $0x18a] sm:$0xff] }
 0xa8f   :  { %14579 = vst [vmem:[#allocation58_spill] sm:$0xff] %v12213_v37  ;;  %v4384_v37 = vld [vmem:[#allocation2 + $0x16a] sm:$0xff] }
 0xa90   :  { %6272 = vmatmul.f32.gmra.mxu1 %v4364_v61 }
 0xa93   :  { %v6202_v27 = vpop.f32.mrf.mxu0 }
 0xa94   :  { %v12215_v45 = vadd.f32 %v6202_v27, %v5994_v49  ;;  %v4370_v49 = vld [vmem:[#allocation2 + $0xc2] sm:$0xff]  ;;  %v4372_v27 = vld [vmem:[#allocation2 + $0xda] sm:$0xff] }
 0xa95   :  { %v12217_v59 = vpop.f32.mrf.mxu1 }
 0xa96   :  { %14580 = vst [vmem:[#allocation42_spill] sm:$0xff] %v12215_v45  ;;  %v4386_v45 = vld [vmem:[#allocation2 + $0x182] sm:$0xff] }
 0xa97   :  { %14581 = vst [vmem:[#allocation63_spill] sm:$0xff] %v12217_v59  ;;  %v4383_v59 = vld [vmem:[#allocation2 + $0x15a] sm:$0xff] }
 0xa98   :  { %6275 = vmatmul.f32.gmra.mxu1 %v4365_v13 }
 0xa9d   :  { %v12219_v50 = vpop.f32.mrf.mxu1 }
 0xa9e   :  { %14582 = vst [vmem:[#allocation62_spill] sm:$0xff] %v12219_v50  ;;  %v4382_v50 = vld [vmem:[#allocation2 + $0x152] sm:$0xff] }
 0xaa0   :  { %6278 = vmatmul.f32.gmra.mxu1 %v4366_v15  ;;  %v4373_v15 = vld [vmem:[#allocation2 + $0xe2] sm:$0xff] }
 0xaa5   :  { %v12221_v31 = vpop.f32.mrf.mxu1 }
 0xaa6   :  { %14583 = vst [vmem:[#allocation66_spill] sm:$0xff] %v12221_v31  ;;  %v4381_v31 = vld [vmem:[#allocation2 + $0x142] sm:$0xff] }
 0xaa8   :  { %6281 = vmatmul.f32.gmra.mxu1 %v4367_v35 }
 0xaad   :  { %v12223_v11 = vpop.f32.mrf.mxu1 }
 0xaae   :  { %14584 = vst [vmem:[#allocation64_spill] sm:$0xff] %v12223_v11  ;;  %v4380_v11 = vld [vmem:[#allocation2 + $0x13a] sm:$0xff] }
 0xab0   :  { %6284 = vmatmul.f32.gmra.mxu1 %v4368_v47  ;;  %v4374_v47 = vld [vmem:[#allocation2 + $0xf2] sm:$0xff] }
 0xab5   :  { %v12225_v41 = vpop.f32.mrf.mxu1 }
 0xab6   :  { %14585 = vst [vmem:[#allocation45_spill] sm:$0xff] %v12225_v41  ;;  %v4379_v41 = vld [vmem:[#allocation2 + $0x12a] sm:$0xff] }
 0xab8   :  { %6287 = vmatmul.f32.gmra.mxu1 %v4369_v12 }
 0xabd   :  { %v12227_v9 = vpop.f32.mrf.mxu1 }
 0xabe   :  { %14586 = vst [vmem:[#allocation68_spill] sm:$0xff] %v12227_v9  ;;  %v4375_v9 = vld [vmem:[#allocation2 + $0xfa] sm:$0xff] }
 0xac0   :  { %6290 = vmatmul.f32.gmra.mxu1 %v4370_v49 }
 0xac5   :  { %v12229_v6 = vpop.f32.mrf.mxu1 }
 0xac6   :  { %14587 = vst [vmem:[#allocation51_spill] sm:$0xff] %v12229_v6  ;;  %v4376_v6 = vld [vmem:[#allocation2 + $0x10a] sm:$0xff] }
 0xac8   :  { %6293 = vmatmul.f32.gmra.mxu1 %v4371_v2 }
 0xacd   :  { %v12231_v61 = vpop.f32.mrf.mxu1 }
 0xace   :  { %14588 = vst [vmem:[#allocation48_spill] sm:$0xff] %v12231_v61  ;;  %v4377_v61 = vld [vmem:[#allocation2 + $0x112] sm:$0xff] }
 0xad0   :  { %6296 = vmatmul.f32.gmra.mxu1 %v4372_v27 }
 0xad5   :  { %v12233_v13 = vpop.f32.mrf.mxu1 }
 0xad6   :  { %14589 = vst [vmem:[#allocation57_spill] sm:$0xff] %v12233_v13  ;;  %v4378_v13 = vld [vmem:[#allocation2 + $0x122] sm:$0xff] }
 0xad8   :  { %6299 = vmatmul.f32.gmra.mxu1 %v4373_v15 }
 0xadd   :  { %v12235_v35 = vpop.f32.mrf.mxu1 }
 0xae0   :  { %6302 = vmatmul.f32.gmra.mxu1 %v4374_v47 }
 0xae5   :  { %v12237_v12 = vpop.f32.mrf.mxu1 }
 0xae8   :  { %6305 = vmatmul.f32.gmra.mxu1 %v4375_v9 }
 0xaed   :  { %v12239_v49 = vpop.f32.mrf.mxu1 }
 0xaf0   :  { %6308 = vmatmul.f32.gmra.mxu1 %v4376_v6 }
 0xaf5   :  { %v12241_v2 = vpop.f32.mrf.mxu1 }
 0xaf8   :  { %6311 = vmatmul.f32.gmra.mxu1 %v4377_v61 }
 0xafd   :  { %v12243_v27 = vpop.f32.mrf.mxu1 }
 0xb00   :  { %6314 = vmatmul.f32.gmra.mxu1 %v4378_v13 }
 0xb05   :  { %v12245_v15 = vpop.f32.mrf.mxu1 }
 0xb08   :  { %6317 = vmatmul.f32.gmra.mxu1 %v4379_v41 }
 0xb0d   :  { %v12247_v47 = vpop.f32.mrf.mxu1 }
 0xb10   :  { %6320 = vmatmul.f32.gmra.mxu1 %v4380_v11 }
 0xb15   :  { %v12249_v9 = vpop.f32.mrf.mxu1 }
 0xb18   :  { %6323 = vmatmul.f32.gmra.mxu1 %v4381_v31 }
 0xb1d   :  { %v12251_v6 = vpop.f32.mrf.mxu1 }
 0xb20   :  { %6326 = vmatmul.f32.gmra.mxu1 %v4382_v50 }
 0xb25   :  { %v12253_v61 = vpop.f32.mrf.mxu1 }
 0xb28   :  { %6329 = vmatmul.f32.gmra.mxu1 %v4383_v59 }
 0xb2d   :  { %v12255_v13 = vpop.f32.mrf.mxu1 }
 0xb30   :  { %6332 = vmatmul.f32.gmra.mxu1 %v4384_v37 }
 0xb35   :  { %v12257_v41 = vpop.f32.mrf.mxu1 }
 0xb38   :  { %6335 = vmatmul.f32.gmra.mxu1 %v4385_v23 }
 0xb3d   :  { %v12259_v11 = vpop.f32.mrf.mxu1 }
 0xb40   :  { %6338 = vmatmul.f32.gmra.mxu1 %v4386_v45 }
 0xb45   :  { %v12261_v31 = vpop.f32.mrf.mxu1 }
 0xb48   :  { %6341 = vmatmul.f32.gmra.mxu1 %v4387_v20 }
 0xb4d   :  { %v12263_v50 = vpop.f32.mrf.mxu1 }
 0xb4e   :  { %14590 = vst [vmem:[#allocation54_spill] sm:$0xff] %v12263_v50  ;;  %v4393_v50 = vld [vmem:[#allocation2 + $0x202] sm:$0xff] }
 0xb50   :  { %6344 = vmatmul.f32.gmra.mxu1 %v4388_v5 }
 0xb55   :  { %v12265_v59 = vpop.f32.mrf.mxu1 }
 0xb56   :  { %14591 = vst [vmem:[#allocation60_spill] sm:$0xff] %v12265_v59  ;;  %v4394_v59 = vld [vmem:[#allocation2 + $0x212] sm:$0xff] }
 0xb58   :  { %6347 = vmatmul.f32.gmra.mxu1 %v4389_v28 }
 0xb5d   :  { %v12267_v37 = vpop.f32.mrf.mxu1 }
 0xb5e   :  { %14592 = vst [vmem:[#allocation59_spill] sm:$0xff] %v12267_v37  ;;  %v4395_v37 = vld [vmem:[#allocation2 + $0x21a] sm:$0xff] }
 0xb60   :  { %6350 = vmatmul.f32.gmra.mxu1 %v4390_v33 }
 0xb65   :  { %v12269_v23 = vpop.f32.mrf.mxu1 }
 0xb66   :  { %14593 = vst [vmem:[#allocation65_spill] sm:$0xff] %v12269_v23  ;;  %v4396_v23 = vld [vmem:[#allocation2 + $0x22a] sm:$0xff] }
 0xb68   :  { %6353 = vmatmul.f32.gmra.mxu1 %v4391_v24 }
 0xb6d   :  { %v12271_v45 = vpop.f32.mrf.mxu1 }
 0xb6e   :  { %14594 = vst [vmem:[#allocation61_spill] sm:$0xff] %v12271_v45  ;;  %v4397_v45 = vld [vmem:[#allocation2 + $0x232] sm:$0xff] }
 0xb70   :  { %6356 = vmatmul.f32.gmra.mxu1 %v4392_v43 }
 0xb75   :  { %v12273_v20 = vpop.f32.mrf.mxu1 }
 0xb76   :  { %14595 = vst [vmem:[#allocation79_spill] sm:$0xff] %v12273_v20  ;;  %v4398_v20 = vld [vmem:[#allocation2 + $0x242] sm:$0xff] }
 0xb78   :  { %6359 = vmatmul.f32.gmra.mxu1 %v4393_v50 }
 0xb7d   :  { %v12275_v5 = vpop.f32.mrf.mxu1 }
 0xb7e   :  { %14596 = vst [vmem:[#allocation102_spill] sm:$0xff] %v12275_v5  ;;  %v4399_v5 = vld [vmem:[#allocation2 + $0x24a] sm:$0xff] }
 0xb80   :  { %6362 = vmatmul.f32.gmra.mxu1 %v4394_v59 }
 0xb85   :  { %v12277_v28 = vpop.f32.mrf.mxu1 }
 0xb86   :  { %14597 = vst [vmem:[#allocation103_spill] sm:$0xff] %v12277_v28  ;;  %v4400_v28 = vld [vmem:[#allocation2 + $0x25a] sm:$0xff] }
 0xb88   :  { %6365 = vmatmul.f32.gmra.mxu1 %v4395_v37 }
 0xb8d   :  { %v12279_v33 = vpop.f32.mrf.mxu1 }
 0xb8e   :  { %14598 = vst [vmem:[#allocation104_spill] sm:$0xff] %v12279_v33  ;;  %v4401_v33 = vld [vmem:[#allocation2 + $0x262] sm:$0xff] }
 0xb90   :  { %6368 = vmatmul.f32.gmra.mxu1 %v4396_v23 }
 0xb95   :  { %v12281_v24 = vpop.f32.mrf.mxu1 }
 0xb96   :  { %14599 = vst [vmem:[#allocation105_spill] sm:$0xff] %v12281_v24  ;;  %v4402_v24 = vld [vmem:[#allocation2 + $0x272] sm:$0xff] }
 0xb98   :  { %6371 = vmatmul.f32.gmra.mxu1 %v4397_v45 }
 0xb9d   :  { %v12283_v43 = vpop.f32.mrf.mxu1 }
 0xb9e   :  { %14600 = vst [vmem:[#allocation106_spill] sm:$0xff] %v12283_v43  ;;  %v4403_v43 = vld [vmem:[#allocation2 + $0x27a] sm:$0xff] }
 0xba0   :  { %6374 = vmatmul.f32.gmra.mxu1 %v4398_v20 }
 0xba5   :  { %v12285_v50 = vpop.f32.mrf.mxu1 }
 0xba6   :  { %14601 = vst [vmem:[#allocation107_spill] sm:$0xff] %v12285_v50  ;;  %v4404_v50 = vld [vmem:[#allocation2 + $0x28a] sm:$0xff] }
 0xba8   :  { %6377 = vmatmul.f32.gmra.mxu1 %v4399_v5 }
 0xbad   :  { %v12287_v59 = vpop.f32.mrf.mxu1 }
 0xbae   :  { %14602 = vst [vmem:[#allocation108_spill] sm:$0xff] %v12287_v59  ;;  %v4405_v59 = vld [vmem:[#allocation2 + $0x292] sm:$0xff] }
 0xbb0   :  { %6380 = vmatmul.f32.gmra.mxu1 %v4400_v28 }
 0xbb5   :  { %v12289_v37 = vpop.f32.mrf.mxu1 }
 0xbb6   :  { %14603 = vst [vmem:[#allocation109_spill] sm:$0xff] %v12289_v37  ;;  %v4406_v37 = vld [vmem:[#allocation2 + $0x2a2] sm:$0xff] }
 0xbb8   :  { %6383 = vmatmul.f32.gmra.mxu1 %v4401_v33 }
 0xbbd   :  { %v12291_v23 = vpop.f32.mrf.mxu1 }
 0xbbe   :  { %14604 = vst [vmem:[#allocation110_spill] sm:$0xff] %v12291_v23  ;;  %v4407_v23 = vld [vmem:[#allocation2 + $0x2aa] sm:$0xff] }
 0xbc0   :  { %6386 = vmatmul.f32.gmra.mxu1 %v4402_v24 }
 0xbc5   :  { %v12293_v45 = vpop.f32.mrf.mxu1 }
 0xbc6   :  { %14605 = vst [vmem:[#allocation111_spill] sm:$0xff] %v12293_v45  ;;  %v4408_v45 = vld [vmem:[#allocation2 + $0x2ba] sm:$0xff] }
 0xbc8   :  { %6389 = vmatmul.f32.gmra.mxu1 %v4403_v43 }
 0xbcd   :  { %v12295_v20 = vpop.f32.mrf.mxu1 }
 0xbce   :  { %14606 = vst [vmem:[#allocation112_spill] sm:$0xff] %v12295_v20  ;;  %v4409_v20 = vld [vmem:[#allocation2 + $0x2c2] sm:$0xff] }
 0xbd0   :  { %6392 = vmatmul.f32.gmra.mxu1 %v4404_v50 }
 0xbd5   :  { %v12297_v5 = vpop.f32.mrf.mxu1 }
 0xbd6   :  { %14607 = vst [vmem:[#allocation113_spill] sm:$0xff] %v12297_v5  ;;  %v4410_v5 = vld [vmem:[#allocation2 + $0x2d2] sm:$0xff] }
 0xbd8   :  { %6395 = vmatmul.f32.gmra.mxu1 %v4405_v59 }
 0xbdd   :  { %v12299_v28 = vpop.f32.mrf.mxu1 }
 0xbde   :  { %14608 = vst [vmem:[#allocation114_spill] sm:$0xff] %v12299_v28  ;;  %v4411_v28 = vld [vmem:[#allocation2 + $0x2da] sm:$0xff] }
 0xbe0   :  { %6398 = vmatmul.f32.gmra.mxu1 %v4406_v37 }
 0xbe5   :  { %v12301_v33 = vpop.f32.mrf.mxu1 }
 0xbe6   :  { %14609 = vst [vmem:[#allocation115_spill] sm:$0xff] %v12301_v33  ;;  %v4412_v33 = vld [vmem:[#allocation2 + $0x2ea] sm:$0xff] }
 0xbe8   :  { %6401 = vmatmul.f32.gmra.mxu1 %v4407_v23 }
 0xbed   :  { %v12303_v24 = vpop.f32.mrf.mxu1 }
 0xbee   :  { %14610 = vst [vmem:[#allocation116_spill] sm:$0xff] %v12303_v24  ;;  %v4413_v24 = vld [vmem:[#allocation2 + $0x2f2] sm:$0xff] }
 0xbf0   :  { %6404 = vmatmul.f32.gmra.mxu1 %v4408_v45 }
 0xbf5   :  { %v12305_v43 = vpop.f32.mrf.mxu1 }
 0xbf6   :  { %14611 = vst [vmem:[#allocation117_spill] sm:$0xff] %v12305_v43 }
 0xbf8   :  { %6407 = vmatmul.f32.gmra.mxu1 %v4409_v20  ;;  %v4414_v20 = vld [vmem:[#allocation2 + $0x302] sm:$0xff] }
 0xbfd   :  { %v12307_v50 = vpop.f32.mrf.mxu1 }
 0xbfe   :  { %14612 = vst [vmem:[#allocation118_spill] sm:$0xff] %v12307_v50 }
 0xc00   :  { %6410 = vmatmul.f32.gmra.mxu1 %v4410_v5 }
 0xc05   :  { %v12309_v59 = vpop.f32.mrf.mxu1 }
 0xc06   :  { %14613 = vst [vmem:[#allocation119_spill] sm:$0xff] %v12309_v59  ;;  %v4415_v59 = vld [vmem:[#allocation2 + $0x30a] sm:$0xff] }
 0xc08   :  { %6413 = vmatmul.f32.gmra.mxu1 %v4411_v28 }
 0xc0d   :  { %v12311_v37 = vpop.f32.mrf.mxu1 }
 0xc0e   :  { %14614 = vst [vmem:[#allocation120_spill] sm:$0xff] %v12311_v37 }
 0xc10   :  { %6416 = vmatmul.f32.gmra.mxu1 %v4412_v33  ;;  %v4416_v33 = vld [vmem:[#allocation2 + $0x31a] sm:$0xff] }
 0xc15   :  { %v12313_v23 = vpop.f32.mrf.mxu1 }
 0xc16   :  { %14615 = vst [vmem:[#allocation121_spill] sm:$0xff] %v12313_v23 }
 0xc18   :  { %6419 = vmatmul.f32.gmra.mxu1 %v4413_v24 }
 0xc1d   :  { %v6375_v45 = vpop.f32.mrf.mxu1 }
 0xc1e   :  { %v12316_v43 = vadd.f32 %v6375_v45, %v12168_v40  ;;  %v4417_v40 = vld [vmem:[#allocation2 + $0x322] sm:$0xff] }
 0xc20   :  { %14616 = vst [vmem:[#allocation122_spill] sm:$0xff] %v12316_v43  ;;  %6422 = vmatmul.f32.gmra.mxu1 %v4414_v20 }
 0xc25   :  { %v6378_v50 = vpop.f32.mrf.mxu1 }
 0xc26   :  { %v12319_v5 = vadd.f32 %v6378_v50, %v12172_v58  ;;  %v4418_v58 = vld [vmem:[#allocation2 + $0x332] sm:$0xff] }
 0xc28   :  { %14617 = vst [vmem:[#allocation123_spill] sm:$0xff] %v12319_v5  ;;  %6425 = vmatmul.f32.gmra.mxu1 %v4415_v59 }
 0xc2d   :  { %v6381_v28 = vpop.f32.mrf.mxu1 }
 0xc2e   :  { %v12322_v37 = vadd.f32 %v6381_v28, %v12176_v21  ;;  %v6050_v21 = vadd.f32 %v11932_v30, %v11924_v18  ;;  %v4419_v28 = vld [vmem:[#allocation2 + $0x33a] sm:$0xff]  ;;  %v6059_v18 = vadd.f32 %v11950_v26, %v11942_v51  ;;  %v4420_v30 = vld [vmem:[#allocation2 + $0x34a] sm:$0xff] }
 0xc30   :  { %14618 = vst [vmem:[#allocation124_spill] sm:$0xff] %v12322_v37  ;;  %6428 = vmatmul.f32.gmra.mxu1 %v4416_v33  ;;  %v6056_v33 = vadd.f32 %v11944_v36, %v11936_v7  ;;  %v6062_v7 = vadd.f32 %v11956_v29, %v11948_v22  ;;  %v12367_v26 = vadd.f32 %v12243_v27, %v6059_v18 }
 0xc32   :  { %v12376_v29 = vadd.f32 %v12245_v15, %v6062_v7 }
 0xc34   :  { %v6523_v15 = vmul.f32 %v12376_v29, %v12376_v29 }
 0xc35   :  { %v6384_v23 = vpop.f32.mrf.mxu1 }
 0xc36   :  { %v12325_v24 = vadd.f32 %v6384_v23, %v12180_v53  ;;  %v6047_v53 = vadd.f32 %v11926_v3, %v11918_v32  ;;  %v6053_v23 = vadd.f32 %v11938_v42, %v11930_v10  ;;  %v12355_v3 = vadd.f32 %v12241_v2, %v6056_v33 }
 0xc37   :  { %v6068_v2 = vadd.f32 %v11968_v62, %v11960_v63  ;;  %v4421_v62 = vld [vmem:[#allocation2 + $0x352] sm:$0xff]  ;;  %v6077_v33 = vadd.f32 %v11986_v4, %v11978_v8  ;;  %v6083_v4 = vadd.f32 %v12001_v1, %v11990_v48 }
 0xc38   :  { %14619 = vst [vmem:[#allocation125_spill] sm:$0xff] %v12325_v24  ;;  %6431 = vmatmul.f32.gmra.mxu1 %v4417_v40  ;;  %v12348_v40 = vadd.f32 %v12239_v49, %v6053_v23  ;;  %v6521_v22 = vmul.f32 %v12355_v3, %v12355_v3 }
 0xc39   :  { %v12438_v1 = vadd.f32 %v12259_v11, %v6083_v4  ;;  %v14644_v4 = vld [vmem:[#allocation100_spill] sm:$0xff] }
 0xc3a   :  { %v6520_v51 = vmul.f32 %v12348_v40, %v12348_v40 }
 0xc3b   :  { %14628 = vst [vmem:[#allocation134_spill] sm:$0xff] %v12438_v1  ;;  %v6530_v11 = vmul.f32 %v12438_v1, %v12438_v1 }
 0xc3d   :  { %v6387_v45 = vpop.f32.mrf.mxu1 }
 0xc3e   :  { %v12328_v20 = vadd.f32 %v6387_v45, %v12185_v56  ;;  %v12340_v56 = vadd.f32 %v12237_v12, %v6050_v21  ;;  %v6522_v45 = vmul.f32 %v12367_v26, %v12367_v26  ;;  %v12392_v21 = vadd.f32 %v12249_v9, %v6068_v2 }
 0xc40   :  { %14620 = vst [vmem:[#allocation126_spill] sm:$0xff] %v12328_v20  ;;  %6434 = vmatmul.f32.gmra.mxu1 %v4418_v58  ;;  %v6519_v32 = vmul.f32 %v12340_v56, %v12340_v56 }
 0xc41   :  { %14623 = vst [vmem:[#allocation129_spill] sm:$0xff] %v12392_v21 }
 0xc45   :  { %v6390_v50 = vpop.f32.mrf.mxu1 }
 0xc46   :  { %v12331_v59 = vadd.f32 %v6390_v50, %v12189_v44  ;;  %v12345_v44 = vadd.f32 %v12235_v35, %v6047_v53 }
 0xc48   :  { %14621 = vst [vmem:[#allocation127_spill] sm:$0xff] %v12331_v59  ;;  %6437 = vmatmul.f32.gmra.mxu1 %v4419_v28  ;;  %v6518_v36 = vmul.f32 %v12345_v44, %v12345_v44  ;;  %v6449_v35 = vadd.f32 %v12340_v56, %v12345_v44 }
 0xc4a   :  { %v6582_v12 = vadd.f32 %v6519_v32, %v6518_v36  ;;  %v6450_v49 = vadd.f32 %v6449_v35, %v12348_v40 }
 0xc4c   :  { %v6583_v27 = vadd.f32 %v6582_v12, %v6520_v51 }
 0xc4d   :  { %v6393_v10 = vpop.f32.mrf.mxu1 }
 0xc4e   :  { %v12358_v42 = vadd.f32 %v6393_v10, %v12193_v14  ;;  %v6065_v14 = vadd.f32 %v11962_v60, %v11954_v19  ;;  %v6451_v19 = vadd.f32 %v6450_v49, %v12355_v3  ;;  %v6071_v60 = vadd.f32 %v11974_v38, %v11966_v46  ;;  %v14631_v49 = vld [vmem:[#allocation94_spill] sm:$0xff] }
 0xc4f   :  { %v6584_v50 = vadd.f32 %v6583_v27, %v6521_v22 }
 0xc50   :  { %14622 = vst [vmem:[#allocation128_spill] sm:$0xff] %v12358_v42  ;;  %6440 = vmatmul.f32.gmra.mxu1 %v4420_v30  ;;  %v12384_v58 = vadd.f32 %v12247_v47, %v6065_v14  ;;  %v6452_v28 = vadd.f32 %v6451_v19, %v12367_v26  ;;  %v6074_v47 = vadd.f32 %v11980_v54, %v11972_v17 }
 0xc51   :  { %v6585_v23 = vadd.f32 %v6584_v50, %v6522_v45  ;;  %v12403_v38 = vadd.f32 %v12251_v6, %v6071_v60  ;;  %v6080_v54 = vadd.f32 %v11992_v57, %v11984_v25  ;;  %v12419_v30 = vadd.f32 %v12255_v13, %v6077_v33  ;;  %v14632_v45 = vld [vmem:[#allocation54_spill] sm:$0xff]  ;;  %v14635_v60 = vld [vmem:[#allocation96_spill] sm:$0xff] }
 0xc52   :  { %v6524_v46 = vmul.f32 %v12384_v58, %v12384_v58  ;;  %v6453_v9 = vadd.f32 %v6452_v28, %v12376_v29  ;;  %v12411_v32 = vadd.f32 %v12253_v61, %v6074_v47  ;;  %v6086_v13 = vadd.f32 %v12008_v52, %v11996_v16  ;;  %v14630_v52 = vld [vmem:[#allocation91_spill] sm:$0xff]  ;;  %v14640_v33 = vld [vmem:[#allocation98_spill] sm:$0xff] }
 0xc53   :  { %14624 = vst [vmem:[#allocation130_spill] sm:$0xff] %v12403_v38  ;;  %v6586_v18 = vadd.f32 %v6585_v23, %v6523_v15  ;;  %v6526_v10 = vmul.f32 %v12403_v38, %v12403_v38  ;;  %v12427_v36 = vadd.f32 %v12257_v41, %v6080_v54  ;;  %v6528_v48 = vmul.f32 %v12419_v30, %v12419_v30  ;;  %v14638_v23 = vld [vmem:[#allocation33_spill] sm:$0xff]  ;;  %v14641_v54 = vld [vmem:[#allocation59_spill] sm:$0xff] }
 0xc54   :  { %14625 = vst [vmem:[#allocation131_spill] sm:$0xff] %v12411_v32  ;;  %v6454_v17 = vadd.f32 %v6453_v9, %v12384_v58  ;;  %v6527_v61 = vmul.f32 %v12411_v32, %v12411_v32  ;;  %v6089_v41 = vadd.f32 %v12014_v39, %v12005_v55  ;;  %v12446_v22 = vadd.f32 %v12261_v31, %v6086_v13  ;;  %v14634_v39 = vld [vmem:[#allocation40_spill] sm:$0xff]  ;;  %v14639_v9 = vld [vmem:[#allocation95_spill] sm:$0xff] }
 0xc55   :  { %v6396_v63 = vpop.f32.mrf.mxu1  ;;  %v6587_v6 = vadd.f32 %v6586_v18, %v6524_v46  ;;  %14626 = vst [vmem:[#allocation132_spill] sm:$0xff] %v12419_v30  ;;  %v6092_v2 = vadd.f32 %v14631_v49, %v14630_v52  ;;  %v6095_v50 = vadd.f32 %v14635_v60, %v14634_v39  ;;  %v6098_v18 = vadd.f32 %v14640_v33, %v14639_v9  ;;  %v14649_v49 = vld [vmem:[#allocation61_spill] sm:$0xff]  ;;  %v12498_v39 = vpop.f32.mrf.mxu0  ;;  %v14656_v9 = vld [vmem:[#allocation86_spill] sm:$0xff]  ;;  %v14657_v33 = vld [vmem:[#allocation43_spill] sm:$0xff] }
 0xc56   :  { %v12396_v53 = vadd.f32 %v6396_v63, %v12197_v34  ;;  %v6525_v34 = vmul.f32 %v12392_v21, %v12392_v21  ;;  %v6455_v8 = vadd.f32 %v6454_v17, %v12392_v21  ;;  %14627 = vst [vmem:[#allocation133_spill] sm:$0xff] %v12427_v36  ;;  %v12454_v19 = vadd.f32 %v14632_v45, %v6089_v41  ;;  %v14636_v63 = vld [vmem:[#allocation60_spill] sm:$0xff]  ;;  %v14648_v41 = vld [vmem:[#allocation101_spill] sm:$0xff] }
 0xc57   :  { %14629 = vst [vmem:[#allocation135_spill] sm:$0xff] %v12446_v22  ;;  %v6531_v31 = vmul.f32 %v12446_v22, %v12446_v22  ;;  %v14652_v45 = vld [vmem:[#allocation92_spill] sm:$0xff] }
 0xc58   :  { %6443 = vmatmul.f32.gmra.mxu1 %v4421_v62  ;;  %v6588_v7 = vadd.f32 %v6587_v6, %v6525_v34  ;;  %v6456_v57 = vadd.f32 %v6455_v8, %v12403_v38  ;;  %14633 = vst [vmem:[#allocation91_spill] sm:$0xff] %v12454_v19  ;;  %v12462_v62 = vadd.f32 %v14636_v63, %v6092_v2  ;;  %v14643_v8 = vld [vmem:[#allocation97_spill] sm:$0xff]  ;;  %v14752_v38 = vld [vmem:[#allocation75_spill] sm:$0xff] }
 0xc59   :  { %v6532_v17 = vmul.f32 %v12454_v19, %v12454_v19  ;;  %v12473_v6 = vadd.f32 %v14641_v54, %v6095_v50  ;;  %v14658_v54 = vld [vmem:[#allocation102_spill] sm:$0xff] }
 0xc5a   :  { %v6589_v35 = vadd.f32 %v6588_v7, %v6526_v10  ;;  %v6457_v14 = vadd.f32 %v6456_v57, %v12411_v32  ;;  %14637 = vst [vmem:[#allocation94_spill] sm:$0xff] %v12462_v62  ;;  %v6101_v7 = vadd.f32 %v14644_v4, %v14643_v8  ;;  %v14645_v57 = vld [vmem:[#allocation65_spill] sm:$0xff] }
 0xc5b   :  { %14642 = vst [vmem:[#allocation54_spill] sm:$0xff] %v12473_v6  ;;  %v12481_v13 = vadd.f32 %v14645_v57, %v6098_v18  ;;  %v6534_v52 = vmul.f32 %v12473_v6, %v12473_v6  ;;  %v6110_v18 = vadd.f32 %v14657_v33, %v14656_v9  ;;  %v14660_v4 = vld [vmem:[#allocation41_spill] sm:$0xff]  ;;  %v14670_v33 = vld [vmem:[#allocation44_spill] sm:$0xff] }
 0xc5c   :  { %v6590_v12 = vadd.f32 %v6589_v35, %v6527_v61  ;;  %v6458_v16 = vadd.f32 %v6457_v14, %v12419_v30  ;;  %v12483_v35 = vpop.f32.mrf.mxu2  ;;  %v14647_v14 = vld [vmem:[#allocation99_spill] sm:$0xff]  ;;  %v12493_v2 = vadd.f32 %v14649_v49, %v6101_v7  ;;  %v14661_v7 = vld [vmem:[#allocation46_spill] sm:$0xff] }
 0xc5d   :  { %v6399_v25 = vpop.f32.mrf.mxu1  ;;  %14646 = vst [vmem:[#allocation40_spill] sm:$0xff] %v12481_v13  ;;  %v6535_v50 = vmul.f32 %v12481_v13, %v12481_v13  ;;  %v14748_v30 = vld [vmem:[#allocation63_spill] sm:$0xff] }
 0xc5e   :  { %v12431_v51 = vadd.f32 %v6399_v25, %v12201_v0  ;;  %v6529_v0 = vmul.f32 %v12427_v36, %v12427_v36  ;;  %v6591_v27 = vadd.f32 %v6590_v12, %v6528_v48  ;;  %v6459_v55 = vadd.f32 %v6458_v16, %v12427_v36  ;;  %14650 = vst [vmem:[#allocation96_spill] sm:$0xff] %v12493_v2 }
 0xc5f   :  { %v6533_v25 = vmul.f32 %v12462_v62, %v12462_v62  ;;  %v6104_v12 = vadd.f32 %v14648_v41, %v14647_v14 }
 0xc60   :  { %v6592_v15 = vadd.f32 %v6591_v27, %v6529_v0  ;;  %v6460_v47 = vadd.f32 %v6459_v55, %v12438_v1  ;;  %v12488_v0 = vpop.f32.mrf.mxu3 }
 0xc62   :  { %v6593_v34 = vadd.f32 %v6592_v15, %v6530_v11  ;;  %v6461_v10 = vadd.f32 %v6460_v47, %v12446_v22  ;;  %v14651_v11 = vld [vmem:[#allocation85_spill] sm:$0xff]  ;;  %v14653_v15 = vld [vmem:[#allocation79_spill] sm:$0xff] }
 0xc63   :  { %v6107_v55 = vadd.f32 %v14652_v45, %v14651_v11  ;;  %v14655_v47 = vld [vmem:[#allocation31_spill] sm:$0xff]  ;;  %v14666_v11 = vld [vmem:[#allocation104_spill] sm:$0xff] }
 0xc64   :  { %v6594_v61 = vadd.f32 %v6593_v34, %v6531_v31  ;;  %v6462_v48 = vadd.f32 %v6461_v10, %v12454_v19  ;;  %v12503_v31 = vadd.f32 %v14653_v15, %v6104_v12  ;;  %v14664_v12 = vld [vmem:[#allocation89_spill] sm:$0xff] }
 0xc65   :  { %v6402_v28 = vpop.f32.mrf.mxu1  ;;  %v12514_v10 = vadd.f32 %v14658_v54, %v6107_v55  ;;  %v12532_v55 = vpop.f32.mrf.mxu2  ;;  %v14672_v54 = vld [vmem:[#allocation39_spill] sm:$0xff] }
 0xc66   :  { %v12466_v46 = vadd.f32 %v6402_v28, %v14638_v23  ;;  %v6595_v16 = vadd.f32 %v6594_v61, %v6532_v17  ;;  %v6463_v27 = vadd.f32 %v6462_v48, %v12462_v62  ;;  %14654 = vst [vmem:[#allocation60_spill] sm:$0xff] %v12503_v31  ;;  %v6536_v17 = vmul.f32 %v12493_v2, %v12493_v2  ;;  %v14662_v48 = vld [vmem:[#allocation103_spill] sm:$0xff] }
 0xc67   :  { %14659 = vst [vmem:[#allocation33_spill] sm:$0xff] %v12514_v10  ;;  %v6113_v61 = vadd.f32 %v14661_v7, %v14660_v4  ;;  %v6537_v57 = vmul.f32 %v12503_v31, %v12503_v31  ;;  %v12522_v14 = vadd.f32 %v14662_v48, %v6110_v18  ;;  %v14671_v18 = vld [vmem:[#allocation52_spill] sm:$0xff]  ;;  %v12548_v4 = vpop.f32.mrf.mxu0 }
 0xc68   :  { %v6596_v60 = vadd.f32 %v6595_v16, %v6533_v25  ;;  %v6464_v28 = vadd.f32 %v6463_v27, %v12473_v6  ;;  %v14665_v16 = vld [vmem:[#allocation49_spill] sm:$0xff]  ;;  %v6538_v27 = vmul.f32 %v12514_v10, %v12514_v10 }
 0xc69   :  { %14663 = vst [vmem:[#allocation95_spill] sm:$0xff] %v12522_v14  ;;  %v12530_v45 = vadd.f32 %v14666_v11, %v6113_v61  ;;  %v14677_v11 = vld [vmem:[#allocation50_spill] sm:$0xff] }
 0xc6a   :  { %v6597_v34 = vadd.f32 %v6596_v60, %v6534_v52  ;;  %v6465_v8 = vadd.f32 %v6464_v28, %v12481_v13  ;;  %v6116_v52 = vadd.f32 %v14665_v16, %v14664_v12  ;;  %v14668_v28 = vld [vmem:[#allocation105_spill] sm:$0xff]  ;;  %v14675_v12 = vld [vmem:[#allocation106_spill] sm:$0xff] }
 0xc6b   :  { %14667 = vst [vmem:[#allocation98_spill] sm:$0xff] %v12530_v45  ;;  %v6540_v61 = vmul.f32 %v12530_v45, %v12530_v45 }
 0xc6c   :  { %v6598_v25 = vadd.f32 %v6597_v34, %v6535_v50  ;;  %v6466_v41 = vadd.f32 %v6465_v8, %v12493_v2  ;;  %v12535_v50 = vpop.f32.mrf.mxu3  ;;  %v6119_v34 = vadd.f32 %v14671_v18, %v14670_v33  ;;  %v14681_v18 = vld [vmem:[#allocation53_spill] sm:$0xff] }
 0xc6d   :  { %v6405_v63 = vpop.f32.mrf.mxu1 }
 0xc6e   :  { %v12507_v23 = vadd.f32 %v6405_v63, %v14655_v47  ;;  %v6599_v49 = vadd.f32 %v6598_v25, %v6536_v17  ;;  %v6467_v60 = vadd.f32 %v6466_v41, %v12503_v31  ;;  %v6539_v63 = vmul.f32 %v12522_v14, %v12522_v14  ;;  %v14673_v25 = vld [vmem:[#allocation47_spill] sm:$0xff] }
 0xc6f   :  { %v12540_v47 = vadd.f32 %v14668_v28, %v6116_v52  ;;  %v12556_v16 = vadd.f32 %v14675_v12, %v6119_v34  ;;  %v14683_v34 = vld [vmem:[#allocation108_spill] sm:$0xff]  ;;  %v14686_v12 = vld [vmem:[#allocation10_spill] sm:$0xff] }
 0xc70   :  { %v6600_v15 = vadd.f32 %v6599_v49, %v6537_v57  ;;  %v6468_v17 = vadd.f32 %v6467_v60, %v12514_v10  ;;  %v14674_v57 = vld [vmem:[#allocation55_spill] sm:$0xff]  ;;  %v14678_v60 = vld [vmem:[#allocation93_spill] sm:$0xff] }
 0xc71   :  { %14669 = vst [vmem:[#allocation59_spill] sm:$0xff] %v12540_v47  ;;  %v6122_v48 = vadd.f32 %v14674_v57, %v14673_v25  ;;  %v6541_v49 = vmul.f32 %v12540_v47, %v12540_v47  ;;  %v6125_v28 = vadd.f32 %v14678_v60, %v14677_v11  ;;  %v14685_v57 = vld [vmem:[#allocation67_spill] sm:$0xff] }
 0xc72   :  { %v6601_v7 = vadd.f32 %v6600_v15, %v6538_v27  ;;  %v6469_v41 = vadd.f32 %v6468_v17, %v12522_v14  ;;  %14676 = vst [vmem:[#allocation97_spill] sm:$0xff] %v12556_v16  ;;  %v14679_v15 = vld [vmem:[#allocation107_spill] sm:$0xff]  ;;  %v6131_v11 = vadd.f32 %v14686_v12, %v14685_v57  ;;  %v14692_v57 = vld [vmem:[#allocation110_spill] sm:$0xff]  ;;  %v12599_v14 = vpop.f32.mrf.mxu0 }
 0xc74   :  { %v6602_v52 = vadd.f32 %v6601_v7, %v6539_v63  ;;  %v6470_v27 = vadd.f32 %v6469_v41, %v12530_v45  ;;  %v6542_v63 = vmul.f32 %v12556_v16, %v12556_v16  ;;  %v12572_v7 = vadd.f32 %v14683_v34, %v6125_v28  ;;  %v12576_v45 = vpop.f32.mrf.mxu2  ;;  %v14690_v28 = vld [vmem:[#allocation56_spill] sm:$0xff] }
 0xc75   :  { %v6408_v9 = vpop.f32.mrf.mxu1  ;;  %v12595_v12 = vadd.f32 %v14692_v57, %v6131_v11  ;;  %v14700_v57 = vld [vmem:[#allocation112_spill] sm:$0xff] }
 0xc76   :  { %v12546_v8 = vadd.f32 %v6408_v9, %v14672_v54  ;;  %v12564_v9 = vadd.f32 %v14679_v15, %v6122_v48  ;;  %v6603_v33 = vadd.f32 %v6602_v52, %v6540_v61  ;;  %v14682_v54 = vld [vmem:[#allocation32_spill] sm:$0xff]  ;;  %v6471_v17 = vadd.f32 %v6470_v27, %v12540_v47  ;;  %14684 = vst [vmem:[#allocation65_spill] sm:$0xff] %v12572_v7  ;;  %v14687_v52 = vld [vmem:[#allocation109_spill] sm:$0xff]  ;;  %v14689_v15 = vld [vmem:[#allocation42_spill] sm:$0xff]  ;;  %v12589_v47 = vpop.f32.mrf.mxu3 }
 0xc77   :  { %v6128_v25 = vadd.f32 %v14682_v54, %v14681_v18  ;;  %v14691_v54 = vld [vmem:[#allocation12_spill] sm:$0xff]  ;;  %14693 = vst [vmem:[#allocation101_spill] sm:$0xff] %v12595_v12 }
 0xc78   :  { %14680 = vst [vmem:[#allocation100_spill] sm:$0xff] %v12564_v9  ;;  %v6604_v60 = vadd.f32 %v6603_v33, %v6541_v49  ;;  %v6472_v61 = vadd.f32 %v6471_v17, %v12556_v16  ;;  %v6543_v48 = vmul.f32 %v12564_v9, %v12564_v9  ;;  %v6134_v34 = vadd.f32 %v14691_v54, %v14690_v28  ;;  %v14694_v16 = vld [vmem:[#allocation9_spill] sm:$0xff]  ;;  %v14699_v54 = vld [vmem:[#allocation16_spill] sm:$0xff] }
 0xc79   :  { %v12582_v27 = vadd.f32 %v14687_v52, %v6128_v25  ;;  %v6544_v17 = vmul.f32 %v12572_v7, %v12572_v7  ;;  %v14695_v25 = vld [vmem:[#allocation14_spill] sm:$0xff] }
 0xc7a   :  { %v6605_v49 = vadd.f32 %v6604_v60, %v6542_v63  ;;  %v6473_v33 = vadd.f32 %v6472_v61, %v12564_v9  ;;  %v6137_v52 = vadd.f32 %v14695_v25, %v14694_v16  ;;  %v14696_v63 = vld [vmem:[#allocation111_spill] sm:$0xff]  ;;  %v6546_v16 = vmul.f32 %v12595_v12, %v12595_v12  ;;  %v12647_v13 = vpop.f32.mrf.mxu0 }
 0xc7b   :  { %14688 = vst [vmem:[#allocation99_spill] sm:$0xff] %v12582_v27  ;;  %v6545_v28 = vmul.f32 %v12582_v27, %v12582_v27  ;;  %v12605_v60 = vadd.f32 %v14696_v63, %v6134_v34  ;;  %v14698_v61 = vld [vmem:[#allocation11_spill] sm:$0xff] }
 0xc7c   :  { %v6140_v9 = vadd.f32 %v14699_v54, %v14698_v61  ;;  %v12613_v25 = vadd.f32 %v14700_v57, %v6137_v52  ;;  %v14707_v61 = vld [vmem:[#allocation20_spill] sm:$0xff] }
 0xc7d   :  { %v6411_v41 = vpop.f32.mrf.mxu1  ;;  %14697 = vst [vmem:[#allocation61_spill] sm:$0xff] %v12605_v60  ;;  %v6547_v63 = vmul.f32 %v12605_v60, %v12605_v60 }
 0xc7e   :  { %v12585_v18 = vadd.f32 %v6411_v41, %v14689_v15  ;;  %v6606_v41 = vadd.f32 %v6605_v49, %v6543_v48  ;;  %v6474_v15 = vadd.f32 %v6473_v33, %v12572_v7  ;;  %14701 = vst [vmem:[#allocation85_spill] sm:$0xff] %v12613_v25  ;;  %v14702_v48 = vld [vmem:[#allocation13_spill] sm:$0xff]  ;;  %v14703_v49 = vld [vmem:[#allocation18_spill] sm:$0xff]  ;;  %v12637_v2 = vpop.f32.mrf.mxu3 }
 0xc7f   :  { %v6143_v33 = vadd.f32 %v14703_v49, %v14702_v48  ;;  %v6548_v48 = vmul.f32 %v12613_v25, %v12613_v25  ;;  %v14711_v49 = vld [vmem:[#allocation22_spill] sm:$0xff] }
 0xc80   :  { %v6607_v10 = vadd.f32 %v6606_v41, %v6544_v17  ;;  %v6475_v11 = vadd.f32 %v6474_v15, %v12582_v27  ;;  %v14704_v17 = vld [vmem:[#allocation113_spill] sm:$0xff]  ;;  %v14706_v15 = vld [vmem:[#allocation15_spill] sm:$0xff]  ;;  %v12627_v27 = vpop.f32.mrf.mxu2 }
 0xc81   :  { %v12623_v41 = vadd.f32 %v14704_v17, %v6140_v9  ;;  %v6146_v54 = vadd.f32 %v14707_v61, %v14706_v15  ;;  %v14715_v61 = vld [vmem:[#allocation24_spill] sm:$0xff] }
 0xc82   :  { %v6608_v31 = vadd.f32 %v6607_v10, %v6545_v28  ;;  %v6476_v34 = vadd.f32 %v6475_v11, %v12595_v12  ;;  %v14708_v10 = vld [vmem:[#allocation114_spill] sm:$0xff]  ;;  %v14710_v11 = vld [vmem:[#allocation17_spill] sm:$0xff] }
 0xc83   :  { %14705 = vst [vmem:[#allocation92_spill] sm:$0xff] %v12623_v41  ;;  %v12633_v28 = vadd.f32 %v14708_v10, %v6143_v33  ;;  %v6149_v12 = vadd.f32 %v14711_v49, %v14710_v11  ;;  %v6549_v15 = vmul.f32 %v12623_v41, %v12623_v41  ;;  %v14719_v49 = vld [vmem:[#allocation26_spill] sm:$0xff] }
 0xc84   :  { %v6609_v52 = vadd.f32 %v6608_v31, %v6546_v16  ;;  %v6477_v57 = vadd.f32 %v6476_v34, %v12605_v60  ;;  %v14712_v31 = vld [vmem:[#allocation115_spill] sm:$0xff] }
 0xc85   :  { %v12617_v7 = vpop.f32.mrf.mxu1  ;;  %14709 = vst [vmem:[#allocation79_spill] sm:$0xff] %v12633_v28  ;;  %v12643_v16 = vadd.f32 %v14712_v31, %v6146_v54  ;;  %v14714_v34 = vld [vmem:[#allocation19_spill] sm:$0xff]  ;;  %v6550_v11 = vmul.f32 %v12633_v28, %v12633_v28 }
 0xc86   :  { %v6610_v9 = vadd.f32 %v6609_v52, %v6547_v63  ;;  %v6478_v17 = vadd.f32 %v6477_v57, %v12613_v25  ;;  %v6152_v60 = vadd.f32 %v14715_v61, %v14714_v34  ;;  %v14716_v63 = vld [vmem:[#allocation116_spill] sm:$0xff]  ;;  %v14718_v57 = vld [vmem:[#allocation21_spill] sm:$0xff] }
 0xc87   :  { %14713 = vst [vmem:[#allocation31_spill] sm:$0xff] %v12643_v16  ;;  %v12653_v52 = vadd.f32 %v14716_v63, %v6149_v12  ;;  %v6155_v25 = vadd.f32 %v14719_v49, %v14718_v57  ;;  %v6551_v34 = vmul.f32 %v12643_v16, %v12643_v16  ;;  %v14723_v61 = vld [vmem:[#allocation28_spill] sm:$0xff]  ;;  %v14724_v57 = vld [vmem:[#allocation118_spill] sm:$0xff] }
 0xc88   :  { %v6611_v33 = vadd.f32 %v6610_v9, %v6548_v48  ;;  %v6479_v10 = vadd.f32 %v6478_v17, %v12623_v41  ;;  %v14720_v48 = vld [vmem:[#allocation117_spill] sm:$0xff]  ;;  %v14722_v17 = vld [vmem:[#allocation23_spill] sm:$0xff] }
 0xc89   :  { %14717 = vst [vmem:[#allocation86_spill] sm:$0xff] %v12653_v52  ;;  %v12663_v9 = vadd.f32 %v14720_v48, %v6152_v60  ;;  %v6158_v41 = vadd.f32 %v14723_v61, %v14722_v17  ;;  %v6552_v63 = vmul.f32 %v12653_v52, %v12653_v52  ;;  %v12671_v49 = vadd.f32 %v14724_v57, %v6155_v25  ;;  %v14731_v17 = vld [vmem:[#allocation29_spill] sm:$0xff] }
 0xc8a   :  { %v6612_v54 = vadd.f32 %v6611_v33, %v6549_v15  ;;  %v6480_v31 = vadd.f32 %v6479_v10, %v12633_v28  ;;  %v14726_v15 = vld [vmem:[#allocation25_spill] sm:$0xff]  ;;  %v14727_v33 = vld [vmem:[#allocation30_spill] sm:$0xff]  ;;  %v12675_v28 = vpop.f32.mrf.mxu2 }
 0xc8b   :  { %14721 = vst [vmem:[#allocation43_spill] sm:$0xff] %v12663_v9  ;;  %v6161_v10 = vadd.f32 %v14727_v33, %v14726_v15  ;;  %v6553_v48 = vmul.f32 %v12663_v9, %v12663_v9  ;;  %v6554_v15 = vmul.f32 %v12671_v49, %v12671_v49 }
 0xc8c   :  { %v6613_v62 = vadd.f32 %v6612_v54, %v6550_v11  ;;  %v6481_v12 = vadd.f32 %v6480_v31, %v12643_v16  ;;  %14725 = vst [vmem:[#allocation102_spill] sm:$0xff] %v12671_v49  ;;  %v14728_v11 = vld [vmem:[#allocation119_spill] sm:$0xff]  ;;  %v12685_v16 = vpop.f32.mrf.mxu3 }
 0xc8d   :  { %v12657_v6 = vpop.f32.mrf.mxu1  ;;  %v12681_v54 = vadd.f32 %v14728_v11, %v6158_v41  ;;  %v14730_v31 = vld [vmem:[#allocation27_spill] sm:$0xff] }
 0xc8e   :  { %v6614_v19 = vadd.f32 %v6613_v62, %v6551_v34  ;;  %v6482_v60 = vadd.f32 %v6481_v12, %v12653_v52  ;;  %v6164_v61 = vadd.f32 %v14731_v17, %v14730_v31  ;;  %v14732_v62 = vld [vmem:[#allocation120_spill] sm:$0xff]  ;;  %v12693_v12 = vpop.f32.mrf.mxu0  ;;  %v14734_v17 = vld [vmem:[#allocation121_spill] sm:$0xff] }
 0xc8f   :  { %14729 = vst [vmem:[#allocation41_spill] sm:$0xff] %v12681_v54  ;;  %v12691_v34 = vadd.f32 %v14732_v62, %v6161_v10  ;;  %v6555_v31 = vmul.f32 %v12681_v54, %v12681_v54 }
 0xc90   :  { %v6615_v25 = vadd.f32 %v6614_v19, %v6552_v63  ;;  %v6483_v57 = vadd.f32 %v6482_v60, %v12663_v9  ;;  %v12701_v19 = vadd.f32 %v14734_v17, %v6164_v61  ;;  %v6558_v61 = vmul.f32 %v12316_v43, %v12316_v43 }
 0xc91   :  { %14733 = vst [vmem:[#allocation46_spill] sm:$0xff] %v12691_v34  ;;  %v6556_v10 = vmul.f32 %v12691_v34, %v12691_v34  ;;  %v6559_v17 = vmul.f32 %v12319_v5, %v12319_v5 }
 0xc92   :  { %v6616_v41 = vadd.f32 %v6615_v25, %v6553_v48  ;;  %v6484_v11 = vadd.f32 %v6483_v57, %v12671_v49  ;;  %14735 = vst [vmem:[#allocation103_spill] sm:$0xff] %v12701_v19  ;;  %v6557_v48 = vmul.f32 %v12701_v19, %v12701_v19  ;;  %v12709_v25 = vpop.f32.mrf.mxu2 }
 0xc94   :  { %v6617_v63 = vadd.f32 %v6616_v41, %v6554_v15  ;;  %v6485_v60 = vadd.f32 %v6484_v11, %v12681_v54  ;;  %v12714_v15 = vpop.f32.mrf.mxu3 }
 0xc95   :  { %v12695_v33 = vpop.f32.mrf.mxu1 }
 0xc96   :  { %v6618_v62 = vadd.f32 %v6617_v63, %v6555_v31  ;;  %v6486_v9 = vadd.f32 %v6485_v60, %v12691_v34  ;;  %v12721_v63 = vpop.f32.mrf.mxu0  ;;  %v6561_v34 = vmul.f32 %v12325_v24, %v12325_v24 }
 0xc98   :  { %v6619_v57 = vadd.f32 %v6618_v62, %v6556_v10  ;;  %v6487_v49 = vadd.f32 %v6486_v9, %v12701_v19  ;;  %v6560_v9 = vmul.f32 %v12322_v37, %v12322_v37 }
 0xc9a   :  { %v6620_v11 = vadd.f32 %v6619_v57, %v6557_v48  ;;  %v6488_v31 = vadd.f32 %v6487_v49, %v12316_v43  ;;  %v6562_v57 = vmul.f32 %v12328_v20, %v12328_v20 }
 0xc9c   :  { %v6621_v60 = vadd.f32 %v6620_v11, %v6558_v61  ;;  %v6489_v10 = vadd.f32 %v6488_v31, %v12319_v5  ;;  %v14736_v61 = vld [vmem:[#allocation73_spill] sm:$0xff]  ;;  %v14737_v11 = vld [vmem:[#allocation34_spill] sm:$0xff]  ;;  %v12736_v5 = vpop.f32.mrf.mxu2 }
 0xc9d   :  { %v12716_v41 = vpop.f32.mrf.mxu1  ;;  %v5370_v31 = vadd.f32 %v14737_v11, %v14736_v61  ;;  %v6564_v61 = vmul.f32 %v12358_v42, %v12358_v42  ;;  %v14741_v11 = vld [vmem:[#allocation71_spill] sm:$0xff] }
 0xc9e   :  { %v6622_v62 = vadd.f32 %v6621_v60, %v6559_v17  ;;  %v6490_v19 = vadd.f32 %v6489_v10, %v12322_v37  ;;  %v6563_v60 = vmul.f32 %v12331_v59, %v12331_v59  ;;  %v14738_v10 = vld [vmem:[#allocation70_spill] sm:$0xff]  ;;  %v12752_v1 = vpop.f32.mrf.mxu0 }
 0xca0   :  { %v6623_v48 = vadd.f32 %v6622_v62, %v6560_v9  ;;  %v6491_v49 = vadd.f32 %v6490_v19, %v12325_v24  ;;  %v14739_v9 = vld [vmem:[#allocation76_spill] sm:$0xff]  ;;  %v12743_v19 = vpop.f32.mrf.mxu3 }
 0xca1   :  { %v5373_v62 = vadd.f32 %v14739_v9, %v14738_v10  ;;  %v14740_v24 = vld [vmem:[#allocation36_spill] sm:$0xff]  ;;  %v6565_v9 = vmul.f32 %v12396_v53, %v12396_v53 }
 0xca2   :  { %v6624_v54 = vadd.f32 %v6623_v48, %v6561_v34  ;;  %v6492_v17 = vadd.f32 %v6491_v49, %v12328_v20  ;;  %v5579_v37 = vadd.f32 %v14740_v24, %v5370_v31  ;;  %v14742_v34 = vld [vmem:[#allocation69_spill] sm:$0xff]  ;;  %v14743_v49 = vld [vmem:[#allocation58_spill] sm:$0xff]  ;;  %v14744_v24 = vld [vmem:[#allocation83_spill] sm:$0xff] }
 0xca3   :  { %v5376_v48 = vadd.f32 %v14742_v34, %v14741_v11  ;;  %v5582_v20 = vadd.f32 %v14743_v49, %v5373_v62  ;;  %v14746_v31 = vld [vmem:[#allocation35_spill] sm:$0xff] }
 0xca4   :  { %v6625_v52 = vadd.f32 %v6624_v54, %v6562_v57  ;;  %v6493_v22 = vadd.f32 %v6492_v17, %v12331_v59  ;;  %v14745_v54 = vld [vmem:[#allocation74_spill] sm:$0xff]  ;;  %v14747_v17 = vld [vmem:[#allocation80_spill] sm:$0xff]  ;;  %v5788_v11 = vadd.f32 %v12483_v35, %v5579_v37  ;;  %v6567_v35 = vmul.f32 %v12466_v46, %v12466_v46 }
 0xca5   :  { %v12732_v43 = vpop.f32.mrf.mxu1  ;;  %v5379_v57 = vadd.f32 %v14745_v54, %v14744_v24  ;;  %v5382_v59 = vadd.f32 %v14747_v17, %v14746_v31  ;;  %v5585_v32 = vadd.f32 %v14748_v30, %v5376_v48  ;;  %v5791_v24 = vadd.f32 %v12532_v55, %v5582_v20  ;;  %v14753_v54 = vld [vmem:[#allocation62_spill] sm:$0xff] }
 0xca6   :  { %v6626_v36 = vadd.f32 %v6625_v52, %v6563_v60  ;;  %v6494_v10 = vadd.f32 %v6493_v22, %v12358_v42  ;;  %v6566_v52 = vmul.f32 %v12431_v51, %v12431_v51  ;;  %v14749_v22 = vld [vmem:[#allocation72_spill] sm:$0xff]  ;;  %v14750_v60 = vld [vmem:[#allocation37_spill] sm:$0xff]  ;;  %v14751_v42 = vld [vmem:[#allocation87_spill] sm:$0xff]  ;;  %v5997_v37 = vadd.f32 %v12488_v0, %v5788_v11 }
 0xca7   :  { %v5385_v49 = vadd.f32 %v14750_v60, %v14749_v22  ;;  %v5388_v21 = vadd.f32 %v14752_v38, %v14751_v42  ;;  %v5588_v31 = vadd.f32 %v14753_v54, %v5379_v57  ;;  %v14755_v48 = vld [vmem:[#allocation90_spill] sm:$0xff]  ;;  %v6000_v22 = vadd.f32 %v12535_v50, %v5791_v24  ;;  %v5808_v57 = vpop.f32.mrf.mxu2  ;;  %v14757_v50 = vld [vmem:[#allocation64_spill] sm:$0xff] }
 0xca8   :  { %v6627_v34 = vadd.f32 %v6626_v36, %v6564_v61  ;;  %v6495_v62 = vadd.f32 %v6494_v10, %v12396_v53  ;;  %v14754_v61 = vld [vmem:[#allocation77_spill] sm:$0xff]  ;;  %v5794_v42 = vadd.f32 %v12576_v45, %v5585_v32  ;;  %v14756_v20 = vld [vmem:[#allocation66_spill] sm:$0xff]  ;;  %v6206_v55 = vadd.f32 %v12498_v39, %v5997_v37  ;;  %v6017_v32 = vpop.f32.mrf.mxu3 }
 0xca9   :  { %v5391_v10 = vadd.f32 %v14755_v48, %v14754_v61  ;;  %v5591_v38 = vadd.f32 %v14756_v20, %v5382_v59  ;;  %v5594_v24 = vadd.f32 %v14757_v50, %v5385_v49  ;;  %v6569_v39 = vmul.f32 %v12546_v8, %v12546_v8  ;;  %v14758_v37 = vld [vmem:[#allocation45_spill] sm:$0xff]  ;;  %v14759_v61 = vld [vmem:[#allocation68_spill] sm:$0xff] }
 0xcaa   :  { %v6628_v30 = vadd.f32 %v6627_v34, %v6565_v9  ;;  %v6496_v36 = vadd.f32 %v6495_v62, %v12431_v51  ;;  %v6568_v9 = vmul.f32 %v12507_v23, %v12507_v23  ;;  %v6003_v11 = vadd.f32 %v12589_v47, %v5794_v42 }
 0xcab   :  { %v6209_v34 = vadd.f32 %v12548_v4, %v6000_v22  ;;  %v5797_v62 = vadd.f32 %v12627_v27, %v5588_v31  ;;  %v5800_v4 = vadd.f32 %v12675_v28, %v5591_v38  ;;  %v5597_v27 = vadd.f32 %v14758_v37, %v5388_v21  ;;  %v6226_v31 = vpop.f32.mrf.mxu0 }
 0xcac   :  { %v6629_v60 = vadd.f32 %v6628_v30, %v6566_v52  ;;  %v6497_v0 = vadd.f32 %v6496_v36, %v12466_v46  ;;  %v12795_v52 = vadd.f32 %v12617_v7, %v6206_v55  ;;  %v6212_v47 = vadd.f32 %v12599_v14, %v6003_v11 }
 0xcad   :  { %v12772_v17 = vpop.f32.mrf.mxu1  ;;  %v6006_v54 = vadd.f32 %v12637_v2, %v5797_v62  ;;  %v6570_v36 = vmul.f32 %v12585_v18, %v12585_v18  ;;  %v6009_v7 = vadd.f32 %v12685_v16, %v5800_v4  ;;  %v5803_v14 = vadd.f32 %v12709_v25, %v5594_v24  ;;  %v14762_v24 = vld [vmem:[#allocation51_spill] sm:$0xff] }
 0xcae   :  { %v6630_v45 = vadd.f32 %v6629_v60, %v6567_v35  ;;  %v6498_v59 = vadd.f32 %v6497_v0, %v12507_v23  ;;  %v12805_v35 = vadd.f32 %v12657_v6, %v6209_v34  ;;  %v5600_v28 = vadd.f32 %v14759_v61, %v5391_v10  ;;  %v14760_v60 = vld [vmem:[#allocation84_spill] sm:$0xff]  ;;  %v14761_v0 = vld [vmem:[#allocation81_spill] sm:$0xff] }
 0xcaf   :  { %v6215_v2 = vadd.f32 %v12647_v13, %v6006_v54  ;;  %v6571_v42 = vmul.f32 %v12795_v52, %v12795_v52  ;;  %v12815_v20 = vadd.f32 %v12695_v33, %v6212_v47  ;;  %v6012_v6 = vadd.f32 %v12714_v15, %v5803_v14 }
 0xcb0   :  { %v6631_v49 = vadd.f32 %v6630_v45, %v6568_v9  ;;  %v6499_v30 = vadd.f32 %v6498_v59, %v12546_v8  ;;  %v6218_v16 = vadd.f32 %v12693_v12, %v6009_v7  ;;  %v5806_v13 = vadd.f32 %v12736_v5, %v5597_v27  ;;  %v5811_v12 = vpop.f32.mrf.mxu2 }
 0xcb1   :  { %v6572_v10 = vmul.f32 %v12805_v35, %v12805_v35  ;;  %v12824_v55 = vadd.f32 %v12716_v41, %v6215_v2  ;;  %v5394_v9 = vadd.f32 %v14761_v0, %v14760_v60  ;;  %v6221_v15 = vadd.f32 %v12721_v63, %v6012_v6  ;;  %v14765_v2 = vld [vmem:[#allocation88_spill] sm:$0xff] }
 0xcb2   :  { %v6632_v21 = vadd.f32 %v6631_v49, %v6569_v39  ;;  %v6500_v22 = vadd.f32 %v6499_v30, %v12585_v18  ;;  %v6015_v33 = vadd.f32 %v12743_v19, %v5806_v13  ;;  %v5809_v11 = vadd.f32 %v5808_v57, %v5600_v28  ;;  %v6020_v39 = vpop.f32.mrf.mxu3 }
 0xcb3   :  { %v6573_v62 = vmul.f32 %v12815_v20, %v12815_v20  ;;  %v12834_v50 = vadd.f32 %v12732_v43, %v6218_v16  ;;  %v5603_v45 = vadd.f32 %v14762_v24, %v5394_v9  ;;  %v6574_v57 = vmul.f32 %v12824_v55, %v12824_v55  ;;  %v6229_v4 = vpop.f32.mrf.mxu0 }
 0xcb4   :  { %v6633_v38 = vadd.f32 %v6632_v21, %v6570_v36  ;;  %v6501_v25 = vadd.f32 %v6500_v22, %v12795_v52  ;;  %v6018_v41 = vadd.f32 %v6017_v32, %v5809_v11  ;;  %v6224_v59 = vadd.f32 %v12752_v1, %v6015_v33  ;;  %v14766_v22 = vld [vmem:[#allocation48_spill] sm:$0xff] }
 0xcb5   :  { %v6432_v48 = vpop.f32.mrf.mxu1  ;;  %v12842_v54 = vadd.f32 %v12772_v17, %v6221_v15  ;;  %v6575_v27 = vmul.f32 %v12834_v50, %v12834_v50  ;;  %v5812_v49 = vadd.f32 %v5811_v12, %v5603_v45 }
 0xcb6   :  { %v6634_v34 = vadd.f32 %v6633_v38, %v6571_v42  ;;  %v6502_v5 = vadd.f32 %v6501_v25, %v12805_v35  ;;  %v6227_v47 = vadd.f32 %v6226_v31, %v6018_v41  ;;  %v12847_v1 = vadd.f32 %v6432_v48, %v6224_v59  ;;  %v14764_v31 = vld [vmem:[#allocation38_spill] sm:$0xff] }
 0xcb7   :  { %v6576_v7 = vmul.f32 %v12842_v54, %v12842_v54  ;;  %v5397_v14 = vadd.f32 %v14765_v2, %v14764_v31  ;;  %v6021_v61 = vadd.f32 %v6020_v39, %v5812_v49  ;;  %v14769_v41 = vld [vmem:[#allocation82_spill] sm:$0xff]  ;;  %v14770_v39 = vld [vmem:[#allocation57_spill] sm:$0xff] }
 0xcb8   :  { %v6635_v19 = vadd.f32 %v6634_v34, %v6572_v10  ;;  %v6503_v63 = vadd.f32 %v6502_v5, %v12815_v20  ;;  %v6577_v48 = vmul.f32 %v12847_v1, %v12847_v1  ;;  %v5814_v6 = vpop.f32.mrf.mxu2 }
 0xcb9   :  { %v5606_v42 = vadd.f32 %v14766_v22, %v5397_v14  ;;  %v6230_v16 = vadd.f32 %v6229_v4, %v6021_v61 }
 0xcba   :  { %v6636_v43 = vadd.f32 %v6635_v19, %v6573_v62  ;;  %v6504_v32 = vadd.f32 %v6503_v63, %v12824_v55  ;;  %v6023_v10 = vpop.f32.mrf.mxu3  ;;  %v14768_v62 = vld [vmem:[#allocation78_spill] sm:$0xff] }
 0xcbb   :  { %v6232_v15 = vpop.f32.mrf.mxu0  ;;  %v5815_v11 = vadd.f32 %v5814_v6, %v5606_v42  ;;  %v5400_v24 = vadd.f32 %v14769_v41, %v14768_v62  ;;  %v12891_v41 = vld [vmem:[%s13744_s0 + $0x339] sm:$0xff] }
 0xcbc   :  { %v6637_v30 = vadd.f32 %v6636_v43, %v6574_v57  ;;  %v6505_v36 = vadd.f32 %v6504_v32, %v12834_v50 }
 0xcbd   :  { %v6435_v37 = vpop.f32.mrf.mxu1  ;;  %v6024_v45 = vadd.f32 %v6023_v10, %v5815_v11  ;;  %v5609_v19 = vadd.f32 %v14770_v39, %v5400_v24  ;;  %v14791_v24 = vld [vmem:[#allocation65_spill] sm:$0xff] }
 0xcbe   :  { %v12852_v17 = vadd.f32 %v6435_v37, %v6227_v47  ;;  %v6638_v28 = vadd.f32 %v6637_v30, %v6575_v27  ;;  %v6506_v21 = vadd.f32 %v6505_v36, %v12842_v54 }
 0xcbf   :  { %v6233_v63 = vadd.f32 %v6232_v15, %v6024_v45  ;;  %v14808_v45 = vld [vmem:[#allocation125_spill] sm:$0xff] }
 0xcc0   :  { %14763 = vst [vmem:[#allocation89_spill] sm:$0xff] %v12852_v17  ;;  %v6639_v13 = vadd.f32 %v6638_v28, %v6576_v7  ;;  %v6507_v38 = vadd.f32 %v6506_v21, %v12847_v1  ;;  %v6578_v25 = vmul.f32 %v12852_v17, %v12852_v17  ;;  %v5817_v4 = vpop.f32.mrf.mxu2 }
 0xcc1   :  { %v5818_v43 = vadd.f32 %v5817_v4, %v5609_v19  ;;  %v6447_v4 = vld [vmem:[%s13749_s5] sm:$0x1]  ;;  %v14811_v19 = vld [vmem:[#allocation128_spill] sm:$0xff] }
 0xcc2   :  { %v6640_v0 = vadd.f32 %v6639_v13, %v6577_v48  ;;  %v6508_v9 = vadd.f32 %v6507_v38, %v12852_v17  ;;  %v6026_v37 = vpop.f32.mrf.mxu3  ;;  %v14810_v17 = vld [vmem:[#allocation127_spill] sm:$0xff] }
 0xcc3   :  { %v6235_v49 = vpop.f32.mrf.mxu0  ;;  %v6027_v30 = vadd.f32 %v6026_v37, %v5818_v43  ;;  %v14772_v37 = vld [vmem:[#allocation129_spill] sm:$0xff] }
 0xcc4   :  { %v6641_v12 = vadd.f32 %v6640_v0, %v6578_v25 }
 0xcc5   :  { %v6438_v60 = vpop.f32.mrf.mxu1  ;;  %v6236_v7 = vadd.f32 %v6235_v49, %v6027_v30  ;;  %v14774_v30 = vld [vmem:[#allocation131_spill] sm:$0xff] }
 0xcc6   :  { %v12864_v33 = vadd.f32 %v6438_v60, %v6230_v16 }
 0xcc8   :  { %14767 = vst [vmem:[#allocation49_spill] sm:$0xff] %v12864_v33  ;;  %v6509_v34 = vadd.f32 %v6508_v9, %v12864_v33  ;;  %v6579_v5 = vmul.f32 %v12864_v33, %v12864_v33 }
 0xcca   :  { %v6642_v59 = vadd.f32 %v6641_v12, %v6579_v5  ;;  %v14809_v12 = vld [vmem:[#allocation126_spill] sm:$0xff] }
 0xccd   :  { %v6441_v57 = vpop.f32.mrf.mxu1 }
 0xcce   :  { %v12872_v47 = vadd.f32 %v6441_v57, %v6233_v63  ;;  %v14807_v63 = vld [vmem:[#allocation124_spill] sm:$0xff] }
 0xcd0   :  { %14771 = vst [vmem:[#allocation104_spill] sm:$0xff] %v12872_v47  ;;  %v6510_v32 = vadd.f32 %v6509_v34, %v12872_v47  ;;  %v6580_v27 = vmul.f32 %v12872_v47, %v12872_v47 }
 0xcd2   :  { %v6643_v36 = vadd.f32 %v6642_v59, %v6580_v27 }
 0xcd5   :  { %v6444_v31 = vpop.f32.mrf.mxu1 }
 0xcd6   :  { %v12877_v2 = vadd.f32 %v6444_v31, %v6236_v7  ;;  %v14775_v7 = vld [vmem:[#allocation132_spill] sm:$0xff]  ;;  %v14794_v31 = vld [vmem:[#allocation61_spill] sm:$0xff] }
 0xcd8   :  { %v6511_v14 = vadd.f32 %v6510_v32, %v12877_v2  ;;  %v6581_v61 = vmul.f32 %v12877_v2, %v12877_v2  ;;  %v14773_v32 = vld [vmem:[#allocation130_spill] sm:$0xff] }
 0xcda   :  { %v6512_v28 = vrot.slane %v6511_v14, 4  ;;  %v6644_v21 = vadd.f32 %v6643_v36, %v6581_v61  ;;  %v14793_v61 = vld [vmem:[#allocation101_spill] sm:$0xff] }
 0xcdc   :  { %v6513_v48 = vadd.f32 %v6512_v28, %v6511_v14  ;;  %v6645_v22 = vrot.slane %v6644_v21, 4  ;;  %v14776_v14 = vld [vmem:[#allocation133_spill] sm:$0xff]  ;;  %v14777_v28 = vld [vmem:[#allocation134_spill] sm:$0xff] }
 0xcde   :  { %v6514_v42 = vrot.slane %v6513_v48, 2  ;;  %v6646_v6 = vadd.f32 %v6645_v22, %v6644_v21  ;;  %v14778_v22 = vld [vmem:[#allocation135_spill] sm:$0xff] }
 0xcdf   :  { %v14792_v21 = vld [vmem:[#allocation99_spill] sm:$0xff] }
 0xce0   :  { %v6515_v16 = vadd.f32 %v6514_v42, %v6513_v48  ;;  %v6647_v13 = vrot.slane %v6646_v6, 2  ;;  %v14785_v42 = vld [vmem:[#allocation33_spill] sm:$0xff] }
 0xce2   :  { %v6516_v38 = vrot.slane %v6515_v16, 1  ;;  %v6648_v25 = vadd.f32 %v6647_v13, %v6646_v6  ;;  %v14779_v6 = vld [vmem:[#allocation91_spill] sm:$0xff]  ;;  %v14780_v13 = vld [vmem:[#allocation94_spill] sm:$0xff] }
 0xce4   :  { %v6517_v10 = vadd.f32 %v6516_v38, %v6515_v16  ;;  %v6649_v60 = vrot.slane %v6648_v25, 1  ;;  %v14786_v16 = vld [vmem:[#allocation95_spill] sm:$0xff]  ;;  %v14787_v38 = vld [vmem:[#allocation98_spill] sm:$0xff] }
 0xce6   :  { %v6650_v0 = vadd.f32 %v6649_v60, %v6648_v25  ;;  %v12882_v9 = vmul.f32 0.001953125, %v6517_v10  ;;  %v14781_v25 = vld [vmem:[#allocation54_spill] sm:$0xff]  ;;  %v14782_v60 = vld [vmem:[#allocation40_spill] sm:$0xff]  ;;  %v14788_v10 = vld [vmem:[#allocation59_spill] sm:$0xff] }
 0xce8   :  { %v6652_v15 = vmul.f32 0.001953125, %v6650_v0  ;;  %v6653_v11 = vmul.f32 %v12882_v9, %v12882_v9  ;;  %v14789_v0 = vld [vmem:[#allocation97_spill] sm:$0xff]  ;;  %v14812_v33 = vsub.f32 %v12877_v2, %v12882_v9  ;;  %v14817_v2 = vsub.f32 %v12367_v26, %v12882_v9 }
 0xce9   :  { %v14820_v26 = vsub.f32 %v14772_v37, %v12882_v9 }
 0xcea   :  { %v6654_v34 = vsub.f32 %v6652_v15, %v6653_v11  ;;  %v14783_v15 = vld [vmem:[#allocation96_spill] sm:$0xff] }
 0xcec   :  { %v6655_v5 = vmax.f32 %v6654_v34, 0.0 }
 0xcee   :  { %v6656_v62 = vadd.f32 1e-05, %v6655_v5  ;;  %v14784_v5 = vld [vmem:[#allocation60_spill] sm:$0xff] }
 0xcf0   :  { %7628 = vrsqrt.f32 %v6656_v62  ;;  %vm6663_vm3 = vweird.f32 %v6656_v62 }
 0xcf6   :  { %v7629_v49 = vpop.eup %7628 }
 0xcf7   :  { %v6658_v48 = vmul.f32 %v7629_v49, %v6656_v62  ;;  %vm6664_vm4 = vweird.f32 %v7629_v49 }
 0xcf8   :  { %vm6665_vm5 = vmor %vm6663_vm3, %vm6664_vm4 }
 0xcf9   :  { %v6659_v34 = vmul.f32 %v7629_v49, %v6658_v48  ;;  %v14790_v48 = vld [vmem:[#allocation100_spill] sm:$0xff] }
 0xcfb   :  { %v6660_v43 = vmul.f32 0.5, %v6659_v34 }
 0xcfd   :  { %v6661_v34 = vsub.f32 1.5, %v6660_v43  ;;  %v14805_v43 = vld [vmem:[#allocation122_spill] sm:$0xff] }
 0xcff   :  { %v6662_v57 = vmul.f32 %v7629_v49, %v6661_v34  ;;  %v14806_v34 = vld [vmem:[#allocation123_spill] sm:$0xff] }
 0xd01   :  { %v6666_v59 = vsel %vm6665_vm5, %v7629_v49, %v6662_v57  ;;  %v14813_v49 = vsub.f32 %v12345_v44, %v12882_v9 }
 0xd02   :  { %v6731_v11 = vmul.f32 %v6666_v59, %v6447_v4  ;;  %v13014_v4 = vld [vmem:[%s13750_s6] ss:$0 sm:$0xff]  ;;  %v14814_v59 = vsub.f32 %v12340_v56, %v12882_v9 }
 0xd04   :  { %v13016_v36 = vperm.slane %v6731_v11, 0  ;;  %v14815_v11 = vsub.f32 %v12348_v40, %v12882_v9 }
 0xd06   :  { %v6796_v57 = vmul.f32 %v13016_v36, %v14812_v33  ;;  %v13040_v39 = vmul.f32 %v13016_v36, %v14813_v49  ;;  %v13046_v62 = vmul.f32 %v13016_v36, %v14814_v59  ;;  %v13052_v27 = vmul.f32 %v13016_v36, %v14815_v11 }
 0xd07   :  { %v14816_v33 = vsub.f32 %v12355_v3, %v12882_v9  ;;  %v13064_v56 = vmul.f32 %v13016_v36, %v14817_v2  ;;  %v14818_v49 = vsub.f32 %v12376_v29, %v12882_v9  ;;  %v14819_v59 = vsub.f32 %v12384_v58, %v12882_v9 }
 0xd08   :  { %v6863_v11 = vadd.f32 %v13014_v4, %v6796_v57  ;;  %v14821_v29 = vsub.f32 %v14773_v32, %v12882_v9  ;;  %v14822_v58 = vsub.f32 %v14774_v30, %v12882_v9  ;;  %v14823_v57 = vsub.f32 %v14775_v7, %v12882_v9 }
 0xd09   :  { %v13058_v44 = vmul.f32 %v13016_v36, %v14816_v33  ;;  %v13070_v40 = vmul.f32 %v13016_v36, %v14818_v49  ;;  %v13076_v3 = vmul.f32 %v13016_v36, %v14819_v59  ;;  %v13083_v33 = vmul.f32 %v13016_v36, %v14820_v26 }
 0xd0a   :  { %v13089_v2 = vmul.f32 %v13016_v36, %v14821_v29  ;;  %v13095_v49 = vmul.f32 %v13016_v36, %v14822_v58  ;;  %v13101_v37 = vmul.f32 %v13016_v36, %v14823_v57  ;;  %v14824_v59 = vsub.f32 %v14776_v14, %v12882_v9 }
 0xd0b   :  { %v14825_v26 = vsub.f32 %v14777_v28, %v12882_v9  ;;  %v14826_v29 = vsub.f32 %v14778_v22, %v12882_v9  ;;  %v14827_v58 = vmax.f32 %v12891_v41, 0.0  ;;  %v14828_v14 = vsub.f32 %v14779_v6, %v12882_v9 }
 0xd0c   :  { %v13107_v32 = vmul.f32 %v13016_v36, %v14824_v59  ;;  %v14829_v28 = vsub.f32 %v14780_v13, %v12882_v9  ;;  %v14830_v22 = vsub.f32 %v14781_v25, %v12882_v9  ;;  %v14831_v41 = vsub.f32 %v14782_v60, %v12882_v9 }
 0xd0d   :  { %v13113_v30 = vmul.f32 %v13016_v36, %v14825_v26  ;;  %v13119_v7 = vmul.f32 %v13016_v36, %v14826_v29  ;;  %v7055_v57 = vadd.f32 %v14827_v58, %v6863_v11  ;;  %v13127_v59 = vmul.f32 %v13016_v36, %v14828_v14 }
 0xd0e   :  { %v13133_v26 = vmul.f32 %v13016_v36, %v14829_v28  ;;  %v13139_v29 = vmul.f32 %v13016_v36, %v14830_v22  ;;  %v13145_v6 = vmul.f32 %v13016_v36, %v14831_v41  ;;  %v14832_v11 = vsub.f32 %v14783_v15, %v12882_v9 }
 0xd0f   :  { %v14834_v58 = vsub.f32 %v14784_v5, %v12882_v9  ;;  %v14836_v14 = vsub.f32 %v14785_v42, %v12882_v9  ;;  %7119 = vst [vmem:[#allocation6 + $0x1f8] sm:$0xff] %v7055_v57  ;;  %v14838_v28 = vsub.f32 %v14786_v16, %v12882_v9  ;;  %v14840_v22 = vsub.f32 %v14787_v38, %v12882_v9 }
 0xd10   :  { %v13151_v13 = vmul.f32 %v13016_v36, %v14832_v11  ;;  %v14842_v41 = vsub.f32 %v14788_v10, %v12882_v9  ;;  %v14844_v57 = vsub.f32 %v14789_v0, %v12882_v9  ;;  %v14846_v11 = vsub.f32 %v14790_v48, %v12882_v9 }
 0xd11   :  { %v13157_v25 = vmul.f32 %v13016_v36, %v14834_v58  ;;  %v13163_v60 = vmul.f32 %v13016_v36, %v14836_v14  ;;  %v13169_v15 = vmul.f32 %v13016_v36, %v14838_v28  ;;  %v13175_v5 = vmul.f32 %v13016_v36, %v14840_v22 }
 0xd12   :  { %14833 = vst [vmem:[#allocation105_spill] sm:$0xff] %v13151_v13  ;;  %v13181_v42 = vmul.f32 %v13016_v36, %v14842_v41  ;;  %v13187_v16 = vmul.f32 %v13016_v36, %v14844_v57  ;;  %v13193_v38 = vmul.f32 %v13016_v36, %v14846_v11  ;;  %v14848_v58 = vsub.f32 %v14791_v24, %v12882_v9  ;;  %v14856_v41 = vld [vmem:[#allocation85_spill] sm:$0xff]  ;;  %v14859_v11 = vld [vmem:[#allocation92_spill] sm:$0xff] }
 0xd13   :  { %14835 = vst [vmem:[#allocation44_spill] sm:$0xff] %v13157_v25  ;;  %v14850_v14 = vsub.f32 %v14792_v21, %v12882_v9  ;;  %v14852_v28 = vsub.f32 %v14793_v61, %v12882_v9  ;;  %v14854_v22 = vsub.f32 %v14794_v31, %v12882_v9  ;;  %v14857_v57 = vsub.f32 %v14856_v41, %v12882_v9 }
 0xd14   :  { %14837 = vst [vmem:[#allocation52_spill] sm:$0xff] %v13163_v60  ;;  %v13199_v10 = vmul.f32 %v13016_v36, %v14848_v58  ;;  %v14860_v58 = vsub.f32 %v14859_v11, %v12882_v9  ;;  %v6800_v60 = vadd.f32 %v13014_v4, %v13040_v39  ;;  %v6801_v25 = vadd.f32 %v13014_v4, %v13046_v62 }
 0xd15   :  { %14839 = vst [vmem:[#allocation39_spill] sm:$0xff] %v13169_v15  ;;  %v13205_v0 = vmul.f32 %v13016_v36, %v14850_v14  ;;  %v13211_v48 = vmul.f32 %v13016_v36, %v14852_v28  ;;  %v13217_v24 = vmul.f32 %v13016_v36, %v14854_v22  ;;  %v13223_v21 = vmul.f32 %v13016_v36, %v14857_v57  ;;  %v14862_v14 = vld [vmem:[#allocation79_spill] sm:$0xff]  ;;  %v14868_v57 = vld [vmem:[#allocation86_spill] sm:$0xff] }
 0xd16   :  { %14841 = vst [vmem:[#allocation47_spill] sm:$0xff] %v13175_v5  ;;  %v13229_v61 = vmul.f32 %v13016_v36, %v14860_v58  ;;  %v14863_v28 = vsub.f32 %v14862_v14, %v12882_v9  ;;  %v14865_v22 = vld [vmem:[#allocation31_spill] sm:$0xff]  ;;  %v6802_v13 = vadd.f32 %v13014_v4, %v13052_v27 }
 0xd17   :  { %14843 = vst [vmem:[#allocation55_spill] sm:$0xff] %v13181_v42  ;;  %v14866_v47 = vsub.f32 %v14865_v22, %v12882_v9  ;;  %v14871_v58 = vld [vmem:[#allocation43_spill] sm:$0xff]  ;;  %v14875_v22 = vld [vmem:[#allocation41_spill] sm:$0xff] }
 0xd18   :  { %14845 = vst [vmem:[#allocation106_spill] sm:$0xff] %v13187_v16  ;;  %v13235_v31 = vmul.f32 %v13016_v36, %v14863_v28 }
 0xd19   :  { %14847 = vst [vmem:[#allocation50_spill] sm:$0xff] %v13193_v38  ;;  %v13241_v41 = vmul.f32 %v13016_v36, %v14866_v47  ;;  %v14876_v47 = vsub.f32 %v14875_v22, %v12882_v9  ;;  %v14882_v22 = vsub.f32 %v14806_v34, %v12882_v9  ;;  %v14886_v34 = vsub.f32 %v14810_v17, %v12882_v9  ;;  %v14905_v38 = vld [vmem:[#allocation104_spill] sm:$0xff] }
 0xd1a   :  { %14849 = vst [vmem:[#allocation93_spill] sm:$0xff] %v13199_v10  ;;  %v14890_v17 = vsub.f32 %v12466_v46, %v12882_v9  ;;  %v14894_v46 = vsub.f32 %v12795_v52, %v12882_v9  ;;  %v14898_v52 = vsub.f32 %v12834_v50, %v12882_v9  ;;  %v14903_v10 = vld [vmem:[#allocation49_spill] sm:$0xff] }
 0xd1b   :  { %14851 = vst [vmem:[#allocation107_spill] sm:$0xff] %v13205_v0  ;;  %v14901_v0 = vld [vmem:[#allocation89_spill] sm:$0xff]  ;;  %v14904_v50 = vsub.f32 %v14903_v10, %v12882_v9 }
 0xd1c   :  { %14853 = vst [vmem:[#allocation53_spill] sm:$0xff] %v13211_v48  ;;  %v14877_v48 = vld [vmem:[#allocation46_spill] sm:$0xff]  ;;  %v7526_v10 = vld [vmem:[%s13744_s0 + $0x39] sm:$0xff] }
 0xd1d   :  { %14855 = vst [vmem:[#allocation32_spill] sm:$0xff] %v13217_v24  ;;  %v14873_v24 = vld [vmem:[#allocation102_spill] sm:$0xff]  ;;  %v6931_v16 = vmax.f32 %v7526_v10, 0.0  ;;  %v6806_v10 = vadd.f32 %v13014_v4, %v13076_v3 }
 0xd1e   :  { %14858 = vst [vmem:[#allocation108_spill] sm:$0xff] %v13223_v21  ;;  %v14869_v21 = vsub.f32 %v14868_v57, %v12882_v9  ;;  %v14874_v28 = vsub.f32 %v14873_v24, %v12882_v9  ;;  %v14878_v57 = vsub.f32 %v14877_v48, %v12882_v9  ;;  %v14881_v24 = vsub.f32 %v14805_v43, %v12882_v9 }
 0xd1f   :  { %14861 = vst [vmem:[#allocation67_spill] sm:$0xff] %v13229_v61  ;;  %v14872_v61 = vsub.f32 %v14871_v58, %v12882_v9  ;;  %v14883_v48 = vsub.f32 %v14807_v63, %v12882_v9  ;;  %v14885_v43 = vsub.f32 %v14809_v12, %v12882_v9  ;;  %v14887_v63 = vsub.f32 %v14811_v19, %v12882_v9 }
 0xd20   :  { %14864 = vst [vmem:[#allocation10_spill] sm:$0xff] %v13235_v31  ;;  %v13247_v11 = vmul.f32 %v13016_v36, %v14869_v21  ;;  %v6769_v31 = vmul.f32 %v13016_v36, %v14874_v28  ;;  %v6771_v21 = vmul.f32 %v13016_v36, %v14878_v57  ;;  %v6773_v28 = vmul.f32 %v13016_v36, %v14881_v24 }
 0xd21   :  { %14867 = vst [vmem:[#allocation109_spill] sm:$0xff] %v13241_v41  ;;  %v6768_v14 = vmul.f32 %v13016_v36, %v14872_v61  ;;  %v6770_v41 = vmul.f32 %v13016_v36, %v14876_v47  ;;  %v6774_v47 = vmul.f32 %v13016_v36, %v14882_v22  ;;  %v6775_v57 = vmul.f32 %v13016_v36, %v14883_v48 }
 0xd22   :  { %14870 = vst [vmem:[#allocation42_spill] sm:$0xff] %v13247_v11  ;;  %v14879_v11 = vld [vmem:[#allocation103_spill] sm:$0xff]  ;;  %v6777_v24 = vmul.f32 %v13016_v36, %v14885_v43  ;;  %v6778_v22 = vmul.f32 %v13016_v36, %v14886_v34  ;;  %v6779_v48 = vmul.f32 %v13016_v36, %v14887_v63  ;;  %v14889_v12 = vsub.f32 %v12431_v51, %v12882_v9 }
 0xd23   :  { %v14880_v58 = vsub.f32 %v14879_v11, %v12882_v9  ;;  %v14884_v11 = vsub.f32 %v14808_v45, %v12882_v9  ;;  %v14888_v45 = vsub.f32 %v12396_v53, %v12882_v9  ;;  %v6782_v34 = vmul.f32 %v13016_v36, %v14890_v17 }
 0xd24   :  { %v6781_v43 = vmul.f32 %v13016_v36, %v14889_v12  ;;  %v14891_v19 = vsub.f32 %v12507_v23, %v12882_v9  ;;  %v14892_v53 = vsub.f32 %v12546_v8, %v12882_v9  ;;  %v14893_v51 = vsub.f32 %v12585_v18, %v12882_v9 }
 0xd25   :  { %v6772_v61 = vmul.f32 %v13016_v36, %v14880_v58  ;;  %v6776_v58 = vmul.f32 %v13016_v36, %v14884_v11  ;;  %v6780_v11 = vmul.f32 %v13016_v36, %v14888_v45  ;;  %v6786_v17 = vmul.f32 %v13016_v36, %v14894_v46 }
 0xd26   :  { %v6783_v63 = vmul.f32 %v13016_v36, %v14891_v19  ;;  %v6784_v45 = vmul.f32 %v13016_v36, %v14892_v53  ;;  %v6785_v12 = vmul.f32 %v13016_v36, %v14893_v51  ;;  %v14895_v23 = vsub.f32 %v12805_v35, %v12882_v9 }
 0xd27   :  { %v14896_v8 = vsub.f32 %v12815_v20, %v12882_v9  ;;  %v14897_v18 = vsub.f32 %v12824_v55, %v12882_v9  ;;  %v6790_v46 = vmul.f32 %v13016_v36, %v14898_v52  ;;  %v14899_v35 = vsub.f32 %v12842_v54, %v12882_v9 }
 0xd28   :  { %v6787_v19 = vmul.f32 %v13016_v36, %v14895_v23  ;;  %v14900_v20 = vsub.f32 %v12847_v1, %v12882_v9  ;;  %v14902_v55 = vsub.f32 %v14901_v0, %v12882_v9  ;;  %v6794_v52 = vmul.f32 %v13016_v36, %v14904_v50  ;;  %v7523_v1 = vld [vmem:[%s13744_s0 + $0x19] sm:$0xff]  ;;  %v7524_v0 = vld [vmem:[%s13744_s0 + $0x21] sm:$0xff] }
 0xd29   :  { %v6788_v53 = vmul.f32 %v13016_v36, %v14896_v8  ;;  %v6789_v51 = vmul.f32 %v13016_v36, %v14897_v18  ;;  %v6791_v23 = vmul.f32 %v13016_v36, %v14899_v35  ;;  %v14906_v54 = vsub.f32 %v14905_v38, %v12882_v9  ;;  %v7527_v9 = vld [vmem:[%s13744_s0 + $0x49] sm:$0xff]  ;;  %v13384_v38 = vld [vmem:[%s13744_s0 + $0x61] sm:$0xff] }
 0xd2a   :  { %v6792_v8 = vmul.f32 %v13016_v36, %v14900_v20  ;;  %v6793_v18 = vmul.f32 %v13016_v36, %v14902_v55  ;;  %v7525_v20 = vld [vmem:[%s13744_s0 + $0x31] sm:$0xff]  ;;  %v6928_v55 = vmax.f32 %v7523_v1, 0.0  ;;  %v6929_v50 = vmax.f32 %v7524_v0, 0.0 }
 0xd2b   :  { %v6795_v35 = vmul.f32 %v13016_v36, %v14906_v54  ;;  %v13379_v36 = vld [vmem:[%s13744_s0 + $0x51] sm:$0xff]  ;;  %v6930_v54 = vmax.f32 %v7525_v20, 0.0  ;;  %v6932_v42 = vmax.f32 %v7527_v9, 0.0  ;;  %v6934_v15 = vmax.f32 %v13384_v38, 0.0 }
 0xd2c   :  { %v6933_v5 = vmax.f32 %v13379_v36, 0.0  ;;  %v6803_v1 = vadd.f32 %v13014_v4, %v13058_v44  ;;  %v6804_v0 = vadd.f32 %v13014_v4, %v13064_v56  ;;  %v6805_v20 = vadd.f32 %v13014_v4, %v13070_v40 }
 0xd2d   :  { %v13403_v39 = vadd.f32 %v13014_v4, %v6768_v14  ;;  %v13406_v62 = vadd.f32 %v13014_v4, %v6769_v31  ;;  %v13409_v27 = vadd.f32 %v13014_v4, %v6770_v41  ;;  %v13412_v44 = vadd.f32 %v13014_v4, %v6771_v21 }
 0xd2e   :  { %v13415_v56 = vadd.f32 %v13014_v4, %v6772_v61  ;;  %v13418_v40 = vadd.f32 %v13014_v4, %v6773_v28  ;;  %v13421_v3 = vadd.f32 %v13014_v4, %v6774_v47  ;;  %v13424_v14 = vadd.f32 %v13014_v4, %v6775_v57 }
 0xd2f   :  { %v13427_v31 = vadd.f32 %v13014_v4, %v6776_v58  ;;  %v13430_v41 = vadd.f32 %v13014_v4, %v6777_v24  ;;  %v13433_v21 = vadd.f32 %v13014_v4, %v6778_v22  ;;  %v13436_v61 = vadd.f32 %v13014_v4, %v6779_v48 }
 0xd30   :  { %v13439_v28 = vadd.f32 %v13014_v4, %v6780_v11  ;;  %v13442_v47 = vadd.f32 %v13014_v4, %v6781_v43  ;;  %v13445_v57 = vadd.f32 %v13014_v4, %v6782_v34  ;;  %v13448_v58 = vadd.f32 %v13014_v4, %v6783_v63  ;;  %v7530_v11 = vld [vmem:[%s13744_s0 + $0x69] sm:$0xff] }
 0xd31   :  { %v13451_v24 = vadd.f32 %v13014_v4, %v6784_v45  ;;  %v13454_v22 = vadd.f32 %v13014_v4, %v6785_v12  ;;  %v13457_v48 = vadd.f32 %v13014_v4, %v6786_v17  ;;  %v13463_v43 = vadd.f32 %v13014_v4, %v6787_v19  ;;  %v7531_v12 = vld [vmem:[%s13744_s0 + $0x79] sm:$0xff] }
 0xd32   :  { %v13466_v34 = vadd.f32 %v13014_v4, %v6788_v53  ;;  %v13469_v63 = vadd.f32 %v13014_v4, %v6789_v51  ;;  %v13472_v45 = vadd.f32 %v13014_v4, %v6790_v46  ;;  %v13478_v17 = vadd.f32 %v13014_v4, %v6791_v23  ;;  %v7532_v51 = vld [vmem:[%s13744_s0 + $0x81] sm:$0xff] }
 0xd33   :  { %v13481_v9 = vadd.f32 %v13014_v4, %v6792_v8  ;;  %v13484_v19 = vadd.f32 %v13014_v4, %v6793_v18  ;;  %v13487_v53 = vadd.f32 %v13014_v4, %v6794_v52  ;;  %v13493_v46 = vadd.f32 %v13014_v4, %v6795_v35  ;;  %v7533_v8 = vld [vmem:[%s13744_s0 + $0x91] sm:$0xff] }
 0xd34   :  { %14907 = vst [vmem:[#allocation56_spill] sm:$0xff] %v13478_v17  ;;  %v6992_v36 = vadd.f32 %v6928_v55, %v6800_v60  ;;  %v6993_v38 = vadd.f32 %v6929_v50, %v6801_v25  ;;  %v6994_v23 = vadd.f32 %v6930_v54, %v6802_v13  ;;  %v6935_v17 = vmax.f32 %v7530_v11, 0.0  ;;  %v7535_v25 = vld [vmem:[%s13744_s0 + $0xa9] sm:$0xff]  ;;  %v7536_v50 = vld [vmem:[%s13744_s0 + $0xb1] sm:$0xff]  ;;  %v7539_v11 = vld [vmem:[%s13744_s0 + $0xd9] sm:$0xff] }
 0xd35   :  { %14908 = vst [vmem:[#allocation12_spill] sm:$0xff] %v13484_v19  ;;  %v6807_v18 = vadd.f32 %v13014_v4, %v13083_v33  ;;  %v6995_v52 = vadd.f32 %v6931_v16, %v6803_v1  ;;  %v7534_v19 = vld [vmem:[%s13744_s0 + $0x99] sm:$0xff]  ;;  %v6808_v35 = vadd.f32 %v13014_v4, %v13089_v2  ;;  %v6996_v60 = vadd.f32 %v6932_v42, %v6804_v0  ;;  %v7537_v1 = vld [vmem:[%s13744_s0 + $0xc1] sm:$0xff] }
 0xd36   :  { %14909 = vst [vmem:[#allocation110_spill] sm:$0xff] %v13487_v53  ;;  %v6936_v53 = vmax.f32 %v7531_v12, 0.0  ;;  %v6937_v13 = vmax.f32 %v7532_v51, 0.0  ;;  %v6809_v55 = vadd.f32 %v13014_v4, %v13095_v49  ;;  %v6997_v33 = vadd.f32 %v6933_v5, %v6805_v20  ;;  %v7538_v20 = vld [vmem:[%s13744_s0 + $0xc9] sm:$0xff] }
 0xd37   :  { %7056 = vst [vmem:[#allocation6] sm:$0xff] %v6992_v36  ;;  %v6938_v16 = vmax.f32 %v7533_v8, 0.0  ;;  %v6810_v2 = vadd.f32 %v13014_v4, %v13101_v37  ;;  %v6998_v42 = vadd.f32 %v6934_v15, %v6806_v10  ;;  %v6939_v54 = vmax.f32 %v7534_v19, 0.0  ;;  %v7540_v19 = vld [vmem:[%s13744_s0 + $0xe1] sm:$0xff]  ;;  %v7541_v36 = vld [vmem:[%s13744_s0 + $0xf1] sm:$0xff]  ;;  %v7542_v8 = vld [vmem:[%s13744_s0 + $0xf9] sm:$0xff] }
 0xd38   :  { %7057 = vst [vmem:[#allocation6 + $0x8] sm:$0xff] %v6993_v38  ;;  %v6811_v49 = vadd.f32 %v13014_v4, %v13107_v32  ;;  %v6999_v5 = vadd.f32 %v6935_v17, %v6807_v18  ;;  %v6940_v0 = vmax.f32 %v7535_v25, 0.0  ;;  %v6812_v37 = vadd.f32 %v13014_v4, %v13113_v30  ;;  %v7544_v25 = vld [vmem:[%s13744_s0 + $0x111] sm:$0xff] }
 0xd39   :  { %7058 = vst [vmem:[#allocation6 + $0x10] sm:$0xff] %v6994_v23  ;;  %v7000_v15 = vadd.f32 %v6936_v53, %v6808_v35  ;;  %v6941_v10 = vmax.f32 %v7536_v50, 0.0  ;;  %v6813_v32 = vadd.f32 %v13014_v4, %v13119_v7  ;;  %v7001_v12 = vadd.f32 %v6937_v13, %v6809_v55  ;;  %v7543_v35 = vld [vmem:[%s13744_s0 + $0x109] sm:$0xff]  ;;  %v14910_v55 = vld [vmem:[#allocation105_spill] sm:$0xff] }
 0xd3a   :  { %7059 = vst [vmem:[#allocation6 + $0x18] sm:$0xff] %v6995_v52  ;;  %v6942_v17 = vmax.f32 %v7537_v1, 0.0  ;;  %v6814_v30 = vadd.f32 %v13014_v4, %v13127_v59  ;;  %v7002_v53 = vadd.f32 %v6938_v16, %v6810_v2  ;;  %v6943_v51 = vmax.f32 %v7538_v20, 0.0  ;;  %v7545_v50 = vld [vmem:[%s13744_s0 + $0x121] sm:$0xff]  ;;  %v14911_v2 = vld [vmem:[#allocation44_spill] sm:$0xff]  ;;  %v7546_v1 = vld [vmem:[%s13744_s0 + $0x129] sm:$0xff] }
 0xd3b   :  { %7060 = vst [vmem:[#allocation6 + $0x20] sm:$0xff] %v6996_v60  ;;  %v6815_v7 = vadd.f32 %v13014_v4, %v13133_v26  ;;  %v7003_v38 = vadd.f32 %v6939_v54, %v6811_v49  ;;  %v6944_v23 = vmax.f32 %v7539_v11, 0.0  ;;  %v6816_v59 = vadd.f32 %v13014_v4, %v13139_v29  ;;  %v14912_v49 = vld [vmem:[#allocation52_spill] sm:$0xff] }
 0xd3c   :  { %7061 = vst [vmem:[#allocation6 + $0x28] sm:$0xff] %v6997_v33  ;;  %v7004_v18 = vadd.f32 %v6940_v0, %v6812_v37  ;;  %v6945_v52 = vmax.f32 %v7540_v19, 0.0  ;;  %v6817_v26 = vadd.f32 %v13014_v4, %v13145_v6  ;;  %v7005_v60 = vadd.f32 %v6941_v10, %v6813_v32  ;;  %v7547_v37 = vld [vmem:[%s13744_s0 + $0x139] sm:$0xff] }
 0xd3d   :  { %7062 = vst [vmem:[#allocation6 + $0x30] sm:$0xff] %v6998_v42  ;;  %v6946_v13 = vmax.f32 %v7541_v36, 0.0  ;;  %v6818_v29 = vadd.f32 %v13014_v4, %v14910_v55  ;;  %v7006_v33 = vadd.f32 %v6942_v17, %v6814_v30  ;;  %v6947_v16 = vmax.f32 %v7542_v8, 0.0  ;;  %v14914_v17 = vld [vmem:[#allocation47_spill] sm:$0xff]  ;;  %v7550_v8 = vld [vmem:[%s13744_s0 + $0x159] sm:$0xff] }
 0xd3e   :  { %7063 = vst [vmem:[#allocation6 + $0x38] sm:$0xff] %v6999_v5  ;;  %v6819_v6 = vadd.f32 %v13014_v4, %v14911_v2  ;;  %v7007_v42 = vadd.f32 %v6943_v51, %v6815_v7  ;;  %v6948_v54 = vmax.f32 %v7543_v35, 0.0  ;;  %v6820_v5 = vadd.f32 %v13014_v4, %v14912_v49  ;;  %v7549_v51 = vld [vmem:[%s13744_s0 + $0x151] sm:$0xff] }
 0xd3f   :  { %7064 = vst [vmem:[#allocation6 + $0x40] sm:$0xff] %v7000_v15  ;;  %v7008_v0 = vadd.f32 %v6944_v23, %v6816_v59  ;;  %v6949_v20 = vmax.f32 %v7544_v25, 0.0  ;;  %v14913_v15 = vld [vmem:[#allocation39_spill] sm:$0xff]  ;;  %v7009_v11 = vadd.f32 %v6945_v52, %v6817_v26  ;;  %v6950_v32 = vmax.f32 %v7545_v50, 0.0  ;;  %v14916_v59 = vld [vmem:[#allocation106_spill] sm:$0xff] }
 0xd40   :  { %7065 = vst [vmem:[#allocation6 + $0x48] sm:$0xff] %v7001_v12  ;;  %v6821_v10 = vadd.f32 %v13014_v4, %v14913_v15  ;;  %v7548_v12 = vld [vmem:[%s13744_s0 + $0x141] sm:$0xff]  ;;  %v6822_v19 = vadd.f32 %v13014_v4, %v14914_v17  ;;  %v7010_v30 = vadd.f32 %v6946_v13, %v6818_v29  ;;  %v14915_v36 = vld [vmem:[#allocation55_spill] sm:$0xff]  ;;  %v6952_v23 = vmax.f32 %v7547_v37, 0.0 }
 0xd41   :  { %7066 = vst [vmem:[#allocation6 + $0x50] sm:$0xff] %v7002_v53  ;;  %v6951_v53 = vmax.f32 %v7546_v1, 0.0  ;;  %v6823_v7 = vadd.f32 %v13014_v4, %v14915_v36  ;;  %v7012_v52 = vadd.f32 %v6948_v54, %v6820_v5  ;;  %v6953_v35 = vmax.f32 %v7548_v12, 0.0  ;;  %v7551_v26 = vld [vmem:[%s13744_s0 + $0x169] sm:$0xff]  ;;  %v7552_v29 = vld [vmem:[%s13744_s0 + $0x171] sm:$0xff] }
 0xd42   :  { %7067 = vst [vmem:[#allocation6 + $0x58] sm:$0xff] %v7003_v38  ;;  %v7011_v38 = vadd.f32 %v6947_v16, %v6819_v6  ;;  %v7013_v25 = vadd.f32 %v6949_v20, %v6821_v10  ;;  %v6954_v55 = vmax.f32 %v7549_v51, 0.0  ;;  %v7014_v50 = vadd.f32 %v6950_v32, %v6822_v19  ;;  %v7553_v6 = vld [vmem:[%s13744_s0 + $0x181] sm:$0xff]  ;;  %v7554_v5 = vld [vmem:[%s13744_s0 + $0x189] sm:$0xff]  ;;  %v7556_v19 = vld [vmem:[%s13744_s0 + $0x1d1] sm:$0xff] }
 0xd43   :  { %7068 = vst [vmem:[#allocation6 + $0x60] sm:$0xff] %v7004_v18  ;;  %v6824_v18 = vadd.f32 %v13014_v4, %v14916_v59  ;;  %v6955_v2 = vmax.f32 %v7550_v8, 0.0  ;;  %v7015_v1 = vadd.f32 %v6951_v53, %v6823_v7  ;;  %v6956_v49 = vmax.f32 %v7551_v26, 0.0  ;;  %v7555_v10 = vld [vmem:[%s13744_s0 + $0x1c9] sm:$0xff]  ;;  %v7557_v7 = vld [vmem:[%s13744_s0 + $0x1e1] sm:$0xff] }
 0xd44   :  { %7069 = vst [vmem:[#allocation6 + $0x68] sm:$0xff] %v7005_v60  ;;  %v14917_v60 = vld [vmem:[#allocation50_spill] sm:$0xff]  ;;  %v6957_v15 = vmax.f32 %v7552_v29, 0.0  ;;  %v6958_v17 = vmax.f32 %v7553_v6, 0.0  ;;  %v6959_v36 = vmax.f32 %v7554_v5, 0.0  ;;  %v6960_v59 = vmax.f32 %v7555_v10, 0.0 }
 0xd45   :  { %7070 = vst [vmem:[#allocation6 + $0x70] sm:$0xff] %v7006_v33  ;;  %v6825_v13 = vadd.f32 %v13014_v4, %v14917_v60  ;;  %v14918_v33 = vld [vmem:[#allocation93_spill] sm:$0xff]  ;;  %v7016_v37 = vadd.f32 %v6952_v23, %v6824_v18  ;;  %v7558_v18 = vld [vmem:[%s13744_s0 + $0x1e9] sm:$0xff]  ;;  %v6961_v60 = vmax.f32 %v7556_v19, 0.0  ;;  %v7564_v10 = vld [vmem:[%s13744_s0 + $0x231] sm:$0xff] }
 0xd46   :  { %7071 = vst [vmem:[#allocation6 + $0x78] sm:$0xff] %v7007_v42  ;;  %v6826_v16 = vadd.f32 %v13014_v4, %v14918_v33  ;;  %v14919_v42 = vld [vmem:[#allocation107_spill] sm:$0xff]  ;;  %v6962_v33 = vmax.f32 %v7557_v7, 0.0  ;;  %v7562_v5 = vld [vmem:[%s13744_s0 + $0x219] sm:$0xff] }
 0xd47   :  { %7072 = vst [vmem:[#allocation6 + $0x80] sm:$0xff] %v7008_v0  ;;  %v6827_v54 = vadd.f32 %v13014_v4, %v14919_v42  ;;  %v14920_v0 = vld [vmem:[#allocation53_spill] sm:$0xff]  ;;  %v7017_v12 = vadd.f32 %v6953_v35, %v6825_v13  ;;  %v6963_v42 = vmax.f32 %v7558_v18, 0.0 }
 0xd48   :  { %7073 = vst [vmem:[#allocation6 + $0x88] sm:$0xff] %v7009_v11  ;;  %v6828_v20 = vadd.f32 %v13014_v4, %v14920_v0  ;;  %v14921_v11 = vld [vmem:[#allocation32_spill] sm:$0xff]  ;;  %v7018_v51 = vadd.f32 %v6954_v55, %v6826_v16  ;;  %v7560_v16 = vld [vmem:[%s13744_s0 + $0x201] sm:$0xff] }
 0xd49   :  { %7074 = vst [vmem:[#allocation6 + $0x90] sm:$0xff] %v7010_v30  ;;  %v6829_v32 = vadd.f32 %v13014_v4, %v14921_v11  ;;  %v14922_v30 = vld [vmem:[#allocation108_spill] sm:$0xff]  ;;  %v7019_v8 = vadd.f32 %v6955_v2, %v6827_v54 }
 0xd4a   :  { %7075 = vst [vmem:[#allocation6 + $0x98] sm:$0xff] %v7011_v38  ;;  %v6830_v53 = vadd.f32 %v13014_v4, %v14922_v30  ;;  %v14923_v38 = vld [vmem:[#allocation67_spill] sm:$0xff]  ;;  %v7020_v26 = vadd.f32 %v6956_v49, %v6828_v20  ;;  %v7559_v13 = vld [vmem:[%s13744_s0 + $0x1f9] sm:$0xff]  ;;  %v6965_v20 = vmax.f32 %v7560_v16, 0.0 }
 0xd4b   :  { %7076 = vst [vmem:[#allocation6 + $0xa0] sm:$0xff] %v7012_v52  ;;  %v6831_v23 = vadd.f32 %v13014_v4, %v14923_v38  ;;  %v14924_v52 = vld [vmem:[#allocation10_spill] sm:$0xff]  ;;  %v7021_v29 = vadd.f32 %v6957_v15, %v6829_v32  ;;  %v7561_v54 = vld [vmem:[%s13744_s0 + $0x211] sm:$0xff]  ;;  %v6964_v49 = vmax.f32 %v7559_v13, 0.0  ;;  %v6967_v32 = vmax.f32 %v7562_v5, 0.0 }
 0xd4c   :  { %7077 = vst [vmem:[#allocation6 + $0xa8] sm:$0xff] %v7013_v25  ;;  %v6832_v35 = vadd.f32 %v13014_v4, %v14924_v52  ;;  %v14925_v25 = vld [vmem:[#allocation109_spill] sm:$0xff]  ;;  %v7022_v6 = vadd.f32 %v6958_v17, %v6830_v53  ;;  %v6966_v15 = vmax.f32 %v7561_v54, 0.0  ;;  %v7027_v17 = vadd.f32 %v6963_v42, %v13403_v39  ;;  %v7566_v30 = vld [vmem:[%s13744_s0 + $0x249] sm:$0xff] }
 0xd4d   :  { %7078 = vst [vmem:[#allocation6 + $0xb0] sm:$0xff] %v7014_v50  ;;  %v6833_v55 = vadd.f32 %v13014_v4, %v14925_v25  ;;  %v14926_v50 = vld [vmem:[#allocation42_spill] sm:$0xff]  ;;  %v7028_v53 = vadd.f32 %v6964_v49, %v13406_v62  ;;  %v7029_v7 = vadd.f32 %v6965_v20, %v13409_v27  ;;  %v7569_v62 = vld [vmem:[%s13744_s0 + $0x271] sm:$0xff]  ;;  %v7570_v27 = vld [vmem:[%s13744_s0 + $0x279] sm:$0xff] }
 0xd4e   :  { %7079 = vst [vmem:[#allocation6 + $0xb8] sm:$0xff] %v7015_v1  ;;  %v6834_v2 = vadd.f32 %v13014_v4, %v14926_v50  ;;  %v7023_v1 = vadd.f32 %v6959_v36, %v6831_v23  ;;  %v7024_v0 = vadd.f32 %v6960_v59, %v6832_v35  ;;  %v7563_v4 = vld [vmem:[%s13744_s0 + $0x229] sm:$0xff]  ;;  %v7567_v36 = vld [vmem:[%s13744_s0 + $0x259] sm:$0xff]  ;;  %v7568_v39 = vld [vmem:[%s13744_s0 + $0x261] sm:$0xff]  ;;  %v7030_v23 = vadd.f32 %v6966_v15, %v13412_v44 }
 0xd4f   :  { %7080 = vst [vmem:[#allocation6 + $0xc0] sm:$0xff] %v7016_v37  ;;  %v7025_v37 = vadd.f32 %v6961_v60, %v6833_v55  ;;  %v6968_v19 = vmax.f32 %v7563_v4, 0.0  ;;  %v7031_v59 = vadd.f32 %v6967_v32, %v13415_v56  ;;  %v6972_v18 = vmax.f32 %v7567_v36, 0.0  ;;  %v7571_v44 = vld [vmem:[%s13744_s0 + $0x289] sm:$0xff]  ;;  %v7572_v56 = vld [vmem:[%s13744_s0 + $0x291] sm:$0xff] }
 0xd50   :  { %7081 = vst [vmem:[#allocation6 + $0xc8] sm:$0xff] %v7017_v12  ;;  %v7026_v11 = vadd.f32 %v6962_v33, %v6834_v2  ;;  %v7565_v12 = vld [vmem:[%s13744_s0 + $0x241] sm:$0xff]  ;;  %v6973_v35 = vmax.f32 %v7568_v39, 0.0  ;;  %v6974_v60 = vmax.f32 %v7569_v62, 0.0  ;;  %v6975_v25 = vmax.f32 %v7570_v27, 0.0  ;;  %v14927_v39 = vld [vmem:[#allocation56_spill] sm:$0xff] }
 0xd51   :  { %7082 = vst [vmem:[#allocation6 + $0xd0] sm:$0xff] %v7018_v51  ;;  %v6969_v51 = vmax.f32 %v7564_v10, 0.0  ;;  %v6970_v38 = vmax.f32 %v7565_v12, 0.0  ;;  %v7032_v52 = vadd.f32 %v6968_v19, %v13418_v40  ;;  %v7573_v40 = vld [vmem:[%s13744_s0 + $0x2a1] sm:$0xff]  ;;  %v7036_v33 = vadd.f32 %v6972_v18, %v13430_v41  ;;  %v7577_v41 = vld [vmem:[%s13744_s0 + $0x2d1] sm:$0xff] }
 0xd52   :  { %7083 = vst [vmem:[#allocation6 + $0xd8] sm:$0xff] %v7019_v8  ;;  %v6971_v8 = vmax.f32 %v7566_v30, 0.0  ;;  %v6977_v16 = vmax.f32 %v7572_v56, 0.0  ;;  %v7037_v50 = vadd.f32 %v6973_v35, %v13433_v21  ;;  %v6978_v2 = vmax.f32 %v7573_v40, 0.0  ;;  %v7578_v21 = vld [vmem:[%s13744_s0 + $0x2d9] sm:$0xff] }
 0xd53   :  { %7084 = vst [vmem:[#allocation6 + $0xe0] sm:$0xff] %v7020_v26  ;;  %v7033_v26 = vadd.f32 %v6969_v51, %v13421_v3  ;;  %v7034_v13 = vadd.f32 %v6970_v38, %v13424_v14  ;;  %v7574_v3 = vld [vmem:[%s13744_s0 + $0x2a9] sm:$0xff]  ;;  %v7575_v14 = vld [vmem:[%s13744_s0 + $0x2b9] sm:$0xff]  ;;  %v7039_v54 = vadd.f32 %v6975_v25, %v13439_v28  ;;  %v6982_v20 = vmax.f32 %v7577_v41, 0.0  ;;  %v7580_v28 = vld [vmem:[%s13744_s0 + $0x2f1] sm:$0xff] }
 0xd54   :  { %7085 = vst [vmem:[#allocation6 + $0xe8] sm:$0xff] %v7021_v29  ;;  %v7035_v55 = vadd.f32 %v6971_v8, %v13427_v31  ;;  %v6976_v29 = vmax.f32 %v7571_v44, 0.0  ;;  %v7576_v31 = vld [vmem:[%s13744_s0 + $0x2c1] sm:$0xff]  ;;  %v6979_v42 = vmax.f32 %v7574_v3, 0.0  ;;  %v7042_v4 = vadd.f32 %v6978_v2, %v13448_v58  ;;  %v7583_v58 = vld [vmem:[%s13744_s0 + $0x319] sm:$0xff] }
 0xd55   :  { %7086 = vst [vmem:[#allocation6 + $0xf0] sm:$0xff] %v7022_v6  ;;  %v7038_v6 = vadd.f32 %v6974_v60, %v13436_v61  ;;  %v6981_v5 = vmax.f32 %v7576_v31, 0.0  ;;  %v7579_v61 = vld [vmem:[%s13744_s0 + $0x2e9] sm:$0xff]  ;;  %v6985_v32 = vmax.f32 %v7580_v28, 0.0  ;;  %v7046_v19 = vadd.f32 %v6982_v20, %v13463_v43  ;;  %v14928_v8 = vld [vmem:[#allocation12_spill] sm:$0xff] }
 0xd56   :  { %7087 = vst [vmem:[#allocation6 + $0xf8] sm:$0xff] %v7023_v1  ;;  %v6980_v1 = vmax.f32 %v7575_v14, 0.0  ;;  %v7040_v49 = vadd.f32 %v6976_v29, %v13442_v47  ;;  %v7581_v47 = vld [vmem:[%s13744_s0 + $0x301] sm:$0xff]  ;;  %v7043_v15 = vadd.f32 %v6979_v42, %v13451_v24  ;;  %v6984_v10 = vmax.f32 %v7579_v61, 0.0 }
 0xd57   :  { %7088 = vst [vmem:[#allocation6 + $0x100] sm:$0xff] %v7024_v0  ;;  %v7041_v0 = vadd.f32 %v6977_v16, %v13445_v57  ;;  %v7582_v57 = vld [vmem:[%s13744_s0 + $0x309] sm:$0xff]  ;;  %v7045_v12 = vadd.f32 %v6981_v5, %v13457_v48  ;;  %v7584_v24 = vld [vmem:[%s13744_s0 + $0x321] sm:$0xff]  ;;  %v6988_v51 = vmax.f32 %v7583_v58, 0.0 }
 0xd58   :  { %7089 = vst [vmem:[#allocation6 + $0x108] sm:$0xff] %v7025_v37  ;;  %v6983_v37 = vmax.f32 %v7578_v21, 0.0  ;;  %v6987_v30 = vmax.f32 %v7582_v57, 0.0  ;;  %v7048_v48 = vadd.f32 %v6984_v10, %v13469_v63  ;;  %v6989_v36 = vmax.f32 %v7584_v24, 0.0 }
 0xd59   :  { %7090 = vst [vmem:[#allocation6 + $0x110] sm:$0xff] %v7026_v11  ;;  %v7044_v11 = vadd.f32 %v6980_v1, %v13454_v22  ;;  %v7585_v22 = vld [vmem:[%s13744_s0 + $0x331] sm:$0xff]  ;;  %v7052_v62 = vadd.f32 %v6988_v51, %v14928_v8  ;;  %s7688_s0 = smov [#allocation6]  }
 0xd5a   :  { %7091 = vst [vmem:[#allocation6 + $0x118] sm:$0xff] %v7027_v17  ;;  %v6986_v17 = vmax.f32 %v7581_v47, 0.0  ;;  %v6990_v38 = vmax.f32 %v7585_v22, 0.0  ;;  %s7124_s4 = sshll.u32 %s7688_s0, 4  ;;  %s7125_s4 = int_to_ptr.vmem [resolvable:$true] %s7124_s4 }
 0xd5b   :  { %7092 = vst [vmem:[#allocation6 + $0x120] sm:$0xff] %v7028_v53  ;;  %v7047_v53 = vadd.f32 %v6983_v37, %v13466_v34  ;;  %v14929_v34 = vld [vmem:[#allocation110_spill] sm:$0xff] }
 0xd5c   :  { %7093 = vst [vmem:[#allocation6 + $0x128] sm:$0xff] %v7029_v7  ;;  %v7049_v7 = vadd.f32 %v6985_v32, %v13472_v45  ;;  %v7050_v43 = vadd.f32 %v6986_v17, %v14927_v39  ;;  %v7054_v63 = vadd.f32 %v6990_v38, %v13493_v46 }
 0xd5d   :  { %7094 = vst [vmem:[#allocation6 + $0x130] sm:$0xff] %v7030_v23  ;;  %v7051_v23 = vadd.f32 %v6987_v30, %v13481_v9 }
 0xd5e   :  { %7095 = vst [vmem:[#allocation6 + $0x138] sm:$0xff] %v7031_v59  ;;  %v7053_v59 = vadd.f32 %v6989_v36, %v14929_v34 }
 0xd5f   :  { %7096 = vst [vmem:[#allocation6 + $0x140] sm:$0xff] %v7032_v52 }
 0xd60   :  { %7097 = vst [vmem:[#allocation6 + $0x148] sm:$0xff] %v7033_v26 }
 0xd61   :  { %7098 = vst [vmem:[#allocation6 + $0x150] sm:$0xff] %v7034_v13 }
 0xd62   :  { %7099 = vst [vmem:[#allocation6 + $0x158] sm:$0xff] %v7035_v55 }
 0xd63   :  { %7100 = vst [vmem:[#allocation6 + $0x160] sm:$0xff] %v7036_v33 }
 0xd64   :  { %7101 = vst [vmem:[#allocation6 + $0x168] sm:$0xff] %v7037_v50 }
 0xd65   :  { %7102 = vst [vmem:[#allocation6 + $0x170] sm:$0xff] %v7038_v6 }
 0xd66   :  { %7103 = vst [vmem:[#allocation6 + $0x178] sm:$0xff] %v7039_v54 }
 0xd67   :  { %7104 = vst [vmem:[#allocation6 + $0x180] sm:$0xff] %v7040_v49 }
 0xd68   :  { %7105 = vst [vmem:[#allocation6 + $0x188] sm:$0xff] %v7041_v0 }
 0xd69   :  { %7106 = vst [vmem:[#allocation6 + $0x190] sm:$0xff] %v7042_v4 }
 0xd6a   :  { %7107 = vst [vmem:[#allocation6 + $0x198] sm:$0xff] %v7043_v15 }
 0xd6b   :  { %7108 = vst [vmem:[#allocation6 + $0x1a0] sm:$0xff] %v7044_v11 }
 0xd6c   :  { %7109 = vst [vmem:[#allocation6 + $0x1a8] sm:$0xff] %v7045_v12 }
 0xd6d   :  { %7110 = vst [vmem:[#allocation6 + $0x1b0] sm:$0xff] %v7046_v19 }
 0xd6e   :  { %7111 = vst [vmem:[#allocation6 + $0x1b8] sm:$0xff] %v7047_v53 }
 0xd6f   :  { %7112 = vst [vmem:[#allocation6 + $0x1c0] sm:$0xff] %v7048_v48 }
 0xd70   :  { %7113 = vst [vmem:[#allocation6 + $0x1c8] sm:$0xff] %v7049_v7 }
 0xd71   :  { %7114 = vst [vmem:[#allocation6 + $0x1d0] sm:$0xff] %v7050_v43 }
 0xd72   :  { %7115 = vst [vmem:[#allocation6 + $0x1d8] sm:$0xff] %v7051_v23 }
 0xd73   :  { %7116 = vst [vmem:[#allocation6 + $0x1e0] sm:$0xff] %v7052_v62 }
 0xd74   :  { %7117 = vst [vmem:[#allocation6 + $0x1e8] sm:$0xff] %v7053_v59 }
 0xd75   :  { %7118 = vst [vmem:[#allocation6 + $0x1f0] sm:$0xff] %v7054_v63 }
 0xd76   :  { %7132 = dma.vmem_to_hbm [thread:$0]  %s7125_s4, 8192, %s7127_s3, [#allocation5], %s7685_s29, %s7685_s29, %s7686_s30  }
 0xd77   :  { %7682 = dma.done.wait [#allocation5], 8192  }
 0xd78   :  { %7683 = vsyncadd [#allocation5], 4294959104 }
 0xd79   :  { %7137 = vsyncpa [#allocation4], 1 }
 0xd7a   :  { %7138 = vsyncpa [#allocation5], 1 }

</bundles_post_ra>
